<compile_context>
chip_gen: v5e
topology: v5e:2x2
jax: 0.10.0
libtpu: 0.0.40
codegen_flags: <defaults>
</compile_context>

<pallas_src>
import functools
import math

import jax
import jax.numpy as jnp
from jax.experimental import pallas as pl
from jax.experimental.pallas import tpu as pltpu


_VMEM_LIMIT = 32 * 1024 * 1024          # explicit scoped-VMEM budget (safe v5e/v6e/v7x)
_LN_EPS = 1e-5
_INV_SQRT2 = 1.0 / math.sqrt(2.0)


def _cparams(n_parallel):
    return pltpu.CompilerParams(
        dimension_semantics=("parallel",) * n_parallel,
        vmem_limit_bytes=_VMEM_LIMIT)


def _row_tile(m):
    # largest row tile dividing m that keeps the grid extent >= 2 (v7x megacore).
    for t in (512, 256, 128, 64, 32, 16, 8):
        if m % t == 0 and m // t >= 2:
            return t
    return m


def _ln_f32(x, g, b, eps):
    mu = jnp.mean(x, axis=-1, keepdims=True)
    xc = x - mu
    var = jnp.mean(xc * xc, axis=-1, keepdims=True)
    return xc * jax.lax.rsqrt(var + eps) * g + b


# =============================================================================
# Pallas kernels
# =============================================================================
def _ln_linear_kernel(x_ref, g_ref, bln_ref, w_ref, b_ref, o_ref, *, eps, act):
    y = _ln_f32(x_ref[...].astype(jnp.float32), g_ref[...], bln_ref[...], eps)
    o = jnp.dot(y.astype(jnp.bfloat16), w_ref[...],
                preferred_element_type=jnp.float32) + b_ref[...]
    if act == "relu":
        o = jnp.maximum(o, 0.0)
    o_ref[...] = o.astype(o_ref.dtype)


def _ln_linear2_kernel(x_ref, g_ref, bln_ref, w_ref, b_ref, o_ref, ln_ref, *, eps):
    # Same as above but also emits the LayerNorm'd activations (erf-fallback path).
    y = _ln_f32(x_ref[...].astype(jnp.float32), g_ref[...], bln_ref[...], eps)
    o = jnp.dot(y.astype(jnp.bfloat16), w_ref[...],
                preferred_element_type=jnp.float32) + b_ref[...]
    o_ref[...] = o.astype(o_ref.dtype)
    ln_ref[...] = y.astype(ln_ref.dtype)


def _linear_residual_kernel(x_ref, w_ref, b_ref, r_ref, o_ref):
    o = jnp.dot(x_ref[...], w_ref[...], preferred_element_type=jnp.float32)
    o = o + b_ref[...] + r_ref[...].astype(jnp.float32)
    o_ref[...] = o.astype(o_ref.dtype)


def _mlp_kernel(x_ref, g_ref, bln_ref, w1_ref, b1_ref, w2_ref, b2_ref, o_ref, *, eps):
    # norm1 -> FC1 -> exact (erf) GELU -> FC2 -> +bias -> residual on the normed value.
    y = _ln_f32(x_ref[...].astype(jnp.float32), g_ref[...], bln_ref[...], eps)
    h = jnp.dot(y.astype(jnp.bfloat16), w1_ref[...],
                preferred_element_type=jnp.float32) + b1_ref[...]
    h = 0.5 * h * (1.0 + jax.lax.erf(h * _INV_SQRT2))
    o = y + jnp.dot(h.astype(jnp.bfloat16), w2_ref[...],
                    preferred_element_type=jnp.float32) + b2_ref[...]
    o_ref[...] = o.astype(o_ref.dtype)


def _ln_kernel(x_ref, g_ref, b_ref, o_ref, *, eps):
    o_ref[...] = _ln_f32(x_ref[...].astype(jnp.float32), g_ref[...], b_ref[...],
                         eps).astype(o_ref.dtype)


def _attn_kernel(qkv_ref, w_ref, b_ref, res_ref, o_ref, *, num_heads, scale):
    # One batch element per grid step, all heads inside one invocation.
    qkv = qkv_ref[0]                                   # (N, 3E) bf16
    e = res_ref.shape[-1]
    hd = e // num_heads
    heads = []
    for h in range(num_heads):
        q = qkv[:, h * hd:(h + 1) * hd]
        k = qkv[:, e + h * hd:e + (h + 1) * hd]
        v = qkv[:, 2 * e + h * hd:2 * e + (h + 1) * hd]
        s = jax.lax.dot_general(q, k, (((1,), (1,)), ((), ())),
                                preferred_element_type=jnp.float32) * scale
        m = jnp.max(s, axis=-1, keepdims=True)
        p = jnp.exp(s - m)
        l = jnp.sum(p, axis=-1, keepdims=True)
        p = p * pl.reciprocal(l, approx=True)          # softmax denom on the EUP
        heads.append(jnp.dot(p.astype(jnp.bfloat16), v,
                             preferred_element_type=jnp.float32))
    o = jnp.concatenate(heads, axis=-1)                # (N, E) f32
    o = jnp.dot(o.astype(jnp.bfloat16), w_ref[...],    # fused output projection
                preferred_element_type=jnp.float32)
    o = o + b_ref[...] + res_ref[0].astype(jnp.float32)   # fused bias + residual
    o_ref[0] = o.astype(o_ref.dtype)


def _conv_kernel(x_ref, w_ref, b_ref, o_ref, *, taps, n_out, act):
    # x_ref: (1, P, Cin, Nflat) lane-flattened (possibly polyphase) input slab.
    # Accumulates per-tap (Cout, Cin) @ (Cin, n_out) matmuls -> lane-dense output.
    phases = [x_ref[0, p] for p in range(x_ref.shape[1])]
    acc = None
    for t, (p, off) in enumerate(taps):
        xs = phases[p][:, off:off + n_out]                     # (Cin, n_out) bf16
        contrib = jax.lax.dot_general(w_ref[t], xs, (((1,), (0,)), ((), ())),
                                      preferred_element_type=jnp.float32)
        acc = contrib if acc is None else acc + contrib
    acc = acc + b_ref[...]
    if act == "relu":
        acc = jnp.maximum(acc, 0.0)
    o_ref[0] = acc.astype(o_ref.dtype)


def _erf_probe_kernel(x_ref, o_ref):
    o_ref[...] = jax.lax.erf(x_ref[...])


@functools.lru_cache(maxsize=None)
def _erf_in_kernel_supported():
    try:
        fn = pl.pallas_call(_erf_probe_kernel,
                            out_shape=jax.ShapeDtypeStruct((8, 128), jnp.float32))
        jax.block_until_ready(jax.jit(fn)(jnp.zeros((8, 128), jnp.float32)))
        return True
    except Exception:
        return False


# =============================================================================
# pallas_call wrappers
# =============================================================================
def _ln_linear(x, g, bln, w, b=None, act="none"):
    m, d = x.shape
    n = w.shape[1]
    if b is None:
        b = jnp.zeros((n,), jnp.float32)
    tm = _row_tile(m)
    return pl.pallas_call(
        functools.partial(_ln_linear_kernel, eps=_LN_EPS, act=act),
        out_shape=jax.ShapeDtypeStruct((m, n), jnp.bfloat16),
        grid_spec=pltpu.PrefetchScalarGridSpec(
            num_scalar_prefetch=0, grid=(m // tm,),
            in_specs=[
                pl.BlockSpec((tm, d), lambda i: (i, 0)),
                pl.BlockSpec((1, d), lambda i: (0, 0)),
                pl.BlockSpec((1, d), lambda i: (0, 0)),
                pl.BlockSpec((d, n), lambda i: (0, 0)),
                pl.BlockSpec((1, n), lambda i: (0, 0)),
            ],
            out_specs=pl.BlockSpec((tm, n), lambda i: (i, 0)),
        ),
        compiler_params=_cparams(1),
    )(x.astype(jnp.bfloat16), g.reshape(1, d).astype(jnp.float32),
      bln.reshape(1, d).astype(jnp.float32), w.astype(jnp.bfloat16),
      b.reshape(1, n).astype(jnp.float32))


def _ln_linear2(x, g, bln, w, b):
    m, d = x.shape
    n = w.shape[1]
    tm = _row_tile(m)
    return pl.pallas_call(
        functools.partial(_ln_linear2_kernel, eps=_LN_EPS),
        out_shape=(jax.ShapeDtypeStruct((m, n), jnp.bfloat16),
                   jax.ShapeDtypeStruct((m, d), jnp.bfloat16)),
        grid_spec=pltpu.PrefetchScalarGridSpec(
            num_scalar_prefetch=0, grid=(m // tm,),
            in_specs=[
                pl.BlockSpec((tm, d), lambda i: (i, 0)),
                pl.BlockSpec((1, d), lambda i: (0, 0)),
                pl.BlockSpec((1, d), lambda i: (0, 0)),
                pl.BlockSpec((d, n), lambda i: (0, 0)),
                pl.BlockSpec((1, n), lambda i: (0, 0)),
            ],
            out_specs=(pl.BlockSpec((tm, n), lambda i: (i, 0)),
                       pl.BlockSpec((tm, d), lambda i: (i, 0))),
        ),
        compiler_params=_cparams(1),
    )(x.astype(jnp.bfloat16), g.reshape(1, d).astype(jnp.float32),
      bln.reshape(1, d).astype(jnp.float32), w.astype(jnp.bfloat16),
      b.reshape(1, n).astype(jnp.float32))


def _linear_residual(x, w, b, res):
    m, k = x.shape
    n = w.shape[1]
    tm = _row_tile(m)
    return pl.pallas_call(
        _linear_residual_kernel,
        out_shape=jax.ShapeDtypeStruct((m, n), jnp.bfloat16),
        grid_spec=pltpu.PrefetchScalarGridSpec(
            num_scalar_prefetch=0, grid=(m // tm,),
            in_specs=[
                pl.BlockSpec((tm, k), lambda i: (i, 0)),
                pl.BlockSpec((k, n), lambda i: (0, 0)),
                pl.BlockSpec((1, n), lambda i: (0, 0)),
                pl.BlockSpec((tm, n), lambda i: (i, 0)),
            ],
            out_specs=pl.BlockSpec((tm, n), lambda i: (i, 0)),
        ),
        compiler_params=_cparams(1),
    )(x.astype(jnp.bfloat16), w.astype(jnp.bfloat16),
      b.reshape(1, n).astype(jnp.float32), res.astype(jnp.bfloat16))


def _mlp_fused(x, g, bln, w1, b1, w2, b2):
    m, d = x.shape
    ff = w1.shape[1]
    tm = _row_tile(m)
    return pl.pallas_call(
        functools.partial(_mlp_kernel, eps=_LN_EPS),
        out_shape=jax.ShapeDtypeStruct((m, d), jnp.bfloat16),
        grid_spec=pltpu.PrefetchScalarGridSpec(
            num_scalar_prefetch=0, grid=(m // tm,),
            in_specs=[
                pl.BlockSpec((tm, d), lambda i: (i, 0)),
                pl.BlockSpec((1, d), lambda i: (0, 0)),
                pl.BlockSpec((1, d), lambda i: (0, 0)),
                pl.BlockSpec((d, ff), lambda i: (0, 0)),
                pl.BlockSpec((1, ff), lambda i: (0, 0)),
                pl.BlockSpec((ff, d), lambda i: (0, 0)),
                pl.BlockSpec((1, d), lambda i: (0, 0)),
            ],
            out_specs=pl.BlockSpec((tm, d), lambda i: (i, 0)),
        ),
        compiler_params=_cparams(1),
    )(x.astype(jnp.bfloat16), g.reshape(1, d).astype(jnp.float32),
      bln.reshape(1, d).astype(jnp.float32), w1.astype(jnp.bfloat16),
      b1.reshape(1, ff).astype(jnp.float32), w2.astype(jnp.bfloat16),
      b2.reshape(1, d).astype(jnp.float32))


def _layernorm(x, g, b):
    m, d = x.shape
    tm = _row_tile(m)
    return pl.pallas_call(
        functools.partial(_ln_kernel, eps=_LN_EPS),
        out_shape=jax.ShapeDtypeStruct((m, d), jnp.bfloat16),
        grid_spec=pltpu.PrefetchScalarGridSpec(
            num_scalar_prefetch=0, grid=(m // tm,),
            in_specs=[
                pl.BlockSpec((tm, d), lambda i: (i, 0)),
                pl.BlockSpec((1, d), lambda i: (0, 0)),
                pl.BlockSpec((1, d), lambda i: (0, 0)),
            ],
            out_specs=pl.BlockSpec((tm, d), lambda i: (i, 0)),
        ),
        compiler_params=_cparams(1),
    )(x.astype(jnp.bfloat16), g.reshape(1, d).astype(jnp.float32),
      b.reshape(1, d).astype(jnp.float32))


def _attention(qkv, res, proj_w, proj_b, num_heads):
    b, n, e3 = qkv.shape
    e = e3 // 3
    scale = (e // num_heads) ** -0.5
    return pl.pallas_call(
        functools.partial(_attn_kernel, num_heads=num_heads, scale=scale),
        out_shape=jax.ShapeDtypeStruct((b, n, e), jnp.bfloat16),
        grid_spec=pltpu.PrefetchScalarGridSpec(
            num_scalar_prefetch=0, grid=(b,),
            in_specs=[
                pl.BlockSpec((1, n, e3), lambda i: (i, 0, 0)),
                pl.BlockSpec((e, e), lambda i: (0, 0)),
                pl.BlockSpec((1, e), lambda i: (0, 0)),
                pl.BlockSpec((1, n, e), lambda i: (i, 0, 0)),
            ],
            out_specs=pl.BlockSpec((1, n, e), lambda i: (i, 0, 0)),
        ),
        compiler_params=_cparams(1),
    )(qkv.astype(jnp.bfloat16), proj_w.astype(jnp.bfloat16),
      proj_b.reshape(1, e).astype(jnp.float32), res.astype(jnp.bfloat16))


def _conv_flat(x_slab, w_taps, bias, taps, n_out, act, out_dtype=jnp.bfloat16):
    b, nph, cin, nflat = x_slab.shape
    t, cout, _ = w_taps.shape
    return pl.pallas_call(
        functools.partial(_conv_kernel, taps=tuple(taps), n_out=n_out, act=act),
        out_shape=jax.ShapeDtypeStruct((b, cout, n_out), out_dtype),
        grid_spec=pltpu.PrefetchScalarGridSpec(
            num_scalar_prefetch=0, grid=(b,),
            in_specs=[
                pl.BlockSpec((1, nph, cin, nflat), lambda i: (i, 0, 0, 0)),
                pl.BlockSpec((t, cout, cin), lambda i: (0, 0, 0)),
                pl.BlockSpec((cout, 1), lambda i: (0, 0)),
            ],
            out_specs=pl.BlockSpec((1, cout, n_out), lambda i: (i, 0, 0)),
        ),
        compiler_params=_cparams(1),
    )(x_slab.astype(jnp.bfloat16), w_taps.astype(jnp.bfloat16),
      bias.reshape(cout, 1).astype(jnp.float32))


# =============================================================================
# XLA glue (layout plumbing only; all matmul/conv/norm hot paths are in Pallas)
# =============================================================================
def _maxpool2d(x, k, stride, pad):
    # TODO(synk): tiny 3x3/s2 pool kept in XLA reduce_window; fusing it into the
    # tokenizer-conv epilogue would need stride-2 lane gathers in the flat layout.
    return jax.lax.reduce_window(
        x, jnp.array(-jnp.inf, x.dtype), jax.lax.max,
        window_dimensions=(1, 1, k, k), window_strides=(1, 1, stride, stride),
        padding=((0, 0), (0, 0), (pad, pad), (pad, pad)))


def _upsample2x(x):
    # TODO(synk): nearest 2x upsample kept in XLA; folding it into the following
    # conv's tap indexing (sub-pixel decomposition) is possible but not done here.
    return jnp.repeat(jnp.repeat(x, 2, axis=2), 2, axis=3)


def _w_taps_3x3(w):
    # (Cout, Cin, 3, 3) -> (9, Cout, Cin), tap order (kh, kw) row-major.
    return jnp.stack([w[:, :, kh, kw] for kh in range(3) for kw in range(3)], axis=0)


def tokenizer_conv(src, w):
    # Conv2d(Cin -> E, k=3, s=2, p=1, bias=False) + ReLU via polyphase decomposition.
    bsz, cin, hin, _ = src.shape
    ho = (hin + 2 - 3) // 2 + 1
    pp = ho + 1
    xp = jnp.pad(src, ((0, 0), (0, 0), (1, 1), (1, 1)))
    phases = jnp.stack([xp[:, :, a::2, c::2] for a in (0, 1) for c in (0, 1)], axis=1)
    phases = phases.reshape(bsz, 4, cin, pp * pp)
    phases = jnp.pad(phases, ((0, 0), (0, 0), (0, 0), (0, pp)))   # slack for tap offsets
    n_out = ho * pp
    taps = [((kh % 2) * 2 + (kw % 2), (kh // 2) * pp + (kw // 2))
            for kh in range(3) for kw in range(3)]
    e = w.shape[0]
    y = _conv_flat(phases, _w_taps_3x3(w), jnp.zeros((e,), jnp.float32),
                   taps, n_out, act="relu")
    return y.reshape(bsz, e, ho, pp)[:, :, :, :ho]                # (B, E, ho, ho)


def conv3x3_s1(x, w, b, act="relu"):
    # Conv2d(Cin -> Cout, k=3, s=1, p=1) on NCHW; im2col-free fused Pallas kernel.
    bsz, cin, h, wdt = x.shape
    wp = wdt + 2
    xp = jnp.pad(x, ((0, 0), (0, 0), (1, 2), (1, 1)))             # Hp = h + 3
    slab = xp.reshape(bsz, 1, cin, (h + 3) * wp)
    n_out = h * wp
    taps = [(0, kh * wp + kw) for kh in range(3) for kw in range(3)]
    y = _conv_flat(slab, _w_taps_3x3(w), b, taps, n_out, act=act)
    return y.reshape(bsz, w.shape[0], h, wp)[:, :, :, :wdt]


def conv1x1(x, w, b, out_dtype=jnp.float32):
    bsz, cin, h, wdt = x.shape
    slab = x.reshape(bsz, 1, cin, h * wdt)
    w_taps = w.reshape(w.shape[0], cin)[None]                     # (1, Cout, Cin)
    y = _conv_flat(slab, w_taps, b, [(0, 0)], h * wdt, act="none", out_dtype=out_dtype)
    return y.reshape(bsz, w.shape[0], h, wdt)


# =============================================================================
# Model forward
# =============================================================================
def transformer_layer(x2d, p, num_heads, batch):
    m, e = x2d.shape
    n_tok = m // batch
    # attention sub-block: fused LN0+QKV, fused MHA(+proj+bias+residual)
    qkv = _ln_linear(x2d, p["ln0_g"], p["ln0_b"], p["qkv_w"])       # (M, 3E), no bias
    x2d = _attention(qkv.reshape(batch, n_tok, 3 * e),
                     x2d.reshape(batch, n_tok, e),
                     p["proj_w"], p["proj_b"], num_heads).reshape(m, e)
    # MLP sub-block: norm1 + FC1 + exact GELU + FC2 + residual (fused when erf lowers)
    if _erf_in_kernel_supported():
        return _mlp_fused(x2d, p["ln1_g"], p["ln1_b"],
                          p["fc1_w"], p["fc1_b"], p["fc2_w"], p["fc2_b"])
    # TODO(synk): erf not lowerable in this Mosaic build -> keep exact-GELU semantics
    # by splitting: fused (LN1+FC1) -> XLA erf-GELU -> fused (FC2 + bias + residual).
    h_pre, y_ln = _ln_linear2(x2d, p["ln1_g"], p["ln1_b"], p["fc1_w"], p["fc1_b"])
    h = jax.nn.gelu(h_pre.astype(jnp.float32), approximate=False)
    return _linear_residual(h, p["fc2_w"], p["fc2_b"], y_ln)


def skip_fcn_cct_forward(src, params, cfg):
    bsz = src.shape[0]
    e = cfg["embedding_dim"]
    num_heads = cfg["num_heads"]
    src_bf = src.astype(jnp.bfloat16)

    # ---- CCT tokenizer: Conv(3, s=2, p=1, bias=False) + ReLU -> MaxPool(3, 2, 1) ----
    x = tokenizer_conv(src_bf, params["tok_w"])                   # (B, E, 16, 16)
    x = _maxpool2d(x, 3, 2, 1)                                    # (B, E, 8, 8)
    p_tok = x.shape[-1]
    seq = p_tok * p_tok
    tokens = x.reshape(bsz, e, seq).transpose(0, 2, 1)            # Flatten(2,3).T
    tokens = tokens + params["pos_emb"]                           # pos-emb; dropout(0)=id
    x2d = tokens.reshape(bsz * seq, e)

    # ---- Transformer encoder (3 pallas_calls per layer) ----
    for lyr in params["layers"]:
        x2d = transformer_layer(x2d, lyr, num_heads, bsz)
    enc = _layernorm(x2d, params["final_g"], params["final_b"]).reshape(bsz, seq, e)

    # ---- Skip-FCN decoder ----
    pd = int(math.isqrt(seq))
    x = enc.reshape(bsz, e, pd, pd)                               # raw reshape (as in torch)
    for (w, b) in params["upblocks"]:
        x = _upsample2x(x)
        x = conv3x3_s1(x, w, b, act="relu")
    bn_src = (src * (1.0 / math.sqrt(1.0 + 0.01))).astype(jnp.bfloat16)  # BN eval, eps=0.01
    x = jnp.concatenate([x, bn_src], axis=1)                      # (B, 2*Cin, H, W)
    return conv1x1(x, params["out_w"], params["out_b"], out_dtype=jnp.float32)


# =============================================================================
# Deterministic parameter init (matmul/conv weights stored in bf16)
# =============================================================================
def init_params(key, cfg):
    e = cfg["embedding_dim"]
    cin = cfg["n_input_channels"]
    p = cfg["img_size"] // 4            # conv(s=2) + maxpool(s=2)
    seq = p * p
    ff = int(e * cfg["mlp_ratio"])
    keys = iter(jax.random.split(key, 64))
    f32 = jnp.float32

    def rnd(shape, scale=0.05):
        return (scale * jax.random.normal(next(keys), shape, f32)).astype(jnp.bfloat16)

    params = {}
    params["tok_w"] = rnd((e, cin, 3, 3))               # tokenizer conv, bias=False
    params["pos_emb"] = rnd((1, seq, e), 0.2)
    layers = []
    for _ in range(cfg["num_layers"]):
        layers.append(dict(
            ln0_g=jnp.ones((e,), f32), ln0_b=jnp.zeros((e,), f32),
            qkv_w=rnd((e, 3 * e)),
            proj_w=rnd((e, e)), proj_b=jnp.zeros((e,), f32),
            ln1_g=jnp.ones((e,), f32), ln1_b=jnp.zeros((e,), f32),
            fc1_w=rnd((e, ff)), fc1_b=jnp.zeros((ff,), f32),
            fc2_w=rnd((ff, e)), fc2_b=jnp.zeros((e,), f32),
        ))
    params["layers"] = layers
    params["final_g"] = jnp.ones((e,), f32)
    params["final_b"] = jnp.zeros((e,), f32)

    times = e // cfg["img_size"]
    ups = []
    for i in range(times):
        c_in = int(e * 0.25 ** i)
        c_out = c_in // 4
        ups.append((rnd((c_out, c_in, 3, 3)), jnp.zeros((c_out,), f32)))
    params["upblocks"] = ups
    params["out_w"] = rnd((1, 2 * cin, 1, 1))           # nn.Conv2d(8 -> 1, k=1) analogue
    params["out_b"] = jnp.zeros((1,), f32)
    return params


if __name__ == "__main__":
    # Scaled-down but structurally consistent config:
    # img_size=32, embedding_dim=64 -> times=2; tokenizer downsamples 4x -> P=8;
    # 2 up-blocks restore 32x32 with 4 channels, concat BN(src) -> 8 ch -> 1x1 conv.
    cfg = dict(img_size=32, embedding_dim=64, n_input_channels=4,
               num_layers=3, num_heads=8, mlp_ratio=4.0)

    _erf_in_kernel_supported()          # prime the erf capability probe outside tracing

    key = jax.random.PRNGKey(0)
    kx, kp = jax.random.split(key)
    src = jax.random.normal(
        kx, (2, cfg["n_input_channels"], cfg["img_size"], cfg["img_size"]), jnp.float32)
    params = init_params(kp, cfg)

    fwd = jax.jit(functools.partial(skip_fcn_cct_forward, cfg=cfg))
    out = jax.block_until_ready(fwd(src, params))
    assert out.shape == (2, 1, cfg["img_size"], cfg["img_size"]), out.shape
    assert bool(jnp.all(jnp.isfinite(out)))
    print("KERNEL_OK")
</pallas_src>

<mosaic_0001>
module attributes {stable_mosaic.version = 11 : i64} {
  func.func @_erf_probe_kernel(%arg0: memref<8x128xf32, #tpu.memory_space<vmem>>, %arg1: memref<8x128xf32, #tpu.memory_space<vmem>>) attributes {dimension_semantics = [], scalar_prefetch = 0 : i64, scratch_operands = 0 : i64, tpu.core_type = #tpu.core_type<tc>} {
    %c0 = arith.constant 0 : index
    %c0_0 = arith.constant 0 : index
    %0 = vector.load %arg0[%c0, %c0_0] : memref<8x128xf32, #tpu.memory_space<vmem>>, vector<8x128xf32>
    %1 = math.erf %0 : vector<8x128xf32>
    %c0_1 = arith.constant 0 : index
    %c0_2 = arith.constant 0 : index
    %2 = vector.load %arg1[%c0_1, %c0_2] : memref<8x128xf32, #tpu.memory_space<vmem>>, vector<8x128xf32>
    tpu.vector_store %arg1[%c0_1, %c0_2], %1 {strides = array<i32>} : memref<8x128xf32, #tpu.memory_space<vmem>>, vector<8x128xf32>,
    return
  }
}

module attributes {stable_mosaic.version = 11 : i64} {
  func.func @_conv_kernel(%arg0: i32, %arg1: memref<1x4x4x306xbf16, #tpu.memory_space<vmem>>, %arg2: memref<9x64x4xbf16, #tpu.memory_space<vmem>>, %arg3: memref<64x1xf32, #tpu.memory_space<vmem>>, %arg4: memref<1x64x272xbf16, #tpu.memory_space<vmem>>) attributes {dimension_semantics = [#tpu.dimension_semantics<parallel>], iteration_bounds = array<i64: 2>, scalar_prefetch = 0 : i64, scratch_operands = 0 : i64, tpu.core_type = #tpu.core_type<tc>, window_params = [{transform_indices = @transform_0, window_bounds = array<i64: 1, 4, 4, 306>}, {pipeline_mode = #tpu.pipeline_mode<synchronous>, transform_indices = @transform_1, window_bounds = array<i64: 9, 64, 4>}, {pipeline_mode = #tpu.pipeline_mode<synchronous>, transform_indices = @transform_2, window_bounds = array<i64: 64, 1>}, {transform_indices = @transform_3, window_bounds = array<i64: 1, 64, 272>}]} {
    %c0 = arith.constant 0 : index
    %c0_0 = arith.constant 0 : index
    %c0_1 = arith.constant 0 : index
    %c0_2 = arith.constant 0 : index
    %0 = vector.load %arg1[%c0, %c0_0, %c0_1, %c0_2] : memref<1x4x4x306xbf16, #tpu.memory_space<vmem>>, vector<1x1x4x306xbf16>
    %1 = vector.shape_cast %0 : vector<1x1x4x306xbf16> to vector<4x306xbf16>
    %c0_3 = arith.constant 0 : index
    %c1 = arith.constant 1 : index
    %c0_4 = arith.constant 0 : index
    %c0_5 = arith.constant 0 : index
    %2 = vector.load %arg1[%c0_3, %c1, %c0_4, %c0_5] : memref<1x4x4x306xbf16, #tpu.memory_space<vmem>>, vector<1x1x4x306xbf16>
    %3 = vector.shape_cast %2 : vector<1x1x4x306xbf16> to vector<4x306xbf16>
    %c0_6 = arith.constant 0 : index
    %c2 = arith.constant 2 : index
    %c0_7 = arith.constant 0 : index
    %c0_8 = arith.constant 0 : index
    %4 = vector.load %arg1[%c0_6, %c2, %c0_7, %c0_8] : memref<1x4x4x306xbf16, #tpu.memory_space<vmem>>, vector<1x1x4x306xbf16>
    %5 = vector.shape_cast %4 : vector<1x1x4x306xbf16> to vector<4x306xbf16>
    %c0_9 = arith.constant 0 : index
    %c3 = arith.constant 3 : index
    %c0_10 = arith.constant 0 : index
    %c0_11 = arith.constant 0 : index
    %6 = vector.load %arg1[%c0_9, %c3, %c0_10, %c0_11] : memref<1x4x4x306xbf16, #tpu.memory_space<vmem>>, vector<1x1x4x306xbf16>
    %7 = vector.shape_cast %6 : vector<1x1x4x306xbf16> to vector<4x306xbf16>
    %8 = vector.extract_strided_slice %1 {offsets = [0, 0], sizes = [4, 272], strides = [1, 1]} : vector<4x306xbf16> to vector<4x272xbf16>
    %c0_12 = arith.constant 0 : index
    %c0_13 = arith.constant 0 : index
    %c0_14 = arith.constant 0 : index
    %9 = vector.load %arg2[%c0_12, %c0_13, %c0_14] : memref<9x64x4xbf16, #tpu.memory_space<vmem>>, vector<1x64x4xbf16>
    %10 = vector.shape_cast %9 : vector<1x64x4xbf16> to vector<64x4xbf16>
    %cst = arith.constant dense<0.000000e+00> : vector<64x272xf32>
    %11 = tpu.matmul %10, %8, %cst {dimension_numbers = #tpu.dot_dimension_numbers<[1], [0], [0], [1], [0, 0, 1, 1], [], []>} : vector<64x4xbf16>, vector<4x272xbf16>, vector<64x272xf32> -> vector<64x272xf32>
    %12 = vector.extract_strided_slice %3 {offsets = [0, 0], sizes = [4, 272], strides = [1, 1]} : vector<4x306xbf16> to vector<4x272xbf16>
    %c1_15 = arith.constant 1 : index
    %c0_16 = arith.constant 0 : index
    %c0_17 = arith.constant 0 : index
    %13 = vector.load %arg2[%c1_15, %c0_16, %c0_17] : memref<9x64x4xbf16, #tpu.memory_space<vmem>>, vector<1x64x4xbf16>
    %14 = vector.shape_cast %13 : vector<1x64x4xbf16> to vector<64x4xbf16>
    %cst_18 = arith.constant dense<0.000000e+00> : vector<64x272xf32>
    %15 = tpu.matmul %14, %12, %cst_18 {dimension_numbers = #tpu.dot_dimension_numbers<[1], [0], [0], [1], [0, 0, 1, 1], [], []>} : vector<64x4xbf16>, vector<4x272xbf16>, vector<64x272xf32> -> vector<64x272xf32>
    %16 = arith.addf %11, %15 : vector<64x272xf32>
    %17 = vector.extract_strided_slice %1 {offsets = [0, 1], sizes = [4, 272], strides = [1, 1]} : vector<4x306xbf16> to vector<4x272xbf16>
    %c2_19 = arith.constant 2 : index
    %c0_20 = arith.constant 0 : index
    %c0_21 = arith.constant 0 : index
    %18 = vector.load %arg2[%c2_19, %c0_20, %c0_21] : memref<9x64x4xbf16, #tpu.memory_space<vmem>>, vector<1x64x4xbf16>
    %19 = vector.shape_cast %18 : vector<1x64x4xbf16> to vector<64x4xbf16>
    %cst_22 = arith.constant dense<0.000000e+00> : vector<64x272xf32>
    %20 = tpu.matmul %19, %17, %cst_22 {dimension_numbers = #tpu.dot_dimension_numbers<[1], [0], [0], [1], [0, 0, 1, 1], [], []>} : vector<64x4xbf16>, vector<4x272xbf16>, vector<64x272xf32> -> vector<64x272xf32>
    %21 = arith.addf %16, %20 : vector<64x272xf32>
    %22 = vector.extract_strided_slice %5 {offsets = [0, 0], sizes = [4, 272], strides = [1, 1]} : vector<4x306xbf16> to vector<4x272xbf16>
    %c3_23 = arith.constant 3 : index
    %c0_24 = arith.constant 0 : index
    %c0_25 = arith.constant 0 : index
    %23 = vector.load %arg2[%c3_23, %c0_24, %c0_25] : memref<9x64x4xbf16, #tpu.memory_space<vmem>>, vector<1x64x4xbf16>
    %24 = vector.shape_cast %23 : vector<1x64x4xbf16> to vector<64x4xbf16>
    %cst_26 = arith.constant dense<0.000000e+00> : vector<64x272xf32>
    %25 = tpu.matmul %24, %22, %cst_26 {dimension_numbers = #tpu.dot_dimension_numbers<[1], [0], [0], [1], [0, 0, 1, 1], [], []>} : vector<64x4xbf16>, vector<4x272xbf16>, vector<64x272xf32> -> vector<64x272xf32>
    %26 = arith.addf %21, %25 : vector<64x272xf32>
    %27 = vector.extract_strided_slice %7 {offsets = [0, 0], sizes = [4, 272], strides = [1, 1]} : vector<4x306xbf16> to vector<4x272xbf16>
    %c4 = arith.constant 4 : index
    %c0_27 = arith.constant 0 : index
    %c0_28 = arith.constant 0 : index
    %28 = vector.load %arg2[%c4, %c0_27, %c0_28] : memref<9x64x4xbf16, #tpu.memory_space<vmem>>, vector<1x64x4xbf16>
    %29 = vector.shape_cast %28 : vector<1x64x4xbf16> to vector<64x4xbf16>
    %cst_29 = arith.constant dense<0.000000e+00> : vector<64x272xf32>
    %30 = tpu.matmul %29, %27, %cst_29 {dimension_numbers = #tpu.dot_dimension_numbers<[1], [0], [0], [1], [0, 0, 1, 1], [], []>} : vector<64x4xbf16>, vector<4x272xbf16>, vector<64x272xf32> -> vector<64x272xf32>
    %31 = arith.addf %26, %30 : vector<64x272xf32>
    %32 = vector.extract_strided_slice %5 {offsets = [0, 1], sizes = [4, 272], strides = [1, 1]} : vector<4x306xbf16> to vector<4x272xbf16>
    %c5 = arith.constant 5 : index
    %c0_30 = arith.constant 0 : index
    %c0_31 = arith.constant 0 : index
    %33 = vector.load %arg2[%c5, %c0_30, %c0_31] : memref<9x64x4xbf16, #tpu.memory_space<vmem>>, vector<1x64x4xbf16>
    %34 = vector.shape_cast %33 : vector<1x64x4xbf16> to vector<64x4xbf16>
    %cst_32 = arith.constant dense<0.000000e+00> : vector<64x272xf32>
    %35 = tpu.matmul %34, %32, %cst_32 {dimension_numbers = #tpu.dot_dimension_numbers<[1], [0], [0], [1], [0, 0, 1, 1], [], []>} : vector<64x4xbf16>, vector<4x272xbf16>, vector<64x272xf32> -> vector<64x272xf32>
    %36 = arith.addf %31, %35 : vector<64x272xf32>
    %37 = vector.extract_strided_slice %1 {offsets = [0, 17], sizes = [4, 272], strides = [1, 1]} : vector<4x306xbf16> to vector<4x272xbf16>
    %c6 = arith.constant 6 : index
    %c0_33 = arith.constant 0 : index
    %c0_34 = arith.constant 0 : index
    %38 = vector.load %arg2[%c6, %c0_33, %c0_34] : memref<9x64x4xbf16, #tpu.memory_space<vmem>>, vector<1x64x4xbf16>
    %39 = vector.shape_cast %38 : vector<1x64x4xbf16> to vector<64x4xbf16>
    %cst_35 = arith.constant dense<0.000000e+00> : vector<64x272xf32>
    %40 = tpu.matmul %39, %37, %cst_35 {dimension_numbers = #tpu.dot_dimension_numbers<[1], [0], [0], [1], [0, 0, 1, 1], [], []>} : vector<64x4xbf16>, vector<4x272xbf16>, vector<64x272xf32> -> vector<64x272xf32>
    %41 = arith.addf %36, %40 : vector<64x272xf32>
    %42 = vector.extract_strided_slice %3 {offsets = [0, 17], sizes = [4, 272], strides = [1, 1]} : vector<4x306xbf16> to vector<4x272xbf16>
    %c7 = arith.constant 7 : index
    %c0_36 = arith.constant 0 : index
    %c0_37 = arith.constant 0 : index
    %43 = vector.load %arg2[%c7, %c0_36, %c0_37] : memref<9x64x4xbf16, #tpu.memory_space<vmem>>, vector<1x64x4xbf16>
    %44 = vector.shape_cast %43 : vector<1x64x4xbf16> to vector<64x4xbf16>
    %cst_38 = arith.constant dense<0.000000e+00> : vector<64x272xf32>
    %45 = tpu.matmul %44, %42, %cst_38 {dimension_numbers = #tpu.dot_dimension_numbers<[1], [0], [0], [1], [0, 0, 1, 1], [], []>} : vector<64x4xbf16>, vector<4x272xbf16>, vector<64x272xf32> -> vector<64x272xf32>
    %46 = arith.addf %41, %45 : vector<64x272xf32>
    %47 = vector.extract_strided_slice %1 {offsets = [0, 18], sizes = [4, 272], strides = [1, 1]} : vector<4x306xbf16> to vector<4x272xbf16>
    %c8 = arith.constant 8 : index
    %c0_39 = arith.constant 0 : index
    %c0_40 = arith.constant 0 : index
    %48 = vector.load %arg2[%c8, %c0_39, %c0_40] : memref<9x64x4xbf16, #tpu.memory_space<vmem>>, vector<1x64x4xbf16>
    %49 = vector.shape_cast %48 : vector<1x64x4xbf16> to vector<64x4xbf16>
    %cst_41 = arith.constant dense<0.000000e+00> : vector<64x272xf32>
    %50 = tpu.matmul %49, %47, %cst_41 {dimension_numbers = #tpu.dot_dimension_numbers<[1], [0], [0], [1], [0, 0, 1, 1], [], []>} : vector<64x4xbf16>, vector<4x272xbf16>, vector<64x272xf32> -> vector<64x272xf32>
    %51 = arith.addf %46, %50 : vector<64x272xf32>
    %c0_42 = arith.constant 0 : index
    %c0_43 = arith.constant 0 : index
    %52 = vector.load %arg3[%c0_42, %c0_43] : memref<64x1xf32, #tpu.memory_space<vmem>>, vector<64x1xf32>
    %53 = vector.broadcast %52 : vector<64x1xf32> to vector<64x272xf32>
    %54 = arith.addf %51, %53 : vector<64x272xf32>
    %cst_44 = arith.constant 0.000000e+00 : f32
    %55 = vector.broadcast %cst_44 : f32 to vector<64x272xf32>
    %56 = arith.maximumf %54, %55 : vector<64x272xf32>
    %57 = arith.truncf %56 : vector<64x272xf32> to vector<64x272xbf16>
    %c0_45 = arith.constant 0 : index
    %c0_46 = arith.constant 0 : index
    %c0_47 = arith.constant 0 : index
    %58 = vector.load %arg4[%c0_45, %c0_46, %c0_47] : memref<1x64x272xbf16, #tpu.memory_space<vmem>>, vector<1x64x272xbf16>
    %59 = vector.shape_cast %58 : vector<1x64x272xbf16> to vector<64x272xbf16>
    %60 = vector.shape_cast %57 : vector<64x272xbf16> to vector<1x64x272xbf16>
    tpu.vector_store %arg4[%c0_45, %c0_46, %c0_47], %60 {strides = array<i32>} : memref<1x64x272xbf16, #tpu.memory_space<vmem>>, vector<1x64x272xbf16>,
    return
  }
  func.func @transform_0(%arg0: i32) -> (i32, i32, i32, i32) {
    %c0_i32 = arith.constant 0 : i32
    %c0_i32_0 = arith.constant 0 : i32
    %c0_i32_1 = arith.constant 0 : i32
    %c0_i32_2 = arith.constant 0 : i32
    return %arg0, %c0_i32, %c0_i32_0, %c0_i32_1 : i32, i32, i32, i32
  }
  func.func @transform_1(%arg0: i32) -> (i32, i32, i32) {
    %c0_i32 = arith.constant 0 : i32
    %c0_i32_0 = arith.constant 0 : i32
    %c0_i32_1 = arith.constant 0 : i32
    %c0_i32_2 = arith.constant 0 : i32
    return %c0_i32, %c0_i32_0, %c0_i32_1 : i32, i32, i32
  }
  func.func @transform_2(%arg0: i32) -> (i32, i32) {
    %c0_i32 = arith.constant 0 : i32
    %c0_i32_0 = arith.constant 0 : i32
    %c0_i32_1 = arith.constant 0 : i32
    return %c0_i32, %c0_i32_0 : i32, i32
  }
  func.func @transform_3(%arg0: i32) -> (i32, i32, i32) {
    %c0_i32 = arith.constant 0 : i32
    %c0_i32_0 = arith.constant 0 : i32
    %c0_i32_1 = arith.constant 0 : i32
    return %arg0, %c0_i32, %c0_i32_0 : i32, i32, i32
  }
}

module attributes {stable_mosaic.version = 11 : i64} {
  func.func @_ln_linear_kernel(%arg0: i32, %arg1: memref<64x64xbf16, #tpu.memory_space<vmem>>, %arg2: memref<1x64xf32, #tpu.memory_space<vmem>>, %arg3: memref<1x64xf32, #tpu.memory_space<vmem>>, %arg4: memref<64x192xbf16, #tpu.memory_space<vmem>>, %arg5: memref<1x192xf32, #tpu.memory_space<vmem>>, %arg6: memref<64x192xbf16, #tpu.memory_space<vmem>>) attributes {dimension_semantics = [#tpu.dimension_semantics<parallel>], iteration_bounds = array<i64: 2>, scalar_prefetch = 0 : i64, scratch_operands = 0 : i64, tpu.core_type = #tpu.core_type<tc>, window_params = [{transform_indices = @transform_0, window_bounds = array<i64: 64, 64>}, {pipeline_mode = #tpu.pipeline_mode<synchronous>, transform_indices = @transform_1, window_bounds = array<i64: 1, 64>}, {pipeline_mode = #tpu.pipeline_mode<synchronous>, transform_indices = @transform_2, window_bounds = array<i64: 1, 64>}, {pipeline_mode = #tpu.pipeline_mode<synchronous>, transform_indices = @transform_3, window_bounds = array<i64: 64, 192>}, {pipeline_mode = #tpu.pipeline_mode<synchronous>, transform_indices = @transform_4, window_bounds = array<i64: 1, 192>}, {transform_indices = @transform_5, window_bounds = array<i64: 64, 192>}]} {
    %c0 = arith.constant 0 : index
    %c0_0 = arith.constant 0 : index
    %0 = vector.load %arg1[%c0, %c0_0] : memref<64x64xbf16, #tpu.memory_space<vmem>>, vector<64x64xbf16>
    %1 = arith.extf %0 : vector<64x64xbf16> to vector<64x64xf32>
    %c0_1 = arith.constant 0 : index
    %c0_2 = arith.constant 0 : index
    %2 = vector.load %arg2[%c0_1, %c0_2] : memref<1x64xf32, #tpu.memory_space<vmem>>, vector<1x64xf32>
    %c0_3 = arith.constant 0 : index
    %c0_4 = arith.constant 0 : index
    %3 = vector.load %arg3[%c0_3, %c0_4] : memref<1x64xf32, #tpu.memory_space<vmem>>, vector<1x64xf32>
    %cst = arith.constant dense<0.000000e+00> : vector<64xf32>
    %4 = vector.multi_reduction <add>, %1, %cst [1] : vector<64x64xf32> to vector<64xf32>
    %5 = vector.shape_cast %4 : vector<64xf32> to vector<64x1xf32>
    %cst_5 = arith.constant 6.400000e+01 : f32
    %6 = vector.broadcast %cst_5 : f32 to vector<64x1xf32>
    %7 = arith.divf %5, %6 : vector<64x1xf32>
    %8 = vector.broadcast %7 : vector<64x1xf32> to vector<64x64xf32>
    %9 = arith.subf %1, %8 : vector<64x64xf32>
    %10 = arith.mulf %9, %9 : vector<64x64xf32>
    %cst_6 = arith.constant dense<0.000000e+00> : vector<64xf32>
    %11 = vector.multi_reduction <add>, %10, %cst_6 [1] : vector<64x64xf32> to vector<64xf32>
    %12 = vector.shape_cast %11 : vector<64xf32> to vector<64x1xf32>
    %cst_7 = arith.constant 6.400000e+01 : f32
    %13 = vector.broadcast %cst_7 : f32 to vector<64x1xf32>
    %14 = arith.divf %12, %13 : vector<64x1xf32>
    %cst_8 = arith.constant 9.99999974E-6 : f32
    %15 = vector.broadcast %cst_8 : f32 to vector<64x1xf32>
    %16 = arith.addf %14, %15 : vector<64x1xf32>
    %17 = math.rsqrt %16 : vector<64x1xf32>
    %18 = vector.broadcast %17 : vector<64x1xf32> to vector<64x64xf32>
    %19 = arith.mulf %9, %18 : vector<64x64xf32>
    %20 = vector.broadcast %2 : vector<1x64xf32> to vector<64x64xf32>
    %21 = arith.mulf %19, %20 : vector<64x64xf32>
    %22 = vector.broadcast %3 : vector<1x64xf32> to vector<64x64xf32>
    %23 = arith.addf %21, %22 : vector<64x64xf32>
    %24 = arith.truncf %23 : vector<64x64xf32> to vector<64x64xbf16>
    %c0_9 = arith.constant 0 : index
    %c0_10 = arith.constant 0 : index
    %25 = vector.load %arg4[%c0_9, %c0_10] : memref<64x192xbf16, #tpu.memory_space<vmem>>, vector<64x192xbf16>
    %cst_11 = arith.constant dense<0.000000e+00> : vector<64x192xf32>
    %26 = tpu.matmul %24, %25, %cst_11 {dimension_numbers = #tpu.dot_dimension_numbers<[1], [0], [0], [1], [0, 0, 1, 1], [], []>} : vector<64x64xbf16>, vector<64x192xbf16>, vector<64x192xf32> -> vector<64x192xf32>
    %c0_12 = arith.constant 0 : index
    %c0_13 = arith.constant 0 : index
    %27 = vector.load %arg5[%c0_12, %c0_13] : memref<1x192xf32, #tpu.memory_space<vmem>>, vector<1x192xf32>
    %28 = vector.broadcast %27 : vector<1x192xf32> to vector<64x192xf32>
    %29 = arith.addf %26, %28 : vector<64x192xf32>
    %30 = arith.truncf %29 : vector<64x192xf32> to vector<64x192xbf16>
    %c0_14 = arith.constant 0 : index
    %c0_15 = arith.constant 0 : index
    %31 = vector.load %arg6[%c0_14, %c0_15] : memref<64x192xbf16, #tpu.memory_space<vmem>>, vector<64x192xbf16>
    tpu.vector_store %arg6[%c0_14, %c0_15], %30 {strides = array<i32>} : memref<64x192xbf16, #tpu.memory_space<vmem>>, vector<64x192xbf16>,
    return
  }
  func.func @transform_0(%arg0: i32) -> (i32, i32) {
    %c0_i32 = arith.constant 0 : i32
    %c0_i32_0 = arith.constant 0 : i32
    return %arg0, %c0_i32 : i32, i32
  }
  func.func @transform_1(%arg0: i32) -> (i32, i32) {
    %c0_i32 = arith.constant 0 : i32
    %c0_i32_0 = arith.constant 0 : i32
    %c0_i32_1 = arith.constant 0 : i32
    return %c0_i32, %c0_i32_0 : i32, i32
  }
  func.func @transform_2(%arg0: i32) -> (i32, i32) {
    %c0_i32 = arith.constant 0 : i32
    %c0_i32_0 = arith.constant 0 : i32
    %c0_i32_1 = arith.constant 0 : i32
    return %c0_i32, %c0_i32_0 : i32, i32
  }
  func.func @transform_3(%arg0: i32) -> (i32, i32) {
    %c0_i32 = arith.constant 0 : i32
    %c0_i32_0 = arith.constant 0 : i32
    %c0_i32_1 = arith.constant 0 : i32
    return %c0_i32, %c0_i32_0 : i32, i32
  }
  func.func @transform_4(%arg0: i32) -> (i32, i32) {
    %c0_i32 = arith.constant 0 : i32
    %c0_i32_0 = arith.constant 0 : i32
    %c0_i32_1 = arith.constant 0 : i32
    return %c0_i32, %c0_i32_0 : i32, i32
  }
  func.func @transform_5(%arg0: i32) -> (i32, i32) {
    %c0_i32 = arith.constant 0 : i32
    %c0_i32_0 = arith.constant 0 : i32
    return %arg0, %c0_i32 : i32, i32
  }
}

module attributes {stable_mosaic.version = 11 : i64} {
  func.func @_attn_kernel(%arg0: i32, %arg1: memref<1x64x192xbf16, #tpu.memory_space<vmem>>, %arg2: memref<64x64xbf16, #tpu.memory_space<vmem>>, %arg3: memref<1x64xf32, #tpu.memory_space<vmem>>, %arg4: memref<1x64x64xbf16, #tpu.memory_space<vmem>>, %arg5: memref<1x64x64xbf16, #tpu.memory_space<vmem>>) attributes {dimension_semantics = [#tpu.dimension_semantics<parallel>], iteration_bounds = array<i64: 2>, scalar_prefetch = 0 : i64, scratch_operands = 0 : i64, tpu.core_type = #tpu.core_type<tc>, window_params = [{transform_indices = @transform_0, window_bounds = array<i64: 1, 64, 192>}, {pipeline_mode = #tpu.pipeline_mode<synchronous>, transform_indices = @transform_1, window_bounds = array<i64: 64, 64>}, {pipeline_mode = #tpu.pipeline_mode<synchronous>, transform_indices = @transform_2, window_bounds = array<i64: 1, 64>}, {transform_indices = @transform_3, window_bounds = array<i64: 1, 64, 64>}, {transform_indices = @transform_4, window_bounds = array<i64: 1, 64, 64>}]} {
    %c0 = arith.constant 0 : index
    %c0_0 = arith.constant 0 : index
    %c0_1 = arith.constant 0 : index
    %0 = vector.load %arg1[%c0, %c0_0, %c0_1] : memref<1x64x192xbf16, #tpu.memory_space<vmem>>, vector<1x64x192xbf16>
    %1 = vector.shape_cast %0 : vector<1x64x192xbf16> to vector<64x192xbf16>
    %2 = vector.extract_strided_slice %1 {offsets = [0, 0], sizes = [64, 8], strides = [1, 1]} : vector<64x192xbf16> to vector<64x8xbf16>
    %3 = vector.extract_strided_slice %1 {offsets = [0, 64], sizes = [64, 8], strides = [1, 1]} : vector<64x192xbf16> to vector<64x8xbf16>
    %4 = vector.extract_strided_slice %1 {offsets = [0, 128], sizes = [64, 8], strides = [1, 1]} : vector<64x192xbf16> to vector<64x8xbf16>
    %cst = arith.constant dense<0.000000e+00> : vector<64x64xf32>
    %5 = tpu.matmul %2, %3, %cst {dimension_numbers = #tpu.dot_dimension_numbers<[1], [1], [0], [0], [0, 0, 1, 0], [], []>} : vector<64x8xbf16>, vector<64x8xbf16>, vector<64x64xf32> -> vector<64x64xf32>
    %cst_2 = arith.constant 0.353553385 : f32
    %6 = vector.broadcast %cst_2 : f32 to vector<64x64xf32>
    %7 = arith.mulf %5, %6 : vector<64x64xf32>
    %cst_3 = arith.constant dense<0xFF800000> : vector<64xf32>
    %8 = vector.multi_reduction <maximumf>, %7, %cst_3 [1] : vector<64x64xf32> to vector<64xf32>
    %9 = vector.shape_cast %8 : vector<64xf32> to vector<64x1xf32>
    %10 = vector.broadcast %9 : vector<64x1xf32> to vector<64x64xf32>
    %11 = arith.subf %7, %10 : vector<64x64xf32>
    %12 = math.exp %11 : vector<64x64xf32>
    %cst_4 = arith.constant dense<0.000000e+00> : vector<64xf32>
    %13 = vector.multi_reduction <add>, %12, %cst_4 [1] : vector<64x64xf32> to vector<64xf32>
    %14 = vector.shape_cast %13 : vector<64xf32> to vector<64x1xf32>
    %15 = tpu.reciprocal %14 {approx = true} : vector<64x1xf32> -> vector<64x1xf32>
    %16 = vector.broadcast %15 : vector<64x1xf32> to vector<64x64xf32>
    %17 = arith.mulf %12, %16 : vector<64x64xf32>
    %18 = arith.truncf %17 : vector<64x64xf32> to vector<64x64xbf16>
    %cst_5 = arith.constant dense<0.000000e+00> : vector<64x8xf32>
    %19 = tpu.matmul %18, %4, %cst_5 {dimension_numbers = #tpu.dot_dimension_numbers<[1], [0], [0], [1], [0, 0, 1, 1], [], []>} : vector<64x64xbf16>, vector<64x8xbf16>, vector<64x8xf32> -> vector<64x8xf32>
    %20 = vector.extract_strided_slice %1 {offsets = [0, 8], sizes = [64, 8], strides = [1, 1]} : vector<64x192xbf16> to vector<64x8xbf16>
    %21 = vector.extract_strided_slice %1 {offsets = [0, 72], sizes = [64, 8], strides = [1, 1]} : vector<64x192xbf16> to vector<64x8xbf16>
    %22 = vector.extract_strided_slice %1 {offsets = [0, 136], sizes = [64, 8], strides = [1, 1]} : vector<64x192xbf16> to vector<64x8xbf16>
    %cst_6 = arith.constant dense<0.000000e+00> : vector<64x64xf32>
    %23 = tpu.matmul %20, %21, %cst_6 {dimension_numbers = #tpu.dot_dimension_numbers<[1], [1], [0], [0], [0, 0, 1, 0], [], []>} : vector<64x8xbf16>, vector<64x8xbf16>, vector<64x64xf32> -> vector<64x64xf32>
    %cst_7 = arith.constant 0.353553385 : f32
    %24 = vector.broadcast %cst_7 : f32 to vector<64x64xf32>
    %25 = arith.mulf %23, %24 : vector<64x64xf32>
    %cst_8 = arith.constant dense<0xFF800000> : vector<64xf32>
    %26 = vector.multi_reduction <maximumf>, %25, %cst_8 [1] : vector<64x64xf32> to vector<64xf32>
    %27 = vector.shape_cast %26 : vector<64xf32> to vector<64x1xf32>
    %28 = vector.broadcast %27 : vector<64x1xf32> to vector<64x64xf32>
    %29 = arith.subf %25, %28 : vector<64x64xf32>
    %30 = math.exp %29 : vector<64x64xf32>
    %cst_9 = arith.constant dense<0.000000e+00> : vector<64xf32>
    %31 = vector.multi_reduction <add>, %30, %cst_9 [1] : vector<64x64xf32> to vector<64xf32>
    %32 = vector.shape_cast %31 : vector<64xf32> to vector<64x1xf32>
    %33 = tpu.reciprocal %32 {approx = true} : vector<64x1xf32> -> vector<64x1xf32>
    %34 = vector.broadcast %33 : vector<64x1xf32> to vector<64x64xf32>
    %35 = arith.mulf %30, %34 : vector<64x64xf32>
    %36 = arith.truncf %35 : vector<64x64xf32> to vector<64x64xbf16>
    %cst_10 = arith.constant dense<0.000000e+00> : vector<64x8xf32>
    %37 = tpu.matmul %36, %22, %cst_10 {dimension_numbers = #tpu.dot_dimension_numbers<[1], [0], [0], [1], [0, 0, 1, 1], [], []>} : vector<64x64xbf16>, vector<64x8xbf16>, vector<64x8xf32> -> vector<64x8xf32>
    %38 = vector.extract_strided_slice %1 {offsets = [0, 16], sizes = [64, 8], strides = [1, 1]} : vector<64x192xbf16> to vector<64x8xbf16>
    %39 = vector.extract_strided_slice %1 {offsets = [0, 80], sizes = [64, 8], strides = [1, 1]} : vector<64x192xbf16> to vector<64x8xbf16>
    %40 = vector.extract_strided_slice %1 {offsets = [0, 144], sizes = [64, 8], strides = [1, 1]} : vector<64x192xbf16> to vector<64x8xbf16>
    %cst_11 = arith.constant dense<0.000000e+00> : vector<64x64xf32>
    %41 = tpu.matmul %38, %39, %cst_11 {dimension_numbers = #tpu.dot_dimension_numbers<[1], [1], [0], [0], [0, 0, 1, 0], [], []>} : vector<64x8xbf16>, vector<64x8xbf16>, vector<64x64xf32> -> vector<64x64xf32>
    %cst_12 = arith.constant 0.353553385 : f32
    %42 = vector.broadcast %cst_12 : f32 to vector<64x64xf32>
    %43 = arith.mulf %41, %42 : vector<64x64xf32>
    %cst_13 = arith.constant dense<0xFF800000> : vector<64xf32>
    %44 = vector.multi_reduction <maximumf>, %43, %cst_13 [1] : vector<64x64xf32> to vector<64xf32>
    %45 = vector.shape_cast %44 : vector<64xf32> to vector<64x1xf32>
    %46 = vector.broadcast %45 : vector<64x1xf32> to vector<64x64xf32>
    %47 = arith.subf %43, %46 : vector<64x64xf32>
    %48 = math.exp %47 : vector<64x64xf32>
    %cst_14 = arith.constant dense<0.000000e+00> : vector<64xf32>
    %49 = vector.multi_reduction <add>, %48, %cst_14 [1] : vector<64x64xf32> to vector<64xf32>
    %50 = vector.shape_cast %49 : vector<64xf32> to vector<64x1xf32>
    %51 = tpu.reciprocal %50 {approx = true} : vector<64x1xf32> -> vector<64x1xf32>
    %52 = vector.broadcast %51 : vector<64x1xf32> to vector<64x64xf32>
    %53 = arith.mulf %48, %52 : vector<64x64xf32>
    %54 = arith.truncf %53 : vector<64x64xf32> to vector<64x64xbf16>
    %cst_15 = arith.constant dense<0.000000e+00> : vector<64x8xf32>
    %55 = tpu.matmul %54, %40, %cst_15 {dimension_numbers = #tpu.dot_dimension_numbers<[1], [0], [0], [1], [0, 0, 1, 1], [], []>} : vector<64x64xbf16>, vector<64x8xbf16>, vector<64x8xf32> -> vector<64x8xf32>
    %56 = vector.extract_strided_slice %1 {offsets = [0, 24], sizes = [64, 8], strides = [1, 1]} : vector<64x192xbf16> to vector<64x8xbf16>
    %57 = vector.extract_strided_slice %1 {offsets = [0, 88], sizes = [64, 8], strides = [1, 1]} : vector<64x192xbf16> to vector<64x8xbf16>
    %58 = vector.extract_strided_slice %1 {offsets = [0, 152], sizes = [64, 8], strides = [1, 1]} : vector<64x192xbf16> to vector<64x8xbf16>
    %cst_16 = arith.constant dense<0.000000e+00> : vector<64x64xf32>
    %59 = tpu.matmul %56, %57, %cst_16 {dimension_numbers = #tpu.dot_dimension_numbers<[1], [1], [0], [0], [0, 0, 1, 0], [], []>} : vector<64x8xbf16>, vector<64x8xbf16>, vector<64x64xf32> -> vector<64x64xf32>
    %cst_17 = arith.constant 0.353553385 : f32
    %60 = vector.broadcast %cst_17 : f32 to vector<64x64xf32>
    %61 = arith.mulf %59, %60 : vector<64x64xf32>
    %cst_18 = arith.constant dense<0xFF800000> : vector<64xf32>
    %62 = vector.multi_reduction <maximumf>, %61, %cst_18 [1] : vector<64x64xf32> to vector<64xf32>
    %63 = vector.shape_cast %62 : vector<64xf32> to vector<64x1xf32>
    %64 = vector.broadcast %63 : vector<64x1xf32> to vector<64x64xf32>
    %65 = arith.subf %61, %64 : vector<64x64xf32>
    %66 = math.exp %65 : vector<64x64xf32>
    %cst_19 = arith.constant dense<0.000000e+00> : vector<64xf32>
    %67 = vector.multi_reduction <add>, %66, %cst_19 [1] : vector<64x64xf32> to vector<64xf32>
    %68 = vector.shape_cast %67 : vector<64xf32> to vector<64x1xf32>
    %69 = tpu.reciprocal %68 {approx = true} : vector<64x1xf32> -> vector<64x1xf32>
    %70 = vector.broadcast %69 : vector<64x1xf32> to vector<64x64xf32>
    %71 = arith.mulf %66, %70 : vector<64x64xf32>
    %72 = arith.truncf %71 : vector<64x64xf32> to vector<64x64xbf16>
    %cst_20 = arith.constant dense<0.000000e+00> : vector<64x8xf32>
    %73 = tpu.matmul %72, %58, %cst_20 {dimension_numbers = #tpu.dot_dimension_numbers<[1], [0], [0], [1], [0, 0, 1, 1], [], []>} : vector<64x64xbf16>, vector<64x8xbf16>, vector<64x8xf32> -> vector<64x8xf32>
    %74 = vector.extract_strided_slice %1 {offsets = [0, 32], sizes = [64, 8], strides = [1, 1]} : vector<64x192xbf16> to vector<64x8xbf16>
    %75 = vector.extract_strided_slice %1 {offsets = [0, 96], sizes = [64, 8], strides = [1, 1]} : vector<64x192xbf16> to vector<64x8xbf16>
    %76 = vector.extract_strided_slice %1 {offsets = [0, 160], sizes = [64, 8], strides = [1, 1]} : vector<64x192xbf16> to vector<64x8xbf16>
    %cst_21 = arith.constant dense<0.000000e+00> : vector<64x64xf32>
    %77 = tpu.matmul %74, %75, %cst_21 {dimension_numbers = #tpu.dot_dimension_numbers<[1], [1], [0], [0], [0, 0, 1, 0], [], []>} : vector<64x8xbf16>, vector<64x8xbf16>, vector<64x64xf32> -> vector<64x64xf32>
    %cst_22 = arith.constant 0.353553385 : f32
    %78 = vector.broadcast %cst_22 : f32 to vector<64x64xf32>
    %79 = arith.mulf %77, %78 : vector<64x64xf32>
    %cst_23 = arith.constant dense<0xFF800000> : vector<64xf32>
    %80 = vector.multi_reduction <maximumf>, %79, %cst_23 [1] : vector<64x64xf32> to vector<64xf32>
    %81 = vector.shape_cast %80 : vector<64xf32> to vector<64x1xf32>
    %82 = vector.broadcast %81 : vector<64x1xf32> to vector<64x64xf32>
    %83 = arith.subf %79, %82 : vector<64x64xf32>
    %84 = math.exp %83 : vector<64x64xf32>
    %cst_24 = arith.constant dense<0.000000e+00> : vector<64xf32>
    %85 = vector.multi_reduction <add>, %84, %cst_24 [1] : vector<64x64xf32> to vector<64xf32>
    %86 = vector.shape_cast %85 : vector<64xf32> to vector<64x1xf32>
    %87 = tpu.reciprocal %86 {approx = true} : vector<64x1xf32> -> vector<64x1xf32>
    %88 = vector.broadcast %87 : vector<64x1xf32> to vector<64x64xf32>
    %89 = arith.mulf %84, %88 : vector<64x64xf32>
    %90 = arith.truncf %89 : vector<64x64xf32> to vector<64x64xbf16>
    %cst_25 = arith.constant dense<0.000000e+00> : vector<64x8xf32>
    %91 = tpu.matmul %90, %76, %cst_25 {dimension_numbers = #tpu.dot_dimension_numbers<[1], [0], [0], [1], [0, 0, 1, 1], [], []>} : vector<64x64xbf16>, vector<64x8xbf16>, vector<64x8xf32> -> vector<64x8xf32>
    %92 = vector.extract_strided_slice %1 {offsets = [0, 40], sizes = [64, 8], strides = [1, 1]} : vector<64x192xbf16> to vector<64x8xbf16>
    %93 = vector.extract_strided_slice %1 {offsets = [0, 104], sizes = [64, 8], strides = [1, 1]} : vector<64x192xbf16> to vector<64x8xbf16>
    %94 = vector.extract_strided_slice %1 {offsets = [0, 168], sizes = [64, 8], strides = [1, 1]} : vector<64x192xbf16> to vector<64x8xbf16>
    %cst_26 = arith.constant dense<0.000000e+00> : vector<64x64xf32>
    %95 = tpu.matmul %92, %93, %cst_26 {dimension_numbers = #tpu.dot_dimension_numbers<[1], [1], [0], [0], [0, 0, 1, 0], [], []>} : vector<64x8xbf16>, vector<64x8xbf16>, vector<64x64xf32> -> vector<64x64xf32>
    %cst_27 = arith.constant 0.353553385 : f32
    %96 = vector.broadcast %cst_27 : f32 to vector<64x64xf32>
    %97 = arith.mulf %95, %96 : vector<64x64xf32>
    %cst_28 = arith.constant dense<0xFF800000> : vector<64xf32>
    %98 = vector.multi_reduction <maximumf>, %97, %cst_28 [1] : vector<64x64xf32> to vector<64xf32>
    %99 = vector.shape_cast %98 : vector<64xf32> to vector<64x1xf32>
    %100 = vector.broadcast %99 : vector<64x1xf32> to vector<64x64xf32>
    %101 = arith.subf %97, %100 : vector<64x64xf32>
    %102 = math.exp %101 : vector<64x64xf32>
    %cst_29 = arith.constant dense<0.000000e+00> : vector<64xf32>
    %103 = vector.multi_reduction <add>, %102, %cst_29 [1] : vector<64x64xf32> to vector<64xf32>
    %104 = vector.shape_cast %103 : vector<64xf32> to vector<64x1xf32>
    %105 = tpu.reciprocal %104 {approx = true} : vector<64x1xf32> -> vector<64x1xf32>
    %106 = vector.broadcast %105 : vector<64x1xf32> to vector<64x64xf32>
    %107 = arith.mulf %102, %106 : vector<64x64xf32>
    %108 = arith.truncf %107 : vector<64x64xf32> to vector<64x64xbf16>
    %cst_30 = arith.constant dense<0.000000e+00> : vector<64x8xf32>
    %109 = tpu.matmul %108, %94, %cst_30 {dimension_numbers = #tpu.dot_dimension_numbers<[1], [0], [0], [1], [0, 0, 1, 1], [], []>} : vector<64x64xbf16>, vector<64x8xbf16>, vector<64x8xf32> -> vector<64x8xf32>
    %110 = vector.extract_strided_slice %1 {offsets = [0, 48], sizes = [64, 8], strides = [1, 1]} : vector<64x192xbf16> to vector<64x8xbf16>
    %111 = vector.extract_strided_slice %1 {offsets = [0, 112], sizes = [64, 8], strides = [1, 1]} : vector<64x192xbf16> to vector<64x8xbf16>
    %112 = vector.extract_strided_slice %1 {offsets = [0, 176], sizes = [64, 8], strides = [1, 1]} : vector<64x192xbf16> to vector<64x8xbf16>
    %cst_31 = arith.constant dense<0.000000e+00> : vector<64x64xf32>
    %113 = tpu.matmul %110, %111, %cst_31 {dimension_numbers = #tpu.dot_dimension_numbers<[1], [1], [0], [0], [0, 0, 1, 0], [], []>} : vector<64x8xbf16>, vector<64x8xbf16>, vector<64x64xf32> -> vector<64x64xf32>
    %cst_32 = arith.constant 0.353553385 : f32
    %114 = vector.broadcast %cst_32 : f32 to vector<64x64xf32>
    %115 = arith.mulf %113, %114 : vector<64x64xf32>
    %cst_33 = arith.constant dense<0xFF800000> : vector<64xf32>
    %116 = vector.multi_reduction <maximumf>, %115, %cst_33 [1] : vector<64x64xf32> to vector<64xf32>
    %117 = vector.shape_cast %116 : vector<64xf32> to vector<64x1xf32>
    %118 = vector.broadcast %117 : vector<64x1xf32> to vector<64x64xf32>
    %119 = arith.subf %115, %118 : vector<64x64xf32>
    %120 = math.exp %119 : vector<64x64xf32>
    %cst_34 = arith.constant dense<0.000000e+00> : vector<64xf32>
    %121 = vector.multi_reduction <add>, %120, %cst_34 [1] : vector<64x64xf32> to vector<64xf32>
    %122 = vector.shape_cast %121 : vector<64xf32> to vector<64x1xf32>
    %123 = tpu.reciprocal %122 {approx = true} : vector<64x1xf32> -> vector<64x1xf32>
    %124 = vector.broadcast %123 : vector<64x1xf32> to vector<64x64xf32>
    %125 = arith.mulf %120, %124 : vector<64x64xf32>
    %126 = arith.truncf %125 : vector<64x64xf32> to vector<64x64xbf16>
    %cst_35 = arith.constant dense<0.000000e+00> : vector<64x8xf32>
    %127 = tpu.matmul %126, %112, %cst_35 {dimension_numbers = #tpu.dot_dimension_numbers<[1], [0], [0], [1], [0, 0, 1, 1], [], []>} : vector<64x64xbf16>, vector<64x8xbf16>, vector<64x8xf32> -> vector<64x8xf32>
    %128 = vector.extract_strided_slice %1 {offsets = [0, 56], sizes = [64, 8], strides = [1, 1]} : vector<64x192xbf16> to vector<64x8xbf16>
    %129 = vector.extract_strided_slice %1 {offsets = [0, 120], sizes = [64, 8], strides = [1, 1]} : vector<64x192xbf16> to vector<64x8xbf16>
    %130 = vector.extract_strided_slice %1 {offsets = [0, 184], sizes = [64, 8], strides = [1, 1]} : vector<64x192xbf16> to vector<64x8xbf16>
    %cst_36 = arith.constant dense<0.000000e+00> : vector<64x64xf32>
    %131 = tpu.matmul %128, %129, %cst_36 {dimension_numbers = #tpu.dot_dimension_numbers<[1], [1], [0], [0], [0, 0, 1, 0], [], []>} : vector<64x8xbf16>, vector<64x8xbf16>, vector<64x64xf32> -> vector<64x64xf32>
    %cst_37 = arith.constant 0.353553385 : f32
    %132 = vector.broadcast %cst_37 : f32 to vector<64x64xf32>
    %133 = arith.mulf %131, %132 : vector<64x64xf32>
    %cst_38 = arith.constant dense<0xFF800000> : vector<64xf32>
    %134 = vector.multi_reduction <maximumf>, %133, %cst_38 [1] : vector<64x64xf32> to vector<64xf32>
    %135 = vector.shape_cast %134 : vector<64xf32> to vector<64x1xf32>
    %136 = vector.broadcast %135 : vector<64x1xf32> to vector<64x64xf32>
    %137 = arith.subf %133, %136 : vector<64x64xf32>
    %138 = math.exp %137 : vector<64x64xf32>
    %cst_39 = arith.constant dense<0.000000e+00> : vector<64xf32>
    %139 = vector.multi_reduction <add>, %138, %cst_39 [1] : vector<64x64xf32> to vector<64xf32>
    %140 = vector.shape_cast %139 : vector<64xf32> to vector<64x1xf32>
    %141 = tpu.reciprocal %140 {approx = true} : vector<64x1xf32> -> vector<64x1xf32>
    %142 = vector.broadcast %141 : vector<64x1xf32> to vector<64x64xf32>
    %143 = arith.mulf %138, %142 : vector<64x64xf32>
    %144 = arith.truncf %143 : vector<64x64xf32> to vector<64x64xbf16>
    %cst_40 = arith.constant dense<0.000000e+00> : vector<64x8xf32>
    %145 = tpu.matmul %144, %130, %cst_40 {dimension_numbers = #tpu.dot_dimension_numbers<[1], [0], [0], [1], [0, 0, 1, 1], [], []>} : vector<64x64xbf16>, vector<64x8xbf16>, vector<64x8xf32> -> vector<64x8xf32>
    %146 = tpu.concatenate %19, %37, %55, %73, %91, %109, %127, %145 in 1 : vector<64x8xf32>, vector<64x8xf32>, vector<64x8xf32>, vector<64x8xf32>, vector<64x8xf32>, vector<64x8xf32>, vector<64x8xf32>, vector<64x8xf32> -> vector<64x64xf32>
    %147 = arith.truncf %146 : vector<64x64xf32> to vector<64x64xbf16>
    %c0_41 = arith.constant 0 : index
    %c0_42 = arith.constant 0 : index
    %148 = vector.load %arg2[%c0_41, %c0_42] : memref<64x64xbf16, #tpu.memory_space<vmem>>, vector<64x64xbf16>
    %cst_43 = arith.constant dense<0.000000e+00> : vector<64x64xf32>
    %149 = tpu.matmul %147, %148, %cst_43 {dimension_numbers = #tpu.dot_dimension_numbers<[1], [0], [0], [1], [0, 0, 1, 1], [], []>} : vector<64x64xbf16>, vector<64x64xbf16>, vector<64x64xf32> -> vector<64x64xf32>
    %c0_44 = arith.constant 0 : index
    %c0_45 = arith.constant 0 : index
    %150 = vector.load %arg3[%c0_44, %c0_45] : memref<1x64xf32, #tpu.memory_space<vmem>>, vector<1x64xf32>
    %151 = vector.broadcast %150 : vector<1x64xf32> to vector<64x64xf32>
    %152 = arith.addf %149, %151 : vector<64x64xf32>
    %c0_46 = arith.constant 0 : index
    %c0_47 = arith.constant 0 : index
    %c0_48 = arith.constant 0 : index
    %153 = vector.load %arg4[%c0_46, %c0_47, %c0_48] : memref<1x64x64xbf16, #tpu.memory_space<vmem>>, vector<1x64x64xbf16>
    %154 = vector.shape_cast %153 : vector<1x64x64xbf16> to vector<64x64xbf16>
    %155 = arith.extf %154 : vector<64x64xbf16> to vector<64x64xf32>
    %156 = arith.addf %152, %155 : vector<64x64xf32>
    %157 = arith.truncf %156 : vector<64x64xf32> to vector<64x64xbf16>
    %c0_49 = arith.constant 0 : index
    %c0_50 = arith.constant 0 : index
    %c0_51 = arith.constant 0 : index
    %158 = vector.load %arg5[%c0_49, %c0_50, %c0_51] : memref<1x64x64xbf16, #tpu.memory_space<vmem>>, vector<1x64x64xbf16>
    %159 = vector.shape_cast %158 : vector<1x64x64xbf16> to vector<64x64xbf16>
    %160 = vector.shape_cast %157 : vector<64x64xbf16> to vector<1x64x64xbf16>
    tpu.vector_store %arg5[%c0_49, %c0_50, %c0_51], %160 {strides = array<i32>} : memref<1x64x64xbf16, #tpu.memory_space<vmem>>, vector<1x64x64xbf16>,
    return
  }
  func.func @transform_0(%arg0: i32) -> (i32, i32, i32) {
    %c0_i32 = arith.constant 0 : i32
    %c0_i32_0 = arith.constant 0 : i32
    %c0_i32_1 = arith.constant 0 : i32
    return %arg0, %c0_i32, %c0_i32_0 : i32, i32, i32
  }
  func.func @transform_1(%arg0: i32) -> (i32, i32) {
    %c0_i32 = arith.constant 0 : i32
    %c0_i32_0 = arith.constant 0 : i32
    %c0_i32_1 = arith.constant 0 : i32
    return %c0_i32, %c0_i32_0 : i32, i32
  }
  func.func @transform_2(%arg0: i32) -> (i32, i32) {
    %c0_i32 = arith.constant 0 : i32
    %c0_i32_0 = arith.constant 0 : i32
    %c0_i32_1 = arith.constant 0 : i32
    return %c0_i32, %c0_i32_0 : i32, i32
  }
  func.func @transform_3(%arg0: i32) -> (i32, i32, i32) {
    %c0_i32 = arith.constant 0 : i32
    %c0_i32_0 = arith.constant 0 : i32
    %c0_i32_1 = arith.constant 0 : i32
    return %arg0, %c0_i32, %c0_i32_0 : i32, i32, i32
  }
  func.func @transform_4(%arg0: i32) -> (i32, i32, i32) {
    %c0_i32 = arith.constant 0 : i32
    %c0_i32_0 = arith.constant 0 : i32
    %c0_i32_1 = arith.constant 0 : i32
    return %arg0, %c0_i32, %c0_i32_0 : i32, i32, i32
  }
}

module attributes {stable_mosaic.version = 11 : i64} {
  func.func @_ln_linear2_kernel(%arg0: i32, %arg1: memref<64x64xbf16, #tpu.memory_space<vmem>>, %arg2: memref<1x64xf32, #tpu.memory_space<vmem>>, %arg3: memref<1x64xf32, #tpu.memory_space<vmem>>, %arg4: memref<64x256xbf16, #tpu.memory_space<vmem>>, %arg5: memref<1x256xf32, #tpu.memory_space<vmem>>, %arg6: memref<64x256xbf16, #tpu.memory_space<vmem>>, %arg7: memref<64x64xbf16, #tpu.memory_space<vmem>>) attributes {dimension_semantics = [#tpu.dimension_semantics<parallel>], iteration_bounds = array<i64: 2>, scalar_prefetch = 0 : i64, scratch_operands = 0 : i64, tpu.core_type = #tpu.core_type<tc>, window_params = [{transform_indices = @transform_0, window_bounds = array<i64: 64, 64>}, {pipeline_mode = #tpu.pipeline_mode<synchronous>, transform_indices = @transform_1, window_bounds = array<i64: 1, 64>}, {pipeline_mode = #tpu.pipeline_mode<synchronous>, transform_indices = @transform_2, window_bounds = array<i64: 1, 64>}, {pipeline_mode = #tpu.pipeline_mode<synchronous>, transform_indices = @transform_3, window_bounds = array<i64: 64, 256>}, {pipeline_mode = #tpu.pipeline_mode<synchronous>, transform_indices = @transform_4, window_bounds = array<i64: 1, 256>}, {transform_indices = @transform_5, window_bounds = array<i64: 64, 256>}, {transform_indices = @transform_6, window_bounds = array<i64: 64, 64>}]} {
    %c0 = arith.constant 0 : index
    %c0_0 = arith.constant 0 : index
    %0 = vector.load %arg1[%c0, %c0_0] : memref<64x64xbf16, #tpu.memory_space<vmem>>, vector<64x64xbf16>
    %1 = arith.extf %0 : vector<64x64xbf16> to vector<64x64xf32>
    %c0_1 = arith.constant 0 : index
    %c0_2 = arith.constant 0 : index
    %2 = vector.load %arg2[%c0_1, %c0_2] : memref<1x64xf32, #tpu.memory_space<vmem>>, vector<1x64xf32>
    %c0_3 = arith.constant 0 : index
    %c0_4 = arith.constant 0 : index
    %3 = vector.load %arg3[%c0_3, %c0_4] : memref<1x64xf32, #tpu.memory_space<vmem>>, vector<1x64xf32>
    %cst = arith.constant dense<0.000000e+00> : vector<64xf32>
    %4 = vector.multi_reduction <add>, %1, %cst [1] : vector<64x64xf32> to vector<64xf32>
    %5 = vector.shape_cast %4 : vector<64xf32> to vector<64x1xf32>
    %cst_5 = arith.constant 6.400000e+01 : f32
    %6 = vector.broadcast %cst_5 : f32 to vector<64x1xf32>
    %7 = arith.divf %5, %6 : vector<64x1xf32>
    %8 = vector.broadcast %7 : vector<64x1xf32> to vector<64x64xf32>
    %9 = arith.subf %1, %8 : vector<64x64xf32>
    %10 = arith.mulf %9, %9 : vector<64x64xf32>
    %cst_6 = arith.constant dense<0.000000e+00> : vector<64xf32>
    %11 = vector.multi_reduction <add>, %10, %cst_6 [1] : vector<64x64xf32> to vector<64xf32>
    %12 = vector.shape_cast %11 : vector<64xf32> to vector<64x1xf32>
    %cst_7 = arith.constant 6.400000e+01 : f32
    %13 = vector.broadcast %cst_7 : f32 to vector<64x1xf32>
    %14 = arith.divf %12, %13 : vector<64x1xf32>
    %cst_8 = arith.constant 9.99999974E-6 : f32
    %15 = vector.broadcast %cst_8 : f32 to vector<64x1xf32>
    %16 = arith.addf %14, %15 : vector<64x1xf32>
    %17 = math.rsqrt %16 : vector<64x1xf32>
    %18 = vector.broadcast %17 : vector<64x1xf32> to vector<64x64xf32>
    %19 = arith.mulf %9, %18 : vector<64x64xf32>
    %20 = vector.broadcast %2 : vector<1x64xf32> to vector<64x64xf32>
    %21 = arith.mulf %19, %20 : vector<64x64xf32>
    %22 = vector.broadcast %3 : vector<1x64xf32> to vector<64x64xf32>
    %23 = arith.addf %21, %22 : vector<64x64xf32>
    %24 = arith.truncf %23 : vector<64x64xf32> to vector<64x64xbf16>
    %c0_9 = arith.constant 0 : index
    %c0_10 = arith.constant 0 : index
    %25 = vector.load %arg4[%c0_9, %c0_10] : memref<64x256xbf16, #tpu.memory_space<vmem>>, vector<64x256xbf16>
    %cst_11 = arith.constant dense<0.000000e+00> : vector<64x256xf32>
    %26 = tpu.matmul %24, %25, %cst_11 {dimension_numbers = #tpu.dot_dimension_numbers<[1], [0], [0], [1], [0, 0, 1, 1], [], []>} : vector<64x64xbf16>, vector<64x256xbf16>, vector<64x256xf32> -> vector<64x256xf32>
    %c0_12 = arith.constant 0 : index
    %c0_13 = arith.constant 0 : index
    %27 = vector.load %arg5[%c0_12, %c0_13] : memref<1x256xf32, #tpu.memory_space<vmem>>, vector<1x256xf32>
    %28 = vector.broadcast %27 : vector<1x256xf32> to vector<64x256xf32>
    %29 = arith.addf %26, %28 : vector<64x256xf32>
    %30 = arith.truncf %29 : vector<64x256xf32> to vector<64x256xbf16>
    %c0_14 = arith.constant 0 : index
    %c0_15 = arith.constant 0 : index
    %31 = vector.load %arg6[%c0_14, %c0_15] : memref<64x256xbf16, #tpu.memory_space<vmem>>, vector<64x256xbf16>
    tpu.vector_store %arg6[%c0_14, %c0_15], %30 {strides = array<i32>} : memref<64x256xbf16, #tpu.memory_space<vmem>>, vector<64x256xbf16>,
    %32 = arith.truncf %23 : vector<64x64xf32> to vector<64x64xbf16>
    %c0_16 = arith.constant 0 : index
    %c0_17 = arith.constant 0 : index
    %33 = vector.load %arg7[%c0_16, %c0_17] : memref<64x64xbf16, #tpu.memory_space<vmem>>, vector<64x64xbf16>
    tpu.vector_store %arg7[%c0_16, %c0_17], %32 {strides = array<i32>} : memref<64x64xbf16, #tpu.memory_space<vmem>>, vector<64x64xbf16>,
    return
  }
  func.func @transform_0(%arg0: i32) -> (i32, i32) {
    %c0_i32 = arith.constant 0 : i32
    %c0_i32_0 = arith.constant 0 : i32
    return %arg0, %c0_i32 : i32, i32
  }
  func.func @transform_1(%arg0: i32) -> (i32, i32) {
    %c0_i32 = arith.constant 0 : i32
    %c0_i32_0 = arith.constant 0 : i32
    %c0_i32_1 = arith.constant 0 : i32
    return %c0_i32, %c0_i32_0 : i32, i32
  }
  func.func @transform_2(%arg0: i32) -> (i32, i32) {
    %c0_i32 = arith.constant 0 : i32
    %c0_i32_0 = arith.constant 0 : i32
    %c0_i32_1 = arith.constant 0 : i32
    return %c0_i32, %c0_i32_0 : i32, i32
  }
  func.func @transform_3(%arg0: i32) -> (i32, i32) {
    %c0_i32 = arith.constant 0 : i32
    %c0_i32_0 = arith.constant 0 : i32
    %c0_i32_1 = arith.constant 0 : i32
    return %c0_i32, %c0_i32_0 : i32, i32
  }
  func.func @transform_4(%arg0: i32) -> (i32, i32) {
    %c0_i32 = arith.constant 0 : i32
    %c0_i32_0 = arith.constant 0 : i32
    %c0_i32_1 = arith.constant 0 : i32
    return %c0_i32, %c0_i32_0 : i32, i32
  }
  func.func @transform_5(%arg0: i32) -> (i32, i32) {
    %c0_i32 = arith.constant 0 : i32
    %c0_i32_0 = arith.constant 0 : i32
    return %arg0, %c0_i32 : i32, i32
  }
  func.func @transform_6(%arg0: i32) -> (i32, i32) {
    %c0_i32 = arith.constant 0 : i32
    %c0_i32_0 = arith.constant 0 : i32
    return %arg0, %c0_i32 : i32, i32
  }
}

module attributes {stable_mosaic.version = 11 : i64} {
  func.func @_linear_residual_kernel(%arg0: i32, %arg1: memref<64x256xbf16, #tpu.memory_space<vmem>>, %arg2: memref<256x64xbf16, #tpu.memory_space<vmem>>, %arg3: memref<1x64xf32, #tpu.memory_space<vmem>>, %arg4: memref<64x64xbf16, #tpu.memory_space<vmem>>, %arg5: memref<64x64xbf16, #tpu.memory_space<vmem>>) attributes {dimension_semantics = [#tpu.dimension_semantics<parallel>], iteration_bounds = array<i64: 2>, scalar_prefetch = 0 : i64, scratch_operands = 0 : i64, tpu.core_type = #tpu.core_type<tc>, window_params = [{transform_indices = @transform_0, window_bounds = array<i64: 64, 256>}, {pipeline_mode = #tpu.pipeline_mode<synchronous>, transform_indices = @transform_1, window_bounds = array<i64: 256, 64>}, {pipeline_mode = #tpu.pipeline_mode<synchronous>, transform_indices = @transform_2, window_bounds = array<i64: 1, 64>}, {transform_indices = @transform_3, window_bounds = array<i64: 64, 64>}, {transform_indices = @transform_4, window_bounds = array<i64: 64, 64>}]} {
    %c0 = arith.constant 0 : index
    %c0_0 = arith.constant 0 : index
    %0 = vector.load %arg1[%c0, %c0_0] : memref<64x256xbf16, #tpu.memory_space<vmem>>, vector<64x256xbf16>
    %c0_1 = arith.constant 0 : index
    %c0_2 = arith.constant 0 : index
    %1 = vector.load %arg2[%c0_1, %c0_2] : memref<256x64xbf16, #tpu.memory_space<vmem>>, vector<256x64xbf16>
    %cst = arith.constant dense<0.000000e+00> : vector<64x64xf32>
    %2 = tpu.matmul %0, %1, %cst {dimension_numbers = #tpu.dot_dimension_numbers<[1], [0], [0], [1], [0, 0, 1, 1], [], []>} : vector<64x256xbf16>, vector<256x64xbf16>, vector<64x64xf32> -> vector<64x64xf32>
    %c0_3 = arith.constant 0 : index
    %c0_4 = arith.constant 0 : index
    %3 = vector.load %arg3[%c0_3, %c0_4] : memref<1x64xf32, #tpu.memory_space<vmem>>, vector<1x64xf32>
    %4 = vector.broadcast %3 : vector<1x64xf32> to vector<64x64xf32>
    %5 = arith.addf %2, %4 : vector<64x64xf32>
    %c0_5 = arith.constant 0 : index
    %c0_6 = arith.constant 0 : index
    %6 = vector.load %arg4[%c0_5, %c0_6] : memref<64x64xbf16, #tpu.memory_space<vmem>>, vector<64x64xbf16>
    %7 = arith.extf %6 : vector<64x64xbf16> to vector<64x64xf32>
    %8 = arith.addf %5, %7 : vector<64x64xf32>
    %9 = arith.truncf %8 : vector<64x64xf32> to vector<64x64xbf16>
    %c0_7 = arith.constant 0 : index
    %c0_8 = arith.constant 0 : index
    %10 = vector.load %arg5[%c0_7, %c0_8] : memref<64x64xbf16, #tpu.memory_space<vmem>>, vector<64x64xbf16>
    tpu.vector_store %arg5[%c0_7, %c0_8], %9 {strides = array<i32>} : memref<64x64xbf16, #tpu.memory_space<vmem>>, vector<64x64xbf16>,
    return
  }
  func.func @transform_0(%arg0: i32) -> (i32, i32) {
    %c0_i32 = arith.constant 0 : i32
    %c0_i32_0 = arith.constant 0 : i32
    return %arg0, %c0_i32 : i32, i32
  }
  func.func @transform_1(%arg0: i32) -> (i32, i32) {
    %c0_i32 = arith.constant 0 : i32
    %c0_i32_0 = arith.constant 0 : i32
    %c0_i32_1 = arith.constant 0 : i32
    return %c0_i32, %c0_i32_0 : i32, i32
  }
  func.func @transform_2(%arg0: i32) -> (i32, i32) {
    %c0_i32 = arith.constant 0 : i32
    %c0_i32_0 = arith.constant 0 : i32
    %c0_i32_1 = arith.constant 0 : i32
    return %c0_i32, %c0_i32_0 : i32, i32
  }
  func.func @transform_3(%arg0: i32) -> (i32, i32) {
    %c0_i32 = arith.constant 0 : i32
    %c0_i32_0 = arith.constant 0 : i32
    return %arg0, %c0_i32 : i32, i32
  }
  func.func @transform_4(%arg0: i32) -> (i32, i32) {
    %c0_i32 = arith.constant 0 : i32
    %c0_i32_0 = arith.constant 0 : i32
    return %arg0, %c0_i32 : i32, i32
  }
}

module attributes {stable_mosaic.version = 11 : i64} {
  func.func @_ln_kernel(%arg0: i32, %arg1: memref<64x64xbf16, #tpu.memory_space<vmem>>, %arg2: memref<1x64xf32, #tpu.memory_space<vmem>>, %arg3: memref<1x64xf32, #tpu.memory_space<vmem>>, %arg4: memref<64x64xbf16, #tpu.memory_space<vmem>>) attributes {dimension_semantics = [#tpu.dimension_semantics<parallel>], iteration_bounds = array<i64: 2>, scalar_prefetch = 0 : i64, scratch_operands = 0 : i64, tpu.core_type = #tpu.core_type<tc>, window_params = [{transform_indices = @transform_0, window_bounds = array<i64: 64, 64>}, {pipeline_mode = #tpu.pipeline_mode<synchronous>, transform_indices = @transform_1, window_bounds = array<i64: 1, 64>}, {pipeline_mode = #tpu.pipeline_mode<synchronous>, transform_indices = @transform_2, window_bounds = array<i64: 1, 64>}, {transform_indices = @transform_3, window_bounds = array<i64: 64, 64>}]} {
    %c0 = arith.constant 0 : index
    %c0_0 = arith.constant 0 : index
    %0 = vector.load %arg1[%c0, %c0_0] : memref<64x64xbf16, #tpu.memory_space<vmem>>, vector<64x64xbf16>
    %1 = arith.extf %0 : vector<64x64xbf16> to vector<64x64xf32>
    %c0_1 = arith.constant 0 : index
    %c0_2 = arith.constant 0 : index
    %2 = vector.load %arg2[%c0_1, %c0_2] : memref<1x64xf32, #tpu.memory_space<vmem>>, vector<1x64xf32>
    %c0_3 = arith.constant 0 : index
    %c0_4 = arith.constant 0 : index
    %3 = vector.load %arg3[%c0_3, %c0_4] : memref<1x64xf32, #tpu.memory_space<vmem>>, vector<1x64xf32>
    %cst = arith.constant dense<0.000000e+00> : vector<64xf32>
    %4 = vector.multi_reduction <add>, %1, %cst [1] : vector<64x64xf32> to vector<64xf32>
    %5 = vector.shape_cast %4 : vector<64xf32> to vector<64x1xf32>
    %cst_5 = arith.constant 6.400000e+01 : f32
    %6 = vector.broadcast %cst_5 : f32 to vector<64x1xf32>
    %7 = arith.divf %5, %6 : vector<64x1xf32>
    %8 = vector.broadcast %7 : vector<64x1xf32> to vector<64x64xf32>
    %9 = arith.subf %1, %8 : vector<64x64xf32>
    %10 = arith.mulf %9, %9 : vector<64x64xf32>
    %cst_6 = arith.constant dense<0.000000e+00> : vector<64xf32>
    %11 = vector.multi_reduction <add>, %10, %cst_6 [1] : vector<64x64xf32> to vector<64xf32>
    %12 = vector.shape_cast %11 : vector<64xf32> to vector<64x1xf32>
    %cst_7 = arith.constant 6.400000e+01 : f32
    %13 = vector.broadcast %cst_7 : f32 to vector<64x1xf32>
    %14 = arith.divf %12, %13 : vector<64x1xf32>
    %cst_8 = arith.constant 9.99999974E-6 : f32
    %15 = vector.broadcast %cst_8 : f32 to vector<64x1xf32>
    %16 = arith.addf %14, %15 : vector<64x1xf32>
    %17 = math.rsqrt %16 : vector<64x1xf32>
    %18 = vector.broadcast %17 : vector<64x1xf32> to vector<64x64xf32>
    %19 = arith.mulf %9, %18 : vector<64x64xf32>
    %20 = vector.broadcast %2 : vector<1x64xf32> to vector<64x64xf32>
    %21 = arith.mulf %19, %20 : vector<64x64xf32>
    %22 = vector.broadcast %3 : vector<1x64xf32> to vector<64x64xf32>
    %23 = arith.addf %21, %22 : vector<64x64xf32>
    %24 = arith.truncf %23 : vector<64x64xf32> to vector<64x64xbf16>
    %c0_9 = arith.constant 0 : index
    %c0_10 = arith.constant 0 : index
    %25 = vector.load %arg4[%c0_9, %c0_10] : memref<64x64xbf16, #tpu.memory_space<vmem>>, vector<64x64xbf16>
    tpu.vector_store %arg4[%c0_9, %c0_10], %24 {strides = array<i32>} : memref<64x64xbf16, #tpu.memory_space<vmem>>, vector<64x64xbf16>,
    return
  }
  func.func @transform_0(%arg0: i32) -> (i32, i32) {
    %c0_i32 = arith.constant 0 : i32
    %c0_i32_0 = arith.constant 0 : i32
    return %arg0, %c0_i32 : i32, i32
  }
  func.func @transform_1(%arg0: i32) -> (i32, i32) {
    %c0_i32 = arith.constant 0 : i32
    %c0_i32_0 = arith.constant 0 : i32
    %c0_i32_1 = arith.constant 0 : i32
    return %c0_i32, %c0_i32_0 : i32, i32
  }
  func.func @transform_2(%arg0: i32) -> (i32, i32) {
    %c0_i32 = arith.constant 0 : i32
    %c0_i32_0 = arith.constant 0 : i32
    %c0_i32_1 = arith.constant 0 : i32
    return %c0_i32, %c0_i32_0 : i32, i32
  }
  func.func @transform_3(%arg0: i32) -> (i32, i32) {
    %c0_i32 = arith.constant 0 : i32
    %c0_i32_0 = arith.constant 0 : i32
    return %arg0, %c0_i32 : i32, i32
  }
}

module attributes {stable_mosaic.version = 11 : i64} {
  func.func @_conv_kernel(%arg0: i32, %arg1: memref<1x1x64x342xbf16, #tpu.memory_space<vmem>>, %arg2: memref<9x16x64xbf16, #tpu.memory_space<vmem>>, %arg3: memref<16x1xf32, #tpu.memory_space<vmem>>, %arg4: memref<1x16x288xbf16, #tpu.memory_space<vmem>>) attributes {dimension_semantics = [#tpu.dimension_semantics<parallel>], iteration_bounds = array<i64: 2>, scalar_prefetch = 0 : i64, scratch_operands = 0 : i64, tpu.core_type = #tpu.core_type<tc>, window_params = [{transform_indices = @transform_0, window_bounds = array<i64: 1, 1, 64, 342>}, {pipeline_mode = #tpu.pipeline_mode<synchronous>, transform_indices = @transform_1, window_bounds = array<i64: 9, 16, 64>}, {pipeline_mode = #tpu.pipeline_mode<synchronous>, transform_indices = @transform_2, window_bounds = array<i64: 16, 1>}, {transform_indices = @transform_3, window_bounds = array<i64: 1, 16, 288>}]} {
    %c0 = arith.constant 0 : index
    %c0_0 = arith.constant 0 : index
    %c0_1 = arith.constant 0 : index
    %c0_2 = arith.constant 0 : index
    %0 = vector.load %arg1[%c0, %c0_0, %c0_1, %c0_2] : memref<1x1x64x342xbf16, #tpu.memory_space<vmem>>, vector<1x1x64x342xbf16>
    %1 = vector.shape_cast %0 : vector<1x1x64x342xbf16> to vector<64x342xbf16>
    %2 = vector.extract_strided_slice %1 {offsets = [0, 0], sizes = [64, 288], strides = [1, 1]} : vector<64x342xbf16> to vector<64x288xbf16>
    %c0_3 = arith.constant 0 : index
    %c0_4 = arith.constant 0 : index
    %c0_5 = arith.constant 0 : index
    %3 = vector.load %arg2[%c0_3, %c0_4, %c0_5] : memref<9x16x64xbf16, #tpu.memory_space<vmem>>, vector<1x16x64xbf16>
    %4 = vector.shape_cast %3 : vector<1x16x64xbf16> to vector<16x64xbf16>
    %cst = arith.constant dense<0.000000e+00> : vector<16x288xf32>
    %5 = tpu.matmul %4, %2, %cst {dimension_numbers = #tpu.dot_dimension_numbers<[1], [0], [0], [1], [0, 0, 1, 1], [], []>} : vector<16x64xbf16>, vector<64x288xbf16>, vector<16x288xf32> -> vector<16x288xf32>
    %6 = vector.extract_strided_slice %1 {offsets = [0, 1], sizes = [64, 288], strides = [1, 1]} : vector<64x342xbf16> to vector<64x288xbf16>
    %c1 = arith.constant 1 : index
    %c0_6 = arith.constant 0 : index
    %c0_7 = arith.constant 0 : index
    %7 = vector.load %arg2[%c1, %c0_6, %c0_7] : memref<9x16x64xbf16, #tpu.memory_space<vmem>>, vector<1x16x64xbf16>
    %8 = vector.shape_cast %7 : vector<1x16x64xbf16> to vector<16x64xbf16>
    %cst_8 = arith.constant dense<0.000000e+00> : vector<16x288xf32>
    %9 = tpu.matmul %8, %6, %cst_8 {dimension_numbers = #tpu.dot_dimension_numbers<[1], [0], [0], [1], [0, 0, 1, 1], [], []>} : vector<16x64xbf16>, vector<64x288xbf16>, vector<16x288xf32> -> vector<16x288xf32>
    %10 = arith.addf %5, %9 : vector<16x288xf32>
    %11 = vector.extract_strided_slice %1 {offsets = [0, 2], sizes = [64, 288], strides = [1, 1]} : vector<64x342xbf16> to vector<64x288xbf16>
    %c2 = arith.constant 2 : index
    %c0_9 = arith.constant 0 : index
    %c0_10 = arith.constant 0 : index
    %12 = vector.load %arg2[%c2, %c0_9, %c0_10] : memref<9x16x64xbf16, #tpu.memory_space<vmem>>, vector<1x16x64xbf16>
    %13 = vector.shape_cast %12 : vector<1x16x64xbf16> to vector<16x64xbf16>
    %cst_11 = arith.constant dense<0.000000e+00> : vector<16x288xf32>
    %14 = tpu.matmul %13, %11, %cst_11 {dimension_numbers = #tpu.dot_dimension_numbers<[1], [0], [0], [1], [0, 0, 1, 1], [], []>} : vector<16x64xbf16>, vector<64x288xbf16>, vector<16x288xf32> -> vector<16x288xf32>
    %15 = arith.addf %10, %14 : vector<16x288xf32>
    %16 = vector.extract_strided_slice %1 {offsets = [0, 18], sizes = [64, 288], strides = [1, 1]} : vector<64x342xbf16> to vector<64x288xbf16>
    %c3 = arith.constant 3 : index
    %c0_12 = arith.constant 0 : index
    %c0_13 = arith.constant 0 : index
    %17 = vector.load %arg2[%c3, %c0_12, %c0_13] : memref<9x16x64xbf16, #tpu.memory_space<vmem>>, vector<1x16x64xbf16>
    %18 = vector.shape_cast %17 : vector<1x16x64xbf16> to vector<16x64xbf16>
    %cst_14 = arith.constant dense<0.000000e+00> : vector<16x288xf32>
    %19 = tpu.matmul %18, %16, %cst_14 {dimension_numbers = #tpu.dot_dimension_numbers<[1], [0], [0], [1], [0, 0, 1, 1], [], []>} : vector<16x64xbf16>, vector<64x288xbf16>, vector<16x288xf32> -> vector<16x288xf32>
    %20 = arith.addf %15, %19 : vector<16x288xf32>
    %21 = vector.extract_strided_slice %1 {offsets = [0, 19], sizes = [64, 288], strides = [1, 1]} : vector<64x342xbf16> to vector<64x288xbf16>
    %c4 = arith.constant 4 : index
    %c0_15 = arith.constant 0 : index
    %c0_16 = arith.constant 0 : index
    %22 = vector.load %arg2[%c4, %c0_15, %c0_16] : memref<9x16x64xbf16, #tpu.memory_space<vmem>>, vector<1x16x64xbf16>
    %23 = vector.shape_cast %22 : vector<1x16x64xbf16> to vector<16x64xbf16>
    %cst_17 = arith.constant dense<0.000000e+00> : vector<16x288xf32>
    %24 = tpu.matmul %23, %21, %cst_17 {dimension_numbers = #tpu.dot_dimension_numbers<[1], [0], [0], [1], [0, 0, 1, 1], [], []>} : vector<16x64xbf16>, vector<64x288xbf16>, vector<16x288xf32> -> vector<16x288xf32>
    %25 = arith.addf %20, %24 : vector<16x288xf32>
    %26 = vector.extract_strided_slice %1 {offsets = [0, 20], sizes = [64, 288], strides = [1, 1]} : vector<64x342xbf16> to vector<64x288xbf16>
    %c5 = arith.constant 5 : index
    %c0_18 = arith.constant 0 : index
    %c0_19 = arith.constant 0 : index
    %27 = vector.load %arg2[%c5, %c0_18, %c0_19] : memref<9x16x64xbf16, #tpu.memory_space<vmem>>, vector<1x16x64xbf16>
    %28 = vector.shape_cast %27 : vector<1x16x64xbf16> to vector<16x64xbf16>
    %cst_20 = arith.constant dense<0.000000e+00> : vector<16x288xf32>
    %29 = tpu.matmul %28, %26, %cst_20 {dimension_numbers = #tpu.dot_dimension_numbers<[1], [0], [0], [1], [0, 0, 1, 1], [], []>} : vector<16x64xbf16>, vector<64x288xbf16>, vector<16x288xf32> -> vector<16x288xf32>
    %30 = arith.addf %25, %29 : vector<16x288xf32>
    %31 = vector.extract_strided_slice %1 {offsets = [0, 36], sizes = [64, 288], strides = [1, 1]} : vector<64x342xbf16> to vector<64x288xbf16>
    %c6 = arith.constant 6 : index
    %c0_21 = arith.constant 0 : index
    %c0_22 = arith.constant 0 : index
    %32 = vector.load %arg2[%c6, %c0_21, %c0_22] : memref<9x16x64xbf16, #tpu.memory_space<vmem>>, vector<1x16x64xbf16>
    %33 = vector.shape_cast %32 : vector<1x16x64xbf16> to vector<16x64xbf16>
    %cst_23 = arith.constant dense<0.000000e+00> : vector<16x288xf32>
    %34 = tpu.matmul %33, %31, %cst_23 {dimension_numbers = #tpu.dot_dimension_numbers<[1], [0], [0], [1], [0, 0, 1, 1], [], []>} : vector<16x64xbf16>, vector<64x288xbf16>, vector<16x288xf32> -> vector<16x288xf32>
    %35 = arith.addf %30, %34 : vector<16x288xf32>
    %36 = vector.extract_strided_slice %1 {offsets = [0, 37], sizes = [64, 288], strides = [1, 1]} : vector<64x342xbf16> to vector<64x288xbf16>
    %c7 = arith.constant 7 : index
    %c0_24 = arith.constant 0 : index
    %c0_25 = arith.constant 0 : index
    %37 = vector.load %arg2[%c7, %c0_24, %c0_25] : memref<9x16x64xbf16, #tpu.memory_space<vmem>>, vector<1x16x64xbf16>
    %38 = vector.shape_cast %37 : vector<1x16x64xbf16> to vector<16x64xbf16>
    %cst_26 = arith.constant dense<0.000000e+00> : vector<16x288xf32>
    %39 = tpu.matmul %38, %36, %cst_26 {dimension_numbers = #tpu.dot_dimension_numbers<[1], [0], [0], [1], [0, 0, 1, 1], [], []>} : vector<16x64xbf16>, vector<64x288xbf16>, vector<16x288xf32> -> vector<16x288xf32>
    %40 = arith.addf %35, %39 : vector<16x288xf32>
    %41 = vector.extract_strided_slice %1 {offsets = [0, 38], sizes = [64, 288], strides = [1, 1]} : vector<64x342xbf16> to vector<64x288xbf16>
    %c8 = arith.constant 8 : index
    %c0_27 = arith.constant 0 : index
    %c0_28 = arith.constant 0 : index
    %42 = vector.load %arg2[%c8, %c0_27, %c0_28] : memref<9x16x64xbf16, #tpu.memory_space<vmem>>, vector<1x16x64xbf16>
    %43 = vector.shape_cast %42 : vector<1x16x64xbf16> to vector<16x64xbf16>
    %cst_29 = arith.constant dense<0.000000e+00> : vector<16x288xf32>
    %44 = tpu.matmul %43, %41, %cst_29 {dimension_numbers = #tpu.dot_dimension_numbers<[1], [0], [0], [1], [0, 0, 1, 1], [], []>} : vector<16x64xbf16>, vector<64x288xbf16>, vector<16x288xf32> -> vector<16x288xf32>
    %45 = arith.addf %40, %44 : vector<16x288xf32>
    %c0_30 = arith.constant 0 : index
    %c0_31 = arith.constant 0 : index
    %46 = vector.load %arg3[%c0_30, %c0_31] : memref<16x1xf32, #tpu.memory_space<vmem>>, vector<16x1xf32>
    %47 = vector.broadcast %46 : vector<16x1xf32> to vector<16x288xf32>
    %48 = arith.addf %45, %47 : vector<16x288xf32>
    %cst_32 = arith.constant 0.000000e+00 : f32
    %49 = vector.broadcast %cst_32 : f32 to vector<16x288xf32>
    %50 = arith.maximumf %48, %49 : vector<16x288xf32>
    %51 = arith.truncf %50 : vector<16x288xf32> to vector<16x288xbf16>
    %c0_33 = arith.constant 0 : index
    %c0_34 = arith.constant 0 : index
    %c0_35 = arith.constant 0 : index
    %52 = vector.load %arg4[%c0_33, %c0_34, %c0_35] : memref<1x16x288xbf16, #tpu.memory_space<vmem>>, vector<1x16x288xbf16>
    %53 = vector.shape_cast %52 : vector<1x16x288xbf16> to vector<16x288xbf16>
    %54 = vector.shape_cast %51 : vector<16x288xbf16> to vector<1x16x288xbf16>
    tpu.vector_store %arg4[%c0_33, %c0_34, %c0_35], %54 {strides = array<i32>} : memref<1x16x288xbf16, #tpu.memory_space<vmem>>, vector<1x16x288xbf16>,
    return
  }
  func.func @transform_0(%arg0: i32) -> (i32, i32, i32, i32) {
    %c0_i32 = arith.constant 0 : i32
    %c0_i32_0 = arith.constant 0 : i32
    %c0_i32_1 = arith.constant 0 : i32
    %c0_i32_2 = arith.constant 0 : i32
    return %arg0, %c0_i32, %c0_i32_0, %c0_i32_1 : i32, i32, i32, i32
  }
  func.func @transform_1(%arg0: i32) -> (i32, i32, i32) {
    %c0_i32 = arith.constant 0 : i32
    %c0_i32_0 = arith.constant 0 : i32
    %c0_i32_1 = arith.constant 0 : i32
    %c0_i32_2 = arith.constant 0 : i32
    return %c0_i32, %c0_i32_0, %c0_i32_1 : i32, i32, i32
  }
  func.func @transform_2(%arg0: i32) -> (i32, i32) {
    %c0_i32 = arith.constant 0 : i32
    %c0_i32_0 = arith.constant 0 : i32
    %c0_i32_1 = arith.constant 0 : i32
    return %c0_i32, %c0_i32_0 : i32, i32
  }
  func.func @transform_3(%arg0: i32) -> (i32, i32, i32) {
    %c0_i32 = arith.constant 0 : i32
    %c0_i32_0 = arith.constant 0 : i32
    %c0_i32_1 = arith.constant 0 : i32
    return %arg0, %c0_i32, %c0_i32_0 : i32, i32, i32
  }
}

module attributes {stable_mosaic.version = 11 : i64} {
  func.func @_conv_kernel(%arg0: i32, %arg1: memref<1x1x16x1190xbf16, #tpu.memory_space<vmem>>, %arg2: memref<9x4x16xbf16, #tpu.memory_space<vmem>>, %arg3: memref<4x1xf32, #tpu.memory_space<vmem>>, %arg4: memref<1x4x1088xbf16, #tpu.memory_space<vmem>>) attributes {dimension_semantics = [#tpu.dimension_semantics<parallel>], iteration_bounds = array<i64: 2>, scalar_prefetch = 0 : i64, scratch_operands = 0 : i64, tpu.core_type = #tpu.core_type<tc>, window_params = [{transform_indices = @transform_0, window_bounds = array<i64: 1, 1, 16, 1190>}, {pipeline_mode = #tpu.pipeline_mode<synchronous>, transform_indices = @transform_1, window_bounds = array<i64: 9, 4, 16>}, {pipeline_mode = #tpu.pipeline_mode<synchronous>, transform_indices = @transform_2, window_bounds = array<i64: 4, 1>}, {transform_indices = @transform_3, window_bounds = array<i64: 1, 4, 1088>}]} {
    %c0 = arith.constant 0 : index
    %c0_0 = arith.constant 0 : index
    %c0_1 = arith.constant 0 : index
    %c0_2 = arith.constant 0 : index
    %0 = vector.load %arg1[%c0, %c0_0, %c0_1, %c0_2] : memref<1x1x16x1190xbf16, #tpu.memory_space<vmem>>, vector<1x1x16x1190xbf16>
    %1 = vector.shape_cast %0 : vector<1x1x16x1190xbf16> to vector<16x1190xbf16>
    %2 = vector.extract_strided_slice %1 {offsets = [0, 0], sizes = [16, 1088], strides = [1, 1]} : vector<16x1190xbf16> to vector<16x1088xbf16>
    %c0_3 = arith.constant 0 : index
    %c0_4 = arith.constant 0 : index
    %c0_5 = arith.constant 0 : index
    %3 = vector.load %arg2[%c0_3, %c0_4, %c0_5] : memref<9x4x16xbf16, #tpu.memory_space<vmem>>, vector<1x4x16xbf16>
    %4 = vector.shape_cast %3 : vector<1x4x16xbf16> to vector<4x16xbf16>
    %cst = arith.constant dense<0.000000e+00> : vector<4x1088xf32>
    %5 = tpu.matmul %4, %2, %cst {dimension_numbers = #tpu.dot_dimension_numbers<[1], [0], [0], [1], [0, 0, 1, 1], [], []>} : vector<4x16xbf16>, vector<16x1088xbf16>, vector<4x1088xf32> -> vector<4x1088xf32>
    %6 = vector.extract_strided_slice %1 {offsets = [0, 1], sizes = [16, 1088], strides = [1, 1]} : vector<16x1190xbf16> to vector<16x1088xbf16>
    %c1 = arith.constant 1 : index
    %c0_6 = arith.constant 0 : index
    %c0_7 = arith.constant 0 : index
    %7 = vector.load %arg2[%c1, %c0_6, %c0_7] : memref<9x4x16xbf16, #tpu.memory_space<vmem>>, vector<1x4x16xbf16>
    %8 = vector.shape_cast %7 : vector<1x4x16xbf16> to vector<4x16xbf16>
    %cst_8 = arith.constant dense<0.000000e+00> : vector<4x1088xf32>
    %9 = tpu.matmul %8, %6, %cst_8 {dimension_numbers = #tpu.dot_dimension_numbers<[1], [0], [0], [1], [0, 0, 1, 1], [], []>} : vector<4x16xbf16>, vector<16x1088xbf16>, vector<4x1088xf32> -> vector<4x1088xf32>
    %10 = arith.addf %5, %9 : vector<4x1088xf32>
    %11 = vector.extract_strided_slice %1 {offsets = [0, 2], sizes = [16, 1088], strides = [1, 1]} : vector<16x1190xbf16> to vector<16x1088xbf16>
    %c2 = arith.constant 2 : index
    %c0_9 = arith.constant 0 : index
    %c0_10 = arith.constant 0 : index
    %12 = vector.load %arg2[%c2, %c0_9, %c0_10] : memref<9x4x16xbf16, #tpu.memory_space<vmem>>, vector<1x4x16xbf16>
    %13 = vector.shape_cast %12 : vector<1x4x16xbf16> to vector<4x16xbf16>
    %cst_11 = arith.constant dense<0.000000e+00> : vector<4x1088xf32>
    %14 = tpu.matmul %13, %11, %cst_11 {dimension_numbers = #tpu.dot_dimension_numbers<[1], [0], [0], [1], [0, 0, 1, 1], [], []>} : vector<4x16xbf16>, vector<16x1088xbf16>, vector<4x1088xf32> -> vector<4x1088xf32>
    %15 = arith.addf %10, %14 : vector<4x1088xf32>
    %16 = vector.extract_strided_slice %1 {offsets = [0, 34], sizes = [16, 1088], strides = [1, 1]} : vector<16x1190xbf16> to vector<16x1088xbf16>
    %c3 = arith.constant 3 : index
    %c0_12 = arith.constant 0 : index
    %c0_13 = arith.constant 0 : index
    %17 = vector.load %arg2[%c3, %c0_12, %c0_13] : memref<9x4x16xbf16, #tpu.memory_space<vmem>>, vector<1x4x16xbf16>
    %18 = vector.shape_cast %17 : vector<1x4x16xbf16> to vector<4x16xbf16>
    %cst_14 = arith.constant dense<0.000000e+00> : vector<4x1088xf32>
    %19 = tpu.matmul %18, %16, %cst_14 {dimension_numbers = #tpu.dot_dimension_numbers<[1], [0], [0], [1], [0, 0, 1, 1], [], []>} : vector<4x16xbf16>, vector<16x1088xbf16>, vector<4x1088xf32> -> vector<4x1088xf32>
    %20 = arith.addf %15, %19 : vector<4x1088xf32>
    %21 = vector.extract_strided_slice %1 {offsets = [0, 35], sizes = [16, 1088], strides = [1, 1]} : vector<16x1190xbf16> to vector<16x1088xbf16>
    %c4 = arith.constant 4 : index
    %c0_15 = arith.constant 0 : index
    %c0_16 = arith.constant 0 : index
    %22 = vector.load %arg2[%c4, %c0_15, %c0_16] : memref<9x4x16xbf16, #tpu.memory_space<vmem>>, vector<1x4x16xbf16>
    %23 = vector.shape_cast %22 : vector<1x4x16xbf16> to vector<4x16xbf16>
    %cst_17 = arith.constant dense<0.000000e+00> : vector<4x1088xf32>
    %24 = tpu.matmul %23, %21, %cst_17 {dimension_numbers = #tpu.dot_dimension_numbers<[1], [0], [0], [1], [0, 0, 1, 1], [], []>} : vector<4x16xbf16>, vector<16x1088xbf16>, vector<4x1088xf32> -> vector<4x1088xf32>
    %25 = arith.addf %20, %24 : vector<4x1088xf32>
    %26 = vector.extract_strided_slice %1 {offsets = [0, 36], sizes = [16, 1088], strides = [1, 1]} : vector<16x1190xbf16> to vector<16x1088xbf16>
    %c5 = arith.constant 5 : index
    %c0_18 = arith.constant 0 : index
    %c0_19 = arith.constant 0 : index
    %27 = vector.load %arg2[%c5, %c0_18, %c0_19] : memref<9x4x16xbf16, #tpu.memory_space<vmem>>, vector<1x4x16xbf16>
    %28 = vector.shape_cast %27 : vector<1x4x16xbf16> to vector<4x16xbf16>
    %cst_20 = arith.constant dense<0.000000e+00> : vector<4x1088xf32>
    %29 = tpu.matmul %28, %26, %cst_20 {dimension_numbers = #tpu.dot_dimension_numbers<[1], [0], [0], [1], [0, 0, 1, 1], [], []>} : vector<4x16xbf16>, vector<16x1088xbf16>, vector<4x1088xf32> -> vector<4x1088xf32>
    %30 = arith.addf %25, %29 : vector<4x1088xf32>
    %31 = vector.extract_strided_slice %1 {offsets = [0, 68], sizes = [16, 1088], strides = [1, 1]} : vector<16x1190xbf16> to vector<16x1088xbf16>
    %c6 = arith.constant 6 : index
    %c0_21 = arith.constant 0 : index
    %c0_22 = arith.constant 0 : index
    %32 = vector.load %arg2[%c6, %c0_21, %c0_22] : memref<9x4x16xbf16, #tpu.memory_space<vmem>>, vector<1x4x16xbf16>
    %33 = vector.shape_cast %32 : vector<1x4x16xbf16> to vector<4x16xbf16>
    %cst_23 = arith.constant dense<0.000000e+00> : vector<4x1088xf32>
    %34 = tpu.matmul %33, %31, %cst_23 {dimension_numbers = #tpu.dot_dimension_numbers<[1], [0], [0], [1], [0, 0, 1, 1], [], []>} : vector<4x16xbf16>, vector<16x1088xbf16>, vector<4x1088xf32> -> vector<4x1088xf32>
    %35 = arith.addf %30, %34 : vector<4x1088xf32>
    %36 = vector.extract_strided_slice %1 {offsets = [0, 69], sizes = [16, 1088], strides = [1, 1]} : vector<16x1190xbf16> to vector<16x1088xbf16>
    %c7 = arith.constant 7 : index
    %c0_24 = arith.constant 0 : index
    %c0_25 = arith.constant 0 : index
    %37 = vector.load %arg2[%c7, %c0_24, %c0_25] : memref<9x4x16xbf16, #tpu.memory_space<vmem>>, vector<1x4x16xbf16>
    %38 = vector.shape_cast %37 : vector<1x4x16xbf16> to vector<4x16xbf16>
    %cst_26 = arith.constant dense<0.000000e+00> : vector<4x1088xf32>
    %39 = tpu.matmul %38, %36, %cst_26 {dimension_numbers = #tpu.dot_dimension_numbers<[1], [0], [0], [1], [0, 0, 1, 1], [], []>} : vector<4x16xbf16>, vector<16x1088xbf16>, vector<4x1088xf32> -> vector<4x1088xf32>
    %40 = arith.addf %35, %39 : vector<4x1088xf32>
    %41 = vector.extract_strided_slice %1 {offsets = [0, 70], sizes = [16, 1088], strides = [1, 1]} : vector<16x1190xbf16> to vector<16x1088xbf16>
    %c8 = arith.constant 8 : index
    %c0_27 = arith.constant 0 : index
    %c0_28 = arith.constant 0 : index
    %42 = vector.load %arg2[%c8, %c0_27, %c0_28] : memref<9x4x16xbf16, #tpu.memory_space<vmem>>, vector<1x4x16xbf16>
    %43 = vector.shape_cast %42 : vector<1x4x16xbf16> to vector<4x16xbf16>
    %cst_29 = arith.constant dense<0.000000e+00> : vector<4x1088xf32>
    %44 = tpu.matmul %43, %41, %cst_29 {dimension_numbers = #tpu.dot_dimension_numbers<[1], [0], [0], [1], [0, 0, 1, 1], [], []>} : vector<4x16xbf16>, vector<16x1088xbf16>, vector<4x1088xf32> -> vector<4x1088xf32>
    %45 = arith.addf %40, %44 : vector<4x1088xf32>
    %c0_30 = arith.constant 0 : index
    %c0_31 = arith.constant 0 : index
    %46 = vector.load %arg3[%c0_30, %c0_31] : memref<4x1xf32, #tpu.memory_space<vmem>>, vector<4x1xf32>
    %47 = vector.broadcast %46 : vector<4x1xf32> to vector<4x1088xf32>
    %48 = arith.addf %45, %47 : vector<4x1088xf32>
    %cst_32 = arith.constant 0.000000e+00 : f32
    %49 = vector.broadcast %cst_32 : f32 to vector<4x1088xf32>
    %50 = arith.maximumf %48, %49 : vector<4x1088xf32>
    %51 = arith.truncf %50 : vector<4x1088xf32> to vector<4x1088xbf16>
    %c0_33 = arith.constant 0 : index
    %c0_34 = arith.constant 0 : index
    %c0_35 = arith.constant 0 : index
    %52 = vector.load %arg4[%c0_33, %c0_34, %c0_35] : memref<1x4x1088xbf16, #tpu.memory_space<vmem>>, vector<1x4x1088xbf16>
    %53 = vector.shape_cast %52 : vector<1x4x1088xbf16> to vector<4x1088xbf16>
    %54 = vector.shape_cast %51 : vector<4x1088xbf16> to vector<1x4x1088xbf16>
    tpu.vector_store %arg4[%c0_33, %c0_34, %c0_35], %54 {strides = array<i32>} : memref<1x4x1088xbf16, #tpu.memory_space<vmem>>, vector<1x4x1088xbf16>,
    return
  }
  func.func @transform_0(%arg0: i32) -> (i32, i32, i32, i32) {
    %c0_i32 = arith.constant 0 : i32
    %c0_i32_0 = arith.constant 0 : i32
    %c0_i32_1 = arith.constant 0 : i32
    %c0_i32_2 = arith.constant 0 : i32
    return %arg0, %c0_i32, %c0_i32_0, %c0_i32_1 : i32, i32, i32, i32
  }
  func.func @transform_1(%arg0: i32) -> (i32, i32, i32) {
    %c0_i32 = arith.constant 0 : i32
    %c0_i32_0 = arith.constant 0 : i32
    %c0_i32_1 = arith.constant 0 : i32
    %c0_i32_2 = arith.constant 0 : i32
    return %c0_i32, %c0_i32_0, %c0_i32_1 : i32, i32, i32
  }
  func.func @transform_2(%arg0: i32) -> (i32, i32) {
    %c0_i32 = arith.constant 0 : i32
    %c0_i32_0 = arith.constant 0 : i32
    %c0_i32_1 = arith.constant 0 : i32
    return %c0_i32, %c0_i32_0 : i32, i32
  }
  func.func @transform_3(%arg0: i32) -> (i32, i32, i32) {
    %c0_i32 = arith.constant 0 : i32
    %c0_i32_0 = arith.constant 0 : i32
    %c0_i32_1 = arith.constant 0 : i32
    return %arg0, %c0_i32, %c0_i32_0 : i32, i32, i32
  }
}

module attributes {stable_mosaic.version = 11 : i64} {
  func.func @_conv_kernel(%arg0: i32, %arg1: memref<1x1x8x1024xbf16, #tpu.memory_space<vmem>>, %arg2: memref<1x1x8xbf16, #tpu.memory_space<vmem>>, %arg3: memref<1x1xf32, #tpu.memory_space<vmem>>, %arg4: memref<1x1x1024xf32, #tpu.memory_space<vmem>>) attributes {dimension_semantics = [#tpu.dimension_semantics<parallel>], iteration_bounds = array<i64: 2>, scalar_prefetch = 0 : i64, scratch_operands = 0 : i64, tpu.core_type = #tpu.core_type<tc>, window_params = [{transform_indices = @transform_0, window_bounds = array<i64: 1, 1, 8, 1024>}, {pipeline_mode = #tpu.pipeline_mode<synchronous>, transform_indices = @transform_1, window_bounds = array<i64: 1, 1, 8>}, {pipeline_mode = #tpu.pipeline_mode<synchronous>, transform_indices = @transform_2, window_bounds = array<i64: 1, 1>}, {transform_indices = @transform_3, window_bounds = array<i64: 1, 1, 1024>}]} {
    %c0 = arith.constant 0 : index
    %c0_0 = arith.constant 0 : index
    %c0_1 = arith.constant 0 : index
    %c0_2 = arith.constant 0 : index
    %0 = vector.load %arg1[%c0, %c0_0, %c0_1, %c0_2] : memref<1x1x8x1024xbf16, #tpu.memory_space<vmem>>, vector<1x1x8x1024xbf16>
    %1 = vector.shape_cast %0 : vector<1x1x8x1024xbf16> to vector<8x1024xbf16>
    %c0_3 = arith.constant 0 : index
    %c0_4 = arith.constant 0 : index
    %c0_5 = arith.constant 0 : index
    %2 = vector.load %arg2[%c0_3, %c0_4, %c0_5] : memref<1x1x8xbf16, #tpu.memory_space<vmem>>, vector<1x1x8xbf16>
    %3 = vector.shape_cast %2 : vector<1x1x8xbf16> to vector<1x8xbf16>
    %cst = arith.constant dense<0.000000e+00> : vector<1x1024xf32>
    %4 = tpu.matmul %3, %1, %cst {dimension_numbers = #tpu.dot_dimension_numbers<[1], [0], [0], [1], [0, 0, 1, 1], [], []>} : vector<1x8xbf16>, vector<8x1024xbf16>, vector<1x1024xf32> -> vector<1x1024xf32>
    %c0_6 = arith.constant 0 : index
    %c0_7 = arith.constant 0 : index
    %5 = vector.load %arg3[%c0_6, %c0_7] : memref<1x1xf32, #tpu.memory_space<vmem>>, vector<1x1xf32>
    %6 = vector.broadcast %5 : vector<1x1xf32> to vector<1x1024xf32>
    %7 = arith.addf %4, %6 : vector<1x1024xf32>
    %c0_8 = arith.constant 0 : index
    %c0_9 = arith.constant 0 : index
    %c0_10 = arith.constant 0 : index
    %8 = vector.load %arg4[%c0_8, %c0_9, %c0_10] : memref<1x1x1024xf32, #tpu.memory_space<vmem>>, vector<1x1x1024xf32>
    %9 = vector.shape_cast %8 : vector<1x1x1024xf32> to vector<1x1024xf32>
    %10 = vector.shape_cast %7 : vector<1x1024xf32> to vector<1x1x1024xf32>
    tpu.vector_store %arg4[%c0_8, %c0_9, %c0_10], %10 {strides = array<i32>} : memref<1x1x1024xf32, #tpu.memory_space<vmem>>, vector<1x1x1024xf32>,
    return
  }
  func.func @transform_0(%arg0: i32) -> (i32, i32, i32, i32) {
    %c0_i32 = arith.constant 0 : i32
    %c0_i32_0 = arith.constant 0 : i32
    %c0_i32_1 = arith.constant 0 : i32
    %c0_i32_2 = arith.constant 0 : i32
    return %arg0, %c0_i32, %c0_i32_0, %c0_i32_1 : i32, i32, i32, i32
  }
  func.func @transform_1(%arg0: i32) -> (i32, i32, i32) {
    %c0_i32 = arith.constant 0 : i32
    %c0_i32_0 = arith.constant 0 : i32
    %c0_i32_1 = arith.constant 0 : i32
    %c0_i32_2 = arith.constant 0 : i32
    return %c0_i32, %c0_i32_0, %c0_i32_1 : i32, i32, i32
  }
  func.func @transform_2(%arg0: i32) -> (i32, i32) {
    %c0_i32 = arith.constant 0 : i32
    %c0_i32_0 = arith.constant 0 : i32
    %c0_i32_1 = arith.constant 0 : i32
    return %c0_i32, %c0_i32_0 : i32, i32
  }
  func.func @transform_3(%arg0: i32) -> (i32, i32, i32) {
    %c0_i32 = arith.constant 0 : i32
    %c0_i32_0 = arith.constant 0 : i32
    %c0_i32_1 = arith.constant 0 : i32
    return %arg0, %c0_i32, %c0_i32_0 : i32, i32, i32
  }
}

</mosaic_0001>

<bundles_post_ra>
// kernel: tpu_custom_call.1
= control target key start
LH: loop header
LB: loop body
LE: loop exit
PB: predicated region body
PF: predicated region fallthrough
CT: control target
= control target key end

     0   :  { %6 = vsyncpa [#allocation3], 0  ;;  %s157_s0 = inlined_call_operand.hbm [shape: f32[8,128], index: 0, kind: input, shape index: {}]   ;;  %s158_s1 = inlined_call_operand.hbm [shape: f32[8,128], index: 1, kind: output, shape index: {}]  }
   0x1   :  { %7 = vsyncpa [#allocation4], 0  ;;  %s13_s8 = sshll.u32 %s157_s0, 4  ;;  %s139_s9 = smov [#allocation2]   ;;  %s14_s8 = int_to_ptr.hbm [resolvable:$true] %s13_s8 }
   0x2   :  { %s15_s10 = sshll.u32 %s139_s9, 4  ;;  %s16_s10 = int_to_ptr.vmem [resolvable:$true] %s15_s10 }
   0x3   :  { %18 = dma.hbm_to_vmem [thread:$0]  %s14_s8, 128, %s16_s10, [#allocation3]  }
   0x4   :  { %135 = dma.done.wait [#allocation3], 128  }
   0x5   :  { %136 = vsyncadd [#allocation3], 4294967168  ;;  %v23_v0 = vld [vmem:[#allocation2] sm:$0xff]  ;;  %s140_s0 = smov [#allocation5]   ;;  %s72_s14 = sshll.u32 %s158_s1, 4  ;;  %s73_s14 = int_to_ptr.hbm [resolvable:$true] %s72_s14 }
   0x6   :  { %v24_v1 = vmul.f32 %v23_v0, %v23_v0  ;;  %s70_s11 = sshll.u32 %s140_s0, 4  ;;  %s71_s11 = int_to_ptr.vmem [resolvable:$true] %s70_s11 }
   0x8   :  { %v25_v2 = vmin.f32 %v24_v1, 16.0 }
   0xa   :  { %v26_v3 = vmul.f32 2.1237322e-06, %v25_v2  ;;  %v37_v4 = vmul.f32 3.8918573e-05, %v25_v2 }
   0xc   :  { %v27_v5 = vadd.f32 0.00028619796, %v26_v3  ;;  %v38_v6 = vadd.f32 0.001143296, %v37_v4 }
   0xe   :  { %v28_v7 = vmul.f32 %v27_v5, %v25_v2  ;;  %v39_v8 = vmul.f32 %v38_v6, %v25_v2 }
  0x10   :  { %v29_v9 = vadd.f32 0.0036580483, %v28_v7  ;;  %v40_v10 = vadd.f32 0.014752088, %v39_v8 }
  0x12   :  { %v30_v11 = vmul.f32 %v29_v9, %v25_v2  ;;  %v41_v12 = vmul.f32 %v40_v10, %v25_v2 }
  0x14   :  { %v42_v13 = vadd.f32 0.112945676, %v41_v12  ;;  %v31_v14 = vadd.f32 0.05243302, %v30_v11 }
  0x16   :  { %v43_v15 = vmul.f32 %v42_v13, %v25_v2  ;;  %v32_v17 = vmul.f32 %v31_v14, %v25_v2 }
  0x18   :  { %v44_v16 = vadd.f32 0.4994258, %v43_v15  ;;  %v33_v20 = vadd.f32 0.18741608, %v32_v17 }
  0x1a   :  { %v45_v18 = vmul.f32 %v44_v16, %v25_v2  ;;  %v34_v21 = vmul.f32 %v33_v20, %v25_v2 }
  0x1c   :  { %v46_v19 = vadd.f32 1.0, %v45_v18  ;;  %v35_v24 = vadd.f32 1.1283791, %v34_v21 }
  0x1e   :  { %85 = vrcp.f32 %v46_v19  ;;  %v58_v25 = vand.u32 2147483648, %v46_v19  ;;  %vm52_vm0 = vweird.f32 %v46_v19  ;;  %v56_v27 = vand.u32 2147483647, %v46_v19 }
  0x1f   :  { %v36_v30 = vmul.f32 %v35_v24, %v23_v0 }
  0x20   :  { %v59_v29 = vor.u32 1.1754944e-38, %v58_v25  ;;  %vm57_vm3 = vcmp.eq.f32.partialorder %v56_v27, 8.507059e+37 }
  0x24   :  { %v86_v22 = vpop.eup %85 }
  0x25   :  { %v48_v23 = vmul.f32 %v86_v22, %v46_v19  ;;  %vm53_vm1 = vweird.f32 %v86_v22 }
  0x26   :  { %vm54_vm2 = vmor %vm52_vm0, %vm53_vm1 }
  0x27   :  { %v49_v26 = vsub.f32 1.0, %v48_v23 }
  0x29   :  { %v50_v28 = vmul.f32 %v86_v22, %v49_v26 }
  0x2b   :  { %v51_v31 = vadd.f32 %v86_v22, %v50_v28 }
  0x2d   :  { %v55_v32 = vsel %vm54_vm2, %v86_v22, %v51_v31 }
  0x2e   :  { %v60_v33 = vsel %vm57_vm3, %v59_v29, %v55_v32 }
  0x2f   :  { %v61_v34 = vmul.f32 %v60_v33, %v36_v30 }
  0x31   :  { %v82_v35 = vclamps-f32 %v61_v34, 1.0 }
  0x33   :  { %64 = vst [vmem:[#allocation5] sm:$0xff] %v82_v35 }
  0x34   :  { %75 = dma.vmem_to_hbm [thread:$0]  %s71_s11, 128, %s73_s14, [#allocation4]  }
  0x35   :  { %137 = dma.done.wait [#allocation4], 128  }
  0x36   :  { %138 = vsyncadd [#allocation4], 4294967168 }
  0x37   :  { %80 = vsyncpa [#allocation3], 1 }
  0x38   :  { %81 = vsyncpa [#allocation4], 1 }

// kernel: skip_fcn_cct_forward.18
= control target key start
LH: loop header
LB: loop body
LE: loop exit
PB: predicated region body
PF: predicated region fallthrough
CT: control target
= control target key end

     0   :  { %s816_s18 = smov 0   ;;  %s1071_s0 = inlined_call_operand.vmem [shape: bf16[128,64], index: 0, kind: input, shape index: {}]   ;;  %s1072_s1 = inlined_call_operand.vmem [shape: f32[1,64], index: 1, kind: input, shape index: {}]   ;;  %s1073_s2 = inlined_call_operand.vmem [shape: f32[1,64], index: 2, kind: input, shape index: {}]   ;;  %s1074_s3 = inlined_call_operand.vmem [shape: bf16[64,192], index: 3, kind: input, shape index: {}]   ;;  %s1075_s4 = inlined_call_operand.vmem [shape: f32[1,192], index: 4, kind: input, shape index: {}]   ;;  %s1076_s5 = inlined_call_operand.vmem [shape: bf16[128,192], index: 5, kind: output, shape index: {}]  }
   0x1 LB: > { %s660_s19 = sadd.s32 4294967295, %s783_s18   ;;  %p664_p0 = scmp.ge.s32.totalorder %s783_s18, 1  ;;  %s783_s18 = sphi %s816_s18, %s15_s18  }
   0x2   : > { %p188_p1 = scmp.lt.s32.totalorder %s783_s18, 3 }
   0x4   : > { %p189_p2 = pnand %p664_p0, %p188_p1 }
   0x5   : > { %s665_s20 = sshll.u32 (!%p189_p2), %s660_s19, 3 }
   0x6   : > { %192 = sbr.rel (%p189_p2) target bundleno = 456 (0x1c8), region = 40  ;;  %p218_p3 = scmp.lt.s32.totalorder (!%p189_p2), %s665_s20, 15 }
   0xb   : > { %s1084_s20 = smov (!%p218_p3, %s665_s20), 15  ;;  %vm249_vm0 = vcmask 523264   ;;  %v785_v20 = vmov 64.0  }
   0xc   : > { %s666_s21 = sshll.u32 %s1084_s20, 2  ;;  %759 = vrcp.f32 %v785_v20  ;;  %s712_s15 = sshll.u32 %s1084_s20, 3 }
   0xd   : > { %s221_s24 = scalar_lea.vmem %s1071_s0, %s666_s21  ;;  %s1038_s19 = scalar_lea.vmem %s1076_s5, %s712_s15 }
   0xe   : > { %v739_v0 = vld [vmem:[%s221_s24 + $0x18] sm:$0xff]   ;;  %v738_v1 = vld [vmem:[%s221_s24 + $0x10] sm:$0xff]   ;;  %v722_v2 = vld [vmem:[%s221_s24] sm:$0xff]  }
   0xf   : > { %v735_v3 = vunpack.c.l.bf16 %v739_v0  ;;  %v731_v4 = vunpack.c.l.bf16 %v738_v1  ;;  %v723_v5 = vunpack.c.l.bf16 %v722_v2  ;;  %v736_v9 = vunpack.c.h.bf16 %v739_v0  ;;  %v737_v15 = vld [vmem:[%s221_s24 + $0x8] sm:$0xff]  }
  0x10   : > { %v732_v10 = vunpack.c.h.bf16 %v738_v1  ;;  %v724_v11 = vunpack.c.h.bf16 %v722_v2  ;;  %v727_v16 = vunpack.c.l.bf16 %v737_v15  ;;  %v728_v17 = vunpack.c.h.bf16 %v737_v15 }
  0x11   : > { %v268_v6 = vsel %vm249_vm0, %v735_v3, 0.0  ;;  %v262_v7 = vsel %vm249_vm0, %v731_v4, 0.0  ;;  %v250_v8 = vsel %vm249_vm0, %v723_v5, 0.0  ;;  %v271_v12 = vsel %vm249_vm0, %v736_v9, 0.0 }
  0x12   : > { %269 = vadd.xlane.f32.xlu2 %v268_v6  ;;  %263 = vadd.xlane.f32.xlu0 %v262_v7  ;;  %v265_v13 = vsel %vm249_vm0, %v732_v10, 0.0  ;;  %v253_v14 = vsel %vm249_vm0, %v724_v11, 0.0  ;;  %v256_v18 = vsel %vm249_vm0, %v727_v16, 0.0  ;;  %v259_v19 = vsel %vm249_vm0, %v728_v17, 0.0  ;;  %v760_v21 = vpop.eup %759  ;;  %v698_v7 = vld [vmem:[%s1074_s3 + $0x38] sm:$0xf0] }
  0x13   : > { %251 = vadd.xlane.f32.xlu1 %v250_v8  ;;  %v275_v22 = vmul.f32 64.0, %v760_v21  ;;  %vm279_vm1 = vweird.f32 %v760_v21 }
  0x15   : > { %v276_v23 = vsub.f32 1.0, %v275_v22  ;;  %v682_v22 = vld [vmem:[%s1074_s3 + $0x18] sm:$0xf0] }
  0x17   : > { %v277_v24 = vmul.f32 %v760_v21, %v276_v23 }
  0x19   : > { %v278_v25 = vadd.f32 %v760_v21, %v277_v24 }
  0x1a   : > { %272 = vadd.xlane.f32.xlu2 %v271_v12  ;;  %266 = vadd.xlane.f32.xlu0 %v265_v13  ;;  %v690_v13 = vld [vmem:[%s1074_s3 + $0x28] sm:$0xf0] }
  0x1b   : > { %254 = vadd.xlane.f32.xlu1 %v253_v14  ;;  %v838_v26 = vsel %vm279_vm1, %v760_v21, %v278_v25 }
  0x22   : > { %257 = vadd.xlane.f32.xlu0 %v256_v18  ;;  %v715_v18 = vld [vmem:[%s1074_s3 + $0x14] sm:$0xf] }
  0x23   : > { %260 = vadd.xlane.f32.xlu1 %v259_v19  ;;  %v685_v24 = vor.u32 %v715_v18, %v682_v22  ;;  %v968_v22 = vld [vmem:[%s1072_s1] ss:$0 sm:$0xff] }
  0x85   : > { %v270_v27 = vpop.xlane.xlu2 %269  ;;  %v264_v28 = vpop.xlane.xlu0 %263 }
  0x86   : > { %v285_v29 = vmul.f32 %v838_v26, %v264_v28  ;;  %v252_v30 = vpop.xlane.xlu1 %251  ;;  %v287_v40 = vmul.f32 %v838_v26, %v270_v27  ;;  %v672_v28 = vld [vmem:[%s1074_s3] sm:$0xf] }
  0x87   : > { %v281_v31 = vmul.f32 %v838_v26, %v252_v30 }
  0x88   : > { %v842_v32 = vsub.f32 %v731_v4, %v285_v29  ;;  %v862_v48 = vsub.f32 %v735_v3, %v287_v40  ;;  %v696_v3 = vld [vmem:[%s1074_s3 + $0x30] sm:$0xf]  ;;  %v720_v4 = vld [vmem:[%s1074_s3 + $0x34] sm:$0xf0]  ;;  %v714_v29 = vld [vmem:[%s1074_s3 + $0x4] sm:$0xf0] }
  0x89   : > { %v844_v33 = vsub.f32 %v723_v5, %v281_v31  ;;  %v719_v5 = vld [vmem:[%s1074_s3 + $0x34] sm:$0xf]  ;;  %v697_v6 = vor.u32 %v720_v4, %v696_v3  ;;  %v673_v30 = vor.u32 %v714_v29, %v672_v28  ;;  %v713_v31 = vld [vmem:[%s1074_s3 + $0x4] sm:$0xf] }
  0x8a   : > { %v301_v34 = vmul.f32 %v842_v32, %v842_v32  ;;  %v303_v57 = vmul.f32 %v862_v48, %v862_v48  ;;  %v701_v8 = vor.u32 %v719_v5, %v698_v7 }
  0x8b   : > { %v297_v35 = vmul.f32 %v844_v33, %v844_v33  ;;  %529 = vmatpush.bf16.msra.mxu0 %v697_v6  ;;  %740 = vmatpush.bf16.msra.mxu2 %v697_v6 }
  0x8c   : > { %v317_v36 = vsel %vm249_vm0, %v301_v34, 0.0  ;;  %v323_v61 = vsel %vm249_vm0, %v303_v57, 0.0  ;;  %558 = vmatpush.bf16.msra.mxu1 %v701_v8  ;;  %744 = vmatpush.bf16.msra.mxu3 %v701_v8  ;;  %v674_v34 = vld [vmem:[%s1074_s3 + $0x8] sm:$0xf0] }
  0x8d   : > { %v273_v37 = vpop.xlane.xlu2 %272  ;;  %318 = vadd.xlane.f32.xlu2 %v317_v36  ;;  %v267_v38 = vpop.xlane.xlu0 %266  ;;  %v305_v39 = vsel %vm249_vm0, %v297_v35, 0.0  ;;  %v677_v35 = vor.u32 %v713_v31, %v674_v34  ;;  %v758_v34 = vld [vmem:[%s1073_s2] ss:$0 sm:$0xff] }
  0x8e   : > { %v288_v41 = vmul.f32 %v838_v26, %v273_v37  ;;  %v286_v42 = vmul.f32 %v838_v26, %v267_v38  ;;  %306 = vadd.xlane.f32.xlu1 %v305_v39  ;;  %v255_v43 = vpop.xlane.xlu1 %254 }
  0x8f   : > { %v282_v44 = vmul.f32 %v838_v26, %v255_v43 }
  0x90   : > { %v856_v45 = vsub.f32 %v736_v9, %v288_v41  ;;  %v858_v46 = vsub.f32 %v732_v10, %v286_v42  ;;  %v688_v9 = vld [vmem:[%s1074_s3 + $0x20] sm:$0xf]  ;;  %v718_v10 = vld [vmem:[%s1074_s3 + $0x24] sm:$0xf0] }
  0x91   : > { %v860_v47 = vsub.f32 %v724_v11, %v282_v44  ;;  %v717_v11 = vld [vmem:[%s1074_s3 + $0x24] sm:$0xf]  ;;  %v689_v12 = vor.u32 %v718_v10, %v688_v9 }
  0x92   : > { %v302_v49 = vmul.f32 %v858_v46, %v858_v46  ;;  %v304_v50 = vmul.f32 %v856_v45, %v856_v45  ;;  %v693_v14 = vor.u32 %v717_v11, %v690_v13 }
  0x93   : > { %v298_v51 = vmul.f32 %v860_v47, %v860_v47  ;;  %530 = vmatpush.bf16.msra.mxu0 %v689_v12  ;;  %741 = vmatpush.bf16.msra.mxu2 %v689_v12 }
  0x94   : > { %v320_v52 = vsel %vm249_vm0, %v302_v49, 0.0  ;;  %v326_v53 = vsel %vm249_vm0, %v304_v50, 0.0  ;;  %559 = vmatpush.bf16.msra.mxu1 %v693_v14  ;;  %745 = vmatpush.bf16.msra.mxu3 %v693_v14 }
  0x95   : > { %321 = vadd.xlane.f32.xlu0 %v320_v52  ;;  %v258_v54 = vpop.xlane.xlu0 %257  ;;  %v308_v55 = vsel %vm249_vm0, %v298_v51, 0.0 }
  0x96   : > { %v283_v56 = vmul.f32 %v838_v26, %v258_v54  ;;  %327 = vadd.xlane.f32.xlu1 %v326_v53  ;;  %309 = vadd.xlane.f32.xlu2 %v308_v55  ;;  %v261_v58 = vpop.xlane.xlu1 %260 }
  0x97   : > { %v284_v59 = vmul.f32 %v838_v26, %v261_v58 }
  0x98   : > { %v877_v60 = vsub.f32 %v727_v16, %v283_v56  ;;  %v680_v16 = vld [vmem:[%s1074_s3 + $0x10] sm:$0xf]  ;;  %560 = vmatpush.bf16.msra.mxu1 %v685_v24  ;;  %746 = vmatpush.bf16.msra.mxu3 %v685_v24 }
  0x99   : > { %v882_v63 = vsub.f32 %v728_v17, %v284_v59  ;;  %v716_v17 = vld [vmem:[%s1074_s3 + $0x14] sm:$0xf0] }
  0x9a   : > { %v299_v62 = vmul.f32 %v877_v60, %v877_v60  ;;  %v681_v21 = vor.u32 %v716_v17, %v680_v16 }
  0x9b   : > { %v300_v1 = vmul.f32 %v882_v63, %v882_v63 }
  0x9c   : > { %v311_v0 = vsel %vm249_vm0, %v299_v62, 0.0  ;;  %531 = vmatpush.bf16.msra.mxu0 %v681_v21  ;;  %742 = vmatpush.bf16.msra.mxu2 %v681_v21 }
  0x9d   : > { %324 = vadd.xlane.f32.xlu0 %v323_v61  ;;  %v314_v2 = vsel %vm249_vm0, %v300_v1, 0.0  ;;  %561 = vmatpush.bf16.msra.mxu1 %v677_v35 }
  0x9e   : > { %312 = vadd.xlane.f32.xlu2 %v311_v0  ;;  %747 = vmatpush.bf16.msra.mxu3 %v677_v35 }
  0xa0   : > { %532 = vmatpush.bf16.msra.mxu0 %v673_v30  ;;  %743 = vmatpush.bf16.msra.mxu2 %v673_v30 }
  0xa5   : > { %315 = vadd.xlane.f32.xlu0 %v314_v2 }
 0x100   : > { %v319_v15 = vpop.xlane.xlu2 %318 }
 0x101   : > { %v333_v19 = vmul.f32 %v319_v15, %v838_v26  ;;  %v307_v20 = vpop.xlane.xlu1 %306 }
 0x102   : > { %v329_v23 = vmul.f32 %v307_v20, %v838_v26 }
 0x103   : > { %v341_v25 = vadd.f32 1e-05, %v333_v19 }
 0x104   : > { %v337_v27 = vadd.f32 1e-05, %v329_v23 }
 0x105   : > { %761 = vrsqrt.f32 %v341_v25  ;;  %vm391_vm5 = vweird.f32 %v341_v25 }
 0x106   : > { %763 = vrsqrt.f32 %v337_v27  ;;  %vm351_vm3 = vweird.f32 %v337_v27 }
 0x108   : > { %v322_v36 = vpop.xlane.xlu0 %321 }
 0x109   : > { %v334_v37 = vmul.f32 %v322_v36, %v838_v26  ;;  %v310_v38 = vpop.xlane.xlu2 %309  ;;  %v328_v39 = vpop.xlane.xlu1 %327 }
 0x10a   : > { %v330_v40 = vmul.f32 %v310_v38, %v838_v26  ;;  %v336_v41 = vmul.f32 %v328_v39, %v838_v26 }
 0x10b   : > { %v762_v42 = vpop.eup %761  ;;  %v342_v43 = vadd.f32 1e-05, %v334_v37 }
 0x10c   : > { %v764_v44 = vpop.eup %763  ;;  %v386_v49 = vmul.f32 %v762_v42, %v341_v25  ;;  %v941_v50 = vadd.f32 1e-05, %v330_v40  ;;  %v943_v51 = vadd.f32 1e-05, %v336_v41  ;;  %vm392_vm2 = vweird.f32 %v762_v42 }
 0x10d   : > { %v346_v52 = vmul.f32 %v764_v44, %v337_v27  ;;  %765 = vrsqrt.f32 %v342_v43  ;;  %vm352_vm4 = vweird.f32 %v764_v44  ;;  %vm393_vm6 = vmor %vm391_vm5, %vm392_vm2  ;;  %vm401_vm11 = vweird.f32 %v342_v43 }
 0x10e   : > { %v387_v53 = vmul.f32 %v762_v42, %v386_v49  ;;  %767 = vrsqrt.f32 %v941_v50  ;;  %vm353_vm7 = vmor %vm351_vm3, %vm352_vm4  ;;  %vm361_vm9 = vweird.f32 %v941_v50  ;;  %vm421_vm14 = vweird.f32 %v943_v51 }
 0x10f   : > { %v347_v54 = vmul.f32 %v764_v44, %v346_v52  ;;  %769 = vrsqrt.f32 %v943_v51 }
 0x110   : > { %v388_v55 = vmul.f32 0.5, %v387_v53  ;;  %v325_v56 = vpop.xlane.xlu0 %324 }
 0x111   : > { %v348_v57 = vmul.f32 0.5, %v347_v54  ;;  %v335_v58 = vmul.f32 %v325_v56, %v838_v26  ;;  %v313_v59 = vpop.xlane.xlu2 %312 }
 0x112   : > { %v389_v61 = vsub.f32 1.5, %v388_v55  ;;  %v331_v62 = vmul.f32 %v313_v59, %v838_v26 }
 0x113   : > { %v766_v0 = vpop.eup %765  ;;  %v349_v1 = vsub.f32 1.5, %v348_v57  ;;  %v949_v2 = vadd.f32 1e-05, %v335_v58 }
 0x114   : > { %v768_v3 = vpop.eup %767  ;;  %v390_v4 = vmul.f32 %v762_v42, %v389_v61  ;;  %v396_v5 = vmul.f32 %v766_v0, %v342_v43  ;;  %v951_v6 = vadd.f32 1e-05, %v331_v62  ;;  %vm402_vm8 = vweird.f32 %v766_v0 }
 0x115   : > { %v953_v7 = vpop.eup %769  ;;  %v350_v8 = vmul.f32 %v764_v44, %v349_v1  ;;  %v356_v9 = vmul.f32 %v768_v3, %v941_v50  ;;  %771 = vrsqrt.f32 %v949_v2  ;;  %vm362_vm10 = vweird.f32 %v768_v3  ;;  %vm403_vm12 = vmor %vm401_vm11, %vm402_vm8 }
 0x116   : > { %v397_v10 = vmul.f32 %v766_v0, %v396_v5  ;;  %v416_v11 = vmul.f32 %v953_v7, %v943_v51  ;;  %v394_v12 = vsel %vm393_vm6, %v762_v42, %v390_v4  ;;  %773 = vrsqrt.f32 %v951_v6  ;;  %vm363_vm13 = vmor %vm361_vm9, %vm362_vm10 }
 0x117   : > { %v357_v13 = vmul.f32 %v768_v3, %v356_v9  ;;  %v354_v14 = vsel %vm353_vm7, %v764_v44, %v350_v8  ;;  %v429_v20 = vmul.f32 %v394_v12, %v842_v32  ;;  %vm422_vm15 = vweird.f32 %v953_v7 }
 0x118   : > { %v398_v15 = vmul.f32 0.5, %v397_v10  ;;  %v417_v16 = vmul.f32 %v953_v7, %v416_v11  ;;  %v316_v17 = vpop.xlane.xlu0 %315  ;;  %v425_v24 = vmul.f32 %v354_v14, %v844_v33  ;;  %vm411_vm1 = vweird.f32 %v949_v2  ;;  %vm996_vm5 = vmor %vm421_vm14, %vm422_vm15 }
 0x119   : > { %v358_v18 = vmul.f32 0.5, %v357_v13  ;;  %v332_v19 = vmul.f32 %v316_v17, %v838_v26  ;;  %v440_v35 = vmul.f32 %v968_v22, %v429_v20  ;;  %vm371_vm2 = vweird.f32 %v951_v6 }
 0x11a   : > { %v399_v21 = vsub.f32 1.5, %v398_v15  ;;  %v418_v26 = vmul.f32 0.5, %v417_v16  ;;  %v436_v39 = vmul.f32 %v968_v22, %v425_v24  ;;  %vm591_vm11 = vcmask 1043456  }
 0x11b   : > { %v772_v23 = vpop.eup %771  ;;  %v359_v25 = vsub.f32 1.5, %v358_v18  ;;  %v971_v27 = vadd.f32 1e-05, %v332_v19  ;;  %v451_v50 = vadd.f32 %v758_v34, %v440_v35 }
 0x11c   : > { %v400_v28 = vmul.f32 %v766_v0, %v399_v21  ;;  %v406_v32 = vmul.f32 %v772_v23, %v949_v2  ;;  %v774_v30 = vpop.eup %773  ;;  %v419_v41 = vsub.f32 1.5, %v418_v26  ;;  %vm412_vm3 = vweird.f32 %v772_v23 }
 0x11d   : > { %v360_v29 = vmul.f32 %v768_v3, %v359_v25  ;;  %775 = vrsqrt.f32 %v971_v27  ;;  %v366_v38 = vmul.f32 %v774_v30, %v951_v6  ;;  %vm372_vm4 = vweird.f32 %v774_v30  ;;  %vm413_vm6 = vmor %vm411_vm1, %vm412_vm3 }
 0x11e   : > { %v404_v31 = vsel %vm403_vm12, %v766_v0, %v400_v28  ;;  %v407_v33 = vmul.f32 %v772_v23, %v406_v32  ;;  %v420_v55 = vmul.f32 %v953_v7, %v419_v41  ;;  %vm1005_vm7 = vmor %vm371_vm2, %vm372_vm4  ;;  %vm381_vm8 = vweird.f32 %v971_v27 }
 0x11f   : > { %v430_v36 = vmul.f32 %v404_v31, %v858_v46  ;;  %v364_v37 = vsel %vm363_vm13, %v768_v3, %v360_v29  ;;  %v367_v43 = vmul.f32 %v774_v30, %v366_v38  ;;  %vm592_vm12 = vcmask 523268  }
 0x120   : > { %v426_v40 = vmul.f32 %v364_v37, %v860_v47  ;;  %v408_v42 = vmul.f32 0.5, %v407_v33  ;;  %v447_v47 = vadd.f32 %v758_v34, %v436_v39  ;;  %v424_v2 = vsel %vm996_vm5, %v953_v7, %v420_v55 }
 0x121   : > { %v441_v44 = vmul.f32 %v968_v22, %v430_v36  ;;  %v368_v53 = vmul.f32 0.5, %v367_v43  ;;  %v432_v10 = vmul.f32 %v424_v2, %v856_v45 }
 0x122   : > { %v409_v49 = vsub.f32 1.5, %v408_v42  ;;  %v437_v46 = vmul.f32 %v968_v22, %v426_v40 }
 0x123   : > { %v776_v52 = vpop.eup %775  ;;  %v452_v54 = vadd.f32 %v758_v34, %v441_v44  ;;  %v369_v61 = vsub.f32 1.5, %v368_v53  ;;  %v443_v15 = vmul.f32 %v968_v22, %v432_v10 }
 0x124   : > { %v410_v57 = vmul.f32 %v772_v23, %v409_v49  ;;  %v376_v58 = vmul.f32 %v776_v52, %v971_v27  ;;  %v448_v59 = vadd.f32 %v758_v34, %v437_v46  ;;  %vm382_vm9 = vweird.f32 %v776_v52 }
 0x125   : > { %v457_v62 = vpack.c.bf16 %v452_v54, %v451_v50  ;;  %v370_v4 = vmul.f32 %v774_v30, %v369_v61  ;;  %vm383_vm10 = vmor %vm381_vm8, %vm382_vm9  ;;  %v454_v45 = vadd.f32 %v758_v34, %v443_v15 }
 0x126   : > { %v414_v0 = vsel %vm413_vm6, %v772_v23, %v410_v57  ;;  %v377_v51 = vmul.f32 %v776_v52, %v376_v58  ;;  %v455_v3 = vpack.c.bf16 %v448_v59, %v447_v47 }
 0x127   : > { %704 = vmatmul.msk.bf16.vlgmr.msra.gmra.mxu2 %vm249_vm0, %v457_v62  ;;  %708 = vmatmul.msk.bf16.vlgmr.msra.gmra.mxu3 %vm249_vm0, %v457_v62  ;;  %v431_v6 = vmul.f32 %v414_v0, %v862_v48  ;;  %v374_v8 = vsel %vm1005_vm7, %v774_v30, %v370_v4 }
 0x128   : > { %v378_v5 = vmul.f32 0.5, %v377_v51  ;;  %702 = vmatmul.msk.bf16.vlgmr.msra.gmra.mxu0 %vm249_vm0, %v455_v3  ;;  %706 = vmatmul.msk.bf16.vlgmr.msra.gmra.mxu1 %vm249_vm0, %v455_v3  ;;  %v427_v11 = vmul.f32 %v374_v8, %v877_v60 }
 0x129   : > { %v442_v7 = vmul.f32 %v968_v22, %v431_v6 }
 0x12a   : > { %v379_v9 = vsub.f32 1.5, %v378_v5  ;;  %v438_v48 = vmul.f32 %v968_v22, %v427_v11 }
 0x12b   : > { %v453_v17 = vadd.f32 %v758_v34, %v442_v7 }
 0x12c   : > { %v380_v12 = vmul.f32 %v776_v52, %v379_v9  ;;  %v449_v18 = vadd.f32 %v758_v34, %v438_v48 }
 0x12d   : > { %v458_v60 = vpack.c.bf16 %v454_v45, %v453_v17 }
 0x12e   : > { %v384_v13 = vsel %vm383_vm10, %v776_v52, %v380_v12 }
 0x12f   : > { %v428_v14 = vmul.f32 %v384_v13, %v882_v63  ;;  %v467_v63 = vld [vmem:[%s1075_s4] sm:$0x3] }
 0x130   : > { %v469_v21 = vperm.slane %v467_v63, 0 }
 0x131   : > { %v439_v16 = vmul.f32 %v968_v22, %v428_v14  ;;  %v470_v22 = vperm.slane %v467_v63, 1 }
 0x133   : > { %v450_v19 = vadd.f32 %v758_v34, %v439_v16 }
 0x135   : > { %v456_v20 = vpack.c.bf16 %v450_v19, %v449_v18 }
 0x137   : > { %705 = vmatmul.msk.bf16.gmra.mxu2 %vm249_vm0, %v458_v60  ;;  %709 = vmatmul.msk.bf16.gmra.mxu3 %vm249_vm0, %v458_v60 }
 0x138   : > { %703 = vmatmul.msk.bf16.gmra.mxu0 %vm249_vm0, %v456_v20  ;;  %707 = vmatmul.msk.bf16.gmra.mxu1 %vm249_vm0, %v456_v20  ;;  %vm1040_vm0 = vmor %vm592_vm12, %vm591_vm11 }
 0x1a5   : > { %v534_v23 = vpop.f32.mrf.mxu0  ;;  %v563_v24 = vpop.f32.mrf.mxu1 }
 0x1a6   : > { %v535_v25 = vadd.f32 %v534_v23, %v469_v21  ;;  %v564_v27 = vadd.f32 %v563_v24, %v470_v22 }
 0x1a8   : > { %v583_v26 = vpack.c.bf16 %v564_v27, %v535_v25 }
 0x1aa   : > { %594 = vst.msk [vmem:[%s1038_s19] sm:$0xff] %vm1040_vm0, %v583_v26  ;;  %v544_v32 = vpop.f32.mrf.mxu2  ;;  %v573_v29 = vpop.f32.mrf.mxu3 }
 0x1ab   : > { %v545_v30 = vadd.f32 %v544_v32, %v469_v21  ;;  %v574_v31 = vadd.f32 %v573_v29, %v470_v22 }
 0x1ad   : > { %v587_v33 = vpack.c.bf16 %v574_v31, %v545_v30  ;;  %v536_v34 = vpop.f32.mrf.mxu0  ;;  %v565_v35 = vpop.f32.mrf.mxu1 }
 0x1ae   : > { %v537_v36 = vadd.f32 %v536_v34, %v469_v21  ;;  %v566_v37 = vadd.f32 %v565_v35, %v470_v22 }
 0x1af   : > { %598 = vst.msk [vmem:[%s1038_s19 + $0x20] sm:$0xff] %vm1040_vm0, %v587_v33 }
 0x1b0   : > { %v584_v38 = vpack.c.bf16 %v566_v37, %v537_v36 }
 0x1b2   : > { %595 = vst.msk [vmem:[%s1038_s19 + $0x8] sm:$0xff] %vm1040_vm0, %v584_v38  ;;  %v546_v39 = vpop.f32.mrf.mxu2  ;;  %v575_v40 = vpop.f32.mrf.mxu3 }
 0x1b3   : > { %v547_v41 = vadd.f32 %v546_v39, %v469_v21  ;;  %v576_v42 = vadd.f32 %v575_v40, %v470_v22 }
 0x1b5   : > { %v588_v43 = vpack.c.bf16 %v576_v42, %v547_v41  ;;  %v539_v44 = vpop.f32.mrf.mxu0  ;;  %v568_v49 = vpop.f32.mrf.mxu1 }
 0x1b6   : > { %v540_v46 = vadd.f32 %v539_v44, %v469_v21  ;;  %v569_v50 = vadd.f32 %v568_v49, %v470_v22 }
 0x1b7   : > { %599 = vst.msk [vmem:[%s1038_s19 + $0x28] sm:$0xff] %vm1040_vm0, %v588_v43 }
 0x1b8   : > { %v585_v52 = vpack.c.bf16 %v569_v50, %v540_v46 }
 0x1ba   : > { %596 = vst.msk [vmem:[%s1038_s19 + $0x10] sm:$0xff] %vm1040_vm0, %v585_v52  ;;  %v549_v53 = vpop.f32.mrf.mxu2  ;;  %v578_v47 = vpop.f32.mrf.mxu3 }
 0x1bb   : > { %v550_v54 = vadd.f32 %v549_v53, %v469_v21  ;;  %v579_v55 = vadd.f32 %v578_v47, %v470_v22 }
 0x1bd   : > { %v589_v56 = vpack.c.bf16 %v579_v55, %v550_v54  ;;  %v541_v57 = vpop.f32.mrf.mxu0  ;;  %v570_v58 = vpop.f32.mrf.mxu1 }
 0x1be   : > { %v542_v59 = vadd.f32 %v541_v57, %v469_v21  ;;  %v571_v61 = vadd.f32 %v570_v58, %v470_v22 }
 0x1bf   : > { %600 = vst.msk [vmem:[%s1038_s19 + $0x30] sm:$0xff] %vm1040_vm0, %v589_v56 }
 0x1c0   : > { %v586_v62 = vpack.c.bf16 %v571_v61, %v542_v59 }
 0x1c2   : > { %597 = vst.msk [vmem:[%s1038_s19 + $0x18] sm:$0xff] %vm1040_vm0, %v586_v62  ;;  %v551_v0 = vpop.f32.mrf.mxu2  ;;  %v580_v1 = vpop.f32.mrf.mxu3 }
 0x1c3   : > { %v552_v51 = vadd.f32 %v551_v0, %v469_v21  ;;  %v581_v3 = vadd.f32 %v580_v1, %v470_v22 }
 0x1c5   : > { %v590_v4 = vpack.c.bf16 %v581_v3, %v552_v51 }
 0x1c7   : > { %601 = vst.msk [vmem:[%s1038_s19 + $0x38] sm:$0xff] %vm1040_vm0, %v590_v4 }
 0x1c8 PF: > { %s15_s18 = sadd.s32 1, %s783_s18  }
 0x1c9   : > { %p12_p4 = scmp.ge.s32.totalorder %s15_s18, 4  }
 0x1cb   :  { %14 = sbr.rel (!%p12_p4) target bundleno = 1 (0x1), region = 70 }

// kernel: skip_fcn_cct_forward.17
= control target key start
LH: loop header
LB: loop body
LE: loop exit
PB: predicated region body
PF: predicated region fallthrough
CT: control target
= control target key end

     0   :  { %s2267_s12 = smov 0   ;;  %s3141_s0 = inlined_call_operand.vmem [shape: bf16[2,4,4,306], index: 0, kind: input, shape index: {}]   ;;  %s3142_s1 = inlined_call_operand.vmem [shape: bf16[9,64,4], index: 1, kind: input, shape index: {}]   ;;  %s3143_s2 = inlined_call_operand.vmem [shape: f32[64,1], index: 2, kind: input, shape index: {}]   ;;  %s3144_s3 = inlined_call_operand.vmem [shape: bf16[2,64,272], index: 3, kind: output, shape index: {}]  }
   0x1 LB: > { %s1851_s13 = sadd.s32 4294967295, %s2241_s12   ;;  %p1855_p0 = scmp.ge.s32.totalorder %s2241_s12, 1  ;;  %s2241_s12 = sphi %s2267_s12, %s13_s12  }
   0x2   : > { %p137_p1 = scmp.lt.s32.totalorder %s2241_s12, 3 }
   0x4   : > { %p138_p2 = pnand %p1855_p0, %p137_p1 }
   0x6   : > { %141 = sbr.rel (%p138_p2) target bundleno = 689 (0x2b1), region = 32 }
   0xb   : > { %p161_p3 = scmp.lt.s32.totalorder %s1851_s13, 1  ;;  %vm234_vm0 = vcmask 1041408   ;;  %v2183_v2 = vld [vmem:[%s3142_s1 + $0x20] sm:$0xff]  ;;  %v2184_v7 = vld [vmem:[%s3142_s1 + $0x28] sm:$0xff]  ;;  %vm221_vm1 = vcmask 31744   ;;  %v2185_v14 = vld [vmem:[%s3142_s1 + $0x30] sm:$0xff] }
   0xc   : > { %s2243_s24 = smov 127   ;;  %v2186_v25 = vld [vmem:[%s3142_s1 + $0x38] sm:$0xff]  ;;  %v2179_v29 = vld [vmem:[%s3142_s1] sm:$0xff]  ;;  %v2180_v30 = vld [vmem:[%s3142_s1 + $0x8] sm:$0xff]  ;;  %vm500_vm2 = vcmask 1039360   ;;  %s2245_s8 = smov 110  }
   0xd   : > { %s3152_s13 = smov (!%p161_p3, %s1851_s13), 1  ;;  %v2181_v31 = vld [vmem:[%s3142_s1 + $0x10] sm:$0xff]  ;;  %v2182_v32 = vld [vmem:[%s3142_s1 + $0x18] sm:$0xff]  ;;  %v2367_v36 = vld [vmem:[%s3142_s1 + $0x60] sm:$0xff]  ;;  %vm1179_vm3 = vcmask 908288   ;;  %vm1532_vm4 = vcmask 900096  }
   0xe   : > { %s2218_s14 = smul.u32 24, %s3152_s13  ;;  %v2187_v42 = vld [vmem:[%s3142_s1 + $0x40] sm:$0xff]  ;;  %v2384_v45 = vld [vmem:[%s3142_s1 + $0x68] sm:$0xff]  ;;  %v2413_v58 = vld [vmem:[%s3142_s1 + $0x70] sm:$0xff]  ;;  %vm1780_vm5 = vcmask 125952  }
   0xf   : > { %v2188_v56 = vld [vmem:[%s3142_s1 + $0x48] sm:$0xff]  ;;  %s2219_s7 = smul.u32 96, %s3152_s13 }
  0x10   : > { %s2281_s17 = scalar_lea.vmem %s3141_s0, %s2218_s14 }
  0x11   : > { %v2284_v0 = vld [vmem:[%s2281_s17 + $0x6] sm:$0x3f]  ;;  %v2288_v1 = vld [vmem:[%s2281_s17] sm:$0x3f]  ;;  %v1859_v13 = vld [vmem:[%s2281_s17 + $0xc] sm:$0x3f]  ;;  %s3041_s10 = scalar_lea.vmem %s3144_s3, %s2219_s7 }
  0x12   : > { %217 = vst [vmem:[#allocation1] ss:$4 sm:$0xff] %v2284_v0  ;;  %v1860_v21 = vld [vmem:[%s2281_s17 + $0x12] sm:$0x3f] }
  0x19   : > { %v218_v3 = vld.sshfl [vmem:[#allocation1] sm:$0xff pattern:$0x73625140]  ;;  %v219_v4 = vld.sshfl [vmem:[#allocation1 + $0x8] sm:$0xff pattern:$0x73625140] }
  0x1a   : > { %v220_v5 = vld.sshfl [vmem:[#allocation1 + $0x10] sm:$0xff pattern:$0x73625140]  ;;  %v235_v6 = vsel %vm234_vm0, %v218_v3, 0  ;;  %v237_v8 = vsel %vm234_vm0, %v219_v4, 0 }
  0x1b   : > { %349 = vst [vmem:[#allocation1] ss:$4 sm:$0xff] %v2288_v1  ;;  %248 = vmatpush.bf16.msra.mxu0 %v235_v6  ;;  %2215 = vmatpush.bf16.msra.mxu3 %v235_v6  ;;  %v239_v9 = vsel %vm234_vm0, %v220_v5, 0  ;;  %v2189_v4 = vld [vmem:[%s3142_s1 + $0x50] sm:$0xff]  ;;  %v2440_v6 = vld [vmem:[%s3142_s1 + $0x78] sm:$0xff] }
  0x1c   : > { %2216 = vmatpush.bf16.msra.mxu1 %v237_v8  ;;  %2217 = vmatpush.bf16.msra.mxu2 %v239_v9 }
  0x1e   : > { %1885 = vmatmul.msk.bf16.vlgmr.msra.gmra.mxu0 %vm221_vm1, %v2183_v2  ;;  %1886 = vmatmul.msk.bf16.vlgmr.msra.gmra.mxu3 %vm221_vm1, %v2184_v7 }
  0x1f   : > { %277 = vmatpush.bf16.msrb.mxu0 %v237_v8  ;;  %1890 = vmatmul.msk.bf16.vlgmr.msra.gmra.mxu1 %vm221_vm1, %v2184_v7 }
  0x20   : > { %1894 = vmatmul.msk.bf16.vlgmr.msra.gmra.mxu2 %vm221_vm1, %v2184_v7 }
  0x22   : > { %v350_v10 = vld.sshfl [vmem:[#allocation1] sm:$0xff pattern:$0x73625140]  ;;  %v351_v11 = vld.sshfl [vmem:[#allocation1 + $0x8] sm:$0xff pattern:$0x73625140] }
  0x23   : > { %306 = vmatpush.bf16.msra.mxu0 %v239_v9  ;;  %v352_v12 = vld.sshfl [vmem:[#allocation1 + $0x10] sm:$0xff pattern:$0x73625140]  ;;  %v367_v18 = vsel %vm234_vm0, %v351_v11, 0  ;;  %v365_v19 = vsel %vm234_vm0, %v350_v10, 0 }
  0x24   : > { %487 = vst [vmem:[#allocation1] ss:$4 sm:$0xff] %v2288_v1  ;;  %v369_v20 = vsel %vm234_vm0, %v352_v12, 0  ;;  %378 = vmatpush.bf16.msrb.mxu3 %v365_v19  ;;  %v2468_v19 = vld [vmem:[%s3142_s1 + $0x80] sm:$0xff] }
  0x25   : > { %436 = vmatpush.bf16.msrb.mxu1 %v369_v20 }
  0x2b   : > { %v492_v15 = vld.sshfl [vmem:[#allocation1 + $0x10] sm:$0xff pattern:$0x73625140]  ;;  %v488_v16 = vld.sshfl [vmem:[#allocation1] sm:$0xff pattern:$0x73625140] }
  0x2c   : > { %498 = vrot.lane.b32.xlu1 %v492_v15, %s2243_s24  ;;  %494 = vrot.lane.b32.xlu0 %v488_v16, %s2243_s24  ;;  %v490_v17 = vld.sshfl [vmem:[#allocation1 + $0x8] sm:$0xff pattern:$0x73625140] }
  0x2d   : > { %665 = vst [vmem:[#allocation1] ss:$4 sm:$0xff] %v1859_v13 }
  0x2e   : > { %1889 = vmatmul.msk.bf16.vlgmr.msrb.gmra.mxu0 %vm221_vm1, %v2183_v2  ;;  %1887 = vmatmul.msk.bf16.gmra.mxu3 %vm221_vm1, %v2185_v14 }
  0x2f   : > { %1891 = vmatmul.msk.bf16.gmra.mxu1 %vm221_vm1, %v2185_v14  ;;  %407 = vmatpush.bf16.msrb.mxu0 %v367_v18 }
  0x30   : > { %1895 = vmatmul.msk.bf16.gmra.mxu2 %vm221_vm1, %v2185_v14 }
  0x34   : > { %496 = vrot.lane.b32.xlu0 %v490_v17, %s2243_s24  ;;  %v666_v22 = vld.sshfl [vmem:[#allocation1] sm:$0xff pattern:$0x73625140]  ;;  %v2320_v23 = vld.sshfl [vmem:[#allocation1 + $0x8] sm:$0xff pattern:$0x73625140] }
  0x35   : > { %v2322_v24 = vld.sshfl [vmem:[#allocation1 + $0x10] sm:$0xff pattern:$0x73625140]  ;;  %v681_v35 = vsel %vm234_vm0, %v666_v22, 0  ;;  %v683_v60 = vsel %vm234_vm0, %v2320_v23, 0  ;;  %v2190_v17 = vld [vmem:[%s3142_s1 + $0x58] sm:$0xff] }
  0x36   : > { %828 = vst [vmem:[#allocation1] ss:$4 sm:$0xff] %v1860_v21  ;;  %694 = vmatpush.bf16.msra.mxu1 %v681_v35  ;;  %v685_v9 = vsel %vm234_vm0, %v2322_v24, 0 }
  0x3d   : > { %v2327_v26 = vld.sshfl [vmem:[#allocation1] sm:$0xff pattern:$0x73625140]  ;;  %v2329_v27 = vld.sshfl [vmem:[#allocation1 + $0x8] sm:$0xff pattern:$0x73625140] }
  0x3e   : > { %v2331_v28 = vld.sshfl [vmem:[#allocation1 + $0x10] sm:$0xff pattern:$0x73625140]  ;;  %1893 = vmatmul.msk.bf16.vlgmr.msra.gmra.mxu0 %vm221_vm1, %v2183_v2  ;;  %1888 = vmatmul.msk.bf16.gmra.mxu3 %vm221_vm1, %v2186_v25  ;;  %v844_v2 = vsel %vm234_vm0, %v2327_v26, 0  ;;  %v846_v15 = vsel %vm234_vm0, %v2329_v27, 0 }
  0x3f   : > { %990 = vst [vmem:[#allocation1] ss:$4 sm:$0xff] %v1859_v13  ;;  %1892 = vmatmul.msk.bf16.gmra.mxu1 %vm221_vm1, %v2186_v25 }
  0x40   : > { %1896 = vmatmul.msk.bf16.gmra.mxu2 %vm221_vm1, %v2186_v25 }
  0x46   : > { %v991_v33 = vld.sshfl [vmem:[#allocation1] sm:$0xff pattern:$0x73625140]  ;;  %v995_v34 = vld.sshfl [vmem:[#allocation1 + $0x10] sm:$0xff pattern:$0x73625140] }
  0x47   : > { %997 = vrot.lane.b32.xlu1 %v991_v33, %s2243_s24  ;;  %v993_v44 = vld.sshfl [vmem:[#allocation1 + $0x8] sm:$0xff pattern:$0x73625140] }
  0x48   : > { %999 = vrot.lane.b32.xlu2 %v993_v44, %s2243_s24  ;;  %1166 = vst [vmem:[#allocation1] ss:$4 sm:$0xff] %v2288_v1 }
  0x4e   : > { %1917 = vmatmul.msk.bf16.vlgmr.msrb.gmra.mxu0 %vm221_vm1, %v2179_v29  ;;  %1913 = vmatmul.msk.bf16.vlgmr.msrb.gmra.mxu3 %vm221_vm1, %v2179_v29 }
  0x4f   : > { %1921 = vmatmul.msk.bf16.vlgmr.msrb.gmra.mxu1 %vm221_vm1, %v2179_v29  ;;  %1001 = vrot.lane.b32.xlu1 %v995_v34, %s2243_s24  ;;  %v1169_v8 = vld.sshfl [vmem:[#allocation1 + $0x8] sm:$0xff pattern:$0x73625140]  ;;  %s2244_s24 = smov 111  }
  0x50   : > { %1175 = vrot.lane.b32.xlu0 %v1169_v8, %s2244_s24  ;;  %886 = vmatpush.bf16.msrb.mxu1 %v846_v15  ;;  %v1167_v22 = vld.sshfl [vmem:[#allocation1] sm:$0xff pattern:$0x73625140]  ;;  %v1171_v23 = vld.sshfl [vmem:[#allocation1 + $0x10] sm:$0xff pattern:$0x73625140] }
  0x51   : > { %1173 = vrot.lane.b32.xlu2 %v1167_v22, %s2244_s24  ;;  %1343 = vst [vmem:[#allocation1] ss:$4 sm:$0xff] %v2284_v0  ;;  %v2498_v34 = vld [vmem:[%s3142_s1 + $0x88] sm:$0xff]  ;;  %v2562_v22 = vld [vmem:[%s3142_s1 + $0x98] sm:$0xff] }
  0x58   : > { %v1346_v29 = vld.sshfl [vmem:[#allocation1 + $0x8] sm:$0xff pattern:$0x73625140] }
  0x59   : > { %1177 = vrot.lane.b32.xlu2 %v1171_v23, %s2244_s24  ;;  %1352 = vrot.lane.b32.xlu0 %v1346_v29, %s2244_s24 }
  0x5e   : > { %1918 = vmatmul.msk.bf16.gmra.mxu0 %vm221_vm1, %v2180_v30  ;;  %1914 = vmatmul.msk.bf16.gmra.mxu3 %vm221_vm1, %v2180_v30 }
  0x5f   : > { %1922 = vmatmul.msk.bf16.gmra.mxu1 %vm221_vm1, %v2180_v30 }
  0x6e   : > { %1919 = vmatmul.msk.bf16.gmra.mxu0 %vm221_vm1, %v2181_v31  ;;  %1915 = vmatmul.msk.bf16.gmra.mxu3 %vm221_vm1, %v2181_v31 }
  0x6f   : > { %1923 = vmatmul.msk.bf16.gmra.mxu1 %vm221_vm1, %v2181_v31 }
  0x7e   : > { %1920 = vmatmul.msk.bf16.gmra.mxu0 %vm221_vm1, %v2182_v32  ;;  %1916 = vmatmul.msk.bf16.gmra.mxu3 %vm221_vm1, %v2182_v32 }
  0x7f   : > { %1924 = vmatmul.msk.bf16.gmra.mxu1 %vm221_vm1, %v2182_v32 }
  0x8f   : > { %1985 = vmatmul.msk.bf16.vlgmr.msra.gmra.mxu1 %vm221_vm1, %v2367_v36 }
  0x9b   : > { %v2371_v37 = vpop.f32.mrf.mxu0 }
  0x9c   : > { %v2373_v38 = vpop.f32.mrf.mxu1 }
  0x9e   : > { %v499_v39 = vpop.permute.xlu1 %498  ;;  %v495_v40 = vpop.permute.xlu0 %494 }
  0x9f   : > { %v522_v41 = vsel %vm234_vm0, %v499_v39, 0  ;;  %1986 = vmatmul.msk.bf16.gmra.mxu1 %vm221_vm1, %v2384_v45 }
  0xa0   : > { %589 = vmatpush.bf16.msra.mxu0 %v522_v41 }
  0xa1   : > { %v2379_v43 = vpop.f32.mrf.mxu3 }
  0xa3   : > { %1957 = vmatmul.msk.bf16.vlgmr.msra.gmra.mxu0 %vm221_vm1, %v2187_v42  ;;  %v2387_v46 = vpop.f32.mrf.mxu0  ;;  %v313_v25 = vpop.f32.mrf.mxu2 }
  0xa4   : > { %v2393_v47 = vpop.f32.mrf.mxu1  ;;  %857 = vmatpush.bf16.msrb.mxu0 %v844_v2 }
  0xa6   : > { %v497_v48 = vpop.permute.xlu0 %496 }
  0xa7   : > { %v502_v49 = vsel %vm500_vm2, %v497_v48, %v499_v39  ;;  %v501_v50 = vsel %vm500_vm2, %v495_v40, %v497_v48 }
  0xa8   : > { %v519_v51 = vsel %vm234_vm0, %v502_v49, 0  ;;  %v516_v52 = vsel %vm234_vm0, %v501_v50, 0  ;;  %v2525_v49 = vld [vmem:[%s3142_s1 + $0x90] sm:$0xff] }
  0xa9   : > { %531 = vmatpush.bf16.msrb.mxu2 %v516_v52  ;;  %560 = vmatpush.bf16.msra.mxu3 %v519_v51  ;;  %v2399_v53 = vpop.f32.mrf.mxu3  ;;  %v848_v52 = vsel %vm234_vm0, %v2331_v28, 0 }
  0xab   : > { %v279_v54 = vpop.f32.mrf.mxu0  ;;  %v2493_v0 = vpop.f32.mrf.mxu2 }
  0xac   : > { %1949 = vmatmul.msk.bf16.vlgmr.msrb.gmra.mxu2 %vm221_vm1, %v2187_v42  ;;  %1953 = vmatmul.msk.bf16.vlgmr.msra.gmra.mxu3 %vm221_vm1, %v2187_v42  ;;  %v2403_v55 = vpop.f32.mrf.mxu1 }
  0xad   : > { %723 = vmatpush.bf16.msra.mxu2 %v683_v60  ;;  %752 = vmatpush.bf16.msrb.mxu3 %v685_v9 }
  0xaf   : > { %1987 = vmatmul.msk.bf16.gmra.mxu1 %vm221_vm1, %v2413_v58 }
  0xb1   : > { %v2408_v57 = vpop.f32.mrf.mxu3  ;;  %915 = vmatpush.bf16.msrb.mxu2 %v848_v52 }
  0xb3   : > { %1958 = vmatmul.msk.bf16.gmra.mxu0 %vm221_vm1, %v2188_v56  ;;  %v2416_v59 = vpop.f32.mrf.mxu0  ;;  %v318_v40 = vpop.f32.mrf.mxu2 }
  0xb4   : > { %v2422_v61 = vpop.f32.mrf.mxu1 }
  0xb9   : > { %v2424_v62 = vpop.f32.mrf.mxu3 }
  0xbb   : > { %v308_v63 = vpop.f32.mrf.mxu0 }
  0xbc   : > { %1950 = vmatmul.msk.bf16.gmra.mxu2 %vm221_vm1, %v2188_v56  ;;  %1954 = vmatmul.msk.bf16.gmra.mxu3 %vm221_vm1, %v2188_v56  ;;  %v2430_v3 = vpop.f32.mrf.mxu1 }
  0xbf   : > { %1988 = vmatmul.msk.bf16.gmra.mxu1 %vm221_vm1, %v2440_v6 }
  0xc1   : > { %v2435_v5 = vpop.f32.mrf.mxu3 }
  0xc3   : > { %1959 = vmatmul.msk.bf16.gmra.mxu0 %vm221_vm1, %v2189_v4  ;;  %v2443_v7 = vpop.f32.mrf.mxu0 }
  0xc4   : > { %v2450_v10 = vpop.f32.mrf.mxu1 }
  0xc9   : > { %v2452_v11 = vpop.f32.mrf.mxu3 }
  0xcb   : > { %v409_v12 = vpop.f32.mrf.mxu0 }
  0xcc   : > { %1951 = vmatmul.msk.bf16.gmra.mxu2 %vm221_vm1, %v2189_v4  ;;  %1955 = vmatmul.msk.bf16.gmra.mxu3 %vm221_vm1, %v2189_v4  ;;  %v2456_v13 = vadd.f32 %v409_v12, %v279_v54  ;;  %v438_v14 = vpop.f32.mrf.mxu1  ;;  %v2539_v54 = vpop.f32.mrf.mxu2 }
  0xcd   : > { %v2460_v16 = vadd.f32 %v438_v14, %v308_v63  ;;  %v1000_v63 = vpop.permute.xlu2 %999 }
  0xcf   : > { %2025 = vmatmul.msk.bf16.vlgmr.msrb.gmra.mxu1 %vm221_vm1, %v2468_v19 }
  0xd1   : > { %v380_v18 = vpop.f32.mrf.mxu3 }
  0xd2   : > { %v2471_v20 = vadd.f32 %v380_v18, %v2371_v37  ;;  %v1348_v18 = vld.sshfl [vmem:[#allocation1 + $0x10] sm:$0xff pattern:$0x73625140] }
  0xd3   : > { %1960 = vmatmul.msk.bf16.gmra.mxu0 %vm221_vm1, %v2190_v17  ;;  %v2474_v21 = vpop.f32.mrf.mxu0  ;;  %1354 = vrot.lane.b32.xlu1 %v1348_v18, %s2244_s24 }
  0xd4   : > { %v2479_v24 = vpop.f32.mrf.mxu1  ;;  %v323_v15 = vpop.f32.mrf.mxu2 }
  0xd9   : > { %v2482_v26 = vpop.f32.mrf.mxu3 }
  0xdb   : > { %v414_v27 = vpop.f32.mrf.mxu0 }
  0xdc   : > { %1952 = vmatmul.msk.bf16.gmra.mxu2 %vm221_vm1, %v2190_v17  ;;  %1956 = vmatmul.msk.bf16.gmra.mxu3 %vm221_vm1, %v2190_v17  ;;  %v2487_v30 = vadd.f32 %v414_v27, %v2373_v38  ;;  %v443_v31 = vpop.f32.mrf.mxu1 }
  0xdd   : > { %v2491_v32 = vadd.f32 %v443_v31, %v313_v25 }
  0xdf   : > { %2026 = vmatmul.msk.bf16.gmra.mxu1 %vm221_vm1, %v2498_v34 }
  0xe1   : > { %v385_v33 = vpop.f32.mrf.mxu3 }
  0xe2   : > { %v2501_v35 = vadd.f32 %v385_v33, %v2379_v43 }
  0xe3   : > { %2021 = vmatmul.msk.bf16.vlgmr.msrb.gmra.mxu0 %vm221_vm1, %v2468_v19  ;;  %v2505_v37 = vpop.f32.mrf.mxu0 }
  0xe4   : > { %v2509_v38 = vpop.f32.mrf.mxu1 }
  0xe9   : > { %v2511_v39 = vpop.f32.mrf.mxu3 }
  0xeb   : > { %v419_v41 = vpop.f32.mrf.mxu0 }
  0xec   : > { %1989 = vmatmul.msk.bf16.vlgmr.msra.gmra.mxu2 %vm221_vm1, %v2367_v36  ;;  %1993 = vmatmul.msk.bf16.vlgmr.msrb.gmra.mxu3 %vm221_vm1, %v2367_v36  ;;  %v2518_v42 = vadd.f32 %v419_v41, %v2403_v55  ;;  %v448_v43 = vpop.f32.mrf.mxu1  ;;  %v1344_v36 = vld.sshfl [vmem:[#allocation1] sm:$0xff pattern:$0x73625140]  ;;  %v998_v55 = vpop.permute.xlu1 %997 }
  0xed   : > { %v2520_v44 = vadd.f32 %v448_v43, %v318_v40  ;;  %1350 = vrot.lane.b32.xlu2 %v1344_v36, %s2244_s24  ;;  %v1003_v4 = vsel %vm500_vm2, %v998_v55, %v1000_v63  ;;  %1519 = vst [vmem:[#allocation1] ss:$4 sm:$0xff] %v2288_v1  ;;  %v2199_v1 = vld [vmem:[%s3142_s1 + $0xa0] sm:$0xff]  ;;  %v2200_v43 = vld [vmem:[%s3142_s1 + $0xa8] sm:$0xff]  ;;  %v441_v36 = vadd.f32 %v2479_v24, %v2443_v7 }
  0xee   : > { %v1018_v12 = vsel %vm234_vm0, %v1003_v4, 0 }
  0xef   : > { %2027 = vmatmul.msk.bf16.gmra.mxu1 %vm221_vm1, %v2525_v49  ;;  %1033 = vmatpush.bf16.msra.mxu3 %v1018_v12 }
  0xf1   : > { %v390_v48 = vpop.f32.mrf.mxu3 }
  0xf2   : > { %v2528_v50 = vadd.f32 %v390_v48, %v2408_v57 }
  0xf3   : > { %2022 = vmatmul.msk.bf16.gmra.mxu0 %vm221_vm1, %v2498_v34  ;;  %v2532_v51 = vpop.f32.mrf.mxu0 }
  0xf4   : > { %v2541_v56 = vpop.f32.mrf.mxu1  ;;  %v1002_v2 = vpop.permute.xlu1 %1001  ;;  %v1520_v27 = vld.sshfl [vmem:[#allocation1] sm:$0xff pattern:$0x73625140]  ;;  %v1524_v33 = vld.sshfl [vmem:[#allocation1 + $0x10] sm:$0xff pattern:$0x73625140] }
  0xf5   : > { %v1004_v8 = vsel %vm500_vm2, %v1000_v63, %v1002_v2  ;;  %v1024_v9 = vsel %vm234_vm0, %v1002_v2, 0  ;;  %1526 = vrot.lane.b32.xlu1 %v1520_v27, %s2245_s8  ;;  %1530 = vrot.lane.b32.xlu0 %v1524_v33, %s2245_s8  ;;  %v1522_v48 = vld.sshfl [vmem:[#allocation1 + $0x8] sm:$0xff pattern:$0x73625140]  ;;  %v1174_v63 = vpop.permute.xlu2 %1173 }
  0xf6   : > { %v1021_v14 = vsel %vm234_vm0, %v1004_v8, 0  ;;  %1091 = vmatpush.bf16.msra.mxu1 %v1024_v9  ;;  %1528 = vrot.lane.b32.xlu2 %v1522_v48, %s2245_s8 }
  0xf7   : > { %1062 = vmatpush.bf16.msra.mxu0 %v1021_v14 }
  0xf9   : > { %v2543_v57 = vpop.f32.mrf.mxu3 }
  0xfb   : > { %v424_v60 = vpop.f32.mrf.mxu0 }
  0xfc   : > { %1990 = vmatmul.msk.bf16.gmra.mxu2 %vm221_vm1, %v2384_v45  ;;  %1994 = vmatmul.msk.bf16.gmra.mxu3 %vm221_vm1, %v2384_v45  ;;  %v2550_v28 = vadd.f32 %v424_v60, %v2430_v3  ;;  %v453_v17 = vpop.f32.mrf.mxu1 }
  0xfd   : > { %v2557_v45 = vadd.f32 %v453_v17, %v323_v15 }
  0xff   : > { %2028 = vmatmul.msk.bf16.gmra.mxu1 %vm221_vm1, %v2562_v22 }
 0x101   : > { %v395_v3 = vpop.f32.mrf.mxu3 }
 0x102   : > { %v2565_v23 = vadd.f32 %v395_v3, %v2435_v5 }
 0x103   : > { %2023 = vmatmul.msk.bf16.gmra.mxu0 %vm221_vm1, %v2525_v49  ;;  %v2585_v29 = vpop.f32.mrf.mxu0 }
 0x104   : > { %v2573_v25 = vpop.f32.mrf.mxu1 }
 0x109   : > { %v2603_v52 = vpop.f32.mrf.mxu3 }
 0x10c   : > { %1991 = vmatmul.msk.bf16.gmra.mxu2 %vm221_vm1, %v2413_v58  ;;  %1995 = vmatmul.msk.bf16.gmra.mxu3 %vm221_vm1, %v2413_v58  ;;  %v696_v5 = vpop.f32.mrf.mxu1 }
 0x10f   : > { %2065 = vmatmul.msk.bf16.vlgmr.msra.gmra.mxu1 %vm221_vm1, %v2199_v1 }
 0x113   : > { %2024 = vmatmul.msk.bf16.gmra.mxu0 %vm221_vm1, %v2562_v22 }
 0x114   : > { %v698_v31 = vpop.f32.mrf.mxu1 }
 0x11c   : > { %1992 = vmatmul.msk.bf16.gmra.mxu2 %vm221_vm1, %v2440_v6  ;;  %1996 = vmatmul.msk.bf16.gmra.mxu3 %vm221_vm1, %v2440_v6  ;;  %v701_v41 = vpop.f32.mrf.mxu1  ;;  %v2601_v6 = vpop.f32.mrf.mxu2 }
 0x11f   : > { %2066 = vmatmul.msk.bf16.gmra.mxu1 %vm221_vm1, %v2200_v43 }
 0x120   : > { %v591_v58 = vpop.f32.mrf.mxu0 }
 0x121   : > { %v2592_v40 = vadd.f32 %v591_v58, %v2460_v16 }
 0x123   : > { %2061 = vmatmul.msk.bf16.vlgmr.msra.gmra.mxu0 %vm221_vm1, %v2199_v1 }
 0x124   : > { %v703_v60 = vpop.f32.mrf.mxu1 }
 0x128   : > { %v593_v16 = vpop.f32.mrf.mxu0 }
 0x129   : > { %v2605_v55 = vadd.f32 %v593_v16, %v441_v36 }
 0x12c   : > { %2029 = vmatmul.msk.bf16.vlgmr.msrb.gmra.mxu2 %vm221_vm1, %v2468_v19  ;;  %2057 = vmatmul.msk.bf16.vlgmr.msra.gmra.mxu3 %vm221_vm1, %v2199_v1  ;;  %v706_v12 = vpop.f32.mrf.mxu1  ;;  %v2201_v19 = vld [vmem:[%s3142_s1 + $0xb0] sm:$0xff]  ;;  %v1178_v1 = vpop.permute.xlu2 %1177 }
 0x12f   : > { %v533_v2 = vpop.f32.mrf.mxu2  ;;  %v562_v4 = vpop.f32.mrf.mxu3  ;;  %2067 = vmatmul.msk.bf16.gmra.mxu1 %vm221_vm1, %v2201_v19 }
 0x130   : > { %v611_v8 = vadd.f32 %v533_v2, %v2471_v20  ;;  %v2612_v7 = vadd.f32 %v562_v4, %v2456_v13  ;;  %v596_v24 = vpop.f32.mrf.mxu0  ;;  %v383_v13 = vadd.f32 %v2482_v26, %v2387_v46  ;;  %v1176_v20 = vpop.permute.xlu0 %1175  ;;  %v1201_v46 = vsel %vm234_vm0, %v1178_v1, 0 }
 0x131   : > { %v2615_v9 = vadd.f32 %v596_v24, %v2491_v32  ;;  %v446_v32 = vadd.f32 %v2509_v38, %v2493_v0  ;;  %v1180_v3 = vsel %vm1179_vm3, %v1174_v63, %v1176_v20  ;;  %v1181_v58 = vsel %vm1179_vm3, %v1176_v20, %v1178_v1  ;;  %1268 = vmatpush.bf16.msrb.mxu0 %v1201_v46 }
 0x132   : > { %v2617_v14 = vadd.f32 %v696_v5, %v611_v8  ;;  %v1195_v5 = vsel %vm234_vm0, %v1180_v3, 0  ;;  %v1198_v0 = vsel %vm234_vm0, %v1181_v58, 0 }
 0x133   : > { %2062 = vmatmul.msk.bf16.gmra.mxu0 %vm221_vm1, %v2200_v43  ;;  %1210 = vmatpush.bf16.msra.mxu2 %v1195_v5 }
 0x134   : > { %v708_v26 = vpop.f32.mrf.mxu1  ;;  %1239 = vmatpush.bf16.msrb.mxu3 %v1198_v0 }
 0x137   : > { %v535_v15 = vpop.f32.mrf.mxu2  ;;  %v2628_v17 = vpop.f32.mrf.mxu3 }
 0x138   : > { %v614_v18 = vadd.f32 %v535_v15, %v383_v13  ;;  %v598_v27 = vpop.f32.mrf.mxu0 }
 0x139   : > { %v2632_v33 = vadd.f32 %v598_v27, %v446_v32 }
 0x13a   : > { %v2636_v48 = vadd.f32 %v698_v31, %v614_v18  ;;  %v1353_v18 = vpop.permute.xlu0 %1352 }
 0x13c   : > { %2030 = vmatmul.msk.bf16.gmra.mxu2 %vm221_vm1, %v2498_v34  ;;  %2058 = vmatmul.msk.bf16.gmra.mxu3 %vm221_vm1, %v2200_v43  ;;  %v711_v4 = vpop.f32.mrf.mxu1  ;;  %v2202_v34 = vld [vmem:[%s3142_s1 + $0xb8] sm:$0xff] }
 0x13f   : > { %v538_v38 = vpop.f32.mrf.mxu2  ;;  %v567_v36 = vpop.f32.mrf.mxu3  ;;  %2068 = vmatmul.msk.bf16.gmra.mxu1 %vm221_vm1, %v2202_v34 }
 0x140   : > { %v617_v16 = vadd.f32 %v538_v38, %v2501_v35  ;;  %v2644_v63 = vadd.f32 %v567_v36, %v2487_v30  ;;  %v601_v2 = vpop.f32.mrf.mxu0  ;;  %v417_v35 = vadd.f32 %v2505_v37, %v2393_v47  ;;  %v388_v30 = vadd.f32 %v2511_v39, %v2399_v53 }
 0x141   : > { %v2647_v31 = vadd.f32 %v601_v2, %v2520_v44  ;;  %v451_v44 = vadd.f32 %v2541_v56, %v2539_v54 }
 0x142   : > { %v2649_v8 = vadd.f32 %v701_v41, %v617_v16 }
 0x143   : > { %2063 = vmatmul.msk.bf16.gmra.mxu0 %vm221_vm1, %v2201_v19 }
 0x144   : > { %v713_v15 = vpop.f32.mrf.mxu1 }
 0x147   : > { %v540_v43 = vpop.f32.mrf.mxu2  ;;  %v569_v41 = vpop.f32.mrf.mxu3 }
 0x148   : > { %v620_v24 = vadd.f32 %v540_v43, %v388_v30  ;;  %v2662_v13 = vadd.f32 %v569_v41, %v417_v35  ;;  %v603_v20 = vpop.f32.mrf.mxu0  ;;  %v1351_v47 = vpop.permute.xlu2 %1350 }
 0x149   : > { %v2664_v32 = vadd.f32 %v603_v20, %v451_v44 }
 0x14a   : > { %v2666_v3 = vadd.f32 %v703_v60, %v620_v24  ;;  %v1356_v60 = vsel %vm1179_vm3, %v1351_v47, %v1353_v18 }
 0x14c   : > { %2031 = vmatmul.msk.bf16.gmra.mxu2 %vm221_vm1, %v2525_v49  ;;  %2059 = vmatmul.msk.bf16.gmra.mxu3 %vm221_vm1, %v2201_v19  ;;  %v888_v5 = vpop.f32.mrf.mxu1  ;;  %v1371_v49 = vsel %vm234_vm0, %v1356_v60, 0  ;;  %v2685_v19 = vld [vmem:[%s3142_s1 + $0xe0] sm:$0xff] }
 0x14d   : > { %1386 = vmatpush.bf16.msrb.mxu1 %v1371_v49 }
 0x14f   : > { %v543_v53 = vpop.f32.mrf.mxu2  ;;  %v572_v37 = vpop.f32.mrf.mxu3 }
 0x150   : > { %v623_v39 = vadd.f32 %v543_v53, %v2528_v50  ;;  %v2673_v54 = vadd.f32 %v572_v37, %v2518_v42  ;;  %v606_v56 = vpop.f32.mrf.mxu0  ;;  %v422_v42 = vadd.f32 %v2532_v51, %v2422_v61  ;;  %v393_v50 = vadd.f32 %v2543_v57, %v2424_v62  ;;  %2129 = vmatmul.msk.bf16.vlgmr.msrb.gmra.mxu1 %vm221_vm1, %v2685_v19  ;;  %v2203_v51 = vld [vmem:[%s3142_s1 + $0xc0] sm:$0xff] }
 0x151   : > { %v2676_v27 = vadd.f32 %v606_v56, %v2557_v45  ;;  %v456_v45 = vadd.f32 %v2573_v25, %v2601_v6 }
 0x152   : > { %v2679_v1 = vadd.f32 %v706_v12, %v623_v39  ;;  %v2755_v39 = vld [vmem:[%s3142_s1 + $0xf0] sm:$0xff] }
 0x153   : > { %2064 = vmatmul.msk.bf16.gmra.mxu0 %vm221_vm1, %v2202_v34 }
 0x154   : > { %v890_v16 = vpop.f32.mrf.mxu1 }
 0x157   : > { %v545_v12 = vpop.f32.mrf.mxu2  ;;  %v574_v58 = vpop.f32.mrf.mxu3 }
 0x158   : > { %v626_v46 = vadd.f32 %v545_v12, %v393_v50  ;;  %v2696_v0 = vadd.f32 %v574_v58, %v422_v42  ;;  %v608_v38 = vpop.f32.mrf.mxu0  ;;  %v1529_v58 = vpop.permute.xlu2 %1528 }
 0x159   : > { %v2698_v36 = vadd.f32 %v608_v38, %v456_v45 }
 0x15a   : > { %v2700_v2 = vadd.f32 %v708_v26, %v626_v46 }
 0x15c   : > { %2032 = vmatmul.msk.bf16.gmra.mxu2 %vm221_vm1, %v2562_v22  ;;  %2060 = vmatmul.msk.bf16.gmra.mxu3 %vm221_vm1, %v2202_v34  ;;  %v893_v35 = vpop.f32.mrf.mxu1  ;;  %v2720_v22 = vld [vmem:[%s3142_s1 + $0xe8] sm:$0xff] }
 0x15f   : > { %v548_v61 = vpop.f32.mrf.mxu2  ;;  %v577_v62 = vpop.f32.mrf.mxu3 }
 0x160   : > { %v629_v57 = vadd.f32 %v548_v61, %v2565_v23  ;;  %v2710_v25 = vadd.f32 %v577_v62, %v2550_v28  ;;  %v859_v6 = vpop.f32.mrf.mxu0  ;;  %v427_v23 = vadd.f32 %v2585_v29, %v2450_v10  ;;  %v398_v28 = vadd.f32 %v2603_v52, %v2452_v11  ;;  %2130 = vmatmul.msk.bf16.gmra.mxu1 %vm221_vm1, %v2720_v22  ;;  %v2204_v29 = vld [vmem:[%s3142_s1 + $0xc8] sm:$0xff] }
 0x161   : > { %v2713_v26 = vadd.f32 %v859_v6, %v2617_v14 }
 0x162   : > { %v2715_v30 = vadd.f32 %v711_v4, %v629_v57 }
 0x163   : > { %2101 = vmatmul.msk.bf16.vlgmr.msrb.gmra.mxu0 %vm221_vm1, %v2203_v51 }
 0x164   : > { %v895_v24 = vpop.f32.mrf.mxu1 }
 0x167   : > { %v550_v14 = vpop.f32.mrf.mxu2  ;;  %v579_v34 = vpop.f32.mrf.mxu3 }
 0x168   : > { %v632_v4 = vadd.f32 %v550_v14, %v398_v28  ;;  %v2729_v44 = vadd.f32 %v579_v34, %v427_v23  ;;  %v861_v43 = vpop.f32.mrf.mxu0  ;;  %v2795_v28 = vld [vmem:[%s3142_s1 + $0xf8] sm:$0xff] }
 0x169   : > { %v2732_v41 = vadd.f32 %v861_v43, %v2636_v48 }
 0x16a   : > { %v2734_v20 = vadd.f32 %v713_v15, %v632_v4 }
 0x16c   : > { %2093 = vmatmul.msk.bf16.vlgmr.msra.gmra.mxu2 %vm221_vm1, %v2203_v51  ;;  %2097 = vmatmul.msk.bf16.vlgmr.msrb.gmra.mxu3 %vm221_vm1, %v2203_v51  ;;  %v2748_v15 = vpop.f32.mrf.mxu1 }
 0x16f   : > { %v725_v10 = vpop.f32.mrf.mxu2  ;;  %v754_v11 = vpop.f32.mrf.mxu3 }
 0x170   : > { %v775_v52 = vadd.f32 %v725_v10, %v2612_v7  ;;  %v2743_v47 = vadd.f32 %v754_v11, %v2592_v40  ;;  %v864_v48 = vpop.f32.mrf.mxu0  ;;  %v412_v7 = vadd.f32 %v2474_v21, %v2416_v59  ;;  %v1355_v40 = vpop.permute.xlu1 %1354  ;;  %2131 = vmatmul.msk.bf16.gmra.mxu1 %vm221_vm1, %v2755_v39  ;;  %v2246_v10 = vmov 0  }
 0x171   : > { %v2746_v53 = vadd.f32 %v864_v48, %v2649_v8  ;;  %v1357_v56 = vsel %vm1179_vm3, %v1353_v18, %v1355_v40  ;;  %v1377_v8 = vsel %vm234_vm0, %v1355_v40, 0  ;;  %2232 = vset.pattern.permute.xlu0 %v2246_v10  ;;  %2233 = vset.pattern.permute.xlu1 %v2246_v10  ;;  %v1531_v48 = vpop.permute.xlu0 %1530 }
 0x172   : > { %v2750_v37 = vadd.f32 %v888_v5, %v775_v52  ;;  %v615_v60 = vadd.f32 %v2628_v17, %v412_v7  ;;  %v1374_v5 = vsel %vm234_vm0, %v1357_v56, 0  ;;  %1444 = vmatpush.bf16.msra.mxu3 %v1377_v8  ;;  %2234 = vset.pattern.permute.xlu2 %v2246_v10  ;;  %v1534_v40 = vsel %vm1532_vm4, %v1529_v58, %v1531_v48 }
 0x173   : > { %2102 = vmatmul.msk.bf16.gmra.mxu0 %vm221_vm1, %v2204_v29  ;;  %1415 = vmatpush.bf16.msrb.mxu2 %v1374_v5  ;;  %v1554_v56 = vsel %vm234_vm0, %v1531_v48, 0  ;;  %v1551_v5 = vsel %vm234_vm0, %v1534_v40, 0 }
 0x174   : > { %v2772_v18 = vpop.f32.mrf.mxu1  ;;  %1592 = vmatpush.bf16.msra.mxu1 %v1551_v5 }
 0x177   : > { %v727_v49 = vpop.f32.mrf.mxu2  ;;  %v756_v42 = vpop.f32.mrf.mxu3  ;;  %1621 = vmatpush.bf16.msra.mxu2 %v1554_v56 }
 0x178   : > { %v778_v50 = vadd.f32 %v727_v49, %v615_v60  ;;  %v2767_v45 = vadd.f32 %v756_v42, %v2605_v55  ;;  %v866_v59 = vpop.f32.mrf.mxu0  ;;  %v1527_v12 = vpop.permute.xlu1 %1526 }
 0x179   : > { %v2770_v21 = vadd.f32 %v866_v59, %v2666_v3  ;;  %v1533_v46 = vsel %vm1532_vm4, %v1527_v12, %v1529_v58  ;;  %v2205_v3 = vld [vmem:[%s3142_s1 + $0xd0] sm:$0xff] }
 0x17a   : > { %v2774_v17 = vadd.f32 %v890_v16, %v778_v50  ;;  %v1548_v61 = vsel %vm234_vm0, %v1533_v46, 0 }
 0x17b   : > { %1563 = vmatpush.bf16.msra.mxu0 %v1548_v61 }
 0x17c   : > { %2094 = vmatmul.msk.bf16.gmra.mxu2 %vm221_vm1, %v2204_v29  ;;  %2098 = vmatmul.msk.bf16.gmra.mxu3 %vm221_vm1, %v2204_v29  ;;  %v903_v6 = vpop.f32.mrf.mxu1 }
 0x17f   : > { %v730_v38 = vpop.f32.mrf.mxu2  ;;  %v759_v55 = vpop.f32.mrf.mxu3 }
 0x180   : > { %v781_v16 = vadd.f32 %v730_v38, %v2644_v63  ;;  %v2785_v62 = vadd.f32 %v759_v55, %v2615_v9  ;;  %v869_v51 = vpop.f32.mrf.mxu0  ;;  %2132 = vmatmul.msk.bf16.gmra.mxu1 %vm221_vm1, %v2795_v28 }
 0x181   : > { %v2788_v57 = vadd.f32 %v869_v51, %v2679_v1 }
 0x182   : > { %v2790_v23 = vadd.f32 %v893_v35, %v781_v16 }
 0x183   : > { %2103 = vmatmul.msk.bf16.gmra.mxu0 %vm221_vm1, %v2205_v3 }
 0x184   : > { %v905_v4 = vpop.f32.mrf.mxu1 }
 0x187   : > { %v732_v9 = vpop.f32.mrf.mxu2  ;;  %v761_v63 = vpop.f32.mrf.mxu3 }
 0x188   : > { %v784_v14 = vadd.f32 %v732_v9, %v2662_v13  ;;  %v2802_v1 = vadd.f32 %v761_v63, %v2632_v33  ;;  %v871_v34 = vpop.f32.mrf.mxu0  ;;  %v2206_v33 = vld [vmem:[%s3142_s1 + $0xd8] sm:$0xff] }
 0x189   : > { %v2805_v35 = vadd.f32 %v871_v34, %v2700_v2  ;;  %v1667_v2 = vld [vmem:[%s3143_s2] sm:$0xff] }
 0x18a   : > { %v2807_v43 = vadd.f32 %v895_v24, %v784_v14  ;;  %1677 = vperm.xlu0 %2232, %v1667_v2  }
 0x18c   : > { %2095 = vmatmul.msk.bf16.gmra.mxu2 %vm221_vm1, %v2205_v3  ;;  %2099 = vmatmul.msk.bf16.gmra.mxu3 %vm221_vm1, %v2205_v3  ;;  %v1093_v8 = vpop.f32.mrf.mxu1 }
 0x18f   : > { %v735_v11 = vpop.f32.mrf.mxu2  ;;  %v764_v13 = vpop.f32.mrf.mxu3 }
 0x190   : > { %v787_v24 = vadd.f32 %v735_v11, %v2673_v54  ;;  %v2819_v29 = vadd.f32 %v764_v13, %v2647_v31  ;;  %v874_v52 = vpop.f32.mrf.mxu0  ;;  %v2834_v31 = vld [vmem:[%s3142_s1 + $0x100] sm:$0xff] }
 0x191   : > { %v2822_v7 = vadd.f32 %v874_v52, %v2715_v30  ;;  %2169 = vmatmul.msk.bf16.vlgmr.msra.gmra.mxu1 %vm221_vm1, %v2834_v31 }
 0x192   : > { %v2827_v60 = vadd.f32 %v2748_v15, %v787_v24  ;;  %v1668_v15 = vld [vmem:[%s3143_s2 + $0x8] sm:$0xff] }
 0x193   : > { %2104 = vmatmul.msk.bf16.gmra.mxu0 %vm221_vm1, %v2206_v33  ;;  %1682 = vperm.xlu1 %2233, %v1668_v15  }
 0x194   : > { %v1095_v12 = vpop.f32.mrf.mxu1 }
 0x197   : > { %v737_v54 = vpop.f32.mrf.mxu2  ;;  %v766_v30 = vpop.f32.mrf.mxu3 }
 0x198   : > { %v790_v49 = vadd.f32 %v737_v54, %v2696_v0  ;;  %v2843_v42 = vadd.f32 %v766_v30, %v2664_v32  ;;  %v876_v50 = vpop.f32.mrf.mxu0 }
 0x199   : > { %v2846_v59 = vadd.f32 %v876_v50, %v2734_v20 }
 0x19a   : > { %v2849_v58 = vadd.f32 %v2772_v18, %v790_v49  ;;  %v2867_v18 = vld [vmem:[%s3142_s1 + $0x108] sm:$0xff] }
 0x19c   : > { %2096 = vmatmul.msk.bf16.gmra.mxu2 %vm221_vm1, %v2206_v33  ;;  %2100 = vmatmul.msk.bf16.gmra.mxu3 %vm221_vm1, %v2206_v33  ;;  %v1098_v20 = vpop.f32.mrf.mxu1 }
 0x19f   : > { %v740_v46 = vpop.f32.mrf.mxu2  ;;  %v769_v38 = vpop.f32.mrf.mxu3 }
 0x1a0   : > { %v793_v0 = vadd.f32 %v740_v46, %v2710_v25  ;;  %v2855_v32 = vadd.f32 %v769_v38, %v2676_v27  ;;  %v1064_v55 = vpop.f32.mrf.mxu0 }
 0x1a1   : > { %v2858_v3 = vadd.f32 %v1064_v55, %v2750_v37  ;;  %2170 = vmatmul.msk.bf16.gmra.mxu1 %vm221_vm1, %v2867_v18  ;;  %v1670_v37 = vld [vmem:[%s3143_s2 + $0x18] sm:$0xff] }
 0x1a2   : > { %v2860_v61 = vadd.f32 %v903_v6, %v793_v0  ;;  %1692 = vperm.xlu1 %2233, %v1670_v37  }
 0x1a3   : > { %2165 = vmatmul.msk.bf16.vlgmr.msra.gmra.mxu0 %vm221_vm1, %v2834_v31 }
 0x1a4   : > { %v1100_v63 = vpop.f32.mrf.mxu1 }
 0x1a7   : > { %v742_v27 = vpop.f32.mrf.mxu2  ;;  %v771_v25 = vpop.f32.mrf.mxu3 }
 0x1a8   : > { %v796_v16 = vadd.f32 %v742_v27, %v2729_v44  ;;  %v2876_v51 = vadd.f32 %v771_v25, %v2698_v36  ;;  %v1066_v6 = vpop.f32.mrf.mxu0 }
 0x1a9   : > { %v2879_v9 = vadd.f32 %v1066_v6, %v2774_v17  ;;  %v2894_v17 = vld [vmem:[%s3142_s1 + $0x110] sm:$0xff] }
 0x1aa   : > { %v959_v14 = vadd.f32 %v905_v4, %v796_v16 }
 0x1ac   : > { %2133 = vmatmul.msk.bf16.vlgmr.msrb.gmra.mxu2 %vm221_vm1, %v2685_v19  ;;  %2137 = vmatmul.msk.bf16.vlgmr.msra.gmra.mxu3 %vm221_vm1, %v2685_v19  ;;  %v1103_v11 = vpop.f32.mrf.mxu1 }
 0x1af   : > { %v917_v34 = vpop.f32.mrf.mxu2  ;;  %v2908_v48 = vpop.f32.mrf.mxu3 }
 0x1b0   : > { %v939_v10 = vadd.f32 %v917_v34, %v2743_v47  ;;  %v1069_v44 = vpop.f32.mrf.mxu0  ;;  %v1672_v47 = vld [vmem:[%s3143_s2 + $0x28] sm:$0xff]  ;;  %v1674_v34 = vld [vmem:[%s3143_s2 + $0x38] sm:$0xff] }
 0x1b1   : > { %v2887_v36 = vadd.f32 %v1069_v44, %v2790_v23  ;;  %2171 = vmatmul.msk.bf16.gmra.mxu1 %vm221_vm1, %v2894_v17  ;;  %v1669_v23 = vld [vmem:[%s3143_s2 + $0x10] sm:$0xff]  ;;  %1702 = vperm.xlu0 %2232, %v1672_v47  }
 0x1b2   : > { %v1115_v13 = vadd.f32 %v1093_v8, %v939_v10  ;;  %1687 = vperm.xlu2 %2234, %v1669_v23  }
 0x1b3   : > { %2166 = vmatmul.msk.bf16.gmra.mxu0 %vm221_vm1, %v2867_v18 }
 0x1b4   : > { %v1105_v24 = vpop.f32.mrf.mxu1 }
 0x1b7   : > { %v919_v19 = vpop.f32.mrf.mxu2  ;;  %v2928_v30 = vpop.f32.mrf.mxu3 }
 0x1b8   : > { %v942_v4 = vadd.f32 %v919_v19, %v2767_v45  ;;  %v1071_v33 = vpop.f32.mrf.mxu0  ;;  %v1673_v45 = vld [vmem:[%s3143_s2 + $0x30] sm:$0xff] }
 0x1b9   : > { %v2906_v2 = vadd.f32 %v1071_v33, %v2807_v43  ;;  %1707 = vperm.xlu1 %2233, %v1673_v45  }
 0x1ba   : > { %v1118_v52 = vadd.f32 %v1095_v12, %v942_v4 }
 0x1bc   : > { %2134 = vmatmul.msk.bf16.gmra.mxu2 %vm221_vm1, %v2720_v22  ;;  %2138 = vmatmul.msk.bf16.gmra.mxu3 %vm221_vm1, %v2720_v22  ;;  %v1108_v5 = vpop.f32.mrf.mxu1  ;;  %v2926_v22 = vld [vmem:[%s3142_s1 + $0x118] sm:$0xff] }
 0x1bf   : > { %v922_v40 = vpop.f32.mrf.mxu2  ;;  %v2943_v0 = vpop.f32.mrf.mxu3 }
 0x1c0   : > { %v945_v56 = vadd.f32 %v922_v40, %v2785_v62  ;;  %v1074_v8 = vpop.f32.mrf.mxu0 }
 0x1c1   : > { %v2919_v43 = vadd.f32 %v1074_v8, %v2827_v60  ;;  %2172 = vmatmul.msk.bf16.gmra.mxu1 %vm221_vm1, %v2926_v22  ;;  %v1671_v60 = vld [vmem:[%s3143_s2 + $0x20] sm:$0xff] }
 0x1c2   : > { %v1121_v54 = vadd.f32 %v1098_v20, %v945_v56  ;;  %1697 = vperm.xlu2 %2234, %v1671_v60  }
 0x1c3   : > { %2167 = vmatmul.msk.bf16.gmra.mxu0 %vm221_vm1, %v2894_v17 }
 0x1c4   : > { %v1110_v12 = vpop.f32.mrf.mxu1 }
 0x1c7   : > { %v924_v62 = vpop.f32.mrf.mxu2  ;;  %v2956_v6 = vpop.f32.mrf.mxu3 }
 0x1c8   : > { %v948_v15 = vadd.f32 %v924_v62, %v2802_v1  ;;  %v1076_v49 = vpop.f32.mrf.mxu0 }
 0x1c9   : > { %v2937_v50 = vadd.f32 %v1076_v49, %v2849_v58 }
 0x1ca   : > { %v1124_v46 = vadd.f32 %v1100_v63, %v948_v15  ;;  %1712 = vperm.xlu2 %2234, %v1674_v34  }
 0x1cc   : > { %2135 = vmatmul.msk.bf16.gmra.mxu2 %vm221_vm1, %v2755_v39  ;;  %2139 = vmatmul.msk.bf16.gmra.mxu3 %vm221_vm1, %v2755_v39 }
 0x1cd   : > { %v2951_v58 = vpop.f32.mrf.mxu1 }
 0x1cf   : > { %v927_v38 = vpop.f32.mrf.mxu2 }
 0x1d0   : > { %v951_v55 = vadd.f32 %v927_v38, %v2819_v29  ;;  %v1079_v20 = vpop.f32.mrf.mxu0 }
 0x1d1   : > { %v2947_v1 = vadd.f32 %v1079_v20, %v2860_v61 }
 0x1d2   : > { %v1127_v27 = vadd.f32 %v1103_v11, %v951_v55  ;;  %v2970_v11 = vpop.f32.mrf.mxu3 }
 0x1d3   : > { %2168 = vmatmul.msk.bf16.gmra.mxu0 %vm221_vm1, %v2926_v22 }
 0x1d5   : > { %v2958_v29 = vpop.f32.mrf.mxu1 }
 0x1d7   : > { %v929_v25 = vpop.f32.mrf.mxu2 }
 0x1d8   : > { %v954_v37 = vadd.f32 %v929_v25, %v2843_v42  ;;  %v1081_v16 = vpop.f32.mrf.mxu0 }
 0x1d9   : > { %v2954_v39 = vadd.f32 %v1081_v16, %v959_v14 }
 0x1da   : > { %v1130_v63 = vadd.f32 %v1105_v24, %v954_v37 }
 0x1dc   : > { %2136 = vmatmul.msk.bf16.gmra.mxu2 %vm221_vm1, %v2795_v28  ;;  %2140 = vmatmul.msk.bf16.gmra.mxu3 %vm221_vm1, %v2795_v28 }
 0x1dd   : > { %v2972_v19 = vpop.f32.mrf.mxu1 }
 0x1df   : > { %v932_v61 = vpop.f32.mrf.mxu2 }
 0x1e0   : > { %v957_v42 = vadd.f32 %v932_v61, %v2855_v32  ;;  %v1270_v14 = vpop.f32.mrf.mxu0  ;;  %v2979_v32 = vpop.f32.mrf.mxu3 }
 0x1e1   : > { %v2968_v10 = vadd.f32 %v1270_v14, %v1115_v13 }
 0x1e2   : > { %v1133_v44 = vadd.f32 %v1108_v5, %v957_v42 }
 0x1e5   : > { %v2981_v13 = vpop.f32.mrf.mxu1 }
 0x1e7   : > { %v934_v47 = vpop.f32.mrf.mxu2 }
 0x1e8   : > { %v960_v23 = vadd.f32 %v934_v47, %v2876_v51  ;;  %v1272_v28 = vpop.f32.mrf.mxu0  ;;  %v2985_v8 = vpop.f32.mrf.mxu3 }
 0x1e9   : > { %v2975_v4 = vadd.f32 %v1272_v28, %v1118_v52 }
 0x1ea   : > { %v1136_v33 = vadd.f32 %v1110_v12, %v960_v23 }
 0x1ec   : > { %2173 = vmatmul.msk.bf16.vlgmr.msra.gmra.mxu2 %vm221_vm1, %v2834_v31 }
 0x1ed   : > { %v2989_v52 = vpop.f32.mrf.mxu1 }
 0x1ef   : > { %v1212_v24 = vpop.f32.mrf.mxu2 }
 0x1f0   : > { %v1275_v40 = vpop.f32.mrf.mxu0  ;;  %v2995_v15 = vpop.f32.mrf.mxu3 }
 0x1f1   : > { %v2983_v45 = vadd.f32 %v1275_v40, %v1121_v54 }
 0x1f5   : > { %v2997_v49 = vpop.f32.mrf.mxu1 }
 0x1f7   : > { %v1214_v56 = vpop.f32.mrf.mxu2 }
 0x1f8   : > { %v1277_v5 = vpop.f32.mrf.mxu0 }
 0x1f9   : > { %v2987_v51 = vadd.f32 %v1277_v5, %v1124_v46  ;;  %v1241_v46 = vpop.f32.mrf.mxu3 }
 0x1fc   : > { %2174 = vmatmul.msk.bf16.gmra.mxu2 %vm221_vm1, %v2867_v18 }
 0x1fd   : > { %v3005_v55 = vpop.f32.mrf.mxu1 }
 0x1ff   : > { %v1217_v31 = vpop.f32.mrf.mxu2 }
 0x200   : > { %v1280_v62 = vpop.f32.mrf.mxu0 }
 0x201   : > { %v2993_v60 = vadd.f32 %v1280_v62, %v1127_v27  ;;  %v1243_v25 = vpop.f32.mrf.mxu3  ;;  %v1291_v62 = vadd.f32 %v1241_v46, %v2858_v3 }
 0x205   : > { %v3013_v16 = vpop.f32.mrf.mxu1 }
 0x207   : > { %v2999_v54 = vpop.f32.mrf.mxu2 }
 0x208   : > { %v1282_v12 = vpop.f32.mrf.mxu0 }
 0x209   : > { %v3001_v38 = vadd.f32 %v1282_v12, %v1130_v63 }
 0x20b   : > { %3145 = vst [vmem:[#allocation2_spill] sm:$0xff] %v3001_v38 }
 0x20c   : > { %2175 = vmatmul.msk.bf16.gmra.mxu2 %vm221_vm1, %v2894_v17  ;;  %v1246_v17 = vpop.f32.mrf.mxu3 }
 0x20e   : > { %v1594_v14 = vpop.f32.mrf.mxu1 }
 0x20f   : > { %v3007_v18 = vpop.f32.mrf.mxu2 }
 0x210   : > { %v1285_v20 = vpop.f32.mrf.mxu0 }
 0x211   : > { %v3009_v27 = vadd.f32 %v1285_v20, %v1133_v44  ;;  %v1113_v44 = vadd.f32 %v2908_v48, %v2713_v26  ;;  %v3029_v20 = vpop.permute.xlu0 %1677 }
 0x213   : > { %3146 = vst [vmem:[#allocation3_spill] sm:$0xff] %v3009_v27  ;;  %v1290_v23 = vadd.f32 %v1212_v24, %v1113_v44 }
 0x214   : > { %v1248_v40 = vpop.f32.mrf.mxu3 }
 0x216   : > { %v1596_v5 = vpop.f32.mrf.mxu1 }
 0x217   : > { %v3011_v37 = vpop.f32.mrf.mxu2 }
 0x218   : > { %v1287_v61 = vpop.f32.mrf.mxu0 }
 0x219   : > { %v3015_v34 = vadd.f32 %v1287_v61, %v1136_v33  ;;  %v1466_v33 = vadd.f32 %v2951_v58, %v1290_v23 }
 0x21b   : > { %3147 = vst [vmem:[#allocation4_spill] sm:$0xff] %v3015_v34 }
 0x21c   : > { %2176 = vmatmul.msk.bf16.gmra.mxu2 %vm221_vm1, %v2926_v22  ;;  %v1116_v22 = vadd.f32 %v2928_v30, %v2732_v41  ;;  %v1251_v38 = vpop.f32.mrf.mxu3  ;;  %v1119_v41 = vadd.f32 %v2943_v0, %v2746_v53  ;;  %v1294_v30 = vadd.f32 %v1243_v25, %v2879_v9 }
 0x21e   : > { %v1293_v34 = vadd.f32 %v1214_v56, %v1116_v22  ;;  %v1599_v3 = vpop.f32.mrf.mxu1  ;;  %v1297_v22 = vadd.f32 %v1246_v17, %v2887_v36 }
 0x21f   : > { %v3019_v63 = vpop.f32.mrf.mxu2 }
 0x220   : > { %v1565_v42 = vpop.f32.mrf.mxu0  ;;  %v1469_v44 = vadd.f32 %v2958_v29, %v1293_v34  ;;  %v1296_v34 = vadd.f32 %v1217_v31, %v1119_v41 }
 0x221   : > { %v1643_v12 = vadd.f32 %v1565_v42, %v1466_v33 }
 0x223   : > { %v1715_v27 = vadd.f32 %v3029_v20, %v1643_v12 }
 0x225   : > { %v1739_v46 = vmax.f32 %v1715_v27, 0.0  ;;  %v1472_v27 = vadd.f32 %v2972_v19, %v1296_v34 }
 0x227   : > { %v3023_v47 = vpop.f32.mrf.mxu2 }
 0x228   : > { %v1567_v28 = vpop.f32.mrf.mxu0 }
 0x229   : > { %v1646_v42 = vadd.f32 %v1567_v28, %v1469_v44  ;;  %v1122_v28 = vadd.f32 %v2956_v6, %v2770_v21  ;;  %v1601_v44 = vpop.f32.mrf.mxu1  ;;  %v1125_v6 = vadd.f32 %v2970_v11, %v2788_v57  ;;  %v1128_v11 = vadd.f32 %v2979_v32, %v2805_v35 }
 0x22b   : > { %v1302_v34 = vadd.f32 %v3007_v18, %v1125_v6 }
 0x22d   : > { %v1478_v57 = vadd.f32 %v2989_v52, %v1302_v34 }
 0x22f   : > { %v1417_v61 = vpop.f32.mrf.mxu2 }
 0x230   : > { %v1467_v26 = vadd.f32 %v1417_v61, %v1291_v62  ;;  %v1570_v48 = vpop.f32.mrf.mxu0  ;;  %v1253_v62 = vpop.f32.mrf.mxu3 }
 0x231   : > { %v1649_v31 = vadd.f32 %v1570_v48, %v1472_v27  ;;  %v3052_v61 = vpop.permute.xlu2 %1687  ;;  %v1300_v48 = vadd.f32 %v1248_v40, %v2906_v2  ;;  %v1303_v40 = vadd.f32 %v1251_v38, %v2919_v43  ;;  %v1131_v38 = vadd.f32 %v2985_v8, %v2822_v7 }
 0x232   : > { %v1644_v24 = vadd.f32 %v1594_v14, %v1467_v26  ;;  %v3043_v14 = vpop.permute.xlu1 %1682 }
 0x233   : > { %v1718_v53 = vadd.f32 %v3043_v14, %v1646_v42  ;;  %v1721_v19 = vadd.f32 %v3052_v61, %v1649_v31 }
 0x234   : > { %v1716_v58 = vadd.f32 %v3029_v20, %v1644_v24 }
 0x235   : > { %v1742_v12 = vmax.f32 %v1718_v53, 0.0 }
 0x236   : > { %v1740_v56 = vmax.f32 %v1716_v58, 0.0 }
 0x237   : > { %v1419_v29 = vpop.f32.mrf.mxu2 }
 0x238   : > { %v1763_v23 = vpack.c.bf16 %v1740_v56, %v1739_v46  ;;  %v1470_v33 = vadd.f32 %v1419_v29, %v1294_v30  ;;  %v1572_v9 = vpop.f32.mrf.mxu0  ;;  %v1745_v46 = vmax.f32 %v1721_v19, 0.0  ;;  %v3082_v19 = vpop.permute.xlu0 %1702 }
 0x239   : > { %v3072_v27 = vpop.permute.xlu2 %1697 }
 0x23a   : > { %1779 = vst [vmem:[%s3041_s10] sm:$0xff] %v1763_v23  ;;  %v1647_v0 = vadd.f32 %v1596_v5, %v1470_v33  ;;  %v1299_v5 = vadd.f32 %v2999_v54, %v1122_v28  ;;  %v3062_v56 = vpop.permute.xlu1 %1692  ;;  %v1604_v33 = vpop.f32.mrf.mxu1 }
 0x23c   : > { %v1719_v25 = vadd.f32 %v3043_v14, %v1647_v0  ;;  %v1475_v21 = vadd.f32 %v2981_v13, %v1299_v5  ;;  %v1306_v5 = vadd.f32 %v1253_v62, %v2937_v50  ;;  %v1134_v62 = vadd.f32 %v2995_v15, %v2846_v59 }
 0x23e   : > { %v1743_v26 = vmax.f32 %v1719_v25, 0.0  ;;  %v1652_v42 = vadd.f32 %v1572_v9, %v1475_v21  ;;  %v1308_v21 = vadd.f32 %v3019_v63, %v1131_v38 }
 0x23f   : > { %v1422_v24 = vpop.f32.mrf.mxu2 }
 0x240   : > { %v1765_v58 = vpack.c.bf16 %v1743_v26, %v1742_v12  ;;  %v1473_v41 = vadd.f32 %v1422_v24, %v1297_v22  ;;  %v1575_v17 = vpop.f32.mrf.mxu0  ;;  %v1724_v53 = vadd.f32 %v3062_v56, %v1652_v42  ;;  %v1305_v12 = vadd.f32 %v3011_v37, %v1128_v11 }
 0x241   : > { %v1655_v18 = vadd.f32 %v1575_v17, %v1478_v57  ;;  %v1484_v7 = vadd.f32 %v3005_v55, %v1308_v21 }
 0x242   : > { %1782 = vst [vmem:[%s3041_s10 + $0xc] sm:$0xff] %v1765_v58  ;;  %v1650_v30 = vadd.f32 %v1599_v3, %v1473_v41  ;;  %v1256_v3 = vpop.f32.mrf.mxu3  ;;  %v1748_v9 = vmax.f32 %v1724_v53, 0.0  ;;  %v1606_v35 = vpop.f32.mrf.mxu1  ;;  %v1481_v43 = vadd.f32 %v2997_v49, %v1305_v12 }
 0x243   : > { %v1727_v52 = vadd.f32 %v3072_v27, %v1655_v18  ;;  %v1309_v42 = vadd.f32 %v1256_v3, %v2947_v1  ;;  %v3092_v34 = vpop.permute.xlu1 %1707 }
 0x244   : > { %v1722_v36 = vadd.f32 %v3052_v61, %v1650_v30 }
 0x245   : > { %v1751_v58 = vmax.f32 %v1727_v52, 0.0 }
 0x246   : > { %v1746_v54 = vmax.f32 %v1722_v36, 0.0 }
 0x247   : > { %v1424_v29 = vpop.f32.mrf.mxu2 }
 0x248   : > { %v1767_v23 = vpack.c.bf16 %v1746_v54, %v1745_v46  ;;  %v1476_v13 = vadd.f32 %v1424_v29, %v1300_v48  ;;  %v1577_v28 = vpop.f32.mrf.mxu0 }
 0x249   : > { %v1658_v37 = vadd.f32 %v1577_v28, %v1481_v43 }
 0x24a   : > { %1784 = vst [vmem:[%s3041_s10 + $0x18] sm:$0xff] %v1767_v23  ;;  %v1653_v0 = vadd.f32 %v1601_v44, %v1476_v13  ;;  %v1258_v24 = vpop.f32.mrf.mxu3  ;;  %v1609_v46 = vpop.f32.mrf.mxu1  ;;  %v1311_v13 = vadd.f32 %v3023_v47, %v1134_v62 }
 0x24b   : > { %v1730_v49 = vadd.f32 %v3082_v19, %v1658_v37  ;;  %v1312_v15 = vadd.f32 %v1258_v24, %v2954_v39 }
 0x24c   : > { %v1725_v2 = vadd.f32 %v3062_v56, %v1653_v0  ;;  %v1487_v59 = vadd.f32 %v3013_v16, %v1311_v13 }
 0x24d   : > { %v1754_v63 = vmax.f32 %v1730_v49, 0.0 }
 0x24e   : > { %v1749_v25 = vmax.f32 %v1725_v2, 0.0 }
 0x24f   : > { %v1427_v22 = vpop.f32.mrf.mxu2 }
 0x250   : > { %v1769_v31 = vpack.c.bf16 %v1749_v25, %v1748_v9  ;;  %v1479_v26 = vadd.f32 %v1427_v22, %v1303_v40  ;;  %v1580_v17 = vpop.f32.mrf.mxu0  ;;  %v3100_v40 = vpop.permute.xlu2 %1712 }
 0x251   : > { %v1661_v54 = vadd.f32 %v1580_v17, %v1484_v7 }
 0x252   : > { %1786 = vst [vmem:[%s3041_s10 + $0x24] sm:$0xff] %v1769_v31  ;;  %v1656_v44 = vadd.f32 %v1604_v33, %v1479_v26  ;;  %v1446_v8 = vpop.f32.mrf.mxu3  ;;  %v1611_v18 = vpop.f32.mrf.mxu1 }
 0x253   : > { %v1733_v55 = vadd.f32 %v3092_v34, %v1661_v54  ;;  %v1468_v39 = vadd.f32 %v1446_v8, %v2968_v10 }
 0x254   : > { %v1728_v32 = vadd.f32 %v3072_v27, %v1656_v44 }
 0x255   : > { %v1757_v2 = vmax.f32 %v1733_v55, 0.0 }
 0x256   : > { %v1752_v41 = vmax.f32 %v1728_v32, 0.0 }
 0x257   : > { %v1429_v30 = vpop.f32.mrf.mxu2 }
 0x258   : > { %v1771_v36 = vpack.c.bf16 %v1752_v41, %v1751_v58  ;;  %v1482_v6 = vadd.f32 %v1429_v30, %v1306_v5  ;;  %v1582_v57 = vpop.f32.mrf.mxu0 }
 0x259   : > { %v1664_v11 = vadd.f32 %v1582_v57, %v1487_v59 }
 0x25a   : > { %1788 = vst [vmem:[%s3041_s10 + $0x30] sm:$0xff] %v1771_v36  ;;  %v1659_v48 = vadd.f32 %v1606_v35, %v1482_v6  ;;  %v1448_v3 = vpop.f32.mrf.mxu3 }
 0x25b   : > { %v1736_v22 = vadd.f32 %v3100_v40, %v1664_v11  ;;  %v1471_v38 = vadd.f32 %v1448_v3, %v2975_v4  ;;  %v3150_v11 = vld [vmem:[#allocation4_spill] sm:$0xff] }
 0x25c   : > { %v1731_v50 = vadd.f32 %v3082_v19, %v1659_v48 }
 0x25d   : > { %v1760_v31 = vmax.f32 %v1736_v22, 0.0 }
 0x25e   : > { %v1755_v29 = vmax.f32 %v1731_v50, 0.0 }
 0x25f   : > { %v1432_v23 = vpop.f32.mrf.mxu2 }
 0x260   : > { %v1773_v33 = vpack.c.bf16 %v1755_v29, %v1754_v63  ;;  %v1485_v53 = vadd.f32 %v1432_v23, %v1309_v42  ;;  %v3148_v29 = vld [vmem:[#allocation2_spill] sm:$0xff] }
 0x262   : > { %1790 = vst [vmem:[%s3041_s10 + $0x3c] sm:$0xff] %v1773_v33  ;;  %v1662_v0 = vadd.f32 %v1609_v46, %v1485_v53  ;;  %v1451_v35 = vpop.f32.mrf.mxu3 }
 0x263   : > { %v1474_v21 = vadd.f32 %v1451_v35, %v2983_v45 }
 0x264   : > { %v1734_v1 = vadd.f32 %v3092_v34, %v1662_v0  ;;  %v3149_v0 = vld [vmem:[#allocation3_spill] sm:$0xff] }
 0x266   : > { %v1758_v47 = vmax.f32 %v1734_v1, 0.0 }
 0x267   : > { %v1434_v9 = vpop.f32.mrf.mxu2 }
 0x268   : > { %v1775_v25 = vpack.c.bf16 %v1758_v47, %v1757_v2  ;;  %v1488_v28 = vadd.f32 %v1434_v9, %v1312_v15 }
 0x26a   : > { %1792 = vst [vmem:[%s3041_s10 + $0x48] sm:$0xff] %v1775_v25  ;;  %v1665_v12 = vadd.f32 %v1611_v18, %v1488_v28  ;;  %v1453_v41 = vpop.f32.mrf.mxu3 }
 0x26b   : > { %v1477_v48 = vadd.f32 %v1453_v41, %v2987_v51 }
 0x26c   : > { %v1737_v16 = vadd.f32 %v3100_v40, %v1665_v12 }
 0x26e   : > { %v1761_v26 = vmax.f32 %v1737_v16, 0.0 }
 0x26f   : > { %v1623_v24 = vpop.f32.mrf.mxu2 }
 0x270   : > { %v1777_v52 = vpack.c.bf16 %v1761_v26, %v1760_v31  ;;  %v1645_v44 = vadd.f32 %v1623_v24, %v1468_v39 }
 0x272   : > { %1794 = vst [vmem:[%s3041_s10 + $0x54] sm:$0xff] %v1777_v52  ;;  %v1717_v43 = vadd.f32 %v3029_v20, %v1645_v44  ;;  %v1456_v49 = vpop.f32.mrf.mxu3 }
 0x273   : > { %v1480_v62 = vadd.f32 %v1456_v49, %v2993_v60 }
 0x274   : > { %v1741_v32 = vmax.f32 %v1717_v43, 0.0 }
 0x276   : > { %v1764_v5 = vpack.c.bf16 %v1741_v32, %v1741_v32 }
 0x277   : > { %v1625_v58 = vpop.f32.mrf.mxu2 }
 0x278   : > { %1781 = vst.msk [vmem:[%s3041_s10 + $0x8] sm:$0xf] %vm1780_vm5, %v1764_v5  ;;  %v1648_v10 = vadd.f32 %v1625_v58, %v1471_v38 }
 0x27a   : > { %v1720_v37 = vadd.f32 %v3043_v14, %v1648_v10  ;;  %v1458_v42 = vpop.f32.mrf.mxu3 }
 0x27b   : > { %v1483_v23 = vadd.f32 %v1458_v42, %v3148_v29 }
 0x27c   : > { %v1744_v30 = vmax.f32 %v1720_v37, 0.0 }
 0x27e   : > { %v1766_v36 = vpack.c.bf16 %v1744_v30, %v1744_v30 }
 0x27f   : > { %v1628_v6 = vpop.f32.mrf.mxu2 }
 0x280   : > { %1783 = vst.msk [vmem:[%s3041_s10 + $0x14] sm:$0xf] %vm1780_vm5, %v1766_v36  ;;  %v1651_v20 = vadd.f32 %v1628_v6, %v1474_v21 }
 0x282   : > { %v1723_v4 = vadd.f32 %v3052_v61, %v1651_v20  ;;  %v1461_v53 = vpop.f32.mrf.mxu3 }
 0x283   : > { %v1486_v57 = vadd.f32 %v1461_v53, %v3149_v0 }
 0x284   : > { %v1747_v17 = vmax.f32 %v1723_v4, 0.0 }
 0x286   : > { %v1768_v7 = vpack.c.bf16 %v1747_v17, %v1747_v17 }
 0x287   : > { %v1630_v8 = vpop.f32.mrf.mxu2 }
 0x288   : > { %1785 = vst.msk [vmem:[%s3041_s10 + $0x20] sm:$0xf] %vm1780_vm5, %v1768_v7  ;;  %v1654_v14 = vadd.f32 %v1630_v8, %v1477_v48 }
 0x28a   : > { %v1726_v45 = vadd.f32 %v3062_v56, %v1654_v14  ;;  %v1463_v3 = vpop.f32.mrf.mxu3 }
 0x28b   : > { %v1489_v47 = vadd.f32 %v1463_v3, %v3150_v11 }
 0x28c   : > { %v1750_v50 = vmax.f32 %v1726_v45, 0.0 }
 0x28e   : > { %v1770_v46 = vpack.c.bf16 %v1750_v50, %v1750_v50 }
 0x28f   : > { %v1633_v63 = vpop.f32.mrf.mxu2 }
 0x290   : > { %1787 = vst.msk [vmem:[%s3041_s10 + $0x2c] sm:$0xf] %vm1780_vm5, %v1770_v46  ;;  %v1657_v61 = vadd.f32 %v1633_v63, %v1480_v62 }
 0x292   : > { %v1729_v51 = vadd.f32 %v3072_v27, %v1657_v61 }
 0x294   : > { %v1753_v54 = vmax.f32 %v1729_v51, 0.0 }
 0x296   : > { %v1772_v13 = vpack.c.bf16 %v1753_v54, %v1753_v54 }
 0x297   : > { %v1635_v33 = vpop.f32.mrf.mxu2 }
 0x298   : > { %1789 = vst.msk [vmem:[%s3041_s10 + $0x38] sm:$0xf] %vm1780_vm5, %v1772_v13  ;;  %v1660_v56 = vadd.f32 %v1635_v33, %v1483_v23 }
 0x29a   : > { %v1732_v60 = vadd.f32 %v3082_v19, %v1660_v56 }
 0x29c   : > { %v1756_v55 = vmax.f32 %v1732_v60, 0.0 }
 0x29e   : > { %v1774_v59 = vpack.c.bf16 %v1756_v55, %v1756_v55 }
 0x29f   : > { %v1638_v1 = vpop.f32.mrf.mxu2 }
 0x2a0   : > { %1791 = vst.msk [vmem:[%s3041_s10 + $0x44] sm:$0xf] %vm1780_vm5, %v1774_v59  ;;  %v1663_v27 = vadd.f32 %v1638_v1, %v1486_v57 }
 0x2a2   : > { %v1735_v15 = vadd.f32 %v3092_v34, %v1663_v27 }
 0x2a4   : > { %v1759_v2 = vmax.f32 %v1735_v15, 0.0 }
 0x2a6   : > { %v1776_v9 = vpack.c.bf16 %v1759_v2, %v1759_v2 }
 0x2a7   : > { %v1640_v18 = vpop.f32.mrf.mxu2 }
 0x2a8   : > { %1793 = vst.msk [vmem:[%s3041_s10 + $0x50] sm:$0xf] %vm1780_vm5, %v1776_v9  ;;  %v1666_v19 = vadd.f32 %v1640_v18, %v1489_v47 }
 0x2aa   : > { %v1738_v25 = vadd.f32 %v3100_v40, %v1666_v19 }
 0x2ac   : > { %v1762_v28 = vmax.f32 %v1738_v25, 0.0 }
 0x2ae   : > { %v1778_v22 = vpack.c.bf16 %v1762_v28, %v1762_v28 }
 0x2b0   : > { %1795 = vst.msk [vmem:[%s3041_s10 + $0x5c] sm:$0xf] %vm1780_vm5, %v1778_v22 }
 0x2b1 PF: > { %s13_s12 = sadd.s32 1, %s2241_s12  }
 0x2b2   : > { %p10_p4 = scmp.ge.s32.totalorder %s13_s12, 4  }
 0x2b4   :  { %12 = sbr.rel (!%p10_p4) target bundleno = 1 (0x1), region = 73 }

// kernel: skip_fcn_cct_forward.20
= control target key start
LH: loop header
LB: loop body
LE: loop exit
PB: predicated region body
PF: predicated region fallthrough
CT: control target
= control target key end

     0   :  { %s928_s21 = smov 0   ;;  %s1209_s0 = inlined_call_operand.vmem [shape: bf16[128,64], index: 0, kind: input, shape index: {}]   ;;  %s1210_s1 = inlined_call_operand.vmem [shape: f32[1,64], index: 1, kind: input, shape index: {}]   ;;  %s1211_s2 = inlined_call_operand.vmem [shape: f32[1,64], index: 2, kind: input, shape index: {}]   ;;  %s1212_s3 = inlined_call_operand.vmem [shape: bf16[64,256], index: 3, kind: input, shape index: {}]   ;;  %s1213_s4 = inlined_call_operand.vmem [shape: f32[1,256], index: 4, kind: input, shape index: {}]   ;;  %s1214_s5 = inlined_call_operand.vmem [shape: bf16[128,256], index: 5, kind: output, shape index: {0}]   ;;  %s1215_s6 = inlined_call_operand.vmem [shape: bf16[128,64], index: 6, kind: output, shape index: {1}]  }
   0x1 LB: > { %s765_s22 = sadd.s32 4294967295, %s890_s21   ;;  %p769_p0 = scmp.ge.s32.totalorder %s890_s21, 1  ;;  %s890_s21 = sphi %s928_s21, %s17_s21  }
   0x2   : > { %p216_p1 = scmp.lt.s32.totalorder %s890_s21, 3 }
   0x4   : > { %p217_p2 = pnand %p769_p0, %p216_p1 }
   0x5   : > { %s770_s23 = sshll.u32 (!%p217_p2), %s765_s22, 3 }
   0x6   : > { %220 = sbr.rel (%p217_p2) target bundleno = 460 (0x1cc), region = 40  ;;  %p253_p3 = scmp.lt.s32.totalorder (!%p217_p2), %s770_s23, 15 }
   0xb   : > { %s1221_s23 = smov (!%p253_p3, %s770_s23), 15  ;;  %vm290_vm0 = vcmask 523264   ;;  %v892_v20 = vmov 64.0  }
   0xc   : > { %s771_s24 = sshll.u32 %s1221_s23, 2  ;;  %866 = vrcp.f32 %v892_v20  ;;  %s819_s26 = sshll.u32 %s1221_s23, 3 }
   0xd   : > { %s256_s27 = scalar_lea.vmem %s1209_s0, %s771_s24  ;;  %s1117_s22 = scalar_lea.vmem %s1215_s6, %s771_s24 }
   0xe   : > { %v846_v0 = vld [vmem:[%s256_s27 + $0x18] sm:$0xff]   ;;  %v845_v1 = vld [vmem:[%s256_s27 + $0x10] sm:$0xff]   ;;  %v829_v2 = vld [vmem:[%s256_s27] sm:$0xff]   ;;  %s1196_s29 = scalar_lea.vmem %s1214_s5, %s819_s26 }
   0xf   : > { %v842_v3 = vunpack.c.l.bf16 %v846_v0  ;;  %v838_v4 = vunpack.c.l.bf16 %v845_v1  ;;  %v830_v5 = vunpack.c.l.bf16 %v829_v2  ;;  %v843_v9 = vunpack.c.h.bf16 %v846_v0  ;;  %v844_v15 = vld [vmem:[%s256_s27 + $0x8] sm:$0xff]  }
  0x10   : > { %v839_v10 = vunpack.c.h.bf16 %v845_v1  ;;  %v831_v11 = vunpack.c.h.bf16 %v829_v2  ;;  %v834_v16 = vunpack.c.l.bf16 %v844_v15  ;;  %v835_v17 = vunpack.c.h.bf16 %v844_v15 }
  0x11   : > { %v309_v6 = vsel %vm290_vm0, %v842_v3, 0.0  ;;  %v303_v7 = vsel %vm290_vm0, %v838_v4, 0.0  ;;  %v291_v8 = vsel %vm290_vm0, %v830_v5, 0.0  ;;  %v312_v12 = vsel %vm290_vm0, %v843_v9, 0.0 }
  0x12   : > { %310 = vadd.xlane.f32.xlu2 %v309_v6  ;;  %304 = vadd.xlane.f32.xlu0 %v303_v7  ;;  %v306_v13 = vsel %vm290_vm0, %v839_v10, 0.0  ;;  %v294_v14 = vsel %vm290_vm0, %v831_v11, 0.0  ;;  %v297_v18 = vsel %vm290_vm0, %v834_v16, 0.0  ;;  %v300_v19 = vsel %vm290_vm0, %v835_v17, 0.0  ;;  %v867_v21 = vpop.eup %866  ;;  %v805_v7 = vld [vmem:[%s1212_s3 + $0x38] sm:$0xf0] }
  0x13   : > { %292 = vadd.xlane.f32.xlu1 %v291_v8  ;;  %v316_v22 = vmul.f32 64.0, %v867_v21  ;;  %vm320_vm1 = vweird.f32 %v867_v21 }
  0x15   : > { %v317_v23 = vsub.f32 1.0, %v316_v22  ;;  %v823_v22 = vld [vmem:[%s1212_s3 + $0x14] sm:$0xf0] }
  0x17   : > { %v318_v24 = vmul.f32 %v867_v21, %v317_v23 }
  0x19   : > { %v319_v25 = vadd.f32 %v867_v21, %v318_v24  ;;  %v822_v24 = vld [vmem:[%s1212_s3 + $0x14] sm:$0xf] }
  0x1a   : > { %313 = vadd.xlane.f32.xlu2 %v312_v12  ;;  %307 = vadd.xlane.f32.xlu0 %v306_v13  ;;  %v824_v12 = vld [vmem:[%s1212_s3 + $0x24] sm:$0xf] }
  0x1b   : > { %295 = vadd.xlane.f32.xlu1 %v294_v14  ;;  %v952_v26 = vsel %vm320_vm1, %v867_v21, %v319_v25  ;;  %v787_v21 = vld [vmem:[%s1212_s3 + $0x10] sm:$0xf]  ;;  %v789_v25 = vld [vmem:[%s1212_s3 + $0x18] sm:$0xf0]  ;;  %vm664_vm1 = vcmask 519168  }
  0x1c   : > { %v788_v23 = vor.u32 %v823_v22, %v787_v21 }
  0x22   : > { %298 = vadd.xlane.f32.xlu0 %v297_v18 }
  0x23   : > { %301 = vadd.xlane.f32.xlu1 %v300_v19 }
  0x85   : > { %v311_v27 = vpop.xlane.xlu2 %310  ;;  %v305_v28 = vpop.xlane.xlu0 %304 }
  0x86   : > { %v326_v29 = vmul.f32 %v952_v26, %v305_v28  ;;  %v293_v30 = vpop.xlane.xlu1 %292  ;;  %v328_v40 = vmul.f32 %v952_v26, %v311_v27  ;;  %v792_v27 = vor.u32 %v822_v24, %v789_v25 }
  0x87   : > { %v322_v31 = vmul.f32 %v952_v26, %v293_v30  ;;  %v821_v30 = vld [vmem:[%s1212_s3 + $0x4] sm:$0xf0] }
  0x88   : > { %v956_v32 = vsub.f32 %v838_v4, %v326_v29  ;;  %v976_v48 = vsub.f32 %v842_v3, %v328_v40  ;;  %v803_v3 = vld [vmem:[%s1212_s3 + $0x30] sm:$0xf]  ;;  %v827_v4 = vld [vmem:[%s1212_s3 + $0x34] sm:$0xf0]  ;;  %v779_v29 = vld [vmem:[%s1212_s3] sm:$0xf] }
  0x89   : > { %v958_v33 = vsub.f32 %v830_v5, %v322_v31  ;;  %v826_v5 = vld [vmem:[%s1212_s3 + $0x34] sm:$0xf]  ;;  %v804_v6 = vor.u32 %v827_v4, %v803_v3  ;;  %v820_v31 = vld [vmem:[%s1212_s3 + $0x4] sm:$0xf] }
  0x8a   : > { %v342_v34 = vmul.f32 %v956_v32, %v956_v32  ;;  %v344_v57 = vmul.f32 %v976_v48, %v976_v48  ;;  %v808_v8 = vor.u32 %v826_v5, %v805_v7 }
  0x8b   : > { %v338_v35 = vmul.f32 %v958_v33, %v958_v33  ;;  %594 = vmatpush.bf16.msra.mxu0 %v804_v6  ;;  %847 = vmatpush.bf16.msra.mxu2 %v804_v6 }
  0x8c   : > { %v358_v36 = vsel %vm290_vm0, %v342_v34, 0.0  ;;  %v364_v61 = vsel %vm290_vm0, %v344_v57, 0.0  ;;  %623 = vmatpush.bf16.msra.mxu1 %v808_v8  ;;  %851 = vmatpush.bf16.msra.mxu3 %v808_v8 }
  0x8d   : > { %v314_v37 = vpop.xlane.xlu2 %313  ;;  %359 = vadd.xlane.f32.xlu2 %v358_v36  ;;  %v308_v38 = vpop.xlane.xlu0 %307  ;;  %v346_v39 = vsel %vm290_vm0, %v338_v35, 0.0 }
  0x8e   : > { %v329_v41 = vmul.f32 %v952_v26, %v314_v37  ;;  %v327_v42 = vmul.f32 %v952_v26, %v308_v38  ;;  %347 = vadd.xlane.f32.xlu1 %v346_v39  ;;  %v296_v43 = vpop.xlane.xlu1 %295  ;;  %v780_v37 = vor.u32 %v821_v30, %v779_v29  ;;  %v781_v38 = vld [vmem:[%s1212_s3 + $0x8] sm:$0xf0] }
  0x8f   : > { %v323_v44 = vmul.f32 %v952_v26, %v296_v43 }
  0x90   : > { %v970_v45 = vsub.f32 %v843_v9, %v329_v41  ;;  %v972_v46 = vsub.f32 %v839_v10, %v327_v42  ;;  %v795_v10 = vld [vmem:[%s1212_s3 + $0x20] sm:$0xf]  ;;  %v784_v41 = vor.u32 %v820_v31, %v781_v38 }
  0x91   : > { %v974_v47 = vsub.f32 %v831_v11, %v323_v44  ;;  %v825_v11 = vld [vmem:[%s1212_s3 + $0x24] sm:$0xf0] }
  0x92   : > { %v343_v49 = vmul.f32 %v972_v46, %v972_v46  ;;  %v345_v50 = vmul.f32 %v970_v45, %v970_v45  ;;  %v796_v15 = vor.u32 %v825_v11, %v795_v10  ;;  %v1087_v10 = vld [vmem:[%s1210_s1] ss:$0 sm:$0xff] }
  0x93   : > { %v339_v51 = vmul.f32 %v974_v47, %v974_v47 }
  0x94   : > { %v361_v52 = vsel %vm290_vm0, %v343_v49, 0.0  ;;  %v367_v53 = vsel %vm290_vm0, %v345_v50, 0.0  ;;  %595 = vmatpush.bf16.msra.mxu0 %v796_v15  ;;  %848 = vmatpush.bf16.msra.mxu2 %v796_v15 }
  0x95   : > { %362 = vadd.xlane.f32.xlu0 %v361_v52  ;;  %v299_v54 = vpop.xlane.xlu0 %298  ;;  %v349_v55 = vsel %vm290_vm0, %v339_v51, 0.0 }
  0x96   : > { %v324_v56 = vmul.f32 %v952_v26, %v299_v54  ;;  %368 = vadd.xlane.f32.xlu1 %v367_v53  ;;  %350 = vadd.xlane.f32.xlu2 %v349_v55  ;;  %v302_v58 = vpop.xlane.xlu1 %301 }
  0x97   : > { %v325_v59 = vmul.f32 %v952_v26, %v302_v58 }
  0x98   : > { %v991_v60 = vsub.f32 %v834_v16, %v324_v56  ;;  %v797_v16 = vld [vmem:[%s1212_s3 + $0x28] sm:$0xf0]  ;;  %596 = vmatpush.bf16.msra.mxu0 %v788_v23  ;;  %849 = vmatpush.bf16.msra.mxu2 %v788_v23 }
  0x99   : > { %v996_v63 = vsub.f32 %v835_v17, %v325_v59  ;;  %v800_v18 = vor.u32 %v824_v12, %v797_v16 }
  0x9a   : > { %v340_v62 = vmul.f32 %v991_v60, %v991_v60 }
  0x9b   : > { %v341_v1 = vmul.f32 %v996_v63, %v996_v63  ;;  %624 = vmatpush.bf16.msra.mxu1 %v800_v18  ;;  %852 = vmatpush.bf16.msra.mxu3 %v800_v18 }
  0x9c   : > { %v352_v0 = vsel %vm290_vm0, %v340_v62, 0.0  ;;  %597 = vmatpush.bf16.msra.mxu0 %v780_v37  ;;  %850 = vmatpush.bf16.msra.mxu2 %v780_v37 }
  0x9d   : > { %365 = vadd.xlane.f32.xlu0 %v364_v61  ;;  %v355_v2 = vsel %vm290_vm0, %v341_v1, 0.0 }
  0x9e   : > { %353 = vadd.xlane.f32.xlu2 %v352_v0 }
  0x9f   : > { %625 = vmatpush.bf16.msra.mxu1 %v792_v27  ;;  %853 = vmatpush.bf16.msra.mxu3 %v792_v27 }
  0xa3   : > { %626 = vmatpush.bf16.msra.mxu1 %v784_v41  ;;  %854 = vmatpush.bf16.msra.mxu3 %v784_v41 }
  0xa5   : > { %356 = vadd.xlane.f32.xlu0 %v355_v2 }
 0x100   : > { %v360_v9 = vpop.xlane.xlu2 %359 }
 0x101   : > { %v374_v13 = vmul.f32 %v360_v9, %v952_v26  ;;  %v348_v14 = vpop.xlane.xlu1 %347 }
 0x102   : > { %v370_v17 = vmul.f32 %v348_v14, %v952_v26 }
 0x103   : > { %v1028_v19 = vadd.f32 1e-05, %v374_v13 }
 0x104   : > { %v1030_v20 = vadd.f32 1e-05, %v370_v17  ;;  %v1099_v17 = vld [vmem:[%s1211_s2] ss:$0 sm:$0xff] }
 0x105   : > { %868 = vrsqrt.f32 %v1028_v19  ;;  %vm432_vm5 = vweird.f32 %v1028_v19 }
 0x106   : > { %870 = vrsqrt.f32 %v1030_v20  ;;  %vm392_vm3 = vweird.f32 %v1030_v20 }
 0x108   : > { %v363_v28 = vpop.xlane.xlu0 %362 }
 0x109   : > { %v375_v34 = vmul.f32 %v363_v28, %v952_v26  ;;  %v351_v35 = vpop.xlane.xlu2 %350  ;;  %v369_v36 = vpop.xlane.xlu1 %368 }
 0x10a   : > { %v371_v39 = vmul.f32 %v351_v35, %v952_v26  ;;  %v377_v40 = vmul.f32 %v369_v36, %v952_v26 }
 0x10b   : > { %v869_v42 = vpop.eup %868  ;;  %v1061_v43 = vadd.f32 1e-05, %v375_v34 }
 0x10c   : > { %v871_v44 = vpop.eup %870  ;;  %v427_v49 = vmul.f32 %v869_v42, %v1028_v19  ;;  %v1064_v50 = vadd.f32 1e-05, %v371_v39  ;;  %v1066_v51 = vadd.f32 1e-05, %v377_v40  ;;  %vm433_vm2 = vweird.f32 %v869_v42 }
 0x10d   : > { %v387_v52 = vmul.f32 %v871_v44, %v1030_v20  ;;  %872 = vrsqrt.f32 %v1061_v43  ;;  %vm393_vm4 = vweird.f32 %v871_v44  ;;  %vm434_vm6 = vmor %vm432_vm5, %vm433_vm2  ;;  %vm442_vm7 = vweird.f32 %v1061_v43 }
 0x10e   : > { %v428_v53 = vmul.f32 %v869_v42, %v427_v49  ;;  %874 = vrsqrt.f32 %v1064_v50  ;;  %vm394_vm8 = vmor %vm392_vm3, %vm393_vm4  ;;  %vm402_vm9 = vweird.f32 %v1064_v50  ;;  %vm462_vm10 = vweird.f32 %v1066_v51 }
 0x10f   : > { %v388_v54 = vmul.f32 %v871_v44, %v387_v52  ;;  %876 = vrsqrt.f32 %v1066_v51 }
 0x110   : > { %v429_v55 = vmul.f32 0.5, %v428_v53  ;;  %v366_v56 = vpop.xlane.xlu0 %365 }
 0x111   : > { %v389_v57 = vmul.f32 0.5, %v388_v54  ;;  %v376_v58 = vmul.f32 %v366_v56, %v952_v26  ;;  %v354_v59 = vpop.xlane.xlu2 %353 }
 0x112   : > { %v430_v61 = vsub.f32 1.5, %v429_v55  ;;  %v372_v62 = vmul.f32 %v354_v59, %v952_v26 }
 0x113   : > { %v873_v0 = vpop.eup %872  ;;  %v390_v1 = vsub.f32 1.5, %v389_v57  ;;  %v1075_v2 = vadd.f32 1e-05, %v376_v58 }
 0x114   : > { %v875_v3 = vpop.eup %874  ;;  %v431_v4 = vmul.f32 %v869_v42, %v430_v61  ;;  %v437_v5 = vmul.f32 %v873_v0, %v1061_v43  ;;  %v1079_v6 = vadd.f32 1e-05, %v372_v62  ;;  %vm443_vm11 = vweird.f32 %v873_v0 }
 0x115   : > { %v877_v7 = vpop.eup %876  ;;  %v391_v8 = vmul.f32 %v871_v44, %v390_v1  ;;  %v397_v9 = vmul.f32 %v875_v3, %v1064_v50  ;;  %878 = vrsqrt.f32 %v1075_v2  ;;  %vm403_vm13 = vweird.f32 %v875_v3  ;;  %vm444_vm14 = vmor %vm442_vm7, %vm443_vm11 }
 0x116   : > { %v435_v11 = vsel %vm434_vm6, %v869_v42, %v431_v4  ;;  %v438_v12 = vmul.f32 %v873_v0, %v437_v5  ;;  %v457_v13 = vmul.f32 %v877_v7, %v1066_v51  ;;  %880 = vrsqrt.f32 %v1079_v6  ;;  %vm404_vm2 = vmor %vm402_vm9, %vm403_vm13 }
 0x117   : > { %v470_v14 = vmul.f32 %v435_v11, %v956_v32  ;;  %v395_v15 = vsel %vm394_vm8, %v871_v44, %v391_v8  ;;  %v398_v16 = vmul.f32 %v875_v3, %v397_v9  ;;  %vm463_vm12 = vweird.f32 %v877_v7 }
 0x118   : > { %v466_v18 = vmul.f32 %v395_v15, %v958_v33  ;;  %v439_v19 = vmul.f32 0.5, %v438_v12  ;;  %v458_v20 = vmul.f32 %v877_v7, %v457_v13  ;;  %v357_v21 = vpop.xlane.xlu0 %356  ;;  %vm1121_vm15 = vmor %vm462_vm10, %vm463_vm12  ;;  %vm412_vm4 = vweird.f32 %v1079_v6 }
 0x119   : > { %v399_v22 = vmul.f32 0.5, %v398_v16  ;;  %v373_v32 = vmul.f32 %v357_v21, %v952_v26  ;;  %v481_v23 = vmul.f32 %v1087_v10, %v470_v14  ;;  %vm452_vm6 = vweird.f32 %v1075_v2 }
 0x11a   : > { %v440_v24 = vsub.f32 1.5, %v439_v19  ;;  %v459_v25 = vmul.f32 0.5, %v458_v20  ;;  %v477_v27 = vmul.f32 %v1087_v10, %v466_v18 }
 0x11b   : > { %v879_v28 = vpop.eup %878  ;;  %v400_v29 = vsub.f32 1.5, %v399_v22  ;;  %v1106_v33 = vadd.f32 1e-05, %v373_v32  ;;  %v492_v30 = vadd.f32 %v1099_v17, %v481_v23 }
 0x11c   : > { %v441_v31 = vmul.f32 %v873_v0, %v440_v24  ;;  %v460_v34 = vsub.f32 1.5, %v459_v25  ;;  %v447_v26 = vmul.f32 %v879_v28, %v1075_v2  ;;  %v488_v37 = vadd.f32 %v1099_v17, %v477_v27  ;;  %v881_v38 = vpop.eup %880 }
 0x11d   : > { %v401_v35 = vmul.f32 %v875_v3, %v400_v29  ;;  %882 = vrsqrt.f32 %v1106_v33  ;;  %v500_v42 = vpack.c.bf16 %v492_v30, %v492_v30  ;;  %v407_v49 = vmul.f32 %v881_v38, %v1079_v6 }
 0x11e   : > { %v445_v39 = vsel %vm444_vm14, %v873_v0, %v441_v31  ;;  %v461_v40 = vmul.f32 %v877_v7, %v460_v34  ;;  %v448_v41 = vmul.f32 %v879_v28, %v447_v26  ;;  %v496_v54 = vpack.c.bf16 %v488_v37, %v488_v37 }
 0x11f   : > { %v471_v43 = vmul.f32 %v445_v39, %v972_v46  ;;  %v405_v44 = vsel %vm404_vm2, %v875_v3, %v401_v35  ;;  %669 = vst.msk [vmem:[%s1117_s22 + $0x10] sm:$0xf] %vm664_vm1, %v500_v42  ;;  %v408_v55 = vmul.f32 %v881_v38, %v407_v49  ;;  %vm453_vm3 = vweird.f32 %v879_v28 }
 0x120   : > { %v467_v51 = vmul.f32 %v405_v44, %v974_v47  ;;  %v465_v52 = vsel %vm1121_vm15, %v877_v7, %v461_v40  ;;  %v449_v53 = vmul.f32 0.5, %v448_v41  ;;  %665 = vst.msk [vmem:[%s1117_s22] sm:$0xf] %vm664_vm1, %v496_v54  ;;  %vm413_vm5 = vweird.f32 %v881_v38  ;;  %vm454_vm7 = vmor %vm452_vm6, %vm453_vm3 }
 0x121   : > { %v473_v50 = vmul.f32 %v465_v52, %v970_v45  ;;  %v482_v56 = vmul.f32 %v1087_v10, %v471_v43  ;;  %v409_v58 = vmul.f32 0.5, %v408_v55  ;;  %vm1151_vm8 = vmor %vm412_vm4, %vm413_vm5  ;;  %v530_v9 = vunpack.c.l.b16 %v500_v42 }
 0x122   : > { %v450_v57 = vsub.f32 1.5, %v449_v53  ;;  %v478_v46 = vmul.f32 %v1087_v10, %v467_v51  ;;  %v526_v16 = vunpack.c.l.b16 %v496_v54  ;;  %vm422_vm9 = vweird.f32 %v1106_v33 }
 0x123   : > { %v883_v47 = vpop.eup %882  ;;  %v493_v59 = vadd.f32 %v1099_v17, %v482_v56  ;;  %v484_v61 = vmul.f32 %v1087_v10, %v473_v50  ;;  %v410_v1 = vsub.f32 1.5, %v409_v58 }
 0x124   : > { %v451_v62 = vmul.f32 %v879_v28, %v450_v57  ;;  %v417_v45 = vmul.f32 %v883_v47, %v1106_v33  ;;  %v489_v0 = vadd.f32 %v1099_v17, %v478_v46  ;;  %vm423_vm10 = vweird.f32 %v883_v47 }
 0x125   : > { %v501_v3 = vpack.c.bf16 %v493_v59, %v493_v59  ;;  %v495_v4 = vadd.f32 %v1099_v17, %v484_v61  ;;  %v411_v12 = vmul.f32 %v881_v38, %v410_v1  ;;  %vm424_vm11 = vmor %vm422_vm9, %vm423_vm10 }
 0x126   : > { %v455_v5 = vsel %vm454_vm7, %v879_v28, %v451_v62  ;;  %v418_v8 = vmul.f32 %v883_v47, %v417_v45  ;;  %v497_v2 = vpack.c.bf16 %v489_v0, %v489_v0 }
 0x127   : > { %v472_v11 = vmul.f32 %v455_v5, %v976_v48  ;;  %v531_v13 = vunpack.c.l.b16 %v501_v3  ;;  %670 = vst.msk [vmem:[%s1117_s22 + $0x14] sm:$0xf] %vm664_vm1, %v501_v3  ;;  %v503_v14 = vpack.c.bf16 %v495_v4, %v495_v4  ;;  %v415_v6 = vsel %vm1151_vm8, %v881_v38, %v411_v12 }
 0x128   : > { %v419_v15 = vmul.f32 0.5, %v418_v8  ;;  %v527_v18 = vunpack.c.l.b16 %v497_v2  ;;  %666 = vst.msk [vmem:[%s1117_s22 + $0x4] sm:$0xf] %vm664_vm1, %v497_v2  ;;  %v468_v48 = vmul.f32 %v415_v6, %v991_v60 }
 0x129   : > { %v536_v19 = vpack.c.b16 %v531_v13, %v530_v9  ;;  %v483_v20 = vmul.f32 %v1087_v10, %v472_v11  ;;  %672 = vst.msk [vmem:[%s1117_s22 + $0x1c] sm:$0xf] %vm664_vm1, %v503_v14  ;;  %v533_v36 = vunpack.c.l.b16 %v503_v14 }
 0x12a   : > { %v420_v21 = vsub.f32 1.5, %v419_v15  ;;  %v534_v22 = vpack.c.b16 %v527_v18, %v526_v16  ;;  %v479_v24 = vmul.f32 %v1087_v10, %v468_v48 }
 0x12b   : > { %811 = vmatmul.msk.bf16.vlgmr.msra.gmra.mxu2 %vm290_vm0, %v536_v19  ;;  %815 = vmatmul.msk.bf16.vlgmr.msra.gmra.mxu3 %vm290_vm0, %v536_v19  ;;  %v494_v32 = vadd.f32 %v1099_v17, %v483_v20 }
 0x12c   : > { %v421_v23 = vmul.f32 %v883_v47, %v420_v21  ;;  %809 = vmatmul.msk.bf16.vlgmr.msra.gmra.mxu0 %vm290_vm0, %v534_v22  ;;  %813 = vmatmul.msk.bf16.vlgmr.msra.gmra.mxu1 %vm290_vm0, %v534_v22  ;;  %v490_v27 = vadd.f32 %v1099_v17, %v479_v24 }
 0x12d   : > { %v502_v60 = vpack.c.bf16 %v494_v32, %v494_v32 }
 0x12e   : > { %v425_v25 = vsel %vm424_vm11, %v883_v47, %v421_v23  ;;  %v498_v29 = vpack.c.bf16 %v490_v27, %v490_v27 }
 0x12f   : > { %v469_v28 = vmul.f32 %v425_v25, %v996_v63  ;;  %671 = vst.msk [vmem:[%s1117_s22 + $0x18] sm:$0xf] %vm664_vm1, %v502_v60  ;;  %v532_v26 = vunpack.c.l.b16 %v502_v60  ;;  %v512_v63 = vld [vmem:[%s1213_s4] sm:$0x3] }
 0x130   : > { %667 = vst.msk [vmem:[%s1117_s22 + $0x8] sm:$0xf] %vm664_vm1, %v498_v29  ;;  %v528_v33 = vunpack.c.l.b16 %v498_v29 }
 0x131   : > { %v480_v30 = vmul.f32 %v1087_v10, %v469_v28  ;;  %v537_v38 = vpack.c.b16 %v533_v36, %v532_v26  ;;  %v514_v10 = vperm.slane %v512_v63, 0 }
 0x133   : > { %v491_v31 = vadd.f32 %v1099_v17, %v480_v30  ;;  %v515_v17 = vperm.slane %v512_v63, 1 }
 0x135   : > { %v499_v34 = vpack.c.bf16 %v491_v31, %v491_v31 }
 0x137   : > { %v529_v35 = vunpack.c.l.b16 %v499_v34  ;;  %668 = vst.msk [vmem:[%s1117_s22 + $0xc] sm:$0xf] %vm664_vm1, %v499_v34 }
 0x139   : > { %v535_v37 = vpack.c.b16 %v529_v35, %v528_v33 }
 0x13b   : > { %812 = vmatmul.msk.bf16.gmra.mxu2 %vm290_vm0, %v537_v38  ;;  %816 = vmatmul.msk.bf16.gmra.mxu3 %vm290_vm0, %v537_v38 }
 0x13c   : > { %810 = vmatmul.msk.bf16.gmra.mxu0 %vm290_vm0, %v535_v37  ;;  %814 = vmatmul.msk.bf16.gmra.mxu1 %vm290_vm0, %v535_v37 }
 0x1a9   : > { %v599_v39 = vpop.f32.mrf.mxu0  ;;  %v628_v40 = vpop.f32.mrf.mxu1 }
 0x1aa   : > { %v600_v41 = vadd.f32 %v599_v39, %v514_v10  ;;  %v629_v42 = vadd.f32 %v628_v40, %v515_v17 }
 0x1ac   : > { %v648_v43 = vpack.c.bf16 %v629_v42, %v600_v41 }
 0x1ae   : > { %656 = vst [vmem:[%s1196_s29] sm:$0xff] %v648_v43  ;;  %v609_v44 = vpop.f32.mrf.mxu2  ;;  %v638_v49 = vpop.f32.mrf.mxu3 }
 0x1af   : > { %v610_v51 = vadd.f32 %v609_v44, %v514_v10  ;;  %v639_v52 = vadd.f32 %v638_v49, %v515_v17 }
 0x1b1   : > { %v652_v53 = vpack.c.bf16 %v639_v52, %v610_v51  ;;  %v601_v54 = vpop.f32.mrf.mxu0  ;;  %v630_v50 = vpop.f32.mrf.mxu1 }
 0x1b2   : > { %v602_v55 = vadd.f32 %v601_v54, %v514_v10  ;;  %v631_v56 = vadd.f32 %v630_v50, %v515_v17 }
 0x1b3   : > { %660 = vst [vmem:[%s1196_s29 + $0x20] sm:$0xff] %v652_v53 }
 0x1b4   : > { %v649_v57 = vpack.c.bf16 %v631_v56, %v602_v55 }
 0x1b6   : > { %657 = vst [vmem:[%s1196_s29 + $0x8] sm:$0xff] %v649_v57  ;;  %v611_v46 = vpop.f32.mrf.mxu2  ;;  %v640_v47 = vpop.f32.mrf.mxu3 }
 0x1b7   : > { %v612_v58 = vadd.f32 %v611_v46, %v514_v10  ;;  %v641_v59 = vadd.f32 %v640_v47, %v515_v17 }
 0x1b9   : > { %v653_v61 = vpack.c.bf16 %v641_v59, %v612_v58  ;;  %v604_v62 = vpop.f32.mrf.mxu0  ;;  %v633_v45 = vpop.f32.mrf.mxu1 }
 0x1ba   : > { %v605_v0 = vadd.f32 %v604_v62, %v514_v10  ;;  %v634_v1 = vadd.f32 %v633_v45, %v515_v17 }
 0x1bb   : > { %661 = vst [vmem:[%s1196_s29 + $0x28] sm:$0xff] %v653_v61 }
 0x1bc   : > { %v650_v3 = vpack.c.bf16 %v634_v1, %v605_v0 }
 0x1be   : > { %658 = vst [vmem:[%s1196_s29 + $0x10] sm:$0xff] %v650_v3  ;;  %v614_v4 = vpop.f32.mrf.mxu2  ;;  %v643_v5 = vpop.f32.mrf.mxu3 }
 0x1bf   : > { %v615_v7 = vadd.f32 %v614_v4, %v514_v10  ;;  %v644_v8 = vadd.f32 %v643_v5, %v515_v17 }
 0x1c1   : > { %v654_v2 = vpack.c.bf16 %v644_v8, %v615_v7  ;;  %v606_v9 = vpop.f32.mrf.mxu0  ;;  %v635_v11 = vpop.f32.mrf.mxu1 }
 0x1c2   : > { %v607_v12 = vadd.f32 %v606_v9, %v514_v10  ;;  %v636_v13 = vadd.f32 %v635_v11, %v515_v17 }
 0x1c3   : > { %662 = vst [vmem:[%s1196_s29 + $0x30] sm:$0xff] %v654_v2 }
 0x1c4   : > { %v651_v14 = vpack.c.bf16 %v636_v13, %v607_v12 }
 0x1c6   : > { %659 = vst [vmem:[%s1196_s29 + $0x18] sm:$0xff] %v651_v14  ;;  %v616_v15 = vpop.f32.mrf.mxu2  ;;  %v645_v16 = vpop.f32.mrf.mxu3 }
 0x1c7   : > { %v617_v18 = vadd.f32 %v616_v15, %v514_v10  ;;  %v646_v6 = vadd.f32 %v645_v16, %v515_v17 }
 0x1c9   : > { %v655_v19 = vpack.c.bf16 %v646_v6, %v617_v18 }
 0x1cb   : > { %663 = vst [vmem:[%s1196_s29 + $0x38] sm:$0xff] %v655_v19 }
 0x1cc PF: > { %s17_s21 = sadd.s32 1, %s890_s21  }
 0x1cd   : > { %p14_p4 = scmp.ge.s32.totalorder %s17_s21, 4  }
 0x1cf   :  { %16 = sbr.rel (!%p14_p4) target bundleno = 1 (0x1), region = 82 }

// kernel: skip_fcn_cct_forward.19
= control target key start
LH: loop header
LB: loop body
LE: loop exit
PB: predicated region body
PF: predicated region fallthrough
CT: control target
= control target key end

     0   :  { %s3131_s15 = smov 0   ;;  %s4616_s0 = inlined_call_operand.vmem [shape: bf16[2,64,192], index: 0, kind: input, shape index: {}]   ;;  %s4617_s1 = inlined_call_operand.vmem [shape: bf16[64,64], index: 1, kind: input, shape index: {}]   ;;  %s4618_s2 = inlined_call_operand.vmem [shape: f32[1,64], index: 2, kind: input, shape index: {}]   ;;  %s4619_s3 = inlined_call_operand.vmem [shape: bf16[2,64,64], index: 3, kind: input, shape index: {}]   ;;  %s4620_s4 = inlined_call_operand.vmem [shape: bf16[2,64,64], index: 4, kind: output, shape index: {}]  }
   0x1 LB: > { %s2496_s16 = sadd.s32 4294967295, %s3089_s15   ;;  %p2500_p0 = scmp.ge.s32.totalorder %s3089_s15, 1  ;;  %s3089_s15 = sphi %s3131_s15, %s14_s15  }
   0x2   : > { %p172_p1 = scmp.lt.s32.totalorder %s3089_s15, 3 }
   0x4   : > { %p173_p2 = pnand %p2500_p0, %p172_p1 }
   0x6   : > { %176 = sbr.rel (%p173_p2) target bundleno = 1957 (0x7a5), region = 36 }
   0xb   : > { %p203_p3 = scmp.lt.s32.totalorder %s2496_s16, 1  ;;  %s3091_s21 = smov 64   ;;  %vm255_vm0 = vcmask 64512   ;;  %vm317_vm1 = vcmask 523264   ;;  %vm2253_vm2 = vcmask 130048   ;;  %vm2262_vm3 = vcmask 195584  }
   0xc   : > { %s3092_s22 = smov 56   ;;  %s3093_s23 = smov 48   ;;  %vm2271_vm4 = vcmask 261120   ;;  %vm2280_vm5 = vcmask 326656   ;;  %vm2289_vm6 = vcmask 392192   ;;  %vm2298_vm7 = vcmask 457728  }
   0xd   : > { %s4654_s16 = smov (!%p203_p3, %s2496_s16), 1  ;;  %s3094_s24 = smov 104   ;;  %vm2420_vm8 = vcmask 519168  }
   0xe   : > { %s2625_s17 = sshll.u32 %s4654_s16, 6  ;;  %s3095_s25 = smov 120  }
   0xf   : > { %s3145_s20 = scalar_lea.vmem %s4616_s0, %s2625_s17  ;;  %s3096_s26 = smov 40  }
  0x10   : > { %v2521_v0 = vld [vmem:[%s3145_s20 + $0x30] sm:$0xf]  ;;  %v2635_v1 = vld [vmem:[%s3145_s20 + $0x34] sm:$0xf0]  ;;  %v2517_v6 = vld [vmem:[%s3145_s20 + $0x20] sm:$0xf] }
  0x11   : > { %v2513_v2 = vld [vmem:[%s3145_s20 + $0x10] sm:$0xf]  ;;  %v3150_v3 = vor.u32 %v2635_v1, %v2521_v0  ;;  %v2631_v4 = vld [vmem:[%s3145_s20 + $0x14] sm:$0xf0]  ;;  %v2633_v7 = vld [vmem:[%s3145_s20 + $0x24] sm:$0xf0] }
  0x12   : > { %v3153_v5 = vor.u32 %v2631_v4, %v2513_v2  ;;  %v2509_v8 = vld [vmem:[%s3145_s20] sm:$0xf]  ;;  %v2629_v9 = vld [vmem:[%s3145_s20 + $0x4] sm:$0xf0]  ;;  %v3163_v10 = vor.u32 %v2633_v7, %v2517_v6  ;;  %s3097_s27 = smov 32   ;;  %s3098_s28 = smov 112  }
  0x13   : > { %253 = vrot.lane.b32.xlu0 %v3150_v3, %s3091_s21  ;;  %v3165_v11 = vor.u32 %v2629_v9, %v2509_v8  ;;  %s3099_s29 = smov 24   ;;  %s3100_s30 = smov 96   ;;  %v2634_v41 = vld [vmem:[%s3145_s20 + $0x34] sm:$0xf]  ;;  %v2539_v42 = vld [vmem:[%s3145_s20 + $0x38] sm:$0xf0] }
  0x14   : > { %249 = vrot.lane.b32.xlu1 %v3153_v5, %s3091_s21  ;;  %477 = vrot.lane.b32.xlu2 %v3153_v5, %s3092_s22  ;;  %s3101_s5 = smov 16   ;;  %s3102_s6 = smov 88   ;;  %v2632_v43 = vld [vmem:[%s3145_s20 + $0x24] sm:$0xf]  ;;  %v3290_v44 = vor.u32 %v2634_v41, %v2539_v42  ;;  %v2535_v46 = vld [vmem:[%s3145_s20 + $0x28] sm:$0xf0] }
  0x15   : > { %s3103_s7 = smov 8   ;;  %s3104_s8 = smov 80   ;;  %v3296_v47 = vor.u32 %v2632_v43, %v2535_v46  ;;  %v2630_v48 = vld [vmem:[%s3145_s20 + $0x14] sm:$0xf]  ;;  %v2531_v49 = vld [vmem:[%s3145_s20 + $0x18] sm:$0xf0] }
  0x16   : > { %s3105_s9 = smov 72   ;;  %442 = vmatpush.bf16.msra.mxu1 %v3290_v44  ;;  %2659 = vmatpush.bf16.msra.mxu3 %v3290_v44  ;;  %v3302_v52 = vor.u32 %v2630_v48, %v2531_v49  ;;  %v2628_v54 = vld [vmem:[%s3145_s20 + $0x4] sm:$0xf]  ;;  %v2527_v55 = vld [vmem:[%s3145_s20 + $0x8] sm:$0xf0]  ;;  %s2626_s20 = sshll.u32 %s4654_s16, 5 }
  0x17   : > { %v3314_v57 = vor.u32 %v2628_v54, %v2527_v55  ;;  %s4592_s16 = scalar_lea.vmem %s4620_s4, %s2626_s20 }
  0x1a   : > { %443 = vmatpush.bf16.msra.mxu1 %v3296_v47  ;;  %2660 = vmatpush.bf16.msra.mxu3 %v3296_v47 }
  0x1b   : > { %251 = vrot.lane.b32.xlu0 %v3163_v10, %s3091_s21 }
  0x1c   : > { %247 = vrot.lane.b32.xlu1 %v3165_v11, %s3091_s21  ;;  %699 = vrot.lane.b32.xlu2 %v3153_v5, %s3093_s23 }
  0x1e   : > { %444 = vmatpush.bf16.msra.mxu1 %v3302_v52  ;;  %2661 = vmatpush.bf16.msra.mxu3 %v3302_v52 }
  0x22   : > { %445 = vmatpush.bf16.msra.mxu1 %v3314_v57  ;;  %2662 = vmatpush.bf16.msra.mxu3 %v3314_v57 }
  0x23   : > { %479 = vrot.lane.b32.xlu0 %v3163_v10, %s3092_s22 }
  0x24   : > { %481 = vrot.lane.b32.xlu1 %v3150_v3, %s3092_s22  ;;  %911 = vrot.lane.b32.xlu2 %v3165_v11, %s3094_s24 }
  0x2b   : > { %467 = vrot.lane.b32.xlu0 %v3165_v11, %s3095_s25 }
  0x2c   : > { %475 = vrot.lane.b32.xlu1 %v3165_v11, %s3092_s22  ;;  %913 = vrot.lane.b32.xlu2 %v3153_v5, %s3094_s24 }
  0x33   : > { %469 = vrot.lane.b32.xlu0 %v3153_v5, %s3095_s25 }
  0x34   : > { %923 = vrot.lane.b32.xlu1 %v3163_v10, %s3096_s26  ;;  %1147 = vrot.lane.b32.xlu2 %v3150_v3, %s3097_s27 }
  0x3b   : > { %471 = vrot.lane.b32.xlu0 %v3163_v10, %s3095_s25 }
  0x3c   : > { %689 = vrot.lane.b32.xlu1 %v3165_v11, %s3098_s28  ;;  %1369 = vrot.lane.b32.xlu2 %v3150_v3, %s3099_s29 }
  0x43   : > { %703 = vrot.lane.b32.xlu0 %v3150_v3, %s3093_s23 }
  0x44   : > { %691 = vrot.lane.b32.xlu1 %v3153_v5, %s3098_s28  ;;  %1367 = vrot.lane.b32.xlu2 %v3163_v10, %s3099_s29 }
  0x4b   : > { %925 = vrot.lane.b32.xlu0 %v3150_v3, %s3096_s26 }
  0x4c   : > { %693 = vrot.lane.b32.xlu1 %v3163_v10, %s3098_s28  ;;  %1143 = vrot.lane.b32.xlu2 %v3153_v5, %s3097_s27 }
  0x53   : > { %701 = vrot.lane.b32.xlu0 %v3163_v10, %s3093_s23 }
  0x54   : > { %915 = vrot.lane.b32.xlu1 %v3163_v10, %s3094_s24  ;;  %1141 = vrot.lane.b32.xlu2 %v3165_v11, %s3097_s27 }
  0x5b   : > { %473 = vrot.lane.b32.xlu0 %v3150_v3, %s3095_s25 }
  0x5c   : > { %1145 = vrot.lane.b32.xlu1 %v3163_v10, %s3097_s27  ;;  %1133 = vrot.lane.b32.xlu2 %v3165_v11, %s3100_s30 }
  0x63   : > { %921 = vrot.lane.b32.xlu0 %v3153_v5, %s3096_s26 }
  0x64   : > { %695 = vrot.lane.b32.xlu1 %v3150_v3, %s3098_s28  ;;  %1139 = vrot.lane.b32.xlu2 %v3150_v3, %s3100_s30 }
  0x6b   : > { %697 = vrot.lane.b32.xlu0 %v3165_v11, %s3093_s23 }
  0x6c   : > { %917 = vrot.lane.b32.xlu1 %v3150_v3, %s3094_s24  ;;  %1587 = vrot.lane.b32.xlu2 %v3153_v5, %s3101_s5 }
  0x6e   : > { %v478_v25 = vpop.permute.xlu2 %477 }
  0x6f   : > { %v499_v27 = vsel %vm255_vm0, %v478_v25, 0 }
  0x73   : > { %919 = vrot.lane.b32.xlu0 %v3165_v11, %s3096_s26 }
  0x74   : > { %1363 = vrot.lane.b32.xlu1 %v3165_v11, %s3099_s29  ;;  %1361 = vrot.lane.b32.xlu2 %v3150_v3, %s3102_s6 }
  0x76   : > { %v700_v35 = vpop.permute.xlu2 %699 }
  0x77   : > { %v721_v6 = vsel %vm255_vm0, %v700_v35, 0 }
  0x7b   : > { %1365 = vrot.lane.b32.xlu0 %v3153_v5, %s3099_s29 }
  0x7c   : > { %1355 = vrot.lane.b32.xlu1 %v3165_v11, %s3102_s6  ;;  %1807 = vrot.lane.b32.xlu2 %v3165_v11, %s3103_s7 }
  0x7e   : > { %v912_v39 = vpop.permute.xlu2 %911 }
  0x83   : > { %1135 = vrot.lane.b32.xlu0 %v3153_v5, %s3100_s30 }
  0x84   : > { %1357 = vrot.lane.b32.xlu1 %v3153_v5, %s3102_s6 }
  0x85   : > { %v254_v12 = vpop.permute.xlu0 %253 }
  0x86   : > { %v250_v13 = vpop.permute.xlu1 %249  ;;  %v278_v14 = vsel %vm255_vm0, %v254_v12, 0  ;;  %v914_v50 = vpop.permute.xlu2 %913 }
  0x87   : > { %284 = vmatpush.bf16.xpose.msra.mxu0 %v278_v14  ;;  %v272_v20 = vsel %vm255_vm0, %v250_v13, 0 }
  0x8b   : > { %1137 = vrot.lane.b32.xlu0 %v3163_v10, %s3100_s30 }
  0x8c   : > { %1591 = vrot.lane.b32.xlu1 %v3150_v3, %s3101_s5 }
  0x8d   : > { %v252_v15 = vpop.permute.xlu0 %251 }
  0x8e   : > { %v248_v16 = vpop.permute.xlu1 %247  ;;  %v275_v17 = vsel %vm255_vm0, %v252_v15, 0  ;;  %v3322_v60 = vpop.permute.xlu2 %1147 }
  0x8f   : > { %285 = vmatpush.bf16.xpose.msra.mxu0 %v275_v17  ;;  %v269_v24 = vsel %vm255_vm0, %v248_v16, 0 }
  0x93   : > { %1359 = vrot.lane.b32.xlu0 %v3163_v10, %s3102_s6 }
  0x94   : > { %1813 = vrot.lane.b32.xlu1 %v3150_v3, %s3103_s7 }
  0x95   : > { %v480_v18 = vpop.permute.xlu0 %479 }
  0x96   : > { %v482_v19 = vpop.permute.xlu1 %481  ;;  %v502_v23 = vsel %vm255_vm0, %v480_v18, 0  ;;  %v1370_v1 = vpop.permute.xlu2 %1369 }
  0x97   : > { %286 = vmatpush.bf16.xpose.msra.mxu0 %v272_v20  ;;  %v505_v21 = vsel %vm255_vm0, %v482_v19, 0  ;;  %v1393_v2 = vsel %vm255_vm0, %v1370_v1, 0 }
  0x98   : > { %511 = vmatpush.bf16.xpose.msra.mxu2 %v505_v21 }
  0x9b   : > { %1589 = vrot.lane.b32.xlu0 %v3163_v10, %s3101_s5 }
  0x9c   : > { %1811 = vrot.lane.b32.xlu1 %v3163_v10, %s3103_s7 }
  0x9d   : > { %v468_v22 = vpop.permute.xlu0 %467 }
  0x9e   : > { %v476_v28 = vpop.permute.xlu1 %475  ;;  %v1368_v7 = vpop.permute.xlu2 %1367 }
  0x9f   : > { %287 = vmatpush.bf16.xpose.msra.mxu0 %v269_v24  ;;  %v496_v30 = vsel %vm255_vm0, %v476_v28, 0  ;;  %v1390_v8 = vsel %vm255_vm0, %v1368_v7, 0 }
  0xa0   : > { %512 = vmatpush.bf16.xpose.msra.mxu2 %v502_v23 }
  0xa3   : > { %1809 = vrot.lane.b32.xlu0 %v3153_v5, %s3103_s7 }
  0xa4   : > { %1585 = vrot.lane.b32.xlu1 %v3165_v11, %s3101_s5 }
  0xa5   : > { %v470_v26 = vpop.permute.xlu0 %469 }
  0xa6   : > { %2523 = vmatmul.msk.bf16.vlgmr.msra.gmra.mxu0 %vm255_vm0, %v3165_v11  ;;  %v924_v34 = vpop.permute.xlu1 %923  ;;  %v3339_v16 = vpop.permute.xlu2 %1143 }
  0xa7   : > { %v946_v36 = vsel %vm255_vm0, %v924_v34, 0 }
  0xa8   : > { %513 = vmatpush.bf16.xpose.msra.mxu2 %v499_v27 }
  0xac   : > { %1577 = vrot.lane.b32.xlu1 %v3165_v11, %s3104_s8 }
  0xad   : > { %v472_v29 = vpop.permute.xlu0 %471 }
  0xae   : > { %v3285_v38 = vpop.permute.xlu1 %689  ;;  %v3342_v17 = vpop.permute.xlu2 %1141 }
  0xb0   : > { %514 = vmatpush.bf16.xpose.msra.mxu2 %v496_v30 }
  0xb4   : > { %1799 = vrot.lane.b32.xlu1 %v3165_v11, %s3105_s9 }
  0xb5   : > { %v704_v31 = vpop.permute.xlu0 %703 }
  0xb6   : > { %2524 = vmatmul.msk.bf16.gmra.mxu0 %vm255_vm0, %v3153_v5  ;;  %v3292_v45 = vpop.permute.xlu1 %691  ;;  %v727_v59 = vsel %vm255_vm0, %v704_v31, 0  ;;  %v3350_v24 = vpop.permute.xlu2 %1133 }
  0xb7   : > { %2547 = vmatmul.msk.bf16.vlgmr.msra.gmra.mxu2 %vm255_vm0, %v468_v22  ;;  %733 = vmatpush.bf16.xpose.msrb.mxu1 %v727_v59 }
  0xbd   : > { %v926_v32 = vpop.permute.xlu0 %925 }
  0xbe   : > { %v949_v33 = vsel %vm255_vm0, %v926_v32, 0  ;;  %v3311_v56 = vpop.permute.xlu1 %693  ;;  %v3361_v30 = vpop.permute.xlu2 %1139 }
  0xbf   : > { %955 = vmatpush.bf16.xpose.msrb.mxu0 %v949_v33 }
  0xc5   : > { %v702_v37 = vpop.permute.xlu0 %701 }
  0xc6   : > { %2525 = vmatmul.msk.bf16.gmra.mxu0 %vm255_vm0, %v3163_v10  ;;  %v916_v61 = vpop.permute.xlu1 %915  ;;  %v724_v63 = vsel %vm255_vm0, %v702_v37, 0  ;;  %v3366_v37 = vpop.permute.xlu2 %1587 }
  0xc7   : > { %2548 = vmatmul.msk.bf16.gmra.mxu2 %vm255_vm0, %v470_v26  ;;  %956 = vmatpush.bf16.xpose.msrb.mxu0 %v946_v36 }
  0xc8   : > { %734 = vmatpush.bf16.xpose.msrb.mxu1 %v724_v63 }
  0xcd   : > { %v474_v40 = vpop.permute.xlu0 %473 }
  0xce   : > { %v3328_v4 = vpop.permute.xlu1 %1145 }
  0xd0   : > { %735 = vmatpush.bf16.xpose.msrb.mxu1 %v721_v6 }
  0xd5   : > { %v922_v51 = vpop.permute.xlu0 %921 }
  0xd6   : > { %2526 = vmatmul.msk.bf16.gmra.mxu0 %vm255_vm0, %v3150_v3  ;;  %v943_v53 = vsel %vm255_vm0, %v922_v51, 0  ;;  %v3333_v9 = vpop.permute.xlu1 %695 }
  0xd7   : > { %2549 = vmatmul.msk.bf16.gmra.mxu2 %vm255_vm0, %v472_v29  ;;  %957 = vmatpush.bf16.xpose.msrb.mxu0 %v943_v53  ;;  %v1362_v53 = vpop.permute.xlu2 %1361 }
  0xdd   : > { %v3317_v58 = vpop.permute.xlu0 %697 }
  0xde   : > { %v918_v11 = vpop.permute.xlu1 %917 }
  0xe5   : > { %v920_v62 = vpop.permute.xlu0 %919 }
  0xe6   : > { %v940_v0 = vsel %vm255_vm0, %v920_v62, 0  ;;  %v1364_v14 = vpop.permute.xlu1 %1363 }
  0xe7   : > { %958 = vmatpush.bf16.xpose.msrb.mxu0 %v940_v0  ;;  %2550 = vmatmul.msk.bf16.gmra.mxu2 %vm255_vm0, %v474_v40  ;;  %v1384_v15 = vsel %vm255_vm0, %v1364_v14, 0 }
  0xed   : > { %v1366_v12 = vpop.permute.xlu0 %1365 }
  0xee   : > { %2563 = vmatmul.msk.bf16.vlgmr.msrb.gmra.mxu0 %vm255_vm0, %v912_v39  ;;  %v1387_v13 = vsel %vm255_vm0, %v1366_v12, 0  ;;  %v1356_v18 = vpop.permute.xlu1 %1355 }
  0xef   : > { %1399 = vmatpush.bf16.xpose.msra.mxu0 %v1393_v2  ;;  %v1808_v2 = vpop.permute.xlu2 %1807 }
  0xf0   : > { %v1828_v7 = vsel %vm255_vm0, %v1808_v2, 0 }
  0xf5   : > { %v3344_v19 = vpop.permute.xlu0 %1135 }
  0xf6   : > { %v1358_v23 = vpop.permute.xlu1 %1357 }
  0xf7   : > { %1400 = vmatpush.bf16.xpose.msra.mxu0 %v1390_v8 }
  0xfd   : > { %v3354_v27 = vpop.permute.xlu0 %1137 }
  0xfe   : > { %2564 = vmatmul.msk.bf16.gmra.mxu0 %vm255_vm0, %v914_v50  ;;  %v3359_v29 = vpop.permute.xlu1 %1591 }
  0xff   : > { %1401 = vmatpush.bf16.xpose.msra.mxu0 %v1387_v13 }
 0x105   : > { %v1360_v31 = vpop.permute.xlu0 %1359 }
 0x106   : > { %v1814_v32 = vpop.permute.xlu1 %1813 }
 0x107   : > { %1402 = vmatpush.bf16.xpose.msra.mxu0 %v1384_v15  ;;  %v1837_v33 = vsel %vm255_vm0, %v1814_v32, 0 }
 0x10d   : > { %v3371_v40 = vpop.permute.xlu0 %1589 }
 0x10e   : > { %2565 = vmatmul.msk.bf16.gmra.mxu0 %vm255_vm0, %v916_v61  ;;  %v1812_v42 = vpop.permute.xlu1 %1811 }
 0x10f   : > { %1843 = vmatpush.bf16.xpose.msrb.mxu0 %v1837_v33  ;;  %v1834_v43 = vsel %vm255_vm0, %v1812_v42, 0 }
 0x115   : > { %v1810_v54 = vpop.permute.xlu0 %1809 }
 0x116   : > { %v1831_v55 = vsel %vm255_vm0, %v1810_v54, 0 }
 0x117   : > { %1844 = vmatpush.bf16.xpose.msrb.mxu0 %v1834_v43 }
 0x11e   : > { %2566 = vmatmul.msk.bf16.gmra.mxu0 %vm255_vm0, %v918_v11 }
 0x11f   : > { %1845 = vmatpush.bf16.xpose.msrb.mxu0 %v1831_v55 }
 0x123   : > { %v289_v20 = vpop.f32.mrf.mxu0 }
 0x124   : > { %v3346_v21 = vmul.f32 0.35355338, %v289_v20 }
 0x126   : > { %v318_v22 = vsel %vm317_vm1, %v3346_v21, -inf }
 0x127   : > { %319 = vmax.xlane.f32.xlu2 %v318_v22  ;;  %1846 = vmatpush.bf16.xpose.msrb.mxu0 %v1828_v7 }
 0x12b   : > { %v291_v25 = vpop.f32.mrf.mxu0 }
 0x12c   : > { %v3352_v26 = vmul.f32 0.35355338, %v291_v25 }
 0x12e   : > { %v321_v28 = vsel %vm317_vm1, %v3352_v26, -inf  ;;  %2579 = vmatmul.msk.bf16.vlgmr.msra.gmra.mxu0 %vm255_vm0, %v1356_v18 }
 0x12f   : > { %322 = vmax.xlane.f32.xlu2 %v321_v28 }
 0x133   : > { %v294_v34 = vpop.f32.mrf.mxu0 }
 0x134   : > { %v3373_v41 = vmul.f32 0.35355338, %v294_v34 }
 0x136   : > { %v324_v49 = vsel %vm317_vm1, %v3373_v41, -inf }
 0x13a   : > { %v516_v35 = vpop.f32.mrf.mxu2 }
 0x13b   : > { %v3364_v36 = vmul.f32 0.35355338, %v516_v35  ;;  %v296_v50 = vpop.f32.mrf.mxu0 }
 0x13c   : > { %v3383_v59 = vmul.f32 0.35355338, %v296_v50 }
 0x13d   : > { %v544_v39 = vsel %vm317_vm1, %v3364_v36, -inf }
 0x13e   : > { %545 = vmax.xlane.f32.xlu0 %v544_v39  ;;  %2580 = vmatmul.msk.bf16.gmra.mxu0 %vm255_vm0, %v1358_v23  ;;  %v327_v63 = vsel %vm317_vm1, %v3383_v59, -inf }
 0x142   : > { %v518_v46 = vpop.f32.mrf.mxu2 }
 0x143   : > { %v3376_v48 = vmul.f32 0.35355338, %v518_v46  ;;  %v299_v1 = vpop.f32.mrf.mxu0 }
 0x144   : > { %v313_v6 = vmul.f32 0.35355338, %v299_v1 }
 0x145   : > { %v547_v51 = vsel %vm317_vm1, %v3376_v48, -inf }
 0x146   : > { %325 = vmax.xlane.f32.xlu0 %v324_v49  ;;  %548 = vmax.xlane.f32.xlu1 %v547_v51  ;;  %v330_v12 = vsel %vm317_vm1, %v313_v6, -inf  ;;  %v718_v51 = vsel %vm255_vm0, %v3317_v58, 0 }
 0x147   : > { %736 = vmatpush.bf16.xpose.msrb.mxu1 %v718_v51 }
 0x14a   : > { %v521_v61 = vpop.f32.mrf.mxu2 }
 0x14b   : > { %v3385_v62 = vmul.f32 0.35355338, %v521_v61  ;;  %v301_v34 = vpop.f32.mrf.mxu0 }
 0x14c   : > { %v3421_v39 = vmul.f32 0.35355338, %v301_v34 }
 0x14d   : > { %v550_v0 = vsel %vm317_vm1, %v3385_v62, -inf }
 0x14e   : > { %328 = vmax.xlane.f32.xlu1 %v327_v63  ;;  %551 = vmax.xlane.f32.xlu2 %v550_v0  ;;  %v333_v42 = vsel %vm317_vm1, %v3421_v39, -inf }
 0x14f   : > { %2581 = vmatmul.msk.bf16.gmra.mxu0 %vm255_vm0, %v1360_v31  ;;  %v3411_v31 = vpop.permute.xlu1 %1585 }
 0x152   : > { %v523_v8 = vpop.f32.mrf.mxu2 }
 0x153   : > { %v3393_v11 = vmul.f32 0.35355338, %v523_v8  ;;  %v304_v49 = vpop.f32.mrf.mxu0 }
 0x154   : > { %v3430_v50 = vmul.f32 0.35355338, %v304_v49 }
 0x155   : > { %v553_v13 = vsel %vm317_vm1, %v3393_v11, -inf }
 0x156   : > { %331 = vmax.xlane.f32.xlu2 %v330_v12  ;;  %554 = vmax.xlane.f32.xlu0 %v553_v13 }
 0x157   : > { %v3413_v32 = vpop.permute.xlu1 %1577 }
 0x15a   : > { %v526_v14 = vpop.f32.mrf.mxu2 }
 0x15b   : > { %v3398_v15 = vmul.f32 0.35355338, %v526_v14 }
 0x15d   : > { %v556_v18 = vsel %vm317_vm1, %v3398_v15, -inf }
 0x15e   : > { %557 = vmax.xlane.f32.xlu1 %v556_v18 }
 0x15f   : > { %2582 = vmatmul.msk.bf16.gmra.mxu0 %vm255_vm0, %v1362_v53  ;;  %v1800_v35 = vpop.permute.xlu1 %1799  ;;  %v336_v53 = vsel %vm317_vm1, %v3430_v50, -inf }
 0x162   : > { %v528_v20 = vpop.f32.mrf.mxu2 }
 0x163   : > { %v3426_v43 = vmul.f32 0.35355338, %v528_v20 }
 0x165   : > { %v559_v46 = vsel %vm317_vm1, %v3426_v43, -inf }
 0x16a   : > { %1801 = vrot.lane.b32.xlu0 %v3153_v5, %s3105_s9  ;;  %v531_v22 = vpop.f32.mrf.mxu2 }
 0x16b   : > { %v3415_v33 = vmul.f32 0.35355338, %v531_v22 }
 0x16e   : > { %1579 = vrot.lane.b32.xlu2 %v3153_v5, %s3104_s8  ;;  %v562_v5 = vsel %vm317_vm1, %v3415_v33, -inf }
 0x16f   : > { %2595 = vmatmul.msk.bf16.vlgmr.msrb.gmra.mxu0 %vm255_vm0, %v1800_v35 }
 0x172   : > { %v533_v23 = vpop.f32.mrf.mxu2 }
 0x173   : > { %v3407_v25 = vmul.f32 0.35355338, %v533_v23  ;;  %v306_v23 = vpop.f32.mrf.mxu0 }
 0x175   : > { %v565_v28 = vsel %vm317_vm1, %v3407_v25, -inf }
 0x176   : > { %566 = vmax.xlane.f32.xlu1 %v565_v28 }
 0x18f   : > { %642 = vrot.lane.b32.xlu1 %v3290_v44, %s3095_s25 }
 0x194   : > { %563 = vmax.xlane.f32.xlu0 %v562_v5  ;;  %v3462_v5 = vmul.f32 0.35355338, %v306_v23 }
 0x197   : > { %334 = vmax.xlane.f32.xlu2 %v333_v42  ;;  %v339_v42 = vsel %vm317_vm1, %v3462_v5, -inf }
 0x19a   : > { %v320_v54 = vpop.xlane.xlu2 %319 }
 0x19f   : > { %560 = vmax.xlane.f32.xlu2 %v559_v46 }
 0x1a2   : > { %v3438_v61 = vpop.xlane.xlu2 %322 }
 0x1a7   : > { %337 = vmax.xlane.f32.xlu2 %v336_v53 }
 0x1b1   : > { %v3436_v55 = vpop.xlane.xlu0 %545 }
 0x1b9   : > { %v326_v63 = vpop.xlane.xlu0 %325  ;;  %v549_v8 = vpop.xlane.xlu1 %548 }
 0x1ba   : > { %v344_v0 = vsub.f32 %v3373_v41, %v326_v63  ;;  %v569_v14 = vsub.f32 %v3376_v48, %v549_v8  ;;  %v960_v48 = vpop.f32.mrf.mxu0 }
 0x1bb   : > { %v3458_v34 = vmul.f32 0.35355338, %v960_v48 }
 0x1bc   : > { %v354_v1 = vmul.f32 1.442695, %v344_v0  ;;  %v578_v41 = vmul.f32 1.442695, %v569_v14  ;;  %v342_v14 = vsub.f32 %v3346_v21, %v320_v54  ;;  %v568_v21 = vsub.f32 %v3364_v36, %v3436_v55 }
 0x1bd   : > { %v988_v35 = vsel %vm317_vm1, %v3458_v34, -inf  ;;  %v343_v36 = vsub.f32 %v3352_v26, %v3438_v61 }
 0x1be   : > { %2827 = vpow2.f32 %v354_v1 }
 0x1bf   : > { %1581 = vrot.lane.b32.xlu2 %v3163_v10, %s3104_s8 }
 0x1c1   : > { %v552_v2 = vpop.xlane.xlu2 %551  ;;  %v329_v1 = vpop.xlane.xlu1 %328 }
 0x1c2   : > { %v3468_v46 = vpop.f32.mrf.mxu0 }
 0x1c4   : > { %v3443_v58 = vpop.eup %2827 }
 0x1c5   : > { %v372_v7 = vsel %vm317_vm1, %v3443_v58, 0.0 }
 0x1c6   : > { %373 = vadd.xlane.f32.xlu0 %v372_v7 }
 0x1c9   : > { %v332_v12 = vpop.xlane.xlu2 %331  ;;  %v555_v49 = vpop.xlane.xlu0 %554 }
 0x1ca   : > { %v346_v13 = vsub.f32 %v313_v6, %v332_v12  ;;  %v3471_v53 = vpop.f32.mrf.mxu0 }
 0x1cc   : > { %v358_v18 = vmul.f32 1.442695, %v346_v13 }
 0x1ce   : > { %2829 = vpow2.f32 %v358_v18  ;;  %v571_v18 = vsub.f32 %v3393_v11, %v555_v49 }
 0x1cf   : > { %2831 = vpow2.f32 %v578_v41  ;;  %v350_v41 = vmul.f32 1.442695, %v342_v14 }
 0x1d0   : > { %v582_v23 = vmul.f32 1.442695, %v571_v18  ;;  %v576_v18 = vmul.f32 1.442695, %v568_v21 }
 0x1d1   : > { %v3477_v63 = vpop.permute.xlu2 %1579  ;;  %v3481_v8 = vpop.xlane.xlu1 %557  ;;  %2833 = vpow2.f32 %v350_v41 }
 0x1d2   : > { %4625 = vst [vmem:[#allocation2_spill] sm:$0xff] %v3477_v63  ;;  %v967_v0 = vpop.f32.mrf.mxu0  ;;  %2835 = vpow2.f32 %v582_v23 }
 0x1d4   : > { %v3448_v20 = vpop.eup %2829 }
 0x1d5   : > { %v378_v22 = vsel %vm317_vm1, %v3448_v20, 0.0  ;;  %v3452_v28 = vpop.eup %2831 }
 0x1d6   : > { %379 = vadd.xlane.f32.xlu1 %v378_v22  ;;  %v595_v6 = vsel %vm317_vm1, %v3452_v28, 0.0 }
 0x1d7   : > { %v3494_v14 = vpop.eup %2833 }
 0x1d8   : > { %v366_v55 = vsel %vm317_vm1, %v3494_v14, 0.0 }
 0x1da   : > { %640 = vrot.lane.b32.xlu0 %v3296_v47, %s3095_s25  ;;  %v3483_v13 = vpop.f32.mrf.mxu0 }
 0x1dc   : > { %v1802_v51 = vpop.permute.xlu0 %1801 }
 0x1dd   : > { %2596 = vmatmul.msk.bf16.gmra.mxu0 %vm255_vm0, %v1802_v51 }
 0x1de   : > { %596 = vadd.xlane.f32.xlu1 %v595_v6 }
 0x1e2   : > { %636 = vrot.lane.b32.xlu0 %v3314_v57, %s3095_s25 }
 0x1e6   : > { %989 = vmax.xlane.f32.xlu1 %v988_v35  ;;  %v570_v35 = vsub.f32 %v3385_v62, %v552_v2 }
 0x1e8   : > { %340 = vmax.xlane.f32.xlu2 %v339_v42  ;;  %v972_v42 = vpop.f32.mrf.mxu0  ;;  %v580_v11 = vmul.f32 1.442695, %v570_v35  ;;  %v345_v35 = vsub.f32 %v3383_v59, %v329_v1 }
 0x1e9   : > { %v3487_v22 = vpop.xlane.xlu1 %566 }
 0x1f0   : > { %v975_v2 = vpop.f32.mrf.mxu0 }
 0x1f8   : > { %v977_v21 = vpop.f32.mrf.mxu0 }
 0x1ff   : > { %1805 = vrot.lane.b32.xlu1 %v3150_v3, %s3105_s9 }
 0x200   : > { %1803 = vrot.lane.b32.xlu2 %v3163_v10, %s3105_s9 }
 0x201   : > { %v643_v49 = vpop.permute.xlu1 %642 }
 0x202   : > { %664 = vmatpush.bf16.msrb.mxu3 %v643_v49 }
 0x207   : > { %v564_v6 = vpop.xlane.xlu0 %563 }
 0x208   : > { %v574_v63 = vsub.f32 %v3415_v33, %v564_v6 }
 0x20a   : > { %v3479_v7 = vpop.xlane.xlu2 %334  ;;  %v588_v54 = vmul.f32 1.442695, %v574_v63 }
 0x212   : > { %v561_v12 = vpop.xlane.xlu2 %560 }
 0x21a   : > { %v338_v10 = vpop.xlane.xlu2 %337 }
 0x21b   : > { %v348_v48 = vsub.f32 %v3430_v50, %v338_v10  ;;  %v3496_v50 = vpop.eup %2835  ;;  %v352_v10 = vmul.f32 1.442695, %v343_v36 }
 0x21c   : > { %v601_v63 = vsel %vm317_vm1, %v3496_v50, 0.0 }
 0x21d   : > { %v362_v51 = vmul.f32 1.442695, %v348_v48  ;;  %v573_v48 = vsub.f32 %v3426_v43, %v561_v12  ;;  %v3524_v43 = vmul.f32 0.35355338, %v977_v21  ;;  %v356_v12 = vmul.f32 1.442695, %v345_v35 }
 0x21f   : > { %2837 = vpow2.f32 %v362_v51  ;;  %v1009_v59 = vsel %vm317_vm1, %v3524_v43, -inf }
 0x220   : > { %2839 = vpow2.f32 %v580_v11  ;;  %v586_v11 = vmul.f32 1.442695, %v573_v48 }
 0x221   : > { %2841 = vpow2.f32 %v588_v54  ;;  %v3522_v54 = vmul.f32 0.35355338, %v967_v0 }
 0x222   : > { %2843 = vpow2.f32 %v576_v18 }
 0x223   : > { %2845 = vpow2.f32 %v352_v10  ;;  %v997_v18 = vsel %vm317_vm1, %v3522_v54, -inf }
 0x224   : > { %2847 = vpow2.f32 %v586_v11 }
 0x225   : > { %v3498_v62 = vpop.eup %2837  ;;  %2849 = vpow2.f32 %v356_v12 }
 0x226   : > { %v384_v33 = vsel %vm317_vm1, %v3498_v62, 0.0  ;;  %v3508_v41 = vpop.eup %2839 }
 0x227   : > { %385 = vadd.xlane.f32.xlu0 %v384_v33  ;;  %v3510_v23 = vpop.eup %2841  ;;  %v598_v26 = vsel %vm317_vm1, %v3508_v41, 0.0 }
 0x228   : > { %v3512_v6 = vpop.eup %2843  ;;  %v610_v61 = vsel %vm317_vm1, %v3510_v23, 0.0 }
 0x229   : > { %367 = vadd.xlane.f32.xlu2 %v366_v55  ;;  %602 = vadd.xlane.f32.xlu1 %v601_v63  ;;  %v592_v51 = vsel %vm317_vm1, %v3512_v6, 0.0  ;;  %v3526_v49 = vpop.eup %2845  ;;  %v3542_v63 = vmul.f32 0.35355338, %v972_v42  ;;  %v3556_v42 = vpop.permute.xlu2 %1581 }
 0x22a   : > { %v369_v1 = vsel %vm317_vm1, %v3526_v49, 0.0  ;;  %v3534_v0 = vpop.eup %2847 }
 0x22b   : > { %v3536_v33 = vpop.eup %2849  ;;  %v607_v36 = vsel %vm317_vm1, %v3534_v0, 0.0  ;;  %v1003_v48 = vsel %vm317_vm1, %v3542_v63, -inf }
 0x22c   : > { %v375_v55 = vsel %vm317_vm1, %v3536_v33, 0.0 }
 0x22f   : > { %599 = vadd.xlane.f32.xlu0 %v598_v26 }
 0x231   : > { %593 = vadd.xlane.f32.xlu2 %v592_v51  ;;  %611 = vadd.xlane.f32.xlu1 %v610_v61  ;;  %v3550_v61 = vmul.f32 0.35355338, %v975_v2 }
 0x233   : > { %v1006_v51 = vsel %vm317_vm1, %v3550_v61, -inf }
 0x237   : > { %998 = vmax.xlane.f32.xlu0 %v997_v18 }
 0x239   : > { %370 = vadd.xlane.f32.xlu2 %v369_v1  ;;  %1010 = vmax.xlane.f32.xlu1 %v1009_v59  ;;  %v3544_v10 = vpop.xlane.xlu0 %373 }
 0x23f   : > { %608 = vadd.xlane.f32.xlu0 %v607_v36 }
 0x241   : > { %376 = vadd.xlane.f32.xlu2 %v375_v55 }
 0x247   : > { %1004 = vmax.xlane.f32.xlu0 %v1003_v48 }
 0x249   : > { %v3548_v26 = vpop.xlane.xlu1 %379 }
 0x24c   : > { %v641_v35 = vpop.permute.xlu0 %640 }
 0x24d   : > { %665 = vmatpush.bf16.msrb.mxu3 %v641_v35 }
 0x24f   : > { %1007 = vmax.xlane.f32.xlu0 %v1006_v51 }
 0x251   : > { %v3554_v21 = vpop.xlane.xlu1 %596 }
 0x259   : > { %638 = vrot.lane.b32.xlu2 %v3302_v52, %s3095_s25  ;;  %v990_v11 = vpop.xlane.xlu1 %989 }
 0x25a   : > { %v1012_v12 = vsub.f32 %v3458_v34, %v990_v11  ;;  %v347_v34 = vsub.f32 %v3421_v39, %v3479_v7  ;;  %v3585_v7 = vmul.f32 0.35355338, %v3468_v46 }
 0x25b   : > { %v341_v18 = vpop.xlane.xlu2 %340 }
 0x25c   : > { %v1020_v59 = vmul.f32 1.442695, %v1012_v12  ;;  %v360_v48 = vmul.f32 1.442695, %v347_v34 }
 0x25e   : > { %2851 = vpow2.f32 %v1020_v59 }
 0x25f   : > { %2853 = vpow2.f32 %v360_v48 }
 0x261   : > { %1583 = vrot.lane.b32.xlu2 %v3150_v3, %s3104_s8  ;;  %v349_v3 = vsub.f32 %v3462_v5, %v341_v18  ;;  %v572_v5 = vsub.f32 %v3398_v15, %v3481_v8  ;;  %v991_v18 = vsel %vm317_vm1, %v3585_v7, -inf  ;;  %v575_v15 = vsub.f32 %v3407_v25, %v3487_v22 }
 0x263   : > { %v1804_v2 = vpop.permute.xlu2 %1803  ;;  %1086 = vrot.lane.b32.xlu0 %v3290_v44, %s3094_s24  ;;  %v364_v35 = vmul.f32 1.442695, %v349_v3  ;;  %v584_v59 = vmul.f32 1.442695, %v572_v5  ;;  %v590_v48 = vmul.f32 1.442695, %v575_v15 }
 0x264   : > { %v3565_v1 = vpop.eup %2851  ;;  %2597 = vmatmul.msk.bf16.gmra.mxu0 %vm255_vm0, %v1804_v2  ;;  %v3605_v3 = vmul.f32 0.35355338, %v3483_v13  ;;  %v1171_v13 = vsel %vm255_vm0, %v3322_v60, 0  ;;  %v1168_v15 = vsel %vm255_vm0, %v3328_v4, 0  ;;  %v1615_v4 = vsel %vm255_vm0, %v3359_v29, 0 }
 0x265   : > { %v1036_v36 = vsel %vm317_vm1, %v3565_v1, 0.0  ;;  %v3576_v51 = vpop.eup %2853  ;;  %2855 = vpow2.f32 %v364_v35  ;;  %v1606_v29 = vsel %vm255_vm0, %v3411_v31, 0 }
 0x266   : > { %1037 = vadd.xlane.f32.xlu1 %v1036_v36  ;;  %v381_v11 = vsel %vm317_vm1, %v3576_v51, 0.0  ;;  %v3592_v36 = vmul.f32 0.35355338, %v3471_v53  ;;  %2857 = vpow2.f32 %v584_v59 }
 0x26b   : > { %v3580_v12 = vpop.eup %2855 }
 0x26c   : > { %v387_v39 = vsel %vm317_vm1, %v3580_v12, 0.0  ;;  %v3598_v46 = vpop.eup %2857 }
 0x26d   : > { %v604_v8 = vsel %vm317_vm1, %v3598_v46, 0.0 }
 0x271   : > { %v1806_v55 = vpop.permute.xlu1 %1805 }
 0x274   : > { %2598 = vmatmul.msk.bf16.gmra.mxu0 %vm255_vm0, %v1806_v55  ;;  %v994_v55 = vsel %vm317_vm1, %v3592_v36, -inf }
 0x27f   : > { %860 = vrot.lane.b32.xlu1 %v3302_v52, %s3098_s28 }
 0x28a   : > { %382 = vadd.xlane.f32.xlu2 %v381_v11  ;;  %v1000_v11 = vsel %vm317_vm1, %v3605_v3, -inf }
 0x292   : > { %388 = vadd.xlane.f32.xlu2 %v387_v39 }
 0x29a   : > { %992 = vmax.xlane.f32.xlu2 %v991_v18 }
 0x29c   : > { %v368_v2 = vpop.xlane.xlu2 %367 }
 0x29d   : > { %2859 = vrcp.f32 %v368_v2 }
 0x2a2   : > { %995 = vmax.xlane.f32.xlu2 %v994_v55 }
 0x2a3   : > { %v2860_v35 = vpop.eup %2859 }
 0x2a4   : > { %v3596_v34 = vpop.xlane.xlu2 %593  ;;  %v398_v25 = vmul.f32 %v2860_v35, %v3494_v14  ;;  %v1162_v35 = vsel %vm255_vm0, %v3342_v17, 0  ;;  %v1609_v17 = vsel %vm255_vm0, %v3366_v37, 0 }
 0x2aa   : > { %605 = vadd.xlane.f32.xlu2 %v604_v8 }
 0x2ac   : > { %v371_v53 = vpop.xlane.xlu2 %370 }
 0x2ad   : > { %2861 = vrcp.f32 %v371_v53 }
 0x2ae   : > { %2863 = vpow2.f32 %v590_v48 }
 0x2b2   : > { %1001 = vmax.xlane.f32.xlu2 %v1000_v11 }
 0x2b3   : > { %v2862_v39 = vpop.eup %2861 }
 0x2b4   : > { %v377_v5 = vpop.xlane.xlu2 %376  ;;  %v399_v22 = vmul.f32 %v2862_v39, %v3526_v49  ;;  %v3611_v18 = vpop.eup %2863 }
 0x2b5   : > { %2865 = vrcp.f32 %v377_v5  ;;  %v613_v2 = vsel %vm317_vm1, %v3611_v18, 0.0  ;;  %v637_v49 = vpop.permute.xlu0 %636 }
 0x2b6   : > { %v406_v59 = vpack.c.bf16 %v399_v22, %v398_v25  ;;  %2867 = vrcp.f32 %v3544_v10  ;;  %v1165_v10 = vsel %vm255_vm0, %v3339_v16, 0  ;;  %v1612_v16 = vsel %vm255_vm0, %v3371_v40, 0 }
 0x2b7   : > { %2869 = vrcp.f32 %v3548_v26 }
 0x2b8   : > { %2543 = vmatmul.msk.bf16.vlgmr.msra.gmra.mxu1 %vm317_vm1, %v406_v59 }
 0x2b9   : > { %1177 = vmatpush.bf16.xpose.msra.mxu1 %v1171_v13 }
 0x2ba   : > { %614 = vadd.xlane.f32.xlu2 %v613_v2 }
 0x2bb   : > { %v2866_v14 = vpop.eup %2865 }
 0x2bc   : > { %v639_v55 = vpop.permute.xlu2 %638  ;;  %v2868_v8 = vpop.eup %2867  ;;  %v401_v60 = vmul.f32 %v2866_v14, %v3536_v33 }
 0x2bd   : > { %666 = vmatpush.bf16.msrb.mxu3 %v639_v55  ;;  %v400_v48 = vmul.f32 %v2868_v8, %v3443_v58  ;;  %v2870_v33 = vpop.eup %2869 }
 0x2be   : > { %v402_v25 = vmul.f32 %v2870_v33, %v3448_v20  ;;  %v603_v20 = vpop.xlane.xlu1 %602 }
 0x2bf   : > { %v407_v53 = vpack.c.bf16 %v401_v60, %v400_v48 }
 0x2c1   : > { %1178 = vmatpush.bf16.xpose.msra.mxu1 %v1168_v15  ;;  %667 = vmatpush.bf16.msrb.mxu3 %v637_v49 }
 0x2c4   : > { %v3650_v40 = vpop.permute.xlu2 %1583 }
 0x2c8   : > { %2544 = vmatmul.msk.bf16.gmra.mxu1 %vm317_vm1, %v407_v53 }
 0x2c9   : > { %1179 = vmatpush.bf16.xpose.msra.mxu1 %v1165_v10 }
 0x2d1   : > { %1180 = vmatpush.bf16.xpose.msra.mxu1 %v1162_v35 }
 0x2d2   : > { %864 = vrot.lane.b32.xlu2 %v3290_v44, %s3098_s28 }
 0x2d8   : > { %2555 = vmatmul.msk.bf16.vlgmr.msrb.gmra.mxu1 %vm255_vm0, %v3285_v38  ;;  %v386_v38 = vpop.xlane.xlu0 %385 }
 0x2d9   : > { %1621 = vmatpush.bf16.xpose.msrb.mxu1 %v1615_v4 }
 0x2da   : > { %862 = vrot.lane.b32.xlu2 %v3296_v47, %s3098_s28 }
 0x2e0   : > { %v3652_v58 = vpop.xlane.xlu0 %599 }
 0x2e1   : > { %1622 = vmatpush.bf16.xpose.msrb.mxu1 %v1612_v16 }
 0x2e2   : > { %1084 = vrot.lane.b32.xlu2 %v3296_v47, %s3094_s24 }
 0x2e8   : > { %2556 = vmatmul.msk.bf16.gmra.mxu1 %vm255_vm0, %v3292_v45  ;;  %v1404_v45 = vpop.f32.mrf.mxu0  ;;  %v999_v31 = vpop.xlane.xlu0 %998 }
 0x2e9   : > { %1623 = vmatpush.bf16.xpose.msrb.mxu1 %v1609_v17  ;;  %v3684_v4 = vmul.f32 0.35355338, %v1404_v45 }
 0x2ea   : > { %1082 = vrot.lane.b32.xlu2 %v3302_v52, %s3094_s24 }
 0x2f0   : > { %v1406_v11 = vpop.f32.mrf.mxu0 }
 0x2f1   : > { %1624 = vmatpush.bf16.xpose.msrb.mxu1 %v1606_v29 }
 0x2f2   : > { %858 = vrot.lane.b32.xlu2 %v3314_v57, %s3098_s28 }
 0x2f8   : > { %2557 = vmatmul.msk.bf16.gmra.mxu1 %vm255_vm0, %v3311_v56  ;;  %v3664_v56 = vpop.xlane.xlu0 %608  ;;  %v3666_v26 = vpop.f32.mrf.mxu0 }
 0x2fa   : > { %1080 = vrot.lane.b32.xlu2 %v3314_v57, %s3094_s24 }
 0x2fd   : > { %v383_v37 = vpop.xlane.xlu2 %382 }
 0x2fe   : > { %2871 = vrcp.f32 %v383_v37 }
 0x300   : > { %v1005_v15 = vpop.xlane.xlu0 %1004  ;;  %v1411_v60 = vpop.f32.mrf.mxu0 }
 0x301   : > { %v1017_v35 = vsub.f32 %v3542_v63, %v1005_v15  ;;  %v3688_v16 = vmul.f32 0.35355338, %v1411_v60  ;;  %v3729_v60 = vmul.f32 0.35355338, %v3666_v26 }
 0x303   : > { %v1441_v45 = vsel %vm317_vm1, %v3688_v16, -inf  ;;  %v1438_v26 = vsel %vm317_vm1, %v3729_v60, -inf }
 0x304   : > { %v2872_v39 = vpop.eup %2871 }
 0x305   : > { %v389_v5 = vpop.xlane.xlu2 %388  ;;  %v403_v22 = vmul.f32 %v2872_v39, %v3576_v51 }
 0x306   : > { %2873 = vrcp.f32 %v389_v5  ;;  %v3700_v5 = vmul.f32 0.35355338, %v1406_v11 }
 0x307   : > { %v408_v59 = vpack.c.bf16 %v403_v22, %v402_v25  ;;  %2875 = vrcp.f32 %v386_v38  ;;  %v1015_v38 = vsub.f32 %v3522_v54, %v999_v31 }
 0x308   : > { %2558 = vmatmul.msk.bf16.gmra.mxu1 %vm255_vm0, %v3333_v9  ;;  %v1414_v17 = vpop.f32.mrf.mxu0 }
 0x309   : > { %2545 = vmatmul.msk.bf16.vlgmr.msra.gmra.mxu3 %vm317_vm1, %v408_v59  ;;  %v1026_v39 = vmul.f32 1.442695, %v1015_v38 }
 0x30c   : > { %v2874_v55 = vpop.eup %2873 }
 0x30d   : > { %v993_v13 = vpop.xlane.xlu2 %992  ;;  %v2876_v49 = vpop.eup %2875  ;;  %v405_v51 = vmul.f32 %v2874_v55, %v3580_v12 }
 0x30e   : > { %v1013_v2 = vsub.f32 %v3585_v7, %v993_v13  ;;  %v404_v8 = vmul.f32 %v2876_v49, %v3498_v62  ;;  %v3681_v62 = vpop.xlane.xlu1 %611 }
 0x310   : > { %v1022_v14 = vmul.f32 1.442695, %v1013_v2  ;;  %v409_v53 = vpack.c.bf16 %v405_v51, %v404_v8  ;;  %v1416_v11 = vpop.f32.mrf.mxu0 }
 0x312   : > { %2877 = vpow2.f32 %v1022_v14  ;;  %v3717_v14 = vmul.f32 0.35355338, %v1414_v17 }
 0x313   : > { %2879 = vrcp.f32 %v3596_v34 }
 0x315   : > { %v996_v9 = vpop.xlane.xlu2 %995 }
 0x316   : > { %v1014_v48 = vsub.f32 %v3592_v36, %v996_v9  ;;  %v1030_v36 = vmul.f32 1.442695, %v1017_v35  ;;  %v1011_v31 = vpop.xlane.xlu1 %1010 }
 0x317   : > { %v1019_v2 = vsub.f32 %v3524_v43, %v1011_v31 }
 0x318   : > { %v3672_v10 = vpop.eup %2877  ;;  %v1024_v7 = vmul.f32 1.442695, %v1014_v48  ;;  %2571 = vmatmul.msk.bf16.vlgmr.msra.gmra.mxu1 %vm255_vm0, %v3350_v24  ;;  %v1419_v8 = vpop.f32.mrf.mxu0 }
 0x319   : > { %2546 = vmatmul.msk.bf16.gmra.mxu3 %vm317_vm1, %v409_v53  ;;  %v1039_v12 = vsel %vm317_vm1, %v3672_v10, 0.0  ;;  %v2880_v24 = vpop.eup %2879  ;;  %v1034_v43 = vmul.f32 1.442695, %v1019_v2  ;;  %v1008_v48 = vpop.xlane.xlu0 %1007 }
 0x31a   : > { %2881 = vpow2.f32 %v1024_v7  ;;  %1040 = vadd.xlane.f32.xlu0 %v1039_v12  ;;  %v624_v33 = vmul.f32 %v2880_v24, %v3512_v6  ;;  %v3736_v12 = vmul.f32 0.35355338, %v1419_v8  ;;  %v1018_v24 = vsub.f32 %v3550_v61, %v1008_v48 }
 0x31b   : > { %2883 = vrcp.f32 %v3554_v21  ;;  %v1432_v21 = vsel %vm317_vm1, %v3684_v4, -inf }
 0x31c   : > { %2885 = vpow2.f32 %v1030_v36  ;;  %v1032_v61 = vmul.f32 1.442695, %v1018_v24 }
 0x31d   : > { %v3686_v63 = vpop.xlane.xlu2 %605  ;;  %2887 = vpow2.f32 %v1026_v39 }
 0x31e   : > { %2889 = vrcp.f32 %v3652_v58 }
 0x320   : > { %v3690_v34 = vpop.eup %2881 }
 0x321   : > { %v1042_v29 = vsel %vm317_vm1, %v3690_v34, 0.0  ;;  %v2884_v37 = vpop.eup %2883 }
 0x322   : > { %1043 = vadd.xlane.f32.xlu1 %v1042_v29  ;;  %1433 = vmax.xlane.f32.xlu0 %v1432_v21  ;;  %v625_v54 = vmul.f32 %v2884_v37, %v3452_v28  ;;  %v3703_v22 = vpop.eup %2885  ;;  %v1435_v28 = vsel %vm317_vm1, %v3700_v5, -inf  ;;  %v1087_v29 = vpop.permute.xlu0 %1086 }
 0x323   : > { %1442 = vmax.xlane.f32.xlu2 %v1441_v45  ;;  %v1051_v6 = vsel %vm317_vm1, %v3703_v22, 0.0  ;;  %1108 = vmatpush.bf16.msrb.mxu2 %v1087_v29 }
 0x324   : > { %v632_v13 = vpack.c.bf16 %v625_v54, %v624_v33 }
 0x325   : > { %v1002_v25 = vpop.xlane.xlu2 %1001 }
 0x326   : > { %v1016_v59 = vsub.f32 %v3605_v3, %v1002_v25  ;;  %v3715_v3 = vpop.eup %2887 }
 0x327   : > { %v1045_v51 = vsel %vm317_vm1, %v3715_v3, 0.0 }
 0x328   : > { %v1028_v55 = vmul.f32 1.442695, %v1016_v59  ;;  %2572 = vmatmul.msk.bf16.gmra.mxu1 %vm255_vm0, %v3344_v19  ;;  %v2890_v19 = vpop.eup %2889  ;;  %v1421_v59 = vpop.f32.mrf.mxu0 }
 0x329   : > { %2551 = vmatmul.msk.bf16.vlgmr.msrb.gmra.mxu3 %vm317_vm1, %v632_v13  ;;  %v626_v9 = vmul.f32 %v2890_v19, %v3508_v41 }
 0x32a   : > { %2891 = vpow2.f32 %v1028_v55  ;;  %1436 = vmax.xlane.f32.xlu0 %v1435_v28  ;;  %1052 = vadd.xlane.f32.xlu1 %v1051_v6 }
 0x32b   : > { %2893 = vrcp.f32 %v603_v20  ;;  %v1444_v20 = vsel %vm317_vm1, %v3717_v14, -inf }
 0x32c   : > { %2895 = vpow2.f32 %v1034_v43 }
 0x32d   : > { %2897 = vrcp.f32 %v3686_v63  ;;  %v615_v38 = vpop.xlane.xlu2 %614 }
 0x32e   : > { %2899 = vrcp.f32 %v3664_v56 }
 0x32f   : > { %2901 = vpow2.f32 %v1032_v61 }
 0x330   : > { %v3719_v58 = vpop.eup %2891  ;;  %2903 = vrcp.f32 %v615_v38 }
 0x331   : > { %v1048_v49 = vsel %vm317_vm1, %v3719_v58, 0.0  ;;  %v2894_v15 = vpop.eup %2893  ;;  %2905 = vrcp.f32 %v3681_v62 }
 0x332   : > { %1049 = vadd.xlane.f32.xlu2 %v1048_v49  ;;  %1046 = vadd.xlane.f32.xlu0 %v1045_v51  ;;  %v627_v35 = vmul.f32 %v2894_v15, %v3496_v50  ;;  %v3734_v7 = vpop.eup %2895  ;;  %v1450_v50 = vsel %vm317_vm1, %v3736_v12, -inf  ;;  %v1038_v49 = vpop.xlane.xlu1 %1037 }
 0x333   : > { %1445 = vmax.xlane.f32.xlu1 %v1444_v20  ;;  %v1057_v41 = vsel %vm317_vm1, %v3734_v7, 0.0  ;;  %v2898_v21 = vpop.eup %2897  ;;  %2907 = vrcp.f32 %v1038_v49 }
 0x334   : > { %v633_v36 = vpack.c.bf16 %v627_v35, %v626_v9  ;;  %v2900_v37 = vpop.eup %2899  ;;  %v628_v45 = vmul.f32 %v2898_v21, %v3598_v46  ;;  %v3768_v46 = vmul.f32 0.35355338, %v1421_v59  ;;  %v1848_v59 = vpop.f32.mrf.mxu0 }
 0x335   : > { %v3731_v53 = vpop.f32.mrf.mxu1  ;;  %v629_v56 = vmul.f32 %v2900_v37, %v3534_v0  ;;  %v3760_v39 = vpop.eup %2901 }
 0x336   : > { %4626 = vst [vmem:[#allocation3_spill] sm:$0xff] %v3731_v53  ;;  %v865_v54 = vpop.permute.xlu2 %864  ;;  %v1054_v25 = vsel %vm317_vm1, %v3760_v39, 0.0  ;;  %v2904_v2 = vpop.eup %2903 }
 0x337   : > { %v634_v31 = vpack.c.bf16 %v629_v56, %v628_v45  ;;  %886 = vmatpush.bf16.msra.mxu3 %v865_v54  ;;  %v2906_v55 = vpop.eup %2905  ;;  %v631_v28 = vmul.f32 %v2904_v2, %v3611_v18 }
 0x338   : > { %2573 = vmatmul.msk.bf16.gmra.mxu1 %vm255_vm0, %v3354_v27  ;;  %v3750_v27 = vmul.f32 0.35355338, %v1416_v11  ;;  %v630_v6 = vmul.f32 %v2906_v55, %v3510_v23  ;;  %v3832_v55 = vmul.f32 0.35355338, %v1848_v59 }
 0x339   : > { %2552 = vmatmul.msk.bf16.gmra.mxu3 %vm317_vm1, %v633_v36 }
 0x33a   : > { %1058 = vadd.xlane.f32.xlu2 %v1057_v41  ;;  %1439 = vmax.xlane.f32.xlu0 %v1438_v26  ;;  %v1447_v63 = vsel %vm317_vm1, %v3750_v27, -inf  ;;  %v635_v43 = vpack.c.bf16 %v631_v28, %v630_v6  ;;  %v861_v15 = vpop.permute.xlu1 %860  ;;  %v2908_v41 = vpop.eup %2907 }
 0x33b   : > { %1451 = vmax.xlane.f32.xlu1 %v1450_v50  ;;  %v1068_v50 = vmul.f32 %v2908_v41, %v3565_v1 }
 0x33d   : > { %v3752_v17 = vpop.f32.mrf.mxu1 }
 0x33e   : > { %4627 = vst [vmem:[#allocation4_spill] sm:$0xff] %v3752_v17  ;;  %v863_v13 = vpop.permute.xlu2 %862 }
 0x33f   : > { %887 = vmatpush.bf16.msra.mxu3 %v863_v13 }
 0x342   : > { %1448 = vmax.xlane.f32.xlu0 %v1447_v63 }
 0x343   : > { %888 = vmatpush.bf16.msra.mxu3 %v861_v15 }
 0x345   : > { %v3757_v33 = vpop.f32.mrf.mxu1 }
 0x346   : > { %4628 = vst [vmem:[#allocation5_spill] sm:$0xff] %v3757_v33  ;;  %v1085_v11 = vpop.permute.xlu2 %1084 }
 0x347   : > { %1109 = vmatpush.bf16.msrb.mxu2 %v1085_v11 }
 0x348   : > { %2574 = vmatmul.msk.bf16.gmra.mxu1 %vm255_vm0, %v3361_v30  ;;  %v1453_v30 = vsel %vm317_vm1, %v3768_v46, -inf }
 0x349   : > { %2553 = vmatmul.msk.bf16.gmra.mxu3 %vm317_vm1, %v634_v31 }
 0x34a   : > { %1055 = vadd.xlane.f32.xlu0 %v1054_v25 }
 0x34d   : > { %v3770_v0 = vpop.f32.mrf.mxu1 }
 0x34e   : > { %4629 = vst [vmem:[#allocation6_spill] sm:$0xff] %v3770_v0  ;;  %v1083_v19 = vpop.permute.xlu2 %1082 }
 0x34f   : > { %1110 = vmatpush.bf16.msrb.mxu2 %v1083_v19 }
 0x352   : > { %1454 = vmax.xlane.f32.xlu0 %v1453_v30  ;;  %1308 = vrot.lane.b32.xlu2 %v3290_v44, %s3100_s30 }
 0x354   : > { %1530 = vrot.lane.b32.xlu1 %v3290_v44, %s3102_s6 }
 0x355   : > { %v3779_v62 = vpop.f32.mrf.mxu1 }
 0x356   : > { %v859_v51 = vpop.permute.xlu2 %858 }
 0x357   : > { %889 = vmatpush.bf16.msra.mxu3 %v859_v51 }
 0x358   : > { %2587 = vmatmul.msk.bf16.vlgmr.msrb.gmra.mxu1 %vm255_vm0, %v3413_v32  ;;  %v4630_v32 = vld [vmem:[#allocation2_spill] sm:$0xff] }
 0x359   : > { %2554 = vmatmul.msk.bf16.gmra.mxu3 %vm317_vm1, %v635_v43 }
 0x35a   : > { %1306 = vrot.lane.b32.xlu2 %v3296_v47, %s3100_s30 }
 0x35c   : > { %1528 = vrot.lane.b32.xlu1 %v3296_v47, %s3102_s6 }
 0x35d   : > { %v3789_v18 = vpop.f32.mrf.mxu1 }
 0x35e   : > { %v1081_v9 = vpop.permute.xlu2 %1080 }
 0x35f   : > { %1111 = vmatpush.bf16.msrb.mxu2 %v1081_v9  ;;  %v1876_v9 = vsel %vm317_vm1, %v3832_v55, -inf }
 0x364   : > { %1526 = vrot.lane.b32.xlu1 %v3302_v52, %s3102_s6 }
 0x365   : > { %v3793_v23 = vpop.f32.mrf.mxu1 }
 0x368   : > { %2588 = vmatmul.msk.bf16.gmra.mxu1 %vm255_vm0, %v4630_v32 }
 0x36c   : > { %1302 = vrot.lane.b32.xlu1 %v3314_v57, %s3100_s30 }
 0x36d   : > { %v3799_v20 = vpop.f32.mrf.mxu1 }
 0x375   : > { %v3801_v8 = vpop.f32.mrf.mxu1 }
 0x378   : > { %2589 = vmatmul.msk.bf16.gmra.mxu1 %vm255_vm0, %v3556_v42 }
 0x37d   : > { %v3805_v48 = vpop.f32.mrf.mxu1 }
 0x385   : > { %v3807_v35 = vpop.f32.mrf.mxu1 }
 0x388   : > { %2590 = vmatmul.msk.bf16.gmra.mxu1 %vm255_vm0, %v3650_v40 }
 0x38d   : > { %v1041_v36 = vpop.xlane.xlu0 %1040  ;;  %v3811_v24 = vpop.f32.mrf.mxu1 }
 0x38e   : > { %2909 = vrcp.f32 %v1041_v36  ;;  %v1850_v36 = vpop.f32.mrf.mxu0 }
 0x394   : > { %v2910_v26 = vpop.eup %2909 }
 0x395   : > { %v1069_v61 = vmul.f32 %v2910_v26, %v3672_v10  ;;  %v1434_v38 = vpop.xlane.xlu0 %1433  ;;  %v3816_v29 = vpop.f32.mrf.mxu1  ;;  %v3843_v26 = vmul.f32 0.35355338, %v1850_v36 }
 0x396   : > { %v1456_v42 = vsub.f32 %v3684_v4, %v1434_v38  ;;  %v1044_v54 = vpop.xlane.xlu1 %1043 }
 0x397   : > { %v1076_v21 = vpack.c.bf16 %v1069_v61, %v1068_v50  ;;  %v1879_v61 = vsel %vm317_vm1, %v3843_v26, -inf }
 0x398   : > { %v1464_v63 = vmul.f32 1.442695, %v1456_v42 }
 0x399   : > { %2567 = vmatmul.msk.bf16.vlgmr.msrb.gmra.mxu2 %vm317_vm1, %v1076_v21 }
 0x39a   : > { %2911 = vpow2.f32 %v1464_v63 }
 0x39d   : > { %v1437_v40 = vpop.xlane.xlu0 %1436  ;;  %v3820_v45 = vpop.f32.mrf.mxu1 }
 0x39e   : > { %v1457_v37 = vsub.f32 %v3700_v5, %v1437_v40  ;;  %v1443_v5 = vpop.xlane.xlu2 %1442  ;;  %v1053_v41 = vpop.xlane.xlu1 %1052  ;;  %v3859_v40 = vmul.f32 0.35355338, %v3789_v18 }
 0x39f   : > { %v1459_v49 = vsub.f32 %v3688_v16, %v1443_v5  ;;  %v1853_v18 = vpop.f32.mrf.mxu0  ;;  %v3872_v5 = vmul.f32 0.35355338, %v3801_v8 }
 0x3a0   : > { %v3822_v56 = vpop.eup %2911  ;;  %v1466_v1 = vmul.f32 1.442695, %v1457_v37 }
 0x3a1   : > { %v1480_v10 = vsel %vm317_vm1, %v3822_v56, 0.0 }
 0x3a2   : > { %2913 = vpow2.f32 %v1466_v1  ;;  %1481 = vadd.xlane.f32.xlu0 %v1480_v10 }
 0x3a3   : > { %2915 = vrcp.f32 %v1044_v54 }
 0x3a5   : > { %v1047_v4 = vpop.xlane.xlu0 %1046  ;;  %v3826_v31 = vpop.f32.mrf.mxu1 }
 0x3a6   : > { %2917 = vrcp.f32 %v1047_v4  ;;  %v1050_v51 = vpop.xlane.xlu2 %1049  ;;  %v3904_v36 = vpop.xlane.xlu1 %1445 }
 0x3a8   : > { %v3828_v25 = vpop.eup %2913 }
 0x3a9   : > { %v1483_v13 = vsel %vm317_vm1, %v3828_v25, 0.0  ;;  %v2916_v2 = vpop.eup %2915 }
 0x3aa   : > { %1484 = vadd.xlane.f32.xlu2 %v1483_v13  ;;  %v1070_v43 = vmul.f32 %v2916_v2, %v3690_v34 }
 0x3ac   : > { %v2918_v30 = vpop.eup %2917 }
 0x3ad   : > { %v1440_v28 = vpop.xlane.xlu0 %1439  ;;  %v3835_v11 = vpop.f32.mrf.mxu1  ;;  %v1071_v19 = vmul.f32 %v2918_v30, %v3715_v3 }
 0x3ae   : > { %v1458_v6 = vsub.f32 %v3729_v60, %v1440_v28  ;;  %v1470_v60 = vmul.f32 1.442695, %v1459_v49  ;;  %v1059_v59 = vpop.xlane.xlu2 %1058  ;;  %v778_v28 = vsel %vm317_vm1, %v3872_v5, -inf  ;;  %v3886_v49 = vpop.f32.mrf.mxu0 }
 0x3af   : > { %v1077_v15 = vpack.c.bf16 %v1071_v19, %v1070_v43  ;;  %v3884_v19 = vmul.f32 0.35355338, %v3820_v45  ;;  %v3900_v45 = vmul.f32 0.35355338, %v3826_v31 }
 0x3b0   : > { %v1468_v32 = vmul.f32 1.442695, %v1458_v6 }
 0x3b1   : > { %2568 = vmatmul.msk.bf16.gmra.mxu2 %vm317_vm1, %v1077_v15 }
 0x3b2   : > { %2919 = vpow2.f32 %v1468_v32  ;;  %1877 = vmax.xlane.f32.xlu2 %v1876_v9  ;;  %v1213_v9 = vsel %vm317_vm1, %v3884_v19, -inf }
 0x3b3   : > { %2921 = vrcp.f32 %v1050_v51  ;;  %v3889_v51 = vmul.f32 0.35355338, %v3816_v29 }
 0x3b4   : > { %2923 = vrcp.f32 %v1053_v41  ;;  %v1216_v41 = vsel %vm317_vm1, %v3900_v45, -inf }
 0x3b5   : > { %v1449_v34 = vpop.xlane.xlu0 %1448  ;;  %v3845_v3 = vpop.f32.mrf.mxu1  ;;  %2925 = vpow2.f32 %v1470_v60 }
 0x3b6   : > { %1304 = vrot.lane.b32.xlu0 %v3302_v52, %s3100_s30  ;;  %v1461_v30 = vsub.f32 %v3750_v27, %v1449_v34 }
 0x3b8   : > { %v3849_v16 = vpop.eup %2919 }
 0x3b9   : > { %v2922_v50 = vpop.eup %2921  ;;  %v1486_v38 = vsel %vm317_vm1, %v3849_v16, 0.0 }
 0x3ba   : > { %1880 = vmax.xlane.f32.xlu2 %v1879_v61  ;;  %1487 = vadd.xlane.f32.xlu1 %v1486_v38  ;;  %v2924_v42 = vpop.eup %2923  ;;  %v1072_v21 = vmul.f32 %v2922_v50, %v3719_v58  ;;  %v769_v58 = vsel %vm317_vm1, %v3859_v40, -inf  ;;  %v3912_v50 = vmul.f32 0.35355338, %v1853_v18 }
 0x3bb   : > { %v3856_v63 = vpop.eup %2925  ;;  %v1073_v1 = vmul.f32 %v2924_v42, %v3703_v22  ;;  %v3875_v22 = vmul.f32 0.35355338, %v3811_v24  ;;  %v1474_v24 = vmul.f32 1.442695, %v1461_v30  ;;  %v1452_v42 = vpop.xlane.xlu1 %1451 }
 0x3bc   : > { %v1489_v4 = vsel %vm317_vm1, %v3856_v63, 0.0  ;;  %v1882_v31 = vsel %vm317_vm1, %v3912_v50, -inf }
 0x3bd   : > { %v3861_v37 = vpop.f32.mrf.mxu1  ;;  %v1056_v10 = vpop.xlane.xlu0 %1055  ;;  %v1078_v54 = vpack.c.bf16 %v1073_v1, %v1072_v21  ;;  %v787_v6 = vsel %vm317_vm1, %v3875_v22, -inf  ;;  %v3921_v1 = vmul.f32 0.35355338, %v3779_v62 }
 0x3be   : > { %1524 = vrot.lane.b32.xlu0 %v3314_v57, %s3102_s6  ;;  %2927 = vrcp.f32 %v1056_v10 }
 0x3bf   : > { %2929 = vrcp.f32 %v1059_v59  ;;  %v766_v59 = vsel %vm317_vm1, %v3921_v1, -inf }
 0x3c0   : > { %2931 = vpow2.f32 %v1474_v24 }
 0x3c1   : > { %2569 = vmatmul.msk.bf16.gmra.mxu2 %vm317_vm1, %v1078_v54 }
 0x3c2   : > { %1490 = vadd.xlane.f32.xlu2 %v1489_v4  ;;  %770 = vmax.xlane.f32.xlu1 %v769_v58  ;;  %v3928_v4 = vmul.f32 0.35355338, %v3835_v11  ;;  %v1462_v58 = vsub.f32 %v3736_v12, %v1452_v42 }
 0x3c4   : > { %v2928_v2 = vpop.eup %2927  ;;  %v1219_v62 = vsel %vm317_vm1, %v3928_v4, -inf  ;;  %v1476_v11 = vmul.f32 1.442695, %v1462_v58  ;;  %v3976_v58 = vmul.f32 0.35355338, %v3807_v35 }
 0x3c5   : > { %v1197_v13 = vpop.f32.mrf.mxu1  ;;  %v2930_v43 = vpop.eup %2929  ;;  %v1074_v8 = vmul.f32 %v2928_v2, %v3760_v39  ;;  %v1210_v39 = vsel %vm317_vm1, %v3889_v51, -inf }
 0x3c6   : > { %v1075_v27 = vmul.f32 %v2930_v43, %v3734_v7  ;;  %v3902_v29 = vpop.eup %2931  ;;  %v1858_v7 = vpop.f32.mrf.mxu0  ;;  %v3943_v12 = vmul.f32 0.35355338, %v1197_v13  ;;  %2933 = vpow2.f32 %v1476_v11  ;;  %v3956_v13 = vmul.f32 0.35355338, %v3799_v20 }
 0x3c7   : > { %v1495_v34 = vsel %vm317_vm1, %v3902_v29, 0.0  ;;  %v3914_v61 = vmul.f32 0.35355338, %v1858_v7  ;;  %v1309_v2 = vpop.permute.xlu2 %1308  ;;  %v1531_v30 = vpop.permute.xlu1 %1530  ;;  %v3967_v20 = vmul.f32 0.35355338, %v3805_v48  ;;  %v1460_v48 = vsub.f32 %v3717_v14, %v3904_v36 }
 0x3c8   : > { %v1079_v15 = vpack.c.bf16 %v1075_v27, %v1074_v8  ;;  %1330 = vmatpush.bf16.msrb.mxu3 %v1309_v2  ;;  %1552 = vmatpush.bf16.msra.mxu2 %v1531_v30  ;;  %v1228_v27 = vsel %vm317_vm1, %v3943_v12, -inf  ;;  %v3987_v11 = vmul.f32 0.35355338, %v3886_v49 }
 0x3c9   : > { %v1888_v21 = vsel %vm317_vm1, %v3914_v61, -inf  ;;  %v781_v42 = vsel %vm317_vm1, %v3967_v20, -inf  ;;  %v1472_v30 = vmul.f32 1.442695, %v1460_v48 }
 0x3ca   : > { %779 = vmax.xlane.f32.xlu2 %v778_v28  ;;  %788 = vmax.xlane.f32.xlu1 %v787_v6  ;;  %v3938_v28 = vmul.f32 0.35355338, %v3793_v23  ;;  %v3941_v6 = vmul.f32 0.35355338, %v3861_v37  ;;  %v1885_v35 = vsel %vm317_vm1, %v3987_v11, -inf }
 0x3cb   : > { %2935 = vpow2.f32 %v1472_v30 }
 0x3cc   : > { %v772_v8 = vsel %vm317_vm1, %v3938_v28, -inf  ;;  %v1225_v23 = vsel %vm317_vm1, %v3941_v6, -inf }
 0x3cd   : > { %v3892_v32 = vpop.f32.mrf.mxu1 }
 0x3ce   : > { %v1860_v38 = vpop.f32.mrf.mxu0 }
 0x3cf   : > { %v3925_v54 = vmul.f32 0.35355338, %v1860_v38  ;;  %v1307_v37 = vpop.permute.xlu2 %1306 }
 0x3d0   : > { %1331 = vmatpush.bf16.msrb.mxu3 %v1307_v37  ;;  %v3997_v37 = vmul.f32 0.35355338, %v3845_v3 }
 0x3d1   : > { %2570 = vmatmul.msk.bf16.gmra.mxu2 %vm317_vm1, %v1079_v15  ;;  %v1891_v18 = vsel %vm317_vm1, %v3925_v54, -inf  ;;  %v1529_v15 = vpop.permute.xlu1 %1528 }
 0x3d2   : > { %1214 = vmax.xlane.f32.xlu2 %v1213_v9  ;;  %1211 = vmax.xlane.f32.xlu1 %v1210_v39  ;;  %v3958_v9 = vpop.eup %2933  ;;  %v775_v39 = vsel %vm317_vm1, %v3956_v13, -inf }
 0x3d3   : > { %1553 = vmatpush.bf16.msra.mxu2 %v1529_v15  ;;  %v1222_v15 = vsel %vm317_vm1, %v3997_v37, -inf }
 0x3d5   : > { %v3908_v60 = vpop.f32.mrf.mxu1 }
 0x3d6   : > { %v3949_v24 = vpop.f32.mrf.mxu0 }
 0x3d9   : > { %v1527_v38 = vpop.permute.xlu1 %1526 }
 0x3da   : > { %1217 = vmax.xlane.f32.xlu2 %v1216_v41  ;;  %1496 = vadd.xlane.f32.xlu1 %v1495_v34  ;;  %v1498_v41 = vsel %vm317_vm1, %v3958_v9, 0.0 }
 0x3db   : > { %1554 = vmatpush.bf16.msra.mxu2 %v1527_v38 }
 0x3dd   : > { %v3923_v10 = vpop.f32.mrf.mxu1 }
 0x3de   : > { %v1865_v34 = vpop.f32.mrf.mxu0 }
 0x3e2   : > { %1883 = vmax.xlane.f32.xlu2 %v1882_v31  ;;  %1889 = vmax.xlane.f32.xlu1 %v1888_v21  ;;  %v3969_v31 = vmul.f32 0.35355338, %v1865_v34 }
 0x3e4   : > { %v1897_v21 = vsel %vm317_vm1, %v3969_v31, -inf }
 0x3e5   : > { %v3945_v43 = vpop.f32.mrf.mxu1 }
 0x3e8   : > { %767 = vmax.xlane.f32.xlu0 %v766_v59 }
 0x3ea   : > { %1892 = vmax.xlane.f32.xlu2 %v1891_v18  ;;  %1220 = vmax.xlane.f32.xlu1 %v1219_v62  ;;  %v784_v62 = vsel %vm317_vm1, %v3976_v58, -inf }
 0x3ed   : > { %v3962_v7 = vpop.f32.mrf.mxu1 }
 0x3f0   : > { %773 = vmax.xlane.f32.xlu0 %v772_v8  ;;  %v1455_v8 = vpop.xlane.xlu0 %1454 }
 0x3f1   : > { %v1463_v14 = vsub.f32 %v3768_v46, %v1455_v8 }
 0x3f2   : > { %1226 = vmax.xlane.f32.xlu2 %v1225_v23  ;;  %1229 = vmax.xlane.f32.xlu1 %v1228_v27  ;;  %v3991_v23 = vpop.eup %2935 }
 0x3f3   : > { %v1492_v36 = vsel %vm317_vm1, %v3991_v23, 0.0  ;;  %v1478_v27 = vmul.f32 1.442695, %v1463_v14 }
 0x3f5   : > { %v1636_v59 = vpop.f32.mrf.mxu1  ;;  %2937 = vpow2.f32 %v1478_v27 }
 0x3f6   : > { %v3978_v18 = vmul.f32 0.35355338, %v1636_v59  ;;  %v4010_v59 = vmul.f32 0.35355338, %v3892_v32  ;;  %v4021_v32 = vmul.f32 0.35355338, %v3923_v10 }
 0x3f8   : > { %776 = vmax.xlane.f32.xlu0 %v775_v39  ;;  %v1666_v2 = vsel %vm317_vm1, %v3978_v18, -inf }
 0x3fa   : > { %1499 = vadd.xlane.f32.xlu2 %v1498_v41 }
 0x3fb   : > { %v4003_v34 = vpop.eup %2937 }
 0x3fc   : > { %v1501_v38 = vsel %vm317_vm1, %v4003_v34, 0.0 }
 0x400   : > { %782 = vmax.xlane.f32.xlu0 %v781_v42  ;;  %v1303_v42 = vpop.permute.xlu1 %1302 }
 0x402   : > { %1898 = vmax.xlane.f32.xlu2 %v1897_v21 }
 0x408   : > { %785 = vmax.xlane.f32.xlu0 %v784_v62 }
 0x40a   : > { %1667 = vmax.xlane.f32.xlu2 %v1666_v2 }
 0x410   : > { %1886 = vmax.xlane.f32.xlu0 %v1885_v35  ;;  %v1231_v35 = vsel %vm317_vm1, %v4010_v59, -inf }
 0x415   : > { %v1482_v39 = vpop.xlane.xlu0 %1481 }
 0x418   : > { %1493 = vadd.xlane.f32.xlu0 %v1492_v36 }
 0x41c   : > { %v4001_v41 = vpop.f32.mrf.mxu2 }
 0x41d   : > { %v1485_v49 = vpop.xlane.xlu2 %1484  ;;  %4631 = vst [vmem:[#allocation2_spill] sm:$0xff] %v4001_v41 }
 0x41e   : > { %2939 = vrcp.f32 %v1485_v49 }
 0x41f   : > { %2941 = vrcp.f32 %v1482_v39 }
 0x420   : > { %1223 = vmax.xlane.f32.xlu0 %v1222_v15 }
 0x424   : > { %v2940_v21 = vpop.eup %2939  ;;  %v4012_v62 = vpop.f32.mrf.mxu2 }
 0x425   : > { %v4005_v46 = vpop.xlane.xlu2 %1877  ;;  %v2942_v48 = vpop.eup %2941  ;;  %4632 = vst [vmem:[#allocation7_spill] sm:$0xff] %v4012_v62  ;;  %v1513_v30 = vmul.f32 %v2940_v21, %v3828_v25  ;;  %v1657_v25 = vsel %vm317_vm1, %v4021_v32, -inf }
 0x426   : > { %v1512_v8 = vmul.f32 %v2942_v48, %v3822_v56 }
 0x428   : > { %v1305_v3 = vpop.permute.xlu0 %1304  ;;  %1502 = vadd.xlane.f32.xlu0 %v1501_v38  ;;  %v1520_v36 = vpack.c.bf16 %v1513_v30, %v1512_v8 }
 0x429   : > { %1332 = vmatpush.bf16.msrb.mxu3 %v1305_v3 }
 0x42d   : > { %v4014_v2 = vpop.xlane.xlu2 %1880  ;;  %1333 = vmatpush.bf16.msrb.mxu3 %v1303_v42  ;;  %v1488_v27 = vpop.xlane.xlu1 %1487 }
 0x430   : > { %v1525_v14 = vpop.permute.xlu0 %1524  ;;  %1232 = vmax.xlane.f32.xlu0 %v1231_v35 }
 0x431   : > { %1555 = vmatpush.bf16.msra.mxu2 %v1525_v14 }
 0x434   : > { %2583 = vmatmul.msk.bf16.vlgmr.msra.gmra.mxu2 %vm317_vm1, %v1520_v36  ;;  %v4024_v49 = vpop.f32.mrf.mxu2 }
 0x435   : > { %4633 = vst [vmem:[#allocation8_spill] sm:$0xff] %v4024_v49  ;;  %v1491_v15 = vpop.xlane.xlu2 %1490  ;;  %v771_v8 = vpop.xlane.xlu1 %770 }
 0x436   : > { %2943 = vrcp.f32 %v1491_v15 }
 0x437   : > { %2945 = vrcp.f32 %v1488_v27 }
 0x438   : > { %1658 = vmax.xlane.f32.xlu0 %v1657_v25 }
 0x43c   : > { %v2944_v56 = vpop.eup %2943  ;;  %v4028_v38 = vpop.f32.mrf.mxu2 }
 0x43d   : > { %v2946_v39 = vpop.eup %2945  ;;  %4634 = vst [vmem:[#allocation9_spill] sm:$0xff] %v4028_v38  ;;  %v1515_v3 = vmul.f32 %v2944_v56, %v3856_v63  ;;  %v4041_v14 = vpop.xlane.xlu2 %779 }
 0x43e   : > { %v1514_v42 = vmul.f32 %v2946_v39, %v3849_v16  ;;  %v4044_v63 = vpop.xlane.xlu1 %788 }
 0x440   : > { %v1521_v21 = vpack.c.bf16 %v1515_v3, %v1514_v42  ;;  %v791_v3 = vsub.f32 %v3859_v40, %v771_v8 }
 0x444   : > { %2584 = vmatmul.msk.bf16.gmra.mxu2 %vm317_vm1, %v1521_v21  ;;  %v4035_v48 = vpop.f32.mrf.mxu2 }
 0x445   : > { %4635 = vst [vmem:[#allocation10_spill] sm:$0xff] %v4035_v48  ;;  %v4047_v56 = vpop.xlane.xlu2 %1214 }
 0x44c   : > { %v4037_v30 = vpop.f32.mrf.mxu2 }
 0x44d   : > { %4636 = vst [vmem:[#allocation11_spill] sm:$0xff] %v4037_v30  ;;  %v1218_v35 = vpop.xlane.xlu2 %1217 }
 0x45b   : > { %v768_v36 = vpop.xlane.xlu0 %767 }
 0x45c   : > { %v790_v27 = vsub.f32 %v3921_v1, %v768_v36  ;;  %v800_v1 = vmul.f32 1.442695, %v791_v3  ;;  %v4055_v36 = vmul.f32 0.35355338, %v3908_v60  ;;  %v4067_v60 = vmul.f32 0.35355338, %v3945_v43 }
 0x45d   : > { %v4082_v43 = vmul.f32 0.35355338, %v3949_v24 }
 0x45e   : > { %v798_v15 = vmul.f32 1.442695, %v790_v27  ;;  %v1654_v8 = vsel %vm317_vm1, %v4055_v36, -inf }
 0x460   : > { %2947 = vpow2.f32 %v798_v15  ;;  %v4057_v15 = vpop.xlane.xlu1 %1211 }
 0x463   : > { %v774_v16 = vpop.xlane.xlu0 %773 }
 0x464   : > { %v792_v25 = vsub.f32 %v3938_v28, %v774_v16 }
 0x466   : > { %v4049_v39 = vpop.eup %2947  ;;  %v802_v42 = vmul.f32 1.442695, %v792_v25 }
 0x467   : > { %v814_v21 = vsel %vm317_vm1, %v4049_v39, 0.0 }
 0x468   : > { %2949 = vpow2.f32 %v802_v42  ;;  %815 = vadd.xlane.f32.xlu1 %v814_v21  ;;  %v4073_v21 = vpop.f32.mrf.mxu1 }
 0x469   : > { %2951 = vpow2.f32 %v800_v1  ;;  %v1660_v1 = vsel %vm317_vm1, %v4067_v60, -inf }
 0x46b   : > { %v777_v27 = vpop.xlane.xlu0 %776 }
 0x46c   : > { %v793_v16 = vsub.f32 %v3956_v13, %v777_v27  ;;  %v1497_v13 = vpop.xlane.xlu1 %1496 }
 0x46e   : > { %v4059_v28 = vpop.eup %2949  ;;  %v804_v25 = vmul.f32 1.442695, %v793_v16  ;;  %v4079_v16 = vpop.xlane.xlu2 %1883 }
 0x46f   : > { %v820_v40 = vsel %vm317_vm1, %v4059_v28, 0.0  ;;  %v4071_v42 = vpop.eup %2951 }
 0x470   : > { %821 = vadd.xlane.f32.xlu0 %v820_v40  ;;  %1655 = vmax.xlane.f32.xlu1 %v1654_v8  ;;  %2953 = vpow2.f32 %v804_v25  ;;  %v817_v27 = vsel %vm317_vm1, %v4071_v42, 0.0  ;;  %v4087_v25 = vpop.f32.mrf.mxu1 }
 0x473   : > { %v4069_v3 = vpop.xlane.xlu0 %782 }
 0x476   : > { %v4084_v8 = vpop.eup %2953  ;;  %v4095_v24 = vpop.xlane.xlu2 %1892 }
 0x477   : > { %v823_v0 = vsel %vm317_vm1, %v4084_v8, 0.0 }
 0x478   : > { %1661 = vmax.xlane.f32.xlu0 %v1660_v1  ;;  %818 = vadd.xlane.f32.xlu1 %v817_v27  ;;  %v1894_v1 = vsel %vm317_vm1, %v4082_v43, -inf  ;;  %v4093_v27 = vpop.xlane.xlu1 %1889 }
 0x47b   : > { %v786_v40 = vpop.xlane.xlu0 %785 }
 0x47c   : > { %v796_v10 = vsub.f32 %v3976_v58, %v786_v40  ;;  %v1236_v58 = vsub.f32 %v3900_v45, %v1218_v35  ;;  %v1643_v40 = vpop.f32.mrf.mxu1 }
 0x47e   : > { %v810_v33 = vmul.f32 1.442695, %v796_v10  ;;  %v1246_v48 = vmul.f32 1.442695, %v1236_v58  ;;  %v1227_v30 = vpop.xlane.xlu2 %1226 }
 0x480   : > { %2955 = vpow2.f32 %v810_v33  ;;  %824 = vadd.xlane.f32.xlu0 %v823_v0  ;;  %1895 = vmax.xlane.f32.xlu1 %v1894_v1  ;;  %v4104_v33 = vmul.f32 0.35355338, %v1643_v40  ;;  %v1221_v0 = vpop.xlane.xlu1 %1220 }
 0x481   : > { %2957 = vrcp.f32 %v1497_v13  ;;  %v1237_v49 = vsub.f32 %v3928_v4, %v1221_v0  ;;  %v1239_v4 = vsub.f32 %v3941_v6, %v1227_v30 }
 0x482   : > { %v1675_v38 = vsel %vm317_vm1, %v4104_v33, -inf }
 0x483   : > { %v4097_v53 = vpop.xlane.xlu0 %1886  ;;  %v1248_v62 = vmul.f32 1.442695, %v1237_v49 }
 0x486   : > { %v4099_v17 = vpop.eup %2955  ;;  %v1500_v40 = vpop.xlane.xlu2 %1499 }
 0x487   : > { %v832_v10 = vsel %vm317_vm1, %v4099_v17, 0.0  ;;  %v2958_v45 = vpop.eup %2957 }
 0x488   : > { %833 = vadd.xlane.f32.xlu2 %v832_v10  ;;  %v1517_v58 = vmul.f32 %v2958_v45, %v3902_v29  ;;  %v1252_v29 = vmul.f32 1.442695, %v1239_v4 }
 0x48b   : > { %v1494_v1 = vpop.xlane.xlu0 %1493 }
 0x48c   : > { %2959 = vrcp.f32 %v1494_v1 }
 0x48d   : > { %2961 = vpow2.f32 %v1246_v48 }
 0x48e   : > { %2963 = vpow2.f32 %v1248_v62  ;;  %v1900_v62 = vsub.f32 %v3832_v55, %v4005_v46 }
 0x48f   : > { %2965 = vrcp.f32 %v1500_v40  ;;  %v1234_v40 = vsub.f32 %v3889_v51, %v4057_v15  ;;  %v1235_v51 = vsub.f32 %v3884_v19, %v4047_v56 }
 0x490   : > { %1676 = vmax.xlane.f32.xlu2 %v1675_v38  ;;  %v1908_v1 = vmul.f32 1.442695, %v1900_v62  ;;  %v1230_v62 = vpop.xlane.xlu1 %1229 }
 0x491   : > { %v1244_v15 = vmul.f32 1.442695, %v1235_v51  ;;  %v1240_v56 = vsub.f32 %v3943_v12, %v1230_v62 }
 0x492   : > { %v2960_v35 = vpop.eup %2959 }
 0x493   : > { %v4109_v41 = vpop.xlane.xlu0 %1223  ;;  %v1516_v13 = vmul.f32 %v2960_v35, %v3991_v23  ;;  %v4113_v10 = vpop.eup %2961 }
 0x494   : > { %1752 = vrot.lane.b32.xlu0 %v3290_v44, %s3104_s8  ;;  %v1264_v49 = vsel %vm317_vm1, %v4113_v10, 0.0  ;;  %v4123_v38 = vpop.eup %2963 }
 0x495   : > { %v1522_v48 = vpack.c.bf16 %v1517_v58, %v1516_v13  ;;  %v1267_v6 = vsel %vm317_vm1, %v4123_v38, 0.0  ;;  %v2966_v30 = vpop.eup %2965  ;;  %v795_v58 = vsub.f32 %v3967_v20, %v4069_v3  ;;  %v4151_v20 = vmul.f32 0.35355338, %v3962_v7 }
 0x496   : > { %v1518_v45 = vmul.f32 %v2966_v30, %v3958_v9  ;;  %v1242_v3 = vmul.f32 1.442695, %v1234_v40  ;;  %v4198_v40 = vpop.f32.mrf.mxu2 }
 0x497   : > { %2585 = vmatmul.msk.bf16.gmra.mxu2 %vm317_vm1, %v1522_v48  ;;  %v808_v48 = vmul.f32 1.442695, %v795_v58 }
 0x498   : > { %1265 = vadd.xlane.f32.xlu2 %v1264_v49 }
 0x499   : > { %1974 = vrot.lane.b32.xlu1 %v3290_v44, %s3105_s9 }
 0x49b   : > { %v1503_v23 = vpop.xlane.xlu0 %1502 }
 0x49c   : > { %2967 = vrcp.f32 %v1503_v23  ;;  %v4154_v23 = vmul.f32 0.35355338, %v4073_v21  ;;  %v797_v21 = vsub.f32 %v3875_v22, %v4044_v63  ;;  %v1238_v22 = vsub.f32 %v3997_v37, %v4109_v41 }
 0x49d   : > { %2969 = vpow2.f32 %v1252_v29 }
 0x49e   : > { %2971 = vpow2.f32 %v1908_v1  ;;  %v812_v30 = vmul.f32 1.442695, %v797_v21  ;;  %v4176_v1 = vmul.f32 0.35355338, %v4087_v25 }
 0x49f   : > { %2973 = vpow2.f32 %v808_v48 }
 0x4a0   : > { %1268 = vadd.xlane.f32.xlu2 %v1267_v6  ;;  %v1672_v12 = vsel %vm317_vm1, %v4176_v1, -inf }
 0x4a2   : > { %v2968_v0 = vpop.eup %2967 }
 0x4a3   : > { %v1519_v44 = vmul.f32 %v2968_v0, %v4003_v34  ;;  %v4131_v35 = vpop.eup %2969  ;;  %v794_v34 = vsub.f32 %v3872_v5, %v4041_v14  ;;  %v1663_v5 = vsel %vm317_vm1, %v4151_v20, -inf  ;;  %v1669_v14 = vsel %vm317_vm1, %v4154_v23, -inf  ;;  %v4180_v63 = vpop.xlane.xlu0 %1232 }
 0x4a4   : > { %v1273_v55 = vsel %vm317_vm1, %v4131_v35, 0.0  ;;  %v4136_v46 = vpop.eup %2971 }
 0x4a5   : > { %v1523_v13 = vpack.c.bf16 %v1519_v44, %v1518_v45  ;;  %v1924_v9 = vsel %vm317_vm1, %v4136_v46, 0.0  ;;  %v4144_v4 = vpop.eup %2973  ;;  %v806_v49 = vmul.f32 1.442695, %v794_v34  ;;  %v1254_v45 = vmul.f32 1.442695, %v1240_v56  ;;  %v4208_v56 = vpop.f32.mrf.mxu2 }
 0x4a6   : > { %v829_v29 = vsel %vm317_vm1, %v4144_v4, 0.0 }
 0x4a7   : > { %2586 = vmatmul.msk.bf16.gmra.mxu2 %vm317_vm1, %v1523_v13  ;;  %2975 = vpow2.f32 %v806_v49  ;;  %v1250_v13 = vmul.f32 1.442695, %v1238_v22 }
 0x4a8   : > { %1274 = vadd.xlane.f32.xlu2 %v1273_v55  ;;  %2977 = vpow2.f32 %v1242_v3 }
 0x4a9   : > { %2979 = vpow2.f32 %v1244_v15  ;;  %v4204_v15 = vpop.xlane.xlu2 %1898 }
 0x4aa   : > { %2981 = vpow2.f32 %v812_v30 }
 0x4ab   : > { %2983 = vpow2.f32 %v1254_v45  ;;  %v1659_v41 = vpop.xlane.xlu0 %1658 }
 0x4ac   : > { %2985 = vpow2.f32 %v1250_v13 }
 0x4ad   : > { %v4162_v7 = vpop.eup %2975 }
 0x4ae   : > { %v4168_v6 = vpop.eup %2977  ;;  %v826_v19 = vsel %vm317_vm1, %v4162_v7, 0.0 }
 0x4af   : > { %v1258_v0 = vsel %vm317_vm1, %v4168_v6, 0.0  ;;  %v4182_v44 = vpop.eup %2979 }
 0x4b0   : > { %1925 = vadd.xlane.f32.xlu2 %v1924_v9  ;;  %v1261_v25 = vsel %vm317_vm1, %v4182_v44, 0.0  ;;  %v4188_v55 = vpop.eup %2981 }
 0x4b1   : > { %v4190_v58 = vpop.eup %2983  ;;  %v835_v37 = vsel %vm317_vm1, %v4188_v55, 0.0  ;;  %v4216_v45 = vpop.xlane.xlu2 %1667 }
 0x4b2   : > { %v1276_v48 = vsel %vm317_vm1, %v4190_v58, 0.0  ;;  %v4196_v34 = vpop.eup %2985 }
 0x4b3   : > { %v1270_v49 = vsel %vm317_vm1, %v4196_v34, 0.0 }
 0x4b7   : > { %v4220_v13 = vpop.f32.mrf.mxu2 }
 0x4be   : > { %830 = vadd.xlane.f32.xlu0 %v829_v29 }
 0x4c3   : > { %1664 = vmax.xlane.f32.xlu1 %v1663_v5 }
 0x4c6   : > { %1670 = vmax.xlane.f32.xlu0 %v1669_v14  ;;  %v1679_v14 = vsub.f32 %v4021_v32, %v1659_v41 }
 0x4c8   : > { %1972 = vrot.lane.b32.xlu2 %v3296_v47, %s3105_s9  ;;  %v1688_v21 = vmul.f32 1.442695, %v1679_v14  ;;  %v4239_v14 = vpop.f32.mrf.mxu3 }
 0x4cb   : > { %827 = vadd.xlane.f32.xlu1 %v826_v19 }
 0x4ce   : > { %1259 = vadd.xlane.f32.xlu0 %v1258_v0 }
 0x4d3   : > { %1673 = vmax.xlane.f32.xlu1 %v1672_v12 }
 0x4d6   : > { %1262 = vadd.xlane.f32.xlu0 %v1261_v25 }
 0x4db   : > { %836 = vadd.xlane.f32.xlu1 %v835_v37  ;;  %v816_v9 = vpop.xlane.xlu1 %815 }
 0x4de   : > { %1277 = vadd.xlane.f32.xlu0 %v1276_v48 }
 0x4e3   : > { %v822_v29 = vpop.xlane.xlu0 %821  ;;  %1271 = vadd.xlane.f32.xlu1 %v1270_v49  ;;  %v1656_v3 = vpop.xlane.xlu1 %1655 }
 0x4e4   : > { %v1678_v5 = vsub.f32 %v4055_v36, %v1656_v3 }
 0x4e6   : > { %v1686_v51 = vmul.f32 1.442695, %v1678_v5 }
 0x4e8   : > { %2987 = vpow2.f32 %v1686_v51 }
 0x4e9   : > { %2989 = vrcp.f32 %v816_v9 }
 0x4eb   : > { %v4206_v62 = vpop.xlane.xlu0 %1661  ;;  %v819_v19 = vpop.xlane.xlu1 %818 }
 0x4ec   : > { %2991 = vrcp.f32 %v819_v19  ;;  %v1901_v19 = vsub.f32 %v3843_v26, %v4014_v2 }
 0x4ed   : > { %2993 = vpow2.f32 %v1688_v21 }
 0x4ee   : > { %v4210_v30 = vpop.eup %2987 }
 0x4ef   : > { %v1702_v36 = vsel %vm317_vm1, %v4210_v30, 0.0  ;;  %v2990_v0 = vpop.eup %2989 }
 0x4f0   : > { %v846_v22 = vmul.f32 %v2990_v0, %v4049_v39 }
 0x4f1   : > { %1703 = vadd.xlane.f32.xlu2 %v1702_v36 }
 0x4f2   : > { %v2992_v32 = vpop.eup %2991  ;;  %1750 = vrot.lane.b32.xlu0 %v3296_v47, %s3104_s8 }
 0x4f3   : > { %v847_v12 = vmul.f32 %v2992_v32, %v4071_v42  ;;  %v4222_v25 = vpop.eup %2993  ;;  %v825_v41 = vpop.xlane.xlu0 %824  ;;  %v1910_v32 = vmul.f32 1.442695, %v1901_v19 }
 0x4f4   : > { %2995 = vrcp.f32 %v825_v41  ;;  %v1705_v9 = vsel %vm317_vm1, %v4222_v25, 0.0  ;;  %v4231_v42 = vpop.f32.mrf.mxu2  ;;  %v4234_v3 = vpop.xlane.xlu1 %1895 }
 0x4f5   : > { %v854_v37 = vpack.c.bf16 %v847_v12, %v846_v22  ;;  %2997 = vrcp.f32 %v822_v29 }
 0x4f6   : > { %2999 = vpow2.f32 %v1910_v32 }
 0x4f7   : > { %2559 = vmatmul.msk.bf16.vlgmr.msra.gmra.mxu3 %vm317_vm1, %v854_v37 }
 0x4f9   : > { %1706 = vadd.xlane.f32.xlu2 %v1705_v9 }
 0x4fa   : > { %v2996_v39 = vpop.eup %2995 }
 0x4fb   : > { %v4227_v47 = vpop.xlane.xlu2 %833  ;;  %v2998_v48 = vpop.eup %2997  ;;  %v849_v49 = vmul.f32 %v2996_v39, %v4084_v8  ;;  %v1903_v39 = vsub.f32 %v3987_v11, %v4097_v53 }
 0x4fc   : > { %1748 = vrot.lane.b32.xlu1 %v3302_v52, %s3104_s8  ;;  %v848_v51 = vmul.f32 %v2998_v48, %v4059_v28  ;;  %v4244_v21 = vpop.f32.mrf.mxu2  ;;  %v4248_v28 = vpop.f32.mrf.mxu3 }
 0x4fd   : > { %v4256_v2 = vpop.eup %2999  ;;  %v1914_v19 = vmul.f32 1.442695, %v1903_v39 }
 0x4fe   : > { %v855_v29 = vpack.c.bf16 %v849_v49, %v848_v51  ;;  %v1241_v51 = vsub.f32 %v4010_v59, %v4180_v63 }
 0x500   : > { %v1256_v11 = vmul.f32 1.442695, %v1241_v51 }
 0x503   : > { %v4236_v5 = vpop.xlane.xlu2 %1676 }
 0x504   : > { %1970 = vrot.lane.b32.xlu1 %v3302_v52, %s3105_s9  ;;  %v1902_v52 = vsub.f32 %v3912_v50, %v4079_v16  ;;  %v4254_v22 = vpop.f32.mrf.mxu2  ;;  %v4258_v41 = vpop.f32.mrf.mxu3  ;;  %v1927_v50 = vsel %vm317_vm1, %v4256_v2, 0.0 }
 0x505   : > { %4637 = vst [vmem:[#allocation12_spill] sm:$0xff] %v4258_v41 }
 0x506   : > { %v1753_v8 = vpop.permute.xlu0 %1752  ;;  %v1912_v26 = vmul.f32 1.442695, %v1902_v52 }
 0x507   : > { %2560 = vmatmul.msk.bf16.gmra.mxu3 %vm317_vm1, %v855_v29 }
 0x508   : > { %1774 = vmatpush.bf16.msra.mxu3 %v1753_v8 }
 0x50b   : > { %v1266_v36 = vpop.xlane.xlu2 %1265  ;;  %v1975_v0 = vpop.permute.xlu1 %1974 }
 0x50c   : > { %1996 = vmatpush.bf16.msrb.mxu2 %v1975_v0  ;;  %3001 = vrcp.f32 %v1266_v36  ;;  %v4278_v8 = vpop.f32.mrf.mxu3 }
 0x511   : > { %1968 = vrot.lane.b32.xlu2 %v3314_v57, %s3105_s9 }
 0x512   : > { %v3002_v37 = vpop.eup %3001 }
 0x513   : > { %v1269_v12 = vpop.xlane.xlu2 %1268  ;;  %v4267_v16 = vmul.f32 %v3002_v37, %v4113_v10  ;;  %v1682_v10 = vsub.f32 %v3978_v18, %v4216_v45 }
 0x514   : > { %3003 = vrcp.f32 %v1269_v12  ;;  %v4296_v45 = vpop.f32.mrf.mxu3 }
 0x515   : > { %3005 = vpow2.f32 %v1912_v26  ;;  %v1694_v63 = vmul.f32 1.442695, %v1682_v10 }
 0x516   : > { %3007 = vpow2.f32 %v1914_v19 }
 0x517   : > { %3009 = vpow2.f32 %v1256_v11 }
 0x518   : > { %3011 = vpow2.f32 %v1694_v63 }
 0x51a   : > { %v3004_v9 = vpop.eup %3003  ;;  %v4262_v48 = vpop.f32.mrf.mxu2 }
 0x51b   : > { %v4270_v49 = vmul.f32 %v3004_v9, %v4123_v38  ;;  %v4276_v53 = vpop.eup %3005  ;;  %v4290_v32 = vpop.xlane.xlu2 %1274 }
 0x51c   : > { %1928 = vadd.xlane.f32.xlu0 %v1927_v50  ;;  %v1930_v59 = vsel %vm317_vm1, %v4276_v53, 0.0  ;;  %v4288_v0 = vpop.eup %3007  ;;  %v4306_v50 = vpop.f32.mrf.mxu3 }
 0x51d   : > { %v4292_v52 = vpop.eup %3009  ;;  %v1933_v18 = vsel %vm317_vm1, %v4288_v0, 0.0 }
 0x51e   : > { %v1279_v12 = vsel %vm317_vm1, %v4292_v52, 0.0  ;;  %v4300_v26 = vpop.eup %3011 }
 0x51f   : > { %v1714_v39 = vsel %vm317_vm1, %v4300_v26, 0.0 }
 0x522   : > { %v4282_v36 = vpop.f32.mrf.mxu2 }
 0x523   : > { %v4302_v9 = vpop.xlane.xlu2 %1925 }
 0x524   : > { %1931 = vadd.xlane.f32.xlu0 %v1930_v59 }
 0x52b   : > { %v1973_v63 = vpop.permute.xlu2 %1972 }
 0x52c   : > { %1934 = vadd.xlane.f32.xlu0 %v1933_v18  ;;  %1997 = vmatpush.bf16.msrb.mxu2 %v1973_v63  ;;  %v1904_v18 = vsub.f32 %v3914_v61, %v4093_v27  ;;  %v1685_v61 = vsub.f32 %v4104_v33, %v4236_v5  ;;  %v1907_v33 = vsub.f32 %v3969_v31, %v4204_v15 }
 0x52e   : > { %1280 = vadd.xlane.f32.xlu1 %v1279_v12  ;;  %v1916_v29 = vmul.f32 1.442695, %v1904_v18 }
 0x531   : > { %v831_v37 = vpop.xlane.xlu0 %830 }
 0x534   : > { %1715 = vadd.xlane.f32.xlu0 %v1714_v39  ;;  %v4312_v39 = vpop.f32.mrf.mxu3 }
 0x536   : > { %v1665_v51 = vpop.xlane.xlu1 %1664 }
 0x537   : > { %v1681_v19 = vsub.f32 %v4151_v20, %v1665_v51 }
 0x539   : > { %v1692_v11 = vmul.f32 1.442695, %v1681_v19  ;;  %v1671_v10 = vpop.xlane.xlu0 %1670 }
 0x53a   : > { %v1683_v59 = vsub.f32 %v4154_v23, %v1671_v10 }
 0x53b   : > { %3013 = vpow2.f32 %v1692_v11 }
 0x53c   : > { %v1696_v12 = vmul.f32 1.442695, %v1683_v59  ;;  %3015 = vrcp.f32 %v831_v37  ;;  %v1700_v59 = vmul.f32 1.442695, %v1685_v61 }
 0x53e   : > { %3017 = vpow2.f32 %v1696_v12  ;;  %v828_v38 = vpop.xlane.xlu1 %827  ;;  %v4333_v12 = vpop.f32.mrf.mxu3 }
 0x53f   : > { %3019 = vrcp.f32 %v828_v38 }
 0x540   : > { %3021 = vpow2.f32 %v1916_v29 }
 0x541   : > { %v4314_v41 = vpop.eup %3013  ;;  %v1260_v29 = vpop.xlane.xlu0 %1259 }
 0x542   : > { %v1711_v20 = vsel %vm317_vm1, %v4314_v41, 0.0  ;;  %v3016_v23 = vpop.eup %3015 }
 0x543   : > { %1712 = vadd.xlane.f32.xlu2 %v1711_v20  ;;  %v851_v11 = vmul.f32 %v3016_v23, %v4144_v4  ;;  %v1922_v4 = vmul.f32 1.442695, %v1907_v33 }
 0x544   : > { %v4318_v51 = vpop.eup %3017 }
 0x545   : > { %v3020_v27 = vpop.eup %3019  ;;  %v1717_v38 = vsel %vm317_vm1, %v4318_v51, 0.0 }
 0x546   : > { %1718 = vadd.xlane.f32.xlu0 %v1717_v38  ;;  %v1674_v37 = vpop.xlane.xlu1 %1673  ;;  %v850_v19 = vmul.f32 %v3020_v27, %v4162_v7  ;;  %v4331_v18 = vpop.eup %3021 }
 0x547   : > { %v1684_v10 = vsub.f32 %v4176_v1, %v1674_v37  ;;  %1746 = vrot.lane.b32.xlu1 %v3314_v57, %s3104_s8  ;;  %v1936_v57 = vsel %vm317_vm1, %v4331_v18, 0.0  ;;  %v4345_v61 = vpop.f32.mrf.mxu3 }
 0x548   : > { %v856_v63 = vpack.c.bf16 %v851_v11, %v850_v19 }
 0x549   : > { %v1698_v5 = vmul.f32 1.442695, %v1684_v10  ;;  %v1263_v15 = vpop.xlane.xlu0 %1262 }
 0x54a   : > { %2561 = vmatmul.msk.bf16.gmra.mxu3 %vm317_vm1, %v856_v63 }
 0x54b   : > { %3023 = vpow2.f32 %v1698_v5 }
 0x54c   : > { %3025 = vpow2.f32 %v1700_v59 }
 0x54d   : > { %3027 = vrcp.f32 %v4227_v47 }
 0x54e   : > { %1937 = vadd.xlane.f32.xlu0 %v1936_v57  ;;  %v837_v7 = vpop.xlane.xlu1 %836 }
 0x54f   : > { %3029 = vrcp.f32 %v837_v7  ;;  %v4358_v63 = vpop.f32.mrf.mxu3 }
 0x550   : > { %3031 = vpow2.f32 %v1922_v4 }
 0x551   : > { %v4339_v1 = vpop.eup %3023  ;;  %3033 = vrcp.f32 %v1263_v15  ;;  %v4356_v59 = vpop.xlane.xlu0 %1277 }
 0x552   : > { %v4341_v31 = vpop.eup %3025  ;;  %v1720_v20 = vsel %vm317_vm1, %v4339_v1, 0.0  ;;  %3035 = vrcp.f32 %v1260_v29  ;;  %v1905_v29 = vsub.f32 %v3925_v54, %v4095_v24 }
 0x553   : > { %v3028_v23 = vpop.eup %3027  ;;  %1721 = vadd.xlane.f32.xlu2 %v1720_v20  ;;  %v1723_v27 = vsel %vm317_vm1, %v4341_v31, 0.0 }
 0x554   : > { %v852_v38 = vmul.f32 %v3028_v23, %v4099_v17  ;;  %v1680_v17 = vsub.f32 %v4067_v60, %v4206_v62  ;;  %v2686_v23 = vpack.i.bf16 %v4306_v50, %v4296_v45  ;;  %v4638_v45 = vld [vmem:[#allocation2_spill] sm:$0xff]  ;;  %v4639_v50 = vld [vmem:[#allocation7_spill] sm:$0xff] }
 0x555   : > { %v3030_v47 = vpop.eup %3029 }
 0x556   : > { %1724 = vadd.xlane.f32.xlu0 %v1723_v27  ;;  %v853_v37 = vmul.f32 %v3030_v47, %v4188_v55  ;;  %v4351_v19 = vpop.eup %3031  ;;  %v1690_v5 = vmul.f32 1.442695, %v1680_v17  ;;  %v1272_v20 = vpop.xlane.xlu1 %1271  ;;  %v1906_v27 = vsub.f32 %v4082_v43, %v4234_v3 }
 0x557   : > { %v1945_v10 = vsel %vm317_vm1, %v4351_v19, 0.0  ;;  %v3034_v33 = vpop.eup %3033  ;;  %v4370_v60 = vpop.f32.mrf.mxu3 }
 0x558   : > { %v857_v11 = vpack.c.bf16 %v853_v37, %v852_v38  ;;  %v3036_v55 = vpop.eup %3035  ;;  %v1291_v4 = vmul.f32 %v3034_v33, %v4182_v44  ;;  %3037 = vpow2.f32 %v1690_v5  ;;  %v1918_v44 = vmul.f32 1.442695, %v1905_v29 }
 0x559   : > { %v1290_v7 = vmul.f32 %v3036_v55, %v4168_v6  ;;  %v2691_v38 = vpack.i.bf16 %v4639_v50, %v4638_v45  ;;  %v4640_v55 = vpack.c.bf16 %v4270_v49, %v4267_v16 }
 0x55a   : > { %2562 = vmatmul.msk.bf16.gmra.mxu3 %vm317_vm1, %v857_v11  ;;  %3039 = vpow2.f32 %v1918_v44  ;;  %v1920_v11 = vmul.f32 1.442695, %v1906_v27 }
 0x55b   : > { %1946 = vadd.xlane.f32.xlu2 %v1945_v10  ;;  %v1298_v62 = vpack.c.bf16 %v1291_v4, %v1290_v7 }
 0x55c   : > { %3041 = vpow2.f32 %v1920_v11 }
 0x55d   : > { %3043 = vrcp.f32 %v1272_v20 }
 0x55e   : > { %v4374_v47 = vpop.eup %3037  ;;  %3045 = vrcp.f32 %v4290_v32 }
 0x55f   : > { %v1708_v24 = vsel %vm317_vm1, %v4374_v47, 0.0  ;;  %v4384_v37 = vpop.f32.mrf.mxu3  ;;  %3047 = vrcp.f32 %v4302_v9 }
 0x560   : > { %v4387_v10 = vpop.eup %3039 }
 0x561   : > { %v1939_v43 = vsel %vm317_vm1, %v4387_v10, 0.0 }
 0x562   : > { %v4395_v5 = vpop.eup %3041 }
 0x563   : > { %v1942_v4 = vsel %vm317_vm1, %v4395_v5, 0.0 }
 0x564   : > { %v1751_v57 = vpop.permute.xlu0 %1750  ;;  %v4364_v15 = vpop.xlane.xlu2 %1703 }
 0x565   : > { %1775 = vmatpush.bf16.msra.mxu3 %v1751_v57  ;;  %v3044_v57 = vpop.eup %3043 }
 0x566   : > { %v3046_v29 = vpop.eup %3045 }
 0x56a   : > { %2687 = vrot.lane.b32.xlu0 %v2686_v23, %s3103_s7  ;;  %2575 = vmatmul.msk.bf16.vlgmr.msrb.gmra.mxu3 %vm317_vm1, %v1298_v62  ;;  %v1294_v23 = vmul.f32 %v3044_v57, %v4196_v34  ;;  %v1295_v62 = vmul.f32 %v3046_v29, %v4131_v35  ;;  %v2696_v35 = vpack.i.bf16 %v4231_v42, %v4220_v13 }
 0x56c   : > { %v4378_v54 = vpop.xlane.xlu2 %1706  ;;  %v1300_v16 = vpack.c.bf16 %v1295_v62, %v1294_v23 }
 0x56e   : > { %v1749_v6 = vpop.permute.xlu1 %1748 }
 0x56f   : > { %1776 = vmatpush.bf16.msra.mxu3 %v1749_v6  ;;  %v3048_v6 = vpop.eup %3047 }
 0x571   : > { %1709 = vadd.xlane.f32.xlu1 %v1708_v24  ;;  %v1956_v24 = vmul.f32 %v3048_v6, %v4136_v46 }
 0x573   : > { %2692 = vrot.lane.b32.xlu2 %v2691_v38, %s3099_s29 }
 0x574   : > { %v1969_v3 = vpop.permute.xlu2 %1968 }
 0x576   : > { %v1971_v17 = vpop.permute.xlu1 %1970 }
 0x577   : > { %1998 = vmatpush.bf16.msrb.mxu2 %v1971_v17 }
 0x579   : > { %1940 = vadd.xlane.f32.xlu1 %v1939_v43 }
 0x57a   : > { %v891_v33 = vpop.f32.mrf.mxu3  ;;  %2576 = vmatmul.msk.bf16.gmra.mxu3 %vm317_vm1, %v4640_v55 }
 0x57b   : > { %1999 = vmatpush.bf16.msrb.mxu2 %v1969_v3  ;;  %v2711_v3 = vpack.i.bf16 %v4333_v12, %v4312_v39 }
 0x581   : > { %1943 = vadd.xlane.f32.xlu1 %v1942_v4 }
 0x582   : > { %v893_v7 = vpop.f32.mrf.mxu3 }
 0x583   : > { %v2706_v38 = vpack.i.bf16 %v893_v7, %v891_v33 }
 0x58a   : > { %v896_v49 = vpop.f32.mrf.mxu3  ;;  %2577 = vmatmul.msk.bf16.gmra.mxu3 %vm317_vm1, %v1300_v16 }
 0x58f   : > { %v1929_v20 = vpop.xlane.xlu0 %1928 }
 0x590   : > { %3049 = vrcp.f32 %v1929_v20 }
 0x592   : > { %v898_v32 = vpop.f32.mrf.mxu3 }
 0x593   : > { %v2721_v44 = vpack.i.bf16 %v898_v32, %v896_v49 }
 0x595   : > { %2722 = vrot.lane.b32.xlu0 %v2721_v44, %s3101_s5 }
 0x596   : > { %v3050_v27 = vpop.eup %3049 }
 0x597   : > { %v1957_v34 = vmul.f32 %v3050_v27, %v4256_v2  ;;  %v1932_v45 = vpop.xlane.xlu0 %1931 }
 0x598   : > { %3051 = vrcp.f32 %v1932_v45 }
 0x599   : > { %v1964_v50 = vpack.c.bf16 %v1957_v34, %v1956_v24  ;;  %3053 = vrcp.f32 %v4356_v59 }
 0x59a   : > { %2697 = vrot.lane.b32.xlu1 %v2696_v35, %s3096_s26 }
 0x59b   : > { %2599 = vmatmul.msk.bf16.vlgmr.msrb.gmra.mxu2 %vm317_vm1, %v1964_v50 }
 0x59e   : > { %v3052_v46 = vpop.eup %3051 }
 0x59f   : > { %v1935_v9 = vpop.xlane.xlu0 %1934  ;;  %v3054_v2 = vpop.eup %3053  ;;  %v1958_v13 = vmul.f32 %v3052_v46, %v4276_v53 }
 0x5a0   : > { %3055 = vrcp.f32 %v1935_v9  ;;  %v1296_v59 = vmul.f32 %v3054_v2, %v4190_v58 }
 0x5a1   : > { %v1281_v11 = vpop.xlane.xlu1 %1280 }
 0x5a2   : > { %3057 = vrcp.f32 %v1281_v11  ;;  %2707 = vrot.lane.b32.xlu1 %v2706_v38, %s3101_s5 }
 0x5a3   : > { %3059 = vrcp.f32 %v4378_v54 }
 0x5a4   : > { %3061 = vrcp.f32 %v4364_v15 }
 0x5a6   : > { %v3056_v17 = vpop.eup %3055 }
 0x5a7   : > { %v1959_v42 = vmul.f32 %v3056_v17, %v4288_v0  ;;  %v1716_v29 = vpop.xlane.xlu0 %1715 }
 0x5a8   : > { %v3058_v43 = vpop.eup %3057 }
 0x5a9   : > { %v1297_v33 = vmul.f32 %v3058_v43, %v4292_v52  ;;  %v1965_v55 = vpack.c.bf16 %v1959_v42, %v1958_v13  ;;  %v3060_v53 = vpop.eup %3059 }
 0x5aa   : > { %2712 = vrot.lane.b32.xlu1 %v2711_v3, %s3103_s7  ;;  %v3062_v0 = vpop.eup %3061  ;;  %v1735_v39 = vmul.f32 %v3060_v53, %v4222_v25 }
 0x5ab   : > { %2600 = vmatmul.msk.bf16.gmra.mxu2 %vm317_vm1, %v1965_v55  ;;  %v1301_v4 = vpack.c.bf16 %v1297_v33, %v1296_v59  ;;  %v1734_v58 = vmul.f32 %v3062_v0, %v4210_v30 }
 0x5ad   : > { %2578 = vmatmul.msk.bf16.gmra.mxu3 %vm317_vm1, %v1301_v4  ;;  %v1742_v52 = vpack.c.bf16 %v1735_v39, %v1734_v58 }
 0x5b6   : > { %v1713_v62 = vpop.xlane.xlu2 %1712 }
 0x5b7   : > { %3063 = vrcp.f32 %v1713_v62 }
 0x5b9   : > { %v1747_v12 = vpop.permute.xlu1 %1746  ;;  %v1719_v23 = vpop.xlane.xlu0 %1718 }
 0x5ba   : > { %1777 = vmatpush.bf16.msra.mxu3 %v1747_v12  ;;  %v1572_v12 = vpop.f32.mrf.mxu2 }
 0x5bd   : > { %2591 = vmatmul.msk.bf16.vlgmr.msra.gmra.mxu3 %vm317_vm1, %v1742_v52  ;;  %v3064_v20 = vpop.eup %3063 }
 0x5be   : > { %v1737_v44 = vmul.f32 %v3064_v20, %v4314_v41 }
 0x5c1   : > { %v1938_v49 = vpop.xlane.xlu0 %1937 }
 0x5c6   : > { %v1722_v34 = vpop.xlane.xlu2 %1721 }
 0x5c9   : > { %v1725_v3 = vpop.xlane.xlu0 %1724 }
 0x5cd   : > { %v4427_v57 = vpop.f32.mrf.mxu3 }
 0x5ce   : > { %v1947_v17 = vpop.xlane.xlu2 %1946 }
 0x5d5   : > { %v4429_v7 = vpop.f32.mrf.mxu3 }
 0x5d6   : > { %v2761_v54 = vpack.i.bf16 %v4429_v7, %v4427_v57  ;;  %v2786_v7 = vpack.i.bf16 %v4384_v37, %v4370_v60  ;;  %v2636_v37 = vld [vmem:[%s4617_s1] sm:$0xff] }
 0x5dd   : > { %v4433_v15 = vpop.f32.mrf.mxu3 }
 0x5e4   : > { %v1710_v25 = vpop.xlane.xlu1 %1709 }
 0x5e5   : > { %3065 = vrcp.f32 %v1710_v25  ;;  %v4435_v30 = vpop.f32.mrf.mxu3 }
 0x5e6   : > { %v2796_v16 = vpack.i.bf16 %v4435_v30, %v4433_v15  ;;  %3067 = vrcp.f32 %v1938_v49 }
 0x5eb   : > { %v3066_v32 = vpop.eup %3065 }
 0x5ec   : > { %v1736_v6 = vmul.f32 %v3066_v32, %v4374_v47  ;;  %v1941_v27 = vpop.xlane.xlu1 %1940  ;;  %v3068_v35 = vpop.eup %3067 }
 0x5ed   : > { %3069 = vrcp.f32 %v1941_v27  ;;  %v1335_v24 = vpop.f32.mrf.mxu3  ;;  %v1960_v9 = vmul.f32 %v3068_v35, %v4331_v18  ;;  %v4644_v35 = vld [vmem:[#allocation11_spill] sm:$0xff] }
 0x5ee   : > { %v1743_v45 = vpack.c.bf16 %v1737_v44, %v1736_v6  ;;  %3071 = vrcp.f32 %v1719_v23  ;;  %v4641_v44 = vld [vmem:[#allocation9_spill] sm:$0xff]  ;;  %v4642_v6 = vld [vmem:[#allocation8_spill] sm:$0xff] }
 0x5ef   : > { %3073 = vrcp.f32 %v1716_v29 }
 0x5f0   : > { %2592 = vmatmul.msk.bf16.gmra.mxu3 %vm317_vm1, %v1743_v45 }
 0x5f3   : > { %v3070_v50 = vpop.eup %3069 }
 0x5f4   : > { %v1961_v38 = vmul.f32 %v3070_v50, %v4387_v10  ;;  %v1944_v46 = vpop.xlane.xlu1 %1943  ;;  %v3072_v47 = vpop.eup %3071  ;;  %v4645_v50 = vld [vmem:[#allocation10_spill] sm:$0xff] }
 0x5f5   : > { %v1337_v11 = vpop.f32.mrf.mxu3  ;;  %v3074_v13 = vpop.eup %3073  ;;  %3075 = vrcp.f32 %v1944_v46  ;;  %v1739_v42 = vmul.f32 %v3072_v47, %v4318_v51  ;;  %v2741_v46 = vpack.i.bf16 %v4254_v22, %v4244_v21  ;;  %v2639_v21 = vld [vmem:[%s4617_s1 + $0x18] sm:$0xff] }
 0x5f6   : > { %v2726_v41 = vpack.i.bf16 %v1337_v11, %v1335_v24  ;;  %v1966_v2 = vpack.c.bf16 %v1961_v38, %v1960_v9  ;;  %3077 = vrcp.f32 %v1947_v17  ;;  %v1738_v43 = vmul.f32 %v3074_v13, %v4300_v26  ;;  %2363 = vmatpush.bf16.msra.mxu1 %v2639_v21 }
 0x5f7   : > { %3079 = vrcp.f32 %v1725_v3  ;;  %v4646_v9 = vpack.i.bf16 %v4644_v35, %v4645_v50 }
 0x5f8   : > { %2727 = vrot.lane.b32.xlu0 %v2726_v41, %s3097_s27  ;;  %2601 = vmatmul.msk.bf16.gmra.mxu2 %vm317_vm1, %v1966_v2  ;;  %v1744_v10 = vpack.c.bf16 %v1739_v42, %v1738_v43  ;;  %3081 = vrcp.f32 %v1722_v34  ;;  %v2751_v41 = vpack.i.bf16 %v4358_v63, %v4345_v61  ;;  %v2801_v63 = vpack.i.bf16 %v4208_v56, %v4198_v40  ;;  %v2637_v56 = vld [vmem:[%s4617_s1 + $0x8] sm:$0xff] }
 0x5fb   : > { %v3076_v59 = vpop.eup %3075 }
 0x5fc   : > { %v3078_v33 = vpop.eup %3077  ;;  %v1962_v55 = vmul.f32 %v3076_v59, %v4395_v5  ;;  %v1574_v5 = vpop.f32.mrf.mxu2 }
 0x5fd   : > { %v1340_v18 = vpop.f32.mrf.mxu3  ;;  %v1963_v4 = vmul.f32 %v3078_v33, %v4351_v19  ;;  %v3080_v51 = vpop.eup %3079 }
 0x5fe   : > { %v3082_v26 = vpop.eup %3081  ;;  %v1741_v58 = vmul.f32 %v3080_v51, %v4341_v31  ;;  %v4643_v31 = vpack.i.bf16 %v4641_v44, %v4642_v6 }
 0x5ff   : > { %v1967_v39 = vpack.c.bf16 %v1963_v4, %v1962_v55  ;;  %v1740_v52 = vmul.f32 %v3082_v26, %v4339_v1 }
 0x600   : > { %2593 = vmatmul.msk.bf16.gmra.mxu3 %vm317_vm1, %v1744_v10  ;;  %v4647_v10 = vpack.i.bf16 %v4282_v36, %v4262_v48  ;;  %v2811_v36 = vpack.i.bf16 %v1574_v5, %v1572_v12 }
 0x601   : > { %v1745_v29 = vpack.c.bf16 %v1741_v58, %v1740_v52  ;;  %v4648_v58 = vld [vmem:[#allocation4_spill] sm:$0xff]  ;;  %v4649_v52 = vld [vmem:[#allocation3_spill] sm:$0xff] }
 0x605   : > { %v1342_v53 = vpop.f32.mrf.mxu3 }
 0x606   : > { %v2731_v0 = vpack.i.bf16 %v1342_v53, %v1340_v18 }
 0x608   : > { %2732 = vrot.lane.b32.xlu1 %v2731_v0, %s3097_s27  ;;  %2602 = vmatmul.msk.bf16.gmra.mxu2 %vm317_vm1, %v1967_v39  ;;  %v2693_v0 = vpop.permute.xlu2 %2692 }
 0x60c   : > { %v2698_v59 = vpop.permute.xlu1 %2697 }
 0x60d   : > { %v1345_v23 = vpop.f32.mrf.mxu3 }
 0x610   : > { %2594 = vmatmul.msk.bf16.gmra.mxu3 %vm317_vm1, %v1745_v29 }
 0x614   : > { %v2708_v55 = vpop.permute.xlu1 %2707 }
 0x615   : > { %v1347_v49 = vpop.f32.mrf.mxu3  ;;  %v2710_v39 = vunpack.i.h.bf16 %v2708_v55  ;;  %v2709_v51 = vunpack.i.l.bf16 %v2708_v55 }
 0x616   : > { %v2771_v2 = vpack.i.bf16 %v1347_v49, %v1345_v23  ;;  %v2694_v49 = vunpack.i.l.bf16 %v2693_v0 }
 0x61e   : > { %v2001_v19 = vpop.f32.mrf.mxu2 }
 0x626   : > { %v2003_v62 = vpop.f32.mrf.mxu2 }
 0x627   : > { %v2701_v25 = vpack.i.bf16 %v2003_v62, %v2001_v19 }
 0x629   : > { %2702 = vrot.lane.b32.xlu2 %v2701_v25, %s3092_s22  ;;  %v2695_v25 = vunpack.i.h.bf16 %v2693_v0 }
 0x62e   : > { %v2006_v20 = vpop.f32.mrf.mxu2 }
 0x630   : > { %v1350_v32 = vpop.f32.mrf.mxu3 }
 0x631   : > { %2717 = vrot.lane.b32.xlu2 %v4643_v31, %s3099_s29 }
 0x636   : > { %v2008_v27 = vpop.f32.mrf.mxu2 }
 0x637   : > { %v2746_v1 = vpack.i.bf16 %v2008_v27, %v2006_v20  ;;  %v2700_v27 = vunpack.i.h.bf16 %v2698_v59 }
 0x638   : > { %v1352_v24 = vpop.f32.mrf.mxu3 }
 0x639   : > { %v2806_v34 = vpack.i.bf16 %v1352_v24, %v1350_v32  ;;  %2747 = vrot.lane.b32.xlu1 %v2746_v1, %s3092_s22  ;;  %v2699_v1 = vunpack.i.l.bf16 %v2698_v59 }
 0x640   : > { %v1779_v45 = vpop.f32.mrf.mxu3 }
 0x641   : > { %2767 = vrot.lane.b32.xlu1 %v4646_v9, %s3099_s29 }
 0x648   : > { %v1781_v38 = vpop.f32.mrf.mxu3 }
 0x649   : > { %v2736_v11 = vpack.i.bf16 %v1781_v38, %v1779_v45 }
 0x64b   : > { %2737 = vrot.lane.b32.xlu0 %v2736_v11, %s3093_s23 }
 0x653   : > { %2742 = vrot.lane.b32.xlu0 %v2741_v46, %s3096_s26 }
 0x65b   : > { %2752 = vrot.lane.b32.xlu0 %v2751_v41, %s3103_s7 }
 0x663   : > { %2772 = vrot.lane.b32.xlu0 %v2771_v2, %s3097_s27 }
 0x673   : > { %v1784_v47 = vpop.f32.mrf.mxu3 }
 0x67b   : > { %v1786_v17 = vpop.f32.mrf.mxu3  ;;  %v2011_v13 = vpop.f32.mrf.mxu2 }
 0x67c   : > { %v2756_v42 = vpack.i.bf16 %v1786_v17, %v1784_v47  ;;  %v2713_v17 = vpop.permute.xlu1 %2712 }
 0x67e   : > { %2757 = vrot.lane.b32.xlu2 %v2756_v42, %s3093_s23  ;;  %v2714_v42 = vunpack.i.l.bf16 %v2713_v17 }
 0x683   : > { %v1789_v43 = vpop.f32.mrf.mxu3  ;;  %v2013_v18 = vpop.f32.mrf.mxu2 }
 0x684   : > { %v2781_v3 = vpack.i.bf16 %v2013_v18, %v2011_v13  ;;  %v2703_v31 = vpop.permute.xlu2 %2702  ;;  %v2715_v13 = vunpack.i.h.bf16 %v2713_v17 }
 0x685   : > { %v2705_v35 = vunpack.i.h.bf16 %v2703_v31  ;;  %v2704_v50 = vunpack.i.l.bf16 %v2703_v31 }
 0x686   : > { %2762 = vrot.lane.b32.xlu2 %v2761_v54, %s3101_s5  ;;  %2782 = vrot.lane.b32.xlu0 %v2781_v3, %s3092_s22  ;;  %v2638_v54 = vld [vmem:[%s4617_s1 + $0x10] sm:$0xff]  ;;  %v4650_v3 = vld [vmem:[#allocation6_spill] sm:$0xff] }
 0x687   : > { %2364 = vmatpush.bf16.msra.mxu1 %v2638_v54  ;;  %v2248_v21 = vsel %vm255_vm0, %v4650_v3, %v2715_v13 }
 0x68b   : > { %v1791_v22 = vpop.f32.mrf.mxu3  ;;  %v2016_v40 = vpop.f32.mrf.mxu2  ;;  %2365 = vmatpush.bf16.msra.mxu1 %v2637_v56 }
 0x68c   : > { %v2791_v61 = vpack.i.bf16 %v1791_v22, %v1789_v43  ;;  %v2733_v43 = vpop.permute.xlu1 %2732  ;;  %v2718_v18 = vpop.permute.xlu2 %2717  ;;  %v4651_v22 = vld [vmem:[#allocation5_spill] sm:$0xff] }
 0x68e   : > { %2777 = vrot.lane.b32.xlu2 %v4647_v10, %s3096_s26  ;;  %2792 = vrot.lane.b32.xlu1 %v2791_v61, %s3093_s23  ;;  %v2247_v61 = vsel %vm255_vm0, %v4651_v22, %v2714_v42  ;;  %v2719_v10 = vunpack.i.l.bf16 %v2718_v18 }
 0x68f   : > { %2802 = vrot.lane.b32.xlu0 %v2801_v63, %s3099_s29  ;;  %2366 = vmatpush.bf16.msra.mxu1 %v2636_v37  ;;  %v2720_v63 = vunpack.i.h.bf16 %v2718_v18 }
 0x693   : > { %v1794_v57 = vpop.f32.mrf.mxu3  ;;  %v2018_v15 = vpop.f32.mrf.mxu2 }
 0x694   : > { %v2821_v30 = vpack.i.bf16 %v2018_v15, %v2016_v40  ;;  %v2735_v15 = vunpack.i.h.bf16 %v2733_v43 }
 0x696   : > { %2787 = vrot.lane.b32.xlu2 %v2786_v7, %s3103_s7  ;;  %2797 = vrot.lane.b32.xlu1 %v2796_v16, %s3101_s5  ;;  %v2688_v16 = vpop.permute.xlu0 %2687 }
 0x697   : > { %v2690_v4 = vunpack.i.h.bf16 %v2688_v16  ;;  %v2689_v53 = vunpack.i.l.bf16 %v2688_v16 }
 0x699   : > { %v2246_v12 = vsel %vm255_vm0, %v4648_v58, %v2690_v4  ;;  %v2245_v29 = vsel %vm255_vm0, %v4649_v52, %v2689_v53 }
 0x69a   : > { %v2255_v5 = vsel %vm2253_vm2, %v2246_v12, %v2710_v39  ;;  %v2254_v23 = vsel %vm2253_vm2, %v2245_v29, %v2709_v51 }
 0x69b   : > { %v1796_v48 = vpop.f32.mrf.mxu3  ;;  %v2263_v20 = vsel %vm2262_vm3, %v2254_v23, %v2694_v49  ;;  %v2264_v32 = vsel %vm2262_vm3, %v2255_v5, %v2695_v25 }
 0x69c   : > { %v2816_v60 = vpack.i.bf16 %v1796_v48, %v1794_v57 }
 0x69e   : > { %2807 = vrot.lane.b32.xlu2 %v2806_v34, %s3097_s27  ;;  %2812 = vrot.lane.b32.xlu1 %v2811_v36, %s3096_s26  ;;  %v2723_v33 = vpop.permute.xlu0 %2722 }
 0x69f   : > { %2817 = vrot.lane.b32.xlu0 %v2816_v60, %s3093_s23  ;;  %v2725_v57 = vunpack.i.h.bf16 %v2723_v33  ;;  %v2724_v7 = vunpack.i.l.bf16 %v2723_v33  ;;  %s4583_s23 = scalar_lea.vmem %s4619_s3, %s2626_s20 }
 0x6a1   : > { %v2256_v40 = vsel %vm2253_vm2, %v2247_v61, %v2724_v7  ;;  %v2257_v56 = vsel %vm2253_vm2, %v2248_v21, %v2725_v57 }
 0x6a2   : > { %v2265_v48 = vsel %vm2262_vm3, %v2256_v40, %v2719_v10  ;;  %v2266_v36 = vsel %vm2262_vm3, %v2257_v56, %v2720_v63 }
 0x6a3   : > { %v2275_v4 = vsel %vm2271_vm4, %v2266_v36, %v2735_v15 }
 0x6a6   : > { %2822 = vrot.lane.b32.xlu2 %v2821_v30, %s3092_s22  ;;  %v2728_v26 = vpop.permute.xlu0 %2727  ;;  %v2734_v30 = vunpack.i.l.bf16 %v2733_v43 }
 0x6a7   : > { %v2730_v19 = vunpack.i.h.bf16 %v2728_v26  ;;  %v2729_v62 = vunpack.i.l.bf16 %v2728_v26 }
 0x6a8   : > { %v2274_v55 = vsel %vm2271_vm4, %v2265_v48, %v2734_v30 }
 0x6a9   : > { %v2272_v44 = vsel %vm2271_vm4, %v2263_v20, %v2729_v62  ;;  %v2273_v6 = vsel %vm2271_vm4, %v2264_v32, %v2730_v19 }
 0x6aa   : > { %v2281_v9 = vsel %vm2280_vm5, %v2272_v44, %v2699_v1  ;;  %v2282_v38 = vsel %vm2280_vm5, %v2273_v6, %v2700_v27 }
 0x6ab   : > { %v2748_v16 = vpop.permute.xlu1 %2747 }
 0x6ac   : > { %v2750_v0 = vunpack.i.h.bf16 %v2748_v16  ;;  %v2749_v39 = vunpack.i.l.bf16 %v2748_v16 }
 0x6b3   : > { %v2768_v6 = vpop.permute.xlu1 %2767 }
 0x6bd   : > { %v2738_v24 = vpop.permute.xlu0 %2737 }
 0x6be   : > { %v2740_v34 = vunpack.i.h.bf16 %v2738_v24  ;;  %v2739_v45 = vunpack.i.l.bf16 %v2738_v24 }
 0x6c0   : > { %v2290_v11 = vsel %vm2289_vm6, %v2281_v9, %v2739_v45  ;;  %v2291_v46 = vsel %vm2289_vm6, %v2282_v38, %v2740_v34  ;;  %v2770_v34 = vunpack.i.h.bf16 %v2768_v6  ;;  %v2769_v45 = vunpack.i.l.bf16 %v2768_v6 }
 0x6c1   : > { %v2299_v41 = vsel %vm2298_vm7, %v2290_v11, %v2704_v50  ;;  %v2300_v2 = vsel %vm2298_vm7, %v2291_v46, %v2705_v35 }
 0x6c2   : > { %v2307_v47 = vpack.c.bf16 %v2300_v2, %v2299_v41 }
 0x6c4   : > { %2619 = vmatmul.msk.bf16.vlgmr.msra.gmra.mxu1 %vm317_vm1, %v2307_v47 }
 0x6c5   : > { %v2743_v54 = vpop.permute.xlu0 %2742 }
 0x6c6   : > { %v2745_v60 = vunpack.i.h.bf16 %v2743_v54  ;;  %v2744_v37 = vunpack.i.l.bf16 %v2743_v54 }
 0x6c8   : > { %v2283_v51 = vsel %vm2280_vm5, %v2274_v55, %v2744_v37  ;;  %v2284_v26 = vsel %vm2280_vm5, %v2275_v4, %v2745_v60  ;;  %v4652_v37 = vld [vmem:[#allocation12_spill] sm:$0xff] }
 0x6cd   : > { %v2753_v19 = vpop.permute.xlu0 %2752 }
 0x6ce   : > { %v2755_v25 = vunpack.i.h.bf16 %v2753_v19  ;;  %v2754_v49 = vunpack.i.l.bf16 %v2753_v19 }
 0x6d0   : > { %v2250_v31 = vsel %vm255_vm0, %v4248_v28, %v2755_v25  ;;  %v2249_v27 = vsel %vm255_vm0, %v4239_v14, %v2754_v49 }
 0x6d5   : > { %v2773_v20 = vpop.permute.xlu0 %2772 }
 0x6d6   : > { %v2775_v46 = vunpack.i.h.bf16 %v2773_v20  ;;  %v2774_v41 = vunpack.i.l.bf16 %v2773_v20 }
 0x6d8   : > { %v2758_v59 = vpop.permute.xlu2 %2757 }
 0x6d9   : > { %v2760_v33 = vunpack.i.h.bf16 %v2758_v59  ;;  %v2759_v53 = vunpack.i.l.bf16 %v2758_v59 }
 0x6db   : > { %v2292_v58 = vsel %vm2289_vm6, %v2283_v51, %v2759_v53  ;;  %v2293_v12 = vsel %vm2289_vm6, %v2284_v26, %v2760_v33 }
 0x6dc   : > { %v2301_v52 = vsel %vm2298_vm7, %v2292_v58, %v2749_v39  ;;  %v2302_v29 = vsel %vm2298_vm7, %v2293_v12, %v2750_v0 }
 0x6dd   : > { %v2308_v5 = vpack.c.bf16 %v2302_v29, %v2301_v52 }
 0x6df   : > { %2620 = vmatmul.msk.bf16.gmra.mxu1 %vm317_vm1, %v2308_v5 }
 0x6e0   : > { %v2763_v23 = vpop.permute.xlu2 %2762 }
 0x6e1   : > { %v2765_v32 = vunpack.i.h.bf16 %v2763_v23  ;;  %v2764_v44 = vunpack.i.l.bf16 %v2763_v23 }
 0x6e3   : > { %v2259_v1 = vsel %vm2253_vm2, %v2250_v31, %v2765_v32  ;;  %v2258_v24 = vsel %vm2253_vm2, %v2249_v27, %v2764_v44  ;;  %v2641_v31 = vld [vmem:[%s4583_s23] sm:$0xff]  }
 0x6e4   : > { %v2267_v50 = vsel %vm2262_vm3, %v2258_v24, %v2769_v45  ;;  %v2268_v9 = vsel %vm2262_vm3, %v2259_v1, %v2770_v34  ;;  %v2826_v27 = vld [vmem:[%s4618_s2] ss:$0 sm:$0xff]  ;;  %v2642_v1 = vunpack.c.l.bf16 %v2641_v31 }
 0x6e5   : > { %v2276_v47 = vsel %vm2271_vm4, %v2267_v50, %v2774_v41  ;;  %v2277_v14 = vsel %vm2271_vm4, %v2268_v9, %v2775_v46  ;;  %v2643_v50 = vunpack.c.h.bf16 %v2641_v31  ;;  %v2656_v41 = vld [vmem:[%s4583_s23 + $0x8] sm:$0xff]  }
 0x6e8   : > { %v2778_v62 = vpop.permute.xlu2 %2777 }
 0x6e9   : > { %v2780_v38 = vunpack.i.h.bf16 %v2778_v62  ;;  %v2779_v11 = vunpack.i.l.bf16 %v2778_v62 }
 0x6eb   : > { %v2285_v42 = vsel %vm2280_vm5, %v2276_v47, %v2779_v11  ;;  %v2286_v43 = vsel %vm2280_vm5, %v2277_v14, %v2780_v38 }
 0x6f0   : > { %v2788_v35 = vpop.permute.xlu2 %2787 }
 0x6f1   : > { %v2790_v7 = vunpack.i.h.bf16 %v2788_v35  ;;  %v2789_v54 = vunpack.i.l.bf16 %v2788_v35 }
 0x6f3   : > { %v2252_v60 = vsel %vm255_vm0, %v4278_v8, %v2790_v7  ;;  %v2251_v15 = vsel %vm255_vm0, %v4652_v37, %v2789_v54 }
 0x6f8   : > { %v2783_v2 = vpop.permute.xlu0 %2782  ;;  %v2808_v57 = vpop.permute.xlu2 %2807 }
 0x6f9   : > { %v2785_v18 = vunpack.i.h.bf16 %v2783_v2  ;;  %v2784_v3 = vunpack.i.l.bf16 %v2783_v2  ;;  %v2810_v53 = vunpack.i.h.bf16 %v2808_v57  ;;  %v2809_v0 = vunpack.i.l.bf16 %v2808_v57 }
 0x6fa   : > { %v2646_v2 = vunpack.c.l.bf16 %v2656_v41 }
 0x700   : > { %v2793_v28 = vpop.permute.xlu1 %2792  ;;  %v2823_v39 = vpop.permute.xlu2 %2822 }
 0x701   : > { %v2795_v17 = vunpack.i.h.bf16 %v2793_v28  ;;  %v2794_v13 = vunpack.i.l.bf16 %v2793_v28  ;;  %v2803_v56 = vpop.permute.xlu0 %2802  ;;  %v2825_v23 = vunpack.i.h.bf16 %v2823_v39  ;;  %v2824_v19 = vunpack.i.l.bf16 %v2823_v39 }
 0x702   : > { %v2805_v59 = vunpack.i.h.bf16 %v2803_v56  ;;  %v2804_v55 = vunpack.i.l.bf16 %v2803_v56 }
 0x703   : > { %v2294_v21 = vsel %vm2289_vm6, %v2285_v42, %v2794_v13  ;;  %v2295_v22 = vsel %vm2289_vm6, %v2286_v43, %v2795_v17  ;;  %v2647_v13 = vunpack.c.h.bf16 %v2656_v41 }
 0x704   : > { %v2303_v61 = vsel %vm2298_vm7, %v2294_v21, %v2784_v3  ;;  %v2304_v63 = vsel %vm2298_vm7, %v2295_v22, %v2785_v18  ;;  %v2657_v21 = vld [vmem:[%s4583_s23 + $0x10] sm:$0xff]  }
 0x705   : > { %v2309_v10 = vpack.c.bf16 %v2304_v63, %v2303_v61  ;;  %v2650_v22 = vunpack.c.l.bf16 %v2657_v21  ;;  %v2651_v7 = vunpack.c.h.bf16 %v2657_v21 }
 0x707   : > { %2621 = vmatmul.msk.bf16.gmra.mxu1 %vm317_vm1, %v2309_v10 }
 0x708   : > { %v2798_v40 = vpop.permute.xlu1 %2797 }
 0x709   : > { %v2800_v48 = vunpack.i.h.bf16 %v2798_v40  ;;  %v2799_v36 = vunpack.i.l.bf16 %v2798_v40 }
 0x70b   : > { %v2261_v30 = vsel %vm2253_vm2, %v2252_v60, %v2800_v48  ;;  %v2260_v16 = vsel %vm2253_vm2, %v2251_v15, %v2799_v36  ;;  %v2658_v36 = vld [vmem:[%s4583_s23 + $0x18] sm:$0xff]  }
 0x70c   : > { %v2270_v4 = vsel %vm2262_vm3, %v2261_v30, %v2805_v59  ;;  %v2269_v33 = vsel %vm2262_vm3, %v2260_v16, %v2804_v55  ;;  %v2654_v60 = vunpack.c.l.bf16 %v2658_v36  ;;  %v2655_v59 = vunpack.c.h.bf16 %v2658_v36 }
 0x70d   : > { %v2278_v29 = vsel %vm2271_vm4, %v2269_v33, %v2809_v0  ;;  %v2279_v5 = vsel %vm2271_vm4, %v2270_v4, %v2810_v53 }
 0x710   : > { %v2813_v51 = vpop.permute.xlu1 %2812 }
 0x711   : > { %v2818_v26 = vpop.permute.xlu0 %2817  ;;  %v2815_v58 = vunpack.i.h.bf16 %v2813_v51  ;;  %v2814_v8 = vunpack.i.l.bf16 %v2813_v51 }
 0x712   : > { %v2820_v12 = vunpack.i.h.bf16 %v2818_v26  ;;  %v2819_v52 = vunpack.i.l.bf16 %v2818_v26 }
 0x713   : > { %v2287_v62 = vsel %vm2280_vm5, %v2278_v29, %v2814_v8  ;;  %v2288_v25 = vsel %vm2280_vm5, %v2279_v5, %v2815_v58 }
 0x714   : > { %v2296_v49 = vsel %vm2289_vm6, %v2287_v62, %v2819_v52  ;;  %v2297_v20 = vsel %vm2289_vm6, %v2288_v25, %v2820_v12 }
 0x715   : > { %v2305_v32 = vsel %vm2298_vm7, %v2296_v49, %v2824_v19  ;;  %v2306_v44 = vsel %vm2298_vm7, %v2297_v20, %v2825_v23 }
 0x716   : > { %v2310_v6 = vpack.c.bf16 %v2306_v44, %v2305_v32 }
 0x718   : > { %2622 = vmatmul.msk.bf16.gmra.mxu1 %vm317_vm1, %v2310_v6 }
 0x741   : > { %v2368_v24 = vpop.f32.mrf.mxu1 }
 0x742   : > { %v2369_v34 = vadd.f32 %v2826_v27, %v2368_v24 }
 0x744   : > { %v2404_v45 = vadd.f32 %v2642_v1, %v2369_v34 }
 0x746   : > { %v2412_v35 = vpack.c.bf16 %v2404_v45, %v2404_v45 }
 0x748   : > { %2421 = vst.msk [vmem:[%s4592_s16] sm:$0xf] %vm2420_vm8, %v2412_v35 }
 0x749   : > { %v2370_v9 = vpop.f32.mrf.mxu1 }
 0x74a   : > { %v2371_v38 = vadd.f32 %v2826_v27, %v2370_v9 }
 0x74c   : > { %v2405_v11 = vadd.f32 %v2643_v50, %v2371_v38 }
 0x74e   : > { %v2413_v46 = vpack.c.bf16 %v2405_v11, %v2405_v11 }
 0x750   : > { %2422 = vst.msk [vmem:[%s4592_s16 + $0x4] sm:$0xf] %vm2420_vm8, %v2413_v46 }
 0x75c   : > { %v2373_v28 = vpop.f32.mrf.mxu1 }
 0x75d   : > { %v2374_v47 = vadd.f32 %v2826_v27, %v2373_v28 }
 0x75f   : > { %v2406_v14 = vadd.f32 %v2646_v2, %v2374_v47 }
 0x761   : > { %v2414_v17 = vpack.c.bf16 %v2406_v14, %v2406_v14 }
 0x763   : > { %2423 = vst.msk [vmem:[%s4592_s16 + $0x8] sm:$0xf] %vm2420_vm8, %v2414_v17 }
 0x764   : > { %v2375_v42 = vpop.f32.mrf.mxu1 }
 0x765   : > { %v2376_v43 = vadd.f32 %v2826_v27, %v2375_v42 }
 0x767   : > { %v2407_v18 = vadd.f32 %v2647_v13, %v2376_v43 }
 0x769   : > { %v2415_v3 = vpack.c.bf16 %v2407_v18, %v2407_v18 }
 0x76b   : > { %2424 = vst.msk [vmem:[%s4592_s16 + $0xc] sm:$0xf] %vm2420_vm8, %v2415_v3 }
 0x784   : > { %v2378_v61 = vpop.f32.mrf.mxu1 }
 0x785   : > { %v2379_v63 = vadd.f32 %v2826_v27, %v2378_v61 }
 0x787   : > { %v2408_v10 = vadd.f32 %v2650_v22, %v2379_v63 }
 0x789   : > { %v2416_v57 = vpack.c.bf16 %v2408_v10, %v2408_v10 }
 0x78b   : > { %2425 = vst.msk [vmem:[%s4592_s16 + $0x10] sm:$0xf] %vm2420_vm8, %v2416_v57 }
 0x78c   : > { %v2380_v54 = vpop.f32.mrf.mxu1 }
 0x78d   : > { %v2381_v40 = vadd.f32 %v2826_v27, %v2380_v54 }
 0x78f   : > { %v2409_v56 = vadd.f32 %v2651_v7, %v2381_v40 }
 0x791   : > { %v2417_v48 = vpack.c.bf16 %v2409_v56, %v2409_v56 }
 0x793   : > { %2426 = vst.msk [vmem:[%s4592_s16 + $0x14] sm:$0xf] %vm2420_vm8, %v2417_v48 }
 0x795   : > { %v2383_v37 = vpop.f32.mrf.mxu1 }
 0x796   : > { %v2384_v15 = vadd.f32 %v2826_v27, %v2383_v37 }
 0x798   : > { %v2410_v30 = vadd.f32 %v2654_v60, %v2384_v15 }
 0x79a   : > { %v2418_v16 = vpack.c.bf16 %v2410_v30, %v2410_v30 }
 0x79c   : > { %2427 = vst.msk [vmem:[%s4592_s16 + $0x18] sm:$0xf] %vm2420_vm8, %v2418_v16 }
 0x79d   : > { %v2385_v55 = vpop.f32.mrf.mxu1 }
 0x79e   : > { %v2386_v4 = vadd.f32 %v2826_v27, %v2385_v55 }
 0x7a0   : > { %v2411_v33 = vadd.f32 %v2655_v59, %v2386_v4 }
 0x7a2   : > { %v2419_v53 = vpack.c.bf16 %v2411_v33, %v2411_v33 }
 0x7a4   : > { %2428 = vst.msk [vmem:[%s4592_s16 + $0x1c] sm:$0xf] %vm2420_vm8, %v2419_v53 }
 0x7a5 PF: > { %s14_s15 = sadd.s32 1, %s3089_s15  }
 0x7a6   : > { %p11_p4 = scmp.ge.s32.totalorder %s14_s15, 4  }
 0x7a8   :  { %13 = sbr.rel (!%p11_p4) target bundleno = 1 (0x1), region = 69 }

// kernel: skip_fcn_cct_forward.21
= control target key start
LH: loop header
LB: loop body
LE: loop exit
PB: predicated region body
PF: predicated region fallthrough
CT: control target
= control target key end

     0   :  { %s785_s15 = smov 0   ;;  %s912_s0 = inlined_call_operand.vmem [shape: bf16[128,256], index: 0, kind: input, shape index: {}]   ;;  %s913_s1 = inlined_call_operand.vmem [shape: bf16[256,64], index: 1, kind: input, shape index: {}]   ;;  %s914_s2 = inlined_call_operand.vmem [shape: f32[1,64], index: 2, kind: input, shape index: {}]   ;;  %s915_s3 = inlined_call_operand.vmem [shape: bf16[128,64], index: 3, kind: input, shape index: {}]   ;;  %s916_s4 = inlined_call_operand.vmem [shape: bf16[128,64], index: 4, kind: output, shape index: {}]  }
   0x1 LB: > { %s573_s16 = sadd.s32 4294967295, %s758_s15   ;;  %p577_p0 = scmp.ge.s32.totalorder %s758_s15, 1  ;;  %s758_s15 = sphi %s785_s15, %s14_s15  }
   0x2   : > { %p175_p1 = scmp.lt.s32.totalorder %s758_s15, 3 }
   0x4   : > { %p176_p2 = pnand %p577_p0, %p175_p1 }
   0x5   : > { %s578_s29 = sshll.u32 (!%p176_p2), %s573_s16, 3 }
   0x6   : > { %179 = sbr.rel (%p176_p2) target bundleno = 208 (0xd0), region = 36  ;;  %p208_p3 = scmp.lt.s32.totalorder (!%p176_p2), %s578_s29, 15 }
   0xb   : > { %v699_v0 = vld [vmem:[%s913_s1 + $0x38] sm:$0xff]  ;;  %v698_v2 = vld [vmem:[%s913_s1 + $0x30] sm:$0xff]  ;;  %v697_v4 = vld [vmem:[%s913_s1 + $0x28] sm:$0xff]  ;;  %s918_s29 = smov (!%p208_p3, %s578_s29), 15  ;;  %vm496_vm0 = vcmask 519168  }
   0xc   : > { %v707_v1 = vld [vmem:[%s913_s1 + $0x78] sm:$0xff]  ;;  %406 = vmatpush.bf16.msra.mxu0 %v699_v0  ;;  %727 = vmatpush.bf16.msra.mxu2 %v699_v0  ;;  %v706_v3 = vld [vmem:[%s913_s1 + $0x70] sm:$0xff]  ;;  %v705_v5 = vld [vmem:[%s913_s1 + $0x68] sm:$0xff]  ;;  %s683_s17 = sshll.u32 %s918_s29, 3  ;;  %s582_s30 = sshll.u32 %s918_s29, 2 }
   0xd   : > { %435 = vmatpush.bf16.msra.mxu1 %v707_v1  ;;  %735 = vmatpush.bf16.msra.mxu3 %v707_v1  ;;  %v696_v6 = vld [vmem:[%s913_s1 + $0x20] sm:$0xff]  ;;  %v695_v8 = vld [vmem:[%s913_s1 + $0x18] sm:$0xff]  ;;  %v694_v10 = vld [vmem:[%s913_s1 + $0x10] sm:$0xff]  ;;  %s838_s22 = scalar_lea.vmem %s912_s0, %s683_s17  ;;  %s869_s7 = scalar_lea.vmem %s915_s3, %s582_s30 }
   0xe   : > { %v704_v7 = vld [vmem:[%s913_s1 + $0x60] sm:$0xff]  ;;  %v703_v9 = vld [vmem:[%s913_s1 + $0x58] sm:$0xff]  ;;  %v702_v11 = vld [vmem:[%s913_s1 + $0x50] sm:$0xff]  ;;  %s882_s11 = scalar_lea.vmem %s916_s4, %s582_s30 }
   0xf   : > { %v693_v12 = vld [vmem:[%s913_s1 + $0x8] sm:$0xff]  ;;  %v692_v14 = vld [vmem:[%s913_s1] sm:$0xff]  ;;  %v595_v28 = vld [vmem:[%s838_s22 + $0x10] sm:$0xf] }
  0x10   : > { %407 = vmatpush.bf16.msra.mxu0 %v698_v2  ;;  %728 = vmatpush.bf16.msra.mxu2 %v698_v2  ;;  %v701_v13 = vld [vmem:[%s913_s1 + $0x48] sm:$0xff]  ;;  %v700_v15 = vld [vmem:[%s913_s1 + $0x40] sm:$0xff]  ;;  %v687_v29 = vld [vmem:[%s838_s22 + $0x14] sm:$0xf0] }
  0x11   : > { %436 = vmatpush.bf16.msra.mxu1 %v706_v3  ;;  %736 = vmatpush.bf16.msra.mxu3 %v706_v3  ;;  %v587_v16 = vld [vmem:[%s838_s22] sm:$0xf]  ;;  %v685_v17 = vld [vmem:[%s838_s22 + $0x4] sm:$0xf0]  ;;  %v684_v20 = vld [vmem:[%s838_s22 + $0x4] sm:$0xf]  ;;  %v596_v36 = vor.u32 %v687_v29, %v595_v28 }
  0x12   : > { %v603_v18 = vld [vmem:[%s838_s22 + $0x20] sm:$0xf]  ;;  %v689_v19 = vld [vmem:[%s838_s22 + $0x24] sm:$0xf0]  ;;  %v589_v21 = vld [vmem:[%s838_s22 + $0x8] sm:$0xf0]  ;;  %v588_v24 = vor.u32 %v685_v17, %v587_v16 }
  0x13   : > { %v688_v22 = vld [vmem:[%s838_s22 + $0x24] sm:$0xf]  ;;  %v605_v23 = vld [vmem:[%s838_s22 + $0x28] sm:$0xf0]  ;;  %v604_v25 = vor.u32 %v689_v19, %v603_v18  ;;  %v592_v26 = vor.u32 %v684_v20, %v589_v21  ;;  %v611_v30 = vld [vmem:[%s838_s22 + $0x30] sm:$0xf] }
  0x14   : > { %408 = vmatpush.bf16.msra.mxu0 %v697_v4  ;;  %729 = vmatpush.bf16.msra.mxu2 %v697_v4  ;;  %v608_v27 = vor.u32 %v688_v22, %v605_v23  ;;  %v691_v31 = vld [vmem:[%s838_s22 + $0x34] sm:$0xf0]  ;;  %v686_v32 = vld [vmem:[%s838_s22 + $0x14] sm:$0xf]  ;;  %v597_v33 = vld [vmem:[%s838_s22 + $0x18] sm:$0xf0] }
  0x15   : > { %437 = vmatpush.bf16.msra.mxu1 %v705_v5  ;;  %737 = vmatpush.bf16.msra.mxu3 %v705_v5  ;;  %v690_v34 = vld [vmem:[%s838_s22 + $0x34] sm:$0xf]  ;;  %v613_v35 = vld [vmem:[%s838_s22 + $0x38] sm:$0xf0]  ;;  %v612_v37 = vor.u32 %v691_v31, %v611_v30  ;;  %v600_v38 = vor.u32 %v686_v32, %v597_v33  ;;  %v874_v40 = vld [vmem:[%s914_s2] ss:$0 sm:$0xff] }
  0x16   : > { %v616_v39 = vor.u32 %v690_v34, %v613_v35  ;;  %v709_v41 = vld [vmem:[%s869_s7] sm:$0xff]   ;;  %v725_v47 = vld [vmem:[%s869_s7 + $0x10] sm:$0xff]   ;;  %v724_v0 = vld [vmem:[%s869_s7 + $0x8] sm:$0xff]  }
  0x17   : > { %v710_v45 = vunpack.c.l.bf16 %v709_v41  ;;  %v718_v53 = vunpack.c.l.bf16 %v725_v47  ;;  %v711_v58 = vunpack.c.h.bf16 %v709_v41  ;;  %v719_v4 = vunpack.c.h.bf16 %v725_v47 }
  0x18   : > { %409 = vmatpush.bf16.msra.mxu0 %v696_v6  ;;  %730 = vmatpush.bf16.msra.mxu2 %v696_v6  ;;  %v715_v23 = vunpack.c.h.bf16 %v724_v0 }
  0x19   : > { %438 = vmatpush.bf16.msra.mxu1 %v704_v7  ;;  %738 = vmatpush.bf16.msra.mxu3 %v704_v7 }
  0x1c   : > { %410 = vmatpush.bf16.msra.mxu0 %v695_v8  ;;  %731 = vmatpush.bf16.msra.mxu2 %v695_v8 }
  0x1d   : > { %439 = vmatpush.bf16.msra.mxu1 %v703_v9  ;;  %739 = vmatpush.bf16.msra.mxu3 %v703_v9  ;;  %v714_v9 = vunpack.c.l.bf16 %v724_v0 }
  0x20   : > { %411 = vmatpush.bf16.msra.mxu0 %v694_v10  ;;  %732 = vmatpush.bf16.msra.mxu2 %v694_v10 }
  0x21   : > { %440 = vmatpush.bf16.msra.mxu1 %v702_v11  ;;  %740 = vmatpush.bf16.msra.mxu3 %v702_v11 }
  0x24   : > { %412 = vmatpush.bf16.msra.mxu0 %v693_v12  ;;  %733 = vmatpush.bf16.msra.mxu2 %v693_v12  ;;  %v726_v12 = vld [vmem:[%s869_s7 + $0x18] sm:$0xff]  }
  0x25   : > { %441 = vmatpush.bf16.msra.mxu1 %v701_v13  ;;  %741 = vmatpush.bf16.msra.mxu3 %v701_v13  ;;  %v722_v19 = vunpack.c.l.bf16 %v726_v12  ;;  %v723_v32 = vunpack.c.h.bf16 %v726_v12 }
  0x28   : > { %413 = vmatpush.bf16.msra.mxu0 %v692_v14  ;;  %734 = vmatpush.bf16.msra.mxu2 %v692_v14 }
  0x29   : > { %442 = vmatpush.bf16.msra.mxu1 %v700_v15  ;;  %742 = vmatpush.bf16.msra.mxu3 %v700_v15 }
  0x2b   : > { %414 = vmatmul.bf16.vlgmr.msra.gmra.mxu0 %v588_v24  ;;  %424 = vmatmul.bf16.vlgmr.msra.gmra.mxu2 %v604_v25 }
  0x2c   : > { %443 = vmatmul.bf16.vlgmr.msra.gmra.mxu1 %v592_v26  ;;  %453 = vmatmul.bf16.vlgmr.msra.gmra.mxu3 %v608_v27 }
  0x3b   : > { %419 = vmatmul.bf16.gmra.mxu0 %v596_v36  ;;  %429 = vmatmul.bf16.gmra.mxu2 %v612_v37 }
  0x3c   : > { %448 = vmatmul.bf16.gmra.mxu1 %v600_v38  ;;  %458 = vmatmul.bf16.gmra.mxu3 %v616_v39 }
  0xa8   : > { %v415_v42 = vpop.f32.mrf.mxu0 }
  0xa9   : > { %v416_v43 = vadd.f32 %v874_v40, %v415_v42  ;;  %v444_v44 = vpop.f32.mrf.mxu1 }
  0xab   : > { %v445_v46 = vadd.f32 %v444_v44, %v416_v43 }
  0xad   : > { %v480_v48 = vadd.f32 %v710_v45, %v445_v46 }
  0xae   : > { %v425_v49 = vpop.f32.mrf.mxu2 }
  0xaf   : > { %v488_v50 = vpack.c.bf16 %v480_v48, %v480_v48  ;;  %v426_v51 = vadd.f32 %v874_v40, %v425_v49  ;;  %v454_v52 = vpop.f32.mrf.mxu3 }
  0xb0   : > { %v417_v54 = vpop.f32.mrf.mxu0 }
  0xb1   : > { %497 = vst.msk [vmem:[%s882_s11] sm:$0xf] %vm496_vm0, %v488_v50  ;;  %v455_v55 = vadd.f32 %v454_v52, %v426_v51  ;;  %v418_v56 = vadd.f32 %v874_v40, %v417_v54  ;;  %v446_v57 = vpop.f32.mrf.mxu1 }
  0xb3   : > { %v484_v59 = vadd.f32 %v718_v53, %v455_v55  ;;  %v447_v60 = vadd.f32 %v446_v57, %v418_v56 }
  0xb5   : > { %v492_v61 = vpack.c.bf16 %v484_v59, %v484_v59  ;;  %v481_v62 = vadd.f32 %v711_v58, %v447_v60 }
  0xb6   : > { %v427_v63 = vpop.f32.mrf.mxu2 }
  0xb7   : > { %501 = vst.msk [vmem:[%s882_s11 + $0x10] sm:$0xf] %vm496_vm0, %v492_v61  ;;  %v489_v1 = vpack.c.bf16 %v481_v62, %v481_v62  ;;  %v428_v2 = vadd.f32 %v874_v40, %v427_v63  ;;  %v456_v3 = vpop.f32.mrf.mxu3 }
  0xb8   : > { %v420_v5 = vpop.f32.mrf.mxu0 }
  0xb9   : > { %498 = vst.msk [vmem:[%s882_s11 + $0x4] sm:$0xf] %vm496_vm0, %v489_v1  ;;  %v457_v6 = vadd.f32 %v456_v3, %v428_v2  ;;  %v421_v7 = vadd.f32 %v874_v40, %v420_v5  ;;  %v449_v8 = vpop.f32.mrf.mxu1 }
  0xbb   : > { %v485_v10 = vadd.f32 %v719_v4, %v457_v6  ;;  %v450_v11 = vadd.f32 %v449_v8, %v421_v7 }
  0xbd   : > { %v493_v13 = vpack.c.bf16 %v485_v10, %v485_v10  ;;  %v482_v14 = vadd.f32 %v714_v9, %v450_v11 }
  0xbe   : > { %v430_v15 = vpop.f32.mrf.mxu2 }
  0xbf   : > { %502 = vst.msk [vmem:[%s882_s11 + $0x14] sm:$0xf] %vm496_vm0, %v493_v13  ;;  %v490_v16 = vpack.c.bf16 %v482_v14, %v482_v14  ;;  %v431_v17 = vadd.f32 %v874_v40, %v430_v15  ;;  %v459_v18 = vpop.f32.mrf.mxu3 }
  0xc0   : > { %v422_v20 = vpop.f32.mrf.mxu0 }
  0xc1   : > { %499 = vst.msk [vmem:[%s882_s11 + $0x8] sm:$0xf] %vm496_vm0, %v490_v16  ;;  %v460_v21 = vadd.f32 %v459_v18, %v431_v17  ;;  %v423_v22 = vadd.f32 %v874_v40, %v422_v20  ;;  %v451_v24 = vpop.f32.mrf.mxu1 }
  0xc3   : > { %v486_v25 = vadd.f32 %v722_v19, %v460_v21  ;;  %v452_v26 = vadd.f32 %v451_v24, %v423_v22 }
  0xc5   : > { %v494_v27 = vpack.c.bf16 %v486_v25, %v486_v25  ;;  %v483_v28 = vadd.f32 %v715_v23, %v452_v26 }
  0xc6   : > { %v432_v29 = vpop.f32.mrf.mxu2 }
  0xc7   : > { %503 = vst.msk [vmem:[%s882_s11 + $0x18] sm:$0xf] %vm496_vm0, %v494_v27  ;;  %v491_v30 = vpack.c.bf16 %v483_v28, %v483_v28  ;;  %v433_v31 = vadd.f32 %v874_v40, %v432_v29  ;;  %v461_v33 = vpop.f32.mrf.mxu3 }
  0xc9   : > { %500 = vst.msk [vmem:[%s882_s11 + $0xc] sm:$0xf] %vm496_vm0, %v491_v30  ;;  %v462_v34 = vadd.f32 %v461_v33, %v433_v31 }
  0xcb   : > { %v487_v35 = vadd.f32 %v723_v32, %v462_v34 }
  0xcd   : > { %v495_v36 = vpack.c.bf16 %v487_v35, %v487_v35 }
  0xcf   : > { %504 = vst.msk [vmem:[%s882_s11 + $0x1c] sm:$0xf] %vm496_vm0, %v495_v36 }
  0xd0 PF: > { %s14_s15 = sadd.s32 1, %s758_s15  }
  0xd1   : > { %p11_p4 = scmp.ge.s32.totalorder %s14_s15, 4  }
  0xd3   :  { %13 = sbr.rel (!%p11_p4) target bundleno = 1 (0x1), region = 69 }

// kernel: skip_fcn_cct_forward.30
= control target key start
LH: loop header
LB: loop body
LE: loop exit
PB: predicated region body
PF: predicated region fallthrough
CT: control target
= control target key end

     0   :  { %s559_s12 = smov 0   ;;  %s744_s0 = inlined_call_operand.vmem [shape: bf16[128,64], index: 0, kind: input, shape index: {}]   ;;  %s745_s1 = inlined_call_operand.vmem [shape: f32[1,64], index: 1, kind: input, shape index: {}]   ;;  %s746_s2 = inlined_call_operand.vmem [shape: f32[1,64], index: 2, kind: input, shape index: {}]   ;;  %s747_s3 = inlined_call_operand.vmem [shape: bf16[128,64], index: 3, kind: output, shape index: {}]  }
   0x1 LB: > { %s471_s13 = sadd.s32 4294967295, %s536_s12   ;;  %p475_p0 = scmp.ge.s32.totalorder %s536_s12, 1  ;;  %s536_s12 = sphi %s559_s12, %s13_s12  }
   0x2   : > { %p138_p1 = scmp.lt.s32.totalorder %s536_s12, 3 }
   0x4   : > { %p139_p2 = pnand %p475_p0, %p138_p1 }
   0x5   : > { %s476_s14 = sshll.u32 (!%p139_p2), %s471_s13, 3 }
   0x6   : > { %142 = sbr.rel (%p139_p2) target bundleno = 314 (0x13a), region = 32  ;;  %p163_p3 = scmp.lt.s32.totalorder (!%p139_p2), %s476_s14, 15 }
   0xb   : > { %s751_s14 = smov (!%p163_p3, %s476_s14), 15  ;;  %vm192_vm0 = vcmask 523264   ;;  %v538_v20 = vmov 64.0   ;;  %vm406_vm5 = vcmask 519168  }
   0xc   : > { %s477_s15 = sshll.u32 %s751_s14, 2  ;;  %512 = vrcp.f32 %v538_v20 }
   0xd   : > { %s166_s18 = scalar_lea.vmem %s744_s0, %s477_s15  ;;  %s686_s25 = scalar_lea.vmem %s747_s3, %s477_s15 }
   0xe   : > { %v575_v0 = vld [vmem:[%s166_s18 + $0x10] sm:$0xff]   ;;  %v498_v1 = vld [vmem:[%s166_s18 + $0x8] sm:$0xff]   ;;  %v483_v2 = vld [vmem:[%s166_s18] sm:$0xff]  }
   0xf   : > { %v492_v3 = vunpack.c.l.bf16 %v575_v0  ;;  %v488_v4 = vunpack.c.l.bf16 %v498_v1  ;;  %v484_v5 = vunpack.c.l.bf16 %v483_v2  ;;  %v493_v9 = vunpack.c.h.bf16 %v575_v0  ;;  %v500_v15 = vld [vmem:[%s166_s18 + $0x18] sm:$0xff]  }
  0x10   : > { %v489_v10 = vunpack.c.h.bf16 %v498_v1  ;;  %v485_v11 = vunpack.c.h.bf16 %v483_v2  ;;  %v497_v16 = vunpack.c.h.bf16 %v500_v15  ;;  %v496_v17 = vunpack.c.l.bf16 %v500_v15 }
  0x11   : > { %v205_v6 = vsel %vm192_vm0, %v492_v3, 0.0  ;;  %v199_v7 = vsel %vm192_vm0, %v488_v4, 0.0  ;;  %v193_v8 = vsel %vm192_vm0, %v484_v5, 0.0  ;;  %v208_v12 = vsel %vm192_vm0, %v493_v9, 0.0 }
  0x12   : > { %206 = vadd.xlane.f32.xlu2 %v205_v6  ;;  %200 = vadd.xlane.f32.xlu1 %v199_v7  ;;  %v202_v13 = vsel %vm192_vm0, %v489_v10, 0.0  ;;  %v196_v14 = vsel %vm192_vm0, %v485_v11, 0.0  ;;  %v214_v18 = vsel %vm192_vm0, %v497_v16, 0.0  ;;  %v211_v19 = vsel %vm192_vm0, %v496_v17, 0.0  ;;  %v513_v21 = vpop.eup %512 }
  0x13   : > { %194 = vadd.xlane.f32.xlu0 %v193_v8  ;;  %v218_v22 = vmul.f32 64.0, %v513_v21  ;;  %vm222_vm1 = vweird.f32 %v513_v21 }
  0x15   : > { %v219_v23 = vsub.f32 1.0, %v218_v22 }
  0x17   : > { %v220_v24 = vmul.f32 %v513_v21, %v219_v23 }
  0x19   : > { %v221_v25 = vadd.f32 %v513_v21, %v220_v24 }
  0x1a   : > { %209 = vadd.xlane.f32.xlu2 %v208_v12  ;;  %203 = vadd.xlane.f32.xlu1 %v202_v13 }
  0x1b   : > { %197 = vadd.xlane.f32.xlu0 %v196_v14  ;;  %v587_v26 = vsel %vm222_vm1, %v513_v21, %v221_v25 }
  0x22   : > { %215 = vadd.xlane.f32.xlu1 %v214_v18 }
  0x23   : > { %212 = vadd.xlane.f32.xlu0 %v211_v19 }
  0x85   : > { %v207_v27 = vpop.xlane.xlu2 %206  ;;  %v201_v28 = vpop.xlane.xlu1 %200 }
  0x86   : > { %v226_v29 = vmul.f32 %v587_v26, %v201_v28  ;;  %v195_v30 = vpop.xlane.xlu0 %194  ;;  %v228_v43 = vmul.f32 %v587_v26, %v207_v27 }
  0x87   : > { %v224_v31 = vmul.f32 %v587_v26, %v195_v30 }
  0x88   : > { %v591_v32 = vsub.f32 %v488_v4, %v226_v29  ;;  %v615_v50 = vsub.f32 %v492_v3, %v228_v43 }
  0x89   : > { %v593_v33 = vsub.f32 %v484_v5, %v224_v31 }
  0x8a   : > { %v242_v34 = vmul.f32 %v591_v32, %v591_v32  ;;  %v244_v59 = vmul.f32 %v615_v50, %v615_v50 }
  0x8b   : > { %v240_v35 = vmul.f32 %v593_v33, %v593_v33 }
  0x8c   : > { %v254_v36 = vsel %vm192_vm0, %v242_v34, 0.0  ;;  %v260_v62 = vsel %vm192_vm0, %v244_v59, 0.0 }
  0x8d   : > { %v210_v37 = vpop.xlane.xlu2 %209  ;;  %255 = vadd.xlane.f32.xlu1 %v254_v36  ;;  %v204_v38 = vpop.xlane.xlu1 %203  ;;  %v248_v39 = vsel %vm192_vm0, %v240_v35, 0.0 }
  0x8e   : > { %v229_v40 = vmul.f32 %v587_v26, %v210_v37  ;;  %v227_v41 = vmul.f32 %v587_v26, %v204_v38  ;;  %249 = vadd.xlane.f32.xlu2 %v248_v39  ;;  %v198_v42 = vpop.xlane.xlu0 %197 }
  0x8f   : > { %v225_v44 = vmul.f32 %v587_v26, %v198_v42 }
  0x90   : > { %v605_v45 = vsub.f32 %v493_v9, %v229_v40  ;;  %v607_v46 = vsub.f32 %v489_v10, %v227_v41  ;;  %v655_v41 = vld [vmem:[%s745_s1] ss:$0 sm:$0xff] }
  0x91   : > { %v609_v47 = vsub.f32 %v485_v11, %v225_v44 }
  0x92   : > { %v245_v48 = vmul.f32 %v605_v45, %v605_v45  ;;  %v243_v49 = vmul.f32 %v607_v46, %v607_v46 }
  0x93   : > { %v241_v51 = vmul.f32 %v609_v47, %v609_v47 }
  0x94   : > { %v263_v52 = vsel %vm192_vm0, %v245_v48, 0.0  ;;  %v257_v53 = vsel %vm192_vm0, %v243_v49, 0.0 }
  0x95   : > { %264 = vadd.xlane.f32.xlu1 %v263_v52  ;;  %v251_v54 = vsel %vm192_vm0, %v241_v51, 0.0  ;;  %v216_v55 = vpop.xlane.xlu1 %215  ;;  %v665_v52 = vld [vmem:[%s746_s2] ss:$0 sm:$0xff] }
  0x96   : > { %258 = vadd.xlane.f32.xlu2 %v257_v53  ;;  %252 = vadd.xlane.f32.xlu0 %v251_v54  ;;  %v213_v56 = vpop.xlane.xlu0 %212  ;;  %v231_v58 = vmul.f32 %v587_v26, %v216_v55 }
  0x97   : > { %v230_v57 = vmul.f32 %v587_v26, %v213_v56 }
  0x98   : > { %v628_v61 = vsub.f32 %v497_v16, %v231_v58 }
  0x99   : > { %v626_v60 = vsub.f32 %v496_v17, %v230_v57 }
  0x9a   : > { %v247_v1 = vmul.f32 %v628_v61, %v628_v61 }
  0x9b   : > { %v246_v63 = vmul.f32 %v626_v60, %v626_v60 }
  0x9c   : > { %v269_v2 = vsel %vm192_vm0, %v247_v1, 0.0 }
  0x9d   : > { %v266_v0 = vsel %vm192_vm0, %v246_v63, 0.0 }
  0x9e   : > { %261 = vadd.xlane.f32.xlu0 %v260_v62  ;;  %267 = vadd.xlane.f32.xlu2 %v266_v0 }
  0xa6   : > { %270 = vadd.xlane.f32.xlu0 %v269_v2 }
 0x100   : > { %v256_v3 = vpop.xlane.xlu1 %255 }
 0x101   : > { %v274_v4 = vmul.f32 %v256_v3, %v587_v26  ;;  %v250_v5 = vpop.xlane.xlu2 %249 }
 0x102   : > { %v272_v6 = vmul.f32 %v250_v5, %v587_v26 }
 0x103   : > { %v282_v7 = vadd.f32 1e-05, %v274_v4 }
 0x104   : > { %v280_v8 = vadd.f32 1e-05, %v272_v6 }
 0x105   : > { %514 = vrsqrt.f32 %v282_v7  ;;  %vm314_vm2 = vweird.f32 %v282_v7 }
 0x106   : > { %516 = vrsqrt.f32 %v280_v8  ;;  %vm294_vm7 = vweird.f32 %v280_v8 }
 0x108   : > { %v265_v9 = vpop.xlane.xlu1 %264 }
 0x109   : > { %v277_v10 = vmul.f32 %v265_v9, %v587_v26  ;;  %v259_v11 = vpop.xlane.xlu2 %258  ;;  %v253_v12 = vpop.xlane.xlu0 %252 }
 0x10a   : > { %v275_v13 = vmul.f32 %v259_v11, %v587_v26  ;;  %v273_v14 = vmul.f32 %v253_v12, %v587_v26 }
 0x10b   : > { %v515_v15 = vpop.eup %514  ;;  %v285_v16 = vadd.f32 1e-05, %v277_v10 }
 0x10c   : > { %v517_v17 = vpop.eup %516  ;;  %v309_v18 = vmul.f32 %v515_v15, %v282_v7  ;;  %v642_v19 = vadd.f32 1e-05, %v275_v13  ;;  %v644_v20 = vadd.f32 1e-05, %v273_v14  ;;  %vm315_vm3 = vweird.f32 %v515_v15 }
 0x10d   : > { %v289_v21 = vmul.f32 %v517_v17, %v280_v8  ;;  %518 = vrsqrt.f32 %v285_v16  ;;  %vm295_vm4 = vweird.f32 %v517_v17  ;;  %vm316_vm6 = vmor %vm314_vm2, %vm315_vm3  ;;  %vm344_vm9 = vweird.f32 %v285_v16 }
 0x10e   : > { %v310_v22 = vmul.f32 %v515_v15, %v309_v18  ;;  %520 = vrsqrt.f32 %v642_v19  ;;  %vm296_vm8 = vmor %vm294_vm7, %vm295_vm4  ;;  %vm324_vm11 = vweird.f32 %v642_v19  ;;  %vm304_vm15 = vweird.f32 %v644_v20 }
 0x10f   : > { %v290_v23 = vmul.f32 %v517_v17, %v289_v21  ;;  %522 = vrsqrt.f32 %v644_v20 }
 0x110   : > { %v311_v24 = vmul.f32 0.5, %v310_v22 }
 0x111   : > { %v291_v25 = vmul.f32 0.5, %v290_v23  ;;  %v268_v27 = vpop.xlane.xlu2 %267  ;;  %v262_v28 = vpop.xlane.xlu0 %261 }
 0x112   : > { %v312_v29 = vsub.f32 1.5, %v311_v24  ;;  %v278_v30 = vmul.f32 %v268_v27, %v587_v26  ;;  %v276_v31 = vmul.f32 %v262_v28, %v587_v26 }
 0x113   : > { %v519_v34 = vpop.eup %518  ;;  %v292_v35 = vsub.f32 1.5, %v291_v25 }
 0x114   : > { %v521_v36 = vpop.eup %520  ;;  %v313_v37 = vmul.f32 %v515_v15, %v312_v29  ;;  %v339_v38 = vmul.f32 %v519_v34, %v285_v16  ;;  %v650_v39 = vadd.f32 1e-05, %v278_v30  ;;  %v659_v44 = vadd.f32 1e-05, %v276_v31 }
 0x115   : > { %v523_v40 = vpop.eup %522  ;;  %v293_v42 = vmul.f32 %v517_v17, %v292_v35  ;;  %v319_v43 = vmul.f32 %v521_v36, %v642_v19  ;;  %vm345_vm10 = vweird.f32 %v519_v34  ;;  %vm325_vm13 = vweird.f32 %v521_v36 }
 0x116   : > { %v317_v48 = vsel %vm316_vm6, %v515_v15, %v313_v37  ;;  %v340_v49 = vmul.f32 %v519_v34, %v339_v38  ;;  %v299_v51 = vmul.f32 %v523_v40, %v644_v20  ;;  %524 = vrsqrt.f32 %v650_v39  ;;  %vm677_vm12 = vmor %vm344_vm9, %vm345_vm10 }
 0x117   : > { %v370_v53 = vmul.f32 %v317_v48, %v591_v32  ;;  %v297_v54 = vsel %vm296_vm8, %v517_v17, %v293_v42  ;;  %v320_v55 = vmul.f32 %v521_v36, %v319_v43  ;;  %526 = vrsqrt.f32 %v659_v44  ;;  %vm326_vm0 = vmor %vm324_vm11, %vm325_vm13 }
 0x118   : > { %v368_v56 = vmul.f32 %v297_v54, %v593_v33  ;;  %v341_v57 = vmul.f32 0.5, %v340_v49  ;;  %v300_v58 = vmul.f32 %v523_v40, %v299_v51  ;;  %vm305_vm14 = vweird.f32 %v523_v40 }
 0x119   : > { %v381_v59 = vmul.f32 %v655_v41, %v370_v53  ;;  %v321_v62 = vmul.f32 0.5, %v320_v55  ;;  %v271_v63 = vpop.xlane.xlu0 %270  ;;  %vm306_vm1 = vmor %vm304_vm15, %vm305_vm14  ;;  %vm354_vm2 = vweird.f32 %v650_v39  ;;  %vm334_vm7 = vweird.f32 %v659_v44 }
 0x11a   : > { %v379_v32 = vmul.f32 %v655_v41, %v368_v56  ;;  %v342_v0 = vsub.f32 1.5, %v341_v57  ;;  %v301_v1 = vmul.f32 0.5, %v300_v58  ;;  %v279_v2 = vmul.f32 %v271_v63, %v587_v26 }
 0x11b   : > { %v392_v33 = vadd.f32 %v665_v52, %v381_v59  ;;  %v322_v4 = vsub.f32 1.5, %v321_v62 }
 0x11c   : > { %v390_v5 = vadd.f32 %v665_v52, %v379_v32  ;;  %v343_v26 = vmul.f32 %v519_v34, %v342_v0  ;;  %v302_v6 = vsub.f32 1.5, %v301_v1  ;;  %v689_v7 = vadd.f32 1e-05, %v279_v2  ;;  %v525_v8 = vpop.eup %524 }
 0x11d   : > { %v400_v9 = vpack.c.bf16 %v392_v33, %v392_v33  ;;  %v323_v10 = vmul.f32 %v521_v36, %v322_v4  ;;  %v349_v14 = vmul.f32 %v525_v8, %v650_v39  ;;  %v527_v15 = vpop.eup %526  ;;  %vm355_vm3 = vweird.f32 %v525_v8 }
 0x11e   : > { %v398_v11 = vpack.c.bf16 %v390_v5, %v390_v5  ;;  %v347_v12 = vsel %vm677_vm12, %v519_v34, %v343_v26  ;;  %v303_v13 = vmul.f32 %v523_v40, %v302_v6  ;;  %528 = vrsqrt.f32 %v689_v7  ;;  %vm356_vm6 = vmor %vm354_vm2, %vm355_vm3 }
 0x11f   : > { %409 = vst.msk [vmem:[%s686_s25 + $0x8] sm:$0xf] %vm406_vm5, %v400_v9  ;;  %v373_v16 = vmul.f32 %v347_v12, %v605_v45  ;;  %v327_v17 = vsel %vm326_vm0, %v521_v36, %v323_v10  ;;  %v350_v19 = vmul.f32 %v525_v8, %v349_v14  ;;  %v329_v21 = vmul.f32 %v527_v15, %v659_v44 }
 0x120   : > { %407 = vst.msk [vmem:[%s686_s25] sm:$0xf] %vm406_vm5, %v398_v11  ;;  %v371_v18 = vmul.f32 %v327_v17, %v607_v46  ;;  %v307_v20 = vsel %vm306_vm1, %v523_v40, %v303_v13  ;;  %vm335_vm4 = vweird.f32 %v527_v15  ;;  %vm364_vm10 = vweird.f32 %v689_v7 }
 0x121   : > { %v384_v22 = vmul.f32 %v655_v41, %v373_v16  ;;  %v369_v23 = vmul.f32 %v307_v20, %v609_v47  ;;  %v351_v45 = vmul.f32 0.5, %v350_v19  ;;  %v330_v25 = vmul.f32 %v527_v15, %v329_v21  ;;  %vm336_vm8 = vmor %vm334_vm7, %vm335_vm4 }
 0x122   : > { %v382_v24 = vmul.f32 %v655_v41, %v371_v18 }
 0x123   : > { %v395_v27 = vadd.f32 %v665_v52, %v384_v22  ;;  %v380_v28 = vmul.f32 %v655_v41, %v369_v23  ;;  %v352_v29 = vsub.f32 1.5, %v351_v45  ;;  %v331_v30 = vmul.f32 0.5, %v330_v25 }
 0x124   : > { %v393_v46 = vadd.f32 %v665_v52, %v382_v24  ;;  %v529_v31 = vpop.eup %528 }
 0x125   : > { %v403_v47 = vpack.c.bf16 %v395_v27, %v395_v27  ;;  %v391_v34 = vadd.f32 %v665_v52, %v380_v28  ;;  %v353_v36 = vmul.f32 %v525_v8, %v352_v29  ;;  %v332_v37 = vsub.f32 1.5, %v331_v30 }
 0x126   : > { %v401_v35 = vpack.c.bf16 %v393_v46, %v393_v46  ;;  %v359_v38 = vmul.f32 %v529_v31, %v689_v7  ;;  %vm365_vm9 = vweird.f32 %v529_v31 }
 0x127   : > { %412 = vst.msk [vmem:[%s686_s25 + $0x14] sm:$0xf] %vm406_vm5, %v403_v47  ;;  %v399_v40 = vpack.c.bf16 %v391_v34, %v391_v34  ;;  %v357_v42 = vsel %vm356_vm6, %v525_v8, %v353_v36  ;;  %v333_v43 = vmul.f32 %v527_v15, %v332_v37  ;;  %vm366_vm11 = vmor %vm364_vm10, %vm365_vm9 }
 0x128   : > { %410 = vst.msk [vmem:[%s686_s25 + $0xc] sm:$0xf] %vm406_vm5, %v401_v35  ;;  %v360_v48 = vmul.f32 %v529_v31, %v359_v38  ;;  %v374_v49 = vmul.f32 %v357_v42, %v626_v60 }
 0x129   : > { %408 = vst.msk [vmem:[%s686_s25 + $0x4] sm:$0xf] %vm406_vm5, %v399_v40  ;;  %v337_v51 = vsel %vm336_vm8, %v527_v15, %v333_v43 }
 0x12a   : > { %v361_v53 = vmul.f32 0.5, %v360_v48  ;;  %v385_v39 = vmul.f32 %v655_v41, %v374_v49  ;;  %v372_v54 = vmul.f32 %v337_v51, %v615_v50 }
 0x12c   : > { %v362_v55 = vsub.f32 1.5, %v361_v53  ;;  %v396_v44 = vadd.f32 %v665_v52, %v385_v39  ;;  %v383_v56 = vmul.f32 %v655_v41, %v372_v54 }
 0x12e   : > { %v363_v57 = vmul.f32 %v529_v31, %v362_v55  ;;  %v404_v60 = vpack.c.bf16 %v396_v44, %v396_v44  ;;  %v394_v58 = vadd.f32 %v665_v52, %v383_v56 }
 0x130   : > { %v367_v59 = vsel %vm366_vm11, %v529_v31, %v363_v57  ;;  %413 = vst.msk [vmem:[%s686_s25 + $0x18] sm:$0xf] %vm406_vm5, %v404_v60  ;;  %v402_v62 = vpack.c.bf16 %v394_v58, %v394_v58 }
 0x131   : > { %v375_v50 = vmul.f32 %v367_v59, %v628_v61 }
 0x132   : > { %411 = vst.msk [vmem:[%s686_s25 + $0x10] sm:$0xf] %vm406_vm5, %v402_v62 }
 0x133   : > { %v386_v63 = vmul.f32 %v655_v41, %v375_v50 }
 0x135   : > { %v397_v32 = vadd.f32 %v665_v52, %v386_v63 }
 0x137   : > { %v405_v0 = vpack.c.bf16 %v397_v32, %v397_v32 }
 0x139   : > { %414 = vst.msk [vmem:[%s686_s25 + $0x1c] sm:$0xf] %vm406_vm5, %v405_v0 }
 0x13a PF: > { %s13_s12 = sadd.s32 1, %s536_s12  }
 0x13b   : > { %p10_p4 = scmp.ge.s32.totalorder %s13_s12, 4  }
 0x13d   :  { %12 = sbr.rel (!%p10_p4) target bundleno = 1 (0x1), region = 62 }

// kernel: skip_fcn_cct_forward.31
= control target key start
LH: loop header
LB: loop body
LE: loop exit
PB: predicated region body
PF: predicated region fallthrough
CT: control target
= control target key end

     0   :  { %s1434_s12 = smov 0   ;;  %s1858_s0 = inlined_call_operand.vmem [shape: bf16[2,1,64,342], index: 0, kind: input, shape index: {}]   ;;  %s1859_s1 = inlined_call_operand.vmem [shape: bf16[9,16,64], index: 1, kind: input, shape index: {}]   ;;  %s1860_s2 = inlined_call_operand.vmem [shape: f32[16,1], index: 2, kind: input, shape index: {}]   ;;  %s1861_s3 = inlined_call_operand.vmem [shape: bf16[2,16,288], index: 3, kind: output, shape index: {}]  }
   0x1 LB: > { %s1219_s13 = sadd.s32 4294967295, %s1403_s12   ;;  %p1223_p0 = scmp.ge.s32.totalorder %s1403_s12, 1  ;;  %s1403_s12 = sphi %s1434_s12, %s13_s12  }
   0x2   : > { %p137_p1 = scmp.lt.s32.totalorder %s1403_s12, 3 }
   0x4   : > { %p138_p2 = pnand %p1223_p0, %p137_p1 }
   0x5   : > { %p161_p3 = scmp.lt.s32.totalorder (!%p138_p2), %s1219_s13, 1  ;;  %s1405_s18 = smov (!%p138_p2), 127  }
   0x6   : > { %141 = sbr.rel (%p138_p2) target bundleno = 533 (0x215), region = 32  ;;  %s1406_s19 = smov (!%p138_p2), 126  }
   0x7   : > { %s1407_s20 = smov (!%p138_p2), 110   ;;  %s1408_s21 = smov (!%p138_p2), 109  }
   0x8   : > { %s1409_s22 = smov (!%p138_p2), 108   ;;  %s1410_s23 = smov (!%p138_p2), 92  }
   0x9   : > { %s1411_s30 = smov (!%p138_p2), 91   ;;  %s1412_s6 = smov (!%p138_p2), 90  }
   0xb   : > { %s1863_s13 = smov (!%p161_p3, %s1219_s13), 1  ;;  %vm274_vm0 = vcmask 1039360   ;;  %v1368_v52 = vld [vmem:[%s1859_s1 + $0x8] sm:$0xff]  ;;  %vm295_vm1 = vcmask 523264   ;;  %vm435_vm2 = vcmask 1031168   ;;  %vm539_vm3 = vcmask 900096  }
   0xc   : > { %s1376_s14 = smul.u32 96, %s1863_s13  ;;  %vm643_vm4 = vcmask 891904   ;;  %vm747_vm5 = vcmask 883712   ;;  %vm851_vm6 = vcmask 752640   ;;  %vm955_vm7 = vcmask 744448  }
   0xd   : > { %vm1059_vm8 = vcmask 736256   ;;  %vm1160_vm9 = vcmask 257024  }
   0xe   : > { %s1448_s17 = scalar_lea.vmem %s1858_s0, %s1376_s14 }
   0xf   : > { %v1278_v0 = vld [vmem:[%s1448_s17 + $0x50] sm:$0xf]  ;;  %v1366_v1 = vld [vmem:[%s1448_s17 + $0x58] sm:$0xf0]  ;;  %v1364_v2 = vld [vmem:[%s1448_s17 + $0x4c] sm:$0xf] }
  0x10   : > { %v1453_v3 = vor.u32 %v1366_v1, %v1278_v0  ;;  %v1272_v4 = vld [vmem:[%s1448_s17 + $0x54] sm:$0xf0]  ;;  %v1363_v6 = vld [vmem:[%s1448_s17 + $0x40] sm:$0xf0]  ;;  %v1270_v9 = vld [vmem:[%s1448_s17 + $0x48] sm:$0xf] }
  0x11   : > { %v1266_v5 = vld [vmem:[%s1448_s17 + $0x38] sm:$0xf]  ;;  %v1458_v7 = vor.u32 %v1364_v2, %v1272_v4  ;;  %v1365_v10 = vld [vmem:[%s1448_s17 + $0x50] sm:$0xf0]  ;;  %v1234_v12 = vld [vmem:[%s1448_s17] sm:$0xf] }
  0x12   : > { %v1460_v8 = vor.u32 %v1363_v6, %v1266_v5  ;;  %272 = vrot.lane.b32.xlu0 %v1453_v3, %s1405_s18  ;;  %v1466_v11 = vor.u32 %v1365_v10, %v1270_v9  ;;  %v1356_v13 = vld [vmem:[%s1448_s17 + $0x8] sm:$0xf0]  ;;  %v1254_v14 = vld [vmem:[%s1448_s17 + $0x20] sm:$0xf]  ;;  %v1258_v16 = vld [vmem:[%s1448_s17 + $0x30] sm:$0xf] }
  0x13   : > { %270 = vrot.lane.b32.xlu2 %v1458_v7, %s1405_s18  ;;  %v1360_v15 = vld [vmem:[%s1448_s17 + $0x28] sm:$0xf0]  ;;  %v1362_v17 = vld [vmem:[%s1448_s17 + $0x38] sm:$0xf0]  ;;  %v1479_v18 = vor.u32 %v1356_v13, %v1234_v12  ;;  %v1246_v21 = vld [vmem:[%s1448_s17 + $0x18] sm:$0xf] }
  0x14   : > { %266 = vrot.lane.b32.xlu1 %v1460_v8, %s1405_s18  ;;  %365 = vmatpush.bf16.msra.mxu3 %v1466_v11  ;;  %v1481_v19 = vor.u32 %v1362_v17, %v1258_v16  ;;  %v1483_v20 = vor.u32 %v1360_v15, %v1254_v14  ;;  %v1359_v22 = vld [vmem:[%s1448_s17 + $0x20] sm:$0xf0]  ;;  %v1361_v24 = vld [vmem:[%s1448_s17 + $0x34] sm:$0xf]  ;;  %v1260_v25 = vld [vmem:[%s1448_s17 + $0x3c] sm:$0xf0] }
  0x15   : > { %v1490_v23 = vor.u32 %v1359_v22, %v1246_v21  ;;  %v1242_v26 = vld [vmem:[%s1448_s17 + $0x8] sm:$0xf]  ;;  %v1357_v27 = vld [vmem:[%s1448_s17 + $0x10] sm:$0xf0]  ;;  %v1501_v28 = vor.u32 %v1361_v24, %v1260_v25  ;;  %v1358_v30 = vld [vmem:[%s1448_s17 + $0x1c] sm:$0xf] }
  0x16   : > { %v1503_v29 = vor.u32 %v1357_v27, %v1242_v26  ;;  %v1248_v31 = vld [vmem:[%s1448_s17 + $0x24] sm:$0xf0]  ;;  %v1355_v33 = vld [vmem:[%s1448_s17 + $0x4] sm:$0xf]  ;;  %v1236_v34 = vld [vmem:[%s1448_s17 + $0xc] sm:$0xf0] }
  0x17   : > { %v1514_v32 = vor.u32 %v1358_v30, %v1248_v31  ;;  %v1523_v35 = vor.u32 %v1355_v33, %v1236_v34  ;;  %v1367_v16 = vld [vmem:[%s1859_s1] sm:$0xff]  ;;  %v1369_v25 = vld [vmem:[%s1859_s1 + $0x10] sm:$0xff] }
  0x18   : > { %366 = vmatpush.bf16.msra.mxu3 %v1481_v19 }
  0x1a   : > { %250 = vrot.lane.b32.xlu0 %v1479_v18, %s1405_s18 }
  0x1b   : > { %260 = vrot.lane.b32.xlu2 %v1483_v20, %s1405_s18 }
  0x1c   : > { %268 = vrot.lane.b32.xlu1 %v1466_v11, %s1405_s18  ;;  %367 = vmatpush.bf16.msra.mxu3 %v1490_v23 }
  0x20   : > { %368 = vmatpush.bf16.msra.mxu3 %v1479_v18 }
  0x22   : > { %262 = vrot.lane.b32.xlu0 %v1481_v19, %s1405_s18 }
  0x23   : > { %254 = vrot.lane.b32.xlu2 %v1503_v29, %s1405_s18  ;;  %1287 = vmatmul.msk.bf16.vlgmr.msra.gmra.mxu3 %vm295_vm1, %v1367_v16 }
  0x24   : > { %264 = vrot.lane.b32.xlu1 %v1501_v28, %s1405_s18 }
  0x2a   : > { %256 = vrot.lane.b32.xlu0 %v1490_v23, %s1405_s18 }
  0x2b   : > { %429 = vrot.lane.b32.xlu2 %v1466_v11, %s1406_s19 }
  0x2c   : > { %258 = vrot.lane.b32.xlu1 %v1514_v32, %s1405_s18 }
  0x32   : > { %431 = vrot.lane.b32.xlu0 %v1458_v7, %s1406_s19 }
  0x33   : > { %423 = vrot.lane.b32.xlu2 %v1481_v19, %s1406_s19 }
  0x34   : > { %252 = vrot.lane.b32.xlu1 %v1523_v35, %s1405_s18 }
  0x3a   : > { %425 = vrot.lane.b32.xlu0 %v1501_v28, %s1406_s19 }
  0x3b   : > { %419 = vrot.lane.b32.xlu2 %v1514_v32, %s1406_s19 }
  0x3c   : > { %417 = vrot.lane.b32.xlu1 %v1490_v23, %s1406_s19 }
  0x42   : > { %411 = vrot.lane.b32.xlu0 %v1479_v18, %s1406_s19 }
  0x43   : > { %433 = vrot.lane.b32.xlu2 %v1453_v3, %s1406_s19 }
  0x44   : > { %413 = vrot.lane.b32.xlu1 %v1523_v35, %s1406_s19 }
  0x4a   : > { %535 = vrot.lane.b32.xlu0 %v1458_v7, %s1407_s20 }
  0x4b   : > { %427 = vrot.lane.b32.xlu2 %v1460_v8, %s1406_s19 }
  0x4c   : > { %537 = vrot.lane.b32.xlu1 %v1453_v3, %s1407_s20 }
  0x52   : > { %529 = vrot.lane.b32.xlu0 %v1501_v28, %s1407_s20 }
  0x53   : > { %421 = vrot.lane.b32.xlu2 %v1483_v20, %s1406_s19 }
  0x54   : > { %531 = vrot.lane.b32.xlu1 %v1460_v8, %s1407_s20 }
  0x5a   : > { %533 = vrot.lane.b32.xlu0 %v1466_v11, %s1407_s20 }
  0x5b   : > { %525 = vrot.lane.b32.xlu2 %v1483_v20, %s1407_s20 }
  0x5c   : > { %523 = vrot.lane.b32.xlu1 %v1514_v32, %s1407_s20 }
  0x62   : > { %415 = vrot.lane.b32.xlu0 %v1503_v29, %s1406_s19 }
  0x63   : > { %517 = vrot.lane.b32.xlu2 %v1523_v35, %s1407_s20 }
  0x64   : > { %527 = vrot.lane.b32.xlu1 %v1481_v19, %s1407_s20 }
  0x6a   : > { %519 = vrot.lane.b32.xlu0 %v1503_v29, %s1407_s20 }
  0x6b   : > { %641 = vrot.lane.b32.xlu2 %v1453_v3, %s1408_s21 }
  0x6c   : > { %521 = vrot.lane.b32.xlu1 %v1490_v23, %s1407_s20 }
  0x6d   : > { %v271_v36 = vpop.permute.xlu2 %270 }
  0x72   : > { %515 = vrot.lane.b32.xlu0 %v1479_v18, %s1407_s20 }
  0x73   : > { %637 = vrot.lane.b32.xlu2 %v1466_v11, %s1408_s21 }
  0x74   : > { %635 = vrot.lane.b32.xlu1 %v1460_v8, %s1408_s21 }
  0x75   : > { %v261_v37 = vpop.permute.xlu2 %260 }
  0x7a   : > { %639 = vrot.lane.b32.xlu0 %v1458_v7, %s1408_s21 }
  0x7b   : > { %631 = vrot.lane.b32.xlu2 %v1481_v19, %s1408_s21 }
  0x7c   : > { %629 = vrot.lane.b32.xlu1 %v1483_v20, %s1408_s21 }
  0x7d   : > { %v255_v38 = vpop.permute.xlu2 %254 }
  0x82   : > { %633 = vrot.lane.b32.xlu0 %v1501_v28, %s1408_s21 }
  0x83   : > { %625 = vrot.lane.b32.xlu2 %v1490_v23, %s1408_s21 }
  0x84   : > { %623 = vrot.lane.b32.xlu1 %v1503_v29, %s1408_s21  ;;  %v273_v39 = vpop.permute.xlu0 %272 }
  0x85   : > { %v430_v41 = vpop.permute.xlu2 %429  ;;  %331 = vmatpush.bf16.msra.mxu2 %v273_v39  ;;  %v282_v42 = vsel %vm274_vm0, %v271_v36, %v273_v39 }
  0x86   : > { %v267_v40 = vpop.permute.xlu1 %266  ;;  %317 = vmatpush.bf16.msra.mxu1 %v282_v42 }
  0x89   : > { %332 = vmatpush.bf16.msra.mxu2 %v267_v40 }
  0x8a   : > { %627 = vrot.lane.b32.xlu0 %v1514_v32, %s1408_s21 }
  0x8b   : > { %743 = vrot.lane.b32.xlu2 %v1458_v7, %s1409_s22 }
  0x8c   : > { %741 = vrot.lane.b32.xlu1 %v1466_v11, %s1409_s22  ;;  %v251_v43 = vpop.permute.xlu0 %250 }
  0x8d   : > { %v424_v45 = vpop.permute.xlu2 %423  ;;  %333 = vmatpush.bf16.msra.mxu2 %v261_v37 }
  0x8e   : > { %v269_v44 = vpop.permute.xlu1 %268 }
  0x8f   : > { %v281_v46 = vsel %vm274_vm0, %v269_v44, %v271_v36 }
  0x90   : > { %303 = vmatpush.bf16.msra.mxu0 %v281_v46 }
  0x91   : > { %334 = vmatpush.bf16.msra.mxu2 %v255_v38 }
  0x92   : > { %845 = vrot.lane.b32.xlu0 %v1466_v11, %s1410_s23 }
  0x93   : > { %619 = vrot.lane.b32.xlu2 %v1479_v18, %s1408_s21 }
  0x94   : > { %847 = vrot.lane.b32.xlu1 %v1458_v7, %s1410_s23  ;;  %v263_v47 = vpop.permute.xlu0 %262  ;;  %1282 = vmatmul.msk.bf16.vlgmr.msra.gmra.mxu2 %vm295_vm1, %v1368_v52 }
  0x95   : > { %v420_v49 = vpop.permute.xlu2 %419 }
  0x96   : > { %v265_v48 = vpop.permute.xlu1 %264 }
  0x97   : > { %v279_v50 = vsel %vm274_vm0, %v263_v47, %v265_v48  ;;  %v280_v51 = vsel %vm274_vm0, %v265_v48, %v267_v40 }
  0x98   : > { %304 = vmatpush.bf16.msra.mxu0 %v279_v50  ;;  %318 = vmatpush.bf16.msra.mxu1 %v280_v51 }
  0x9a   : > { %621 = vrot.lane.b32.xlu0 %v1523_v35, %s1408_s21 }
  0x9b   : > { %737 = vrot.lane.b32.xlu2 %v1501_v28, %s1409_s22 }
  0x9c   : > { %735 = vrot.lane.b32.xlu1 %v1481_v19, %s1409_s22  ;;  %v257_v53 = vpop.permute.xlu0 %256 }
  0x9d   : > { %v434_v55 = vpop.permute.xlu2 %433 }
  0x9e   : > { %v259_v54 = vpop.permute.xlu1 %258 }
  0x9f   : > { %v277_v56 = vsel %vm274_vm0, %v257_v53, %v259_v54  ;;  %v278_v57 = vsel %vm274_vm0, %v259_v54, %v261_v37  ;;  %v1370_v53 = vld [vmem:[%s1859_s1 + $0x18] sm:$0xff] }
  0xa0   : > { %305 = vmatpush.bf16.msra.mxu0 %v277_v56  ;;  %319 = vmatpush.bf16.msra.mxu1 %v278_v57 }
  0xa2   : > { %839 = vrot.lane.b32.xlu0 %v1481_v19, %s1410_s23 }
  0xa3   : > { %729 = vrot.lane.b32.xlu2 %v1490_v23, %s1409_s22 }
  0xa4   : > { %841 = vrot.lane.b32.xlu1 %v1501_v28, %s1410_s23  ;;  %v432_v58 = vpop.permute.xlu0 %431 }
  0xa5   : > { %v428_v59 = vpop.permute.xlu2 %427  ;;  %v442_v61 = vsel %vm435_vm2, %v430_v41, %v432_v58  ;;  %v443_v62 = vsel %vm435_vm2, %v432_v58, %v434_v55 }
  0xa6   : > { %v253_v60 = vpop.permute.xlu1 %252  ;;  %463 = vmatpush.bf16.msrb.mxu2 %v442_v61  ;;  %477 = vmatpush.bf16.msrb.mxu3 %v443_v62 }
  0xa7   : > { %v275_v63 = vsel %vm274_vm0, %v251_v43, %v253_v60  ;;  %v276_v0 = vsel %vm274_vm0, %v253_v60, %v255_v38 }
  0xa8   : > { %306 = vmatpush.bf16.msra.mxu0 %v275_v63  ;;  %320 = vmatpush.bf16.msra.mxu1 %v276_v0 }
  0xaa   : > { %731 = vrot.lane.b32.xlu0 %v1514_v32, %s1409_s22 }
  0xab   : > { %1280 = vmatmul.msk.bf16.vlgmr.msra.gmra.mxu0 %vm295_vm1, %v1368_v52  ;;  %833 = vrot.lane.b32.xlu2 %v1490_v23, %s1410_s23 }
  0xac   : > { %379 = vmatpush.bf16.msrb.mxu0 %v1458_v7  ;;  %393 = vmatpush.bf16.msrb.mxu1 %v1453_v3  ;;  %v426_v1 = vpop.permute.xlu0 %425 }
  0xad   : > { %745 = vrot.lane.b32.xlu1 %v1453_v3, %s1409_s22  ;;  %v422_v2 = vpop.permute.xlu2 %421  ;;  %v440_v5 = vsel %vm435_vm2, %v424_v45, %v426_v1  ;;  %v441_v6 = vsel %vm435_vm2, %v426_v1, %v428_v59  ;;  %1281 = vmatmul.msk.bf16.vlgmr.msra.gmra.mxu1 %vm295_vm1, %v1368_v52  ;;  %v1371_v1 = vld [vmem:[%s1859_s1 + $0x20] sm:$0xff] }
  0xae   : > { %v418_v4 = vpop.permute.xlu1 %417  ;;  %464 = vmatpush.bf16.msrb.mxu2 %v440_v5  ;;  %478 = vmatpush.bf16.msrb.mxu3 %v441_v6  ;;  %v439_v9 = vsel %vm435_vm2, %v420_v49, %v422_v2 }
  0xaf   : > { %v438_v10 = vsel %vm435_vm2, %v418_v4, %v420_v49 }
  0xb0   : > { %380 = vmatpush.bf16.msrb.mxu0 %v1501_v28  ;;  %394 = vmatpush.bf16.msrb.mxu1 %v1460_v8 }
  0xb2   : > { %479 = vmatpush.bf16.msrb.mxu3 %v439_v9  ;;  %835 = vrot.lane.b32.xlu0 %v1514_v32, %s1410_s23 }
  0xb3   : > { %725 = vrot.lane.b32.xlu2 %v1523_v35, %s1409_s22  ;;  %465 = vmatpush.bf16.msrb.mxu2 %v438_v10 }
  0xb4   : > { %381 = vmatpush.bf16.msrb.mxu0 %v1514_v32  ;;  %395 = vmatpush.bf16.msrb.mxu1 %v1483_v20  ;;  %v412_v12 = vpop.permute.xlu0 %411 }
  0xb5   : > { %723 = vrot.lane.b32.xlu1 %v1479_v18, %s1409_s22  ;;  %v1631_v13 = vpop.permute.xlu2 %525 }
  0xb6   : > { %v414_v14 = vpop.permute.xlu1 %413 }
  0xb7   : > { %v436_v15 = vsel %vm435_vm2, %v412_v12, %v414_v14 }
  0xb8   : > { %382 = vmatpush.bf16.msrb.mxu0 %v1523_v35  ;;  %396 = vmatpush.bf16.msrb.mxu1 %v1503_v29 }
  0xb9   : > { %466 = vmatpush.bf16.msrb.mxu2 %v436_v15 }
  0xba   : > { %739 = vrot.lane.b32.xlu0 %v1460_v8, %s1409_s22 }
  0xbb   : > { %1288 = vmatmul.msk.bf16.vlgmr.msrb.gmra.mxu0 %vm295_vm1, %v1367_v16  ;;  %829 = vrot.lane.b32.xlu2 %v1523_v35, %s1410_s23 }
  0xbc   : > { %491 = vmatpush.bf16.msra.mxu0 %v434_v55  ;;  %v536_v17 = vpop.permute.xlu0 %535  ;;  %1296 = vmatmul.msk.bf16.vlgmr.msrb.gmra.mxu2 %vm295_vm1, %v1369_v25 }
  0xbd   : > { %827 = vrot.lane.b32.xlu1 %v1479_v18, %s1410_s23  ;;  %v518_v21 = vpop.permute.xlu2 %517  ;;  %1289 = vmatmul.msk.bf16.vlgmr.msrb.gmra.mxu1 %vm295_vm1, %v1367_v16 }
  0xbe   : > { %v538_v22 = vpop.permute.xlu1 %537 }
  0xbf   : > { %v547_v24 = vsel %vm539_vm3, %v536_v17, %v538_v22 }
  0xc0   : > { %492 = vmatpush.bf16.msra.mxu0 %v428_v59  ;;  %581 = vmatpush.bf16.msra.mxu2 %v547_v24 }
  0xc2   : > { %733 = vrot.lane.b32.xlu0 %v1483_v20, %s1409_s22 }
  0xc3   : > { %951 = vrot.lane.b32.xlu2 %v1458_v7, %s1411_s30 }
  0xc4   : > { %493 = vmatpush.bf16.msra.mxu0 %v422_v2  ;;  %v530_v26 = vpop.permute.xlu0 %529 }
  0xc5   : > { %849 = vrot.lane.b32.xlu1 %v1453_v3, %s1410_s23  ;;  %v1658_v27 = vpop.permute.xlu2 %641 }
  0xc6   : > { %v532_v30 = vpop.permute.xlu1 %531 }
  0xc7   : > { %v545_v31 = vsel %vm539_vm3, %v530_v26, %v532_v30 }
  0xc8   : > { %582 = vmatpush.bf16.msra.mxu2 %v545_v31 }
  0xca   : > { %953 = vrot.lane.b32.xlu0 %v1453_v3, %s1411_s30 }
  0xcb   : > { %843 = vrot.lane.b32.xlu2 %v1460_v8, %s1410_s23 }
  0xcc   : > { %v534_v33 = vpop.permute.xlu0 %533 }
  0xcd   : > { %727 = vrot.lane.b32.xlu1 %v1503_v29, %s1409_s22  ;;  %v546_v34 = vsel %vm539_vm3, %v534_v33, %v536_v17  ;;  %v638_v36 = vpop.permute.xlu2 %637 }
  0xce   : > { %v524_v37 = vpop.permute.xlu1 %523  ;;  %567 = vmatpush.bf16.msra.mxu1 %v546_v34  ;;  %v1373_v34 = vld [vmem:[%s1859_s1 + $0x30] sm:$0xff] }
  0xcf   : > { %v543_v38 = vsel %vm539_vm3, %v524_v37, %v1631_v13 }
  0xd0   : > { %583 = vmatpush.bf16.msra.mxu2 %v543_v38 }
  0xd2   : > { %945 = vrot.lane.b32.xlu0 %v1501_v28, %s1411_s30 }
  0xd3   : > { %837 = vrot.lane.b32.xlu2 %v1483_v20, %s1410_s23 }
  0xd4   : > { %v416_v39 = vpop.permute.xlu0 %415 }
  0xd5   : > { %947 = vrot.lane.b32.xlu1 %v1460_v8, %s1411_s30  ;;  %v632_v40 = vpop.permute.xlu2 %631  ;;  %494 = vmatpush.bf16.msra.mxu0 %v416_v39  ;;  %v437_v42 = vsel %vm435_vm2, %v414_v14, %v416_v39 }
  0xd6   : > { %v528_v41 = vpop.permute.xlu1 %527  ;;  %480 = vmatpush.bf16.msrb.mxu3 %v437_v42 }
  0xd7   : > { %v544_v43 = vsel %vm539_vm3, %v528_v41, %v530_v26  ;;  %v1372_v26 = vld [vmem:[%s1859_s1 + $0x28] sm:$0xff] }
  0xd8   : > { %568 = vmatpush.bf16.msra.mxu1 %v544_v43  ;;  %1298 = vmatmul.msk.bf16.vlgmr.msra.gmra.mxu0 %vm295_vm1, %v1369_v25 }
  0xd9   : > { %1297 = vmatmul.msk.bf16.vlgmr.msrb.gmra.mxu3 %vm295_vm1, %v1369_v25 }
  0xda   : > { %595 = vmatpush.bf16.msra.mxu3 %v538_v22  ;;  %949 = vrot.lane.b32.xlu0 %v1466_v11, %s1411_s30 }
  0xdb   : > { %941 = vrot.lane.b32.xlu2 %v1483_v20, %s1411_s30 }
  0xdc   : > { %v520_v44 = vpop.permute.xlu0 %519 }
  0xdd   : > { %939 = vrot.lane.b32.xlu1 %v1514_v32, %s1411_s30  ;;  %v626_v45 = vpop.permute.xlu2 %625  ;;  %v541_v47 = vsel %vm539_vm3, %v518_v21, %v520_v44 }
  0xde   : > { %596 = vmatpush.bf16.msra.mxu3 %v532_v30  ;;  %v522_v46 = vpop.permute.xlu1 %521  ;;  %584 = vmatpush.bf16.msra.mxu2 %v541_v47 }
  0xdf   : > { %v542_v48 = vsel %vm539_vm3, %v522_v46, %v524_v37 }
  0xe0   : > { %569 = vmatpush.bf16.msra.mxu1 %v542_v48 }
  0xe1   : > { %1306 = vmatmul.msk.bf16.vlgmr.msra.gmra.mxu2 %vm295_vm1, %v1370_v53 }
  0xe2   : > { %597 = vmatpush.bf16.msra.mxu3 %v1631_v13  ;;  %699 = vmatpush.bf16.msrb.mxu2 %v1658_v27 }
  0xe3   : > { %831 = vrot.lane.b32.xlu0 %v1503_v29, %s1410_s23  ;;  %933 = vrot.lane.b32.xlu2 %v1523_v35, %s1411_s30  ;;  %s1377_s23 = smul.u32 24, %s1863_s13 }
  0xe4   : > { %v516_v49 = vpop.permute.xlu0 %515 }
  0xe5   : > { %943 = vrot.lane.b32.xlu1 %v1481_v19, %s1411_s30  ;;  %v1696_v50 = vpop.permute.xlu2 %743  ;;  %v540_v52 = vsel %vm539_vm3, %v516_v49, %v518_v21  ;;  %s1846_s26 = scalar_lea.vmem %s1861_s3, %s1377_s23 }
  0xe6   : > { %598 = vmatpush.bf16.msra.mxu3 %v520_v44  ;;  %v636_v51 = vpop.permute.xlu1 %635  ;;  %570 = vmatpush.bf16.msra.mxu1 %v540_v52 }
  0xe7   : > { %700 = vmatpush.bf16.msrb.mxu2 %v636_v51 }
  0xe9   : > { %1305 = vmatmul.msk.bf16.vlgmr.msra.gmra.mxu1 %vm295_vm1, %v1370_v53  ;;  %1307 = vmatmul.msk.bf16.vlgmr.msra.gmra.mxu3 %vm295_vm1, %v1370_v53 }
  0xeb   : > { %935 = vrot.lane.b32.xlu0 %v1503_v29, %s1411_s30  ;;  %1057 = vrot.lane.b32.xlu2 %v1453_v3, %s1412_s6 }
  0xec   : > { %v640_v54 = vpop.permute.xlu0 %639 }
  0xed   : > { %937 = vrot.lane.b32.xlu1 %v1490_v23, %s1411_s30  ;;  %v650_v55 = vsel %vm643_vm4, %v638_v36, %v640_v54  ;;  %v651_v56 = vsel %vm643_vm4, %v640_v54, %v1658_v27  ;;  %v620_v57 = vpop.permute.xlu2 %619 }
  0xee   : > { %v630_v58 = vpop.permute.xlu1 %629  ;;  %671 = vmatpush.bf16.msrb.mxu0 %v650_v55  ;;  %685 = vmatpush.bf16.msrb.mxu1 %v651_v56 }
  0xef   : > { %701 = vmatpush.bf16.msrb.mxu2 %v630_v58 }
  0xf3   : > { %931 = vrot.lane.b32.xlu0 %v1479_v18, %s1411_s30  ;;  %1053 = vrot.lane.b32.xlu2 %v1466_v11, %s1412_s6 }
  0xf4   : > { %v634_v59 = vpop.permute.xlu0 %633 }
  0xf5   : > { %1051 = vrot.lane.b32.xlu1 %v1460_v8, %s1412_s6  ;;  %v1720_v3 = vpop.permute.xlu2 %737  ;;  %v648_v61 = vsel %vm643_vm4, %v632_v40, %v634_v59  ;;  %v649_v62 = vsel %vm643_vm4, %v634_v59, %v636_v51 }
  0xf6   : > { %v624_v60 = vpop.permute.xlu1 %623  ;;  %672 = vmatpush.bf16.msrb.mxu0 %v648_v61  ;;  %686 = vmatpush.bf16.msrb.mxu1 %v649_v62 }
  0xf7   : > { %702 = vmatpush.bf16.msrb.mxu2 %v624_v60 }
  0xfa   : > { %1316 = vmatmul.msk.bf16.vlgmr.msrb.gmra.mxu2 %vm295_vm1, %v1371_v1 }
  0xfb   : > { %1055 = vrot.lane.b32.xlu0 %v1458_v7, %s1412_s6  ;;  %1047 = vrot.lane.b32.xlu2 %v1481_v19, %s1412_s6 }
  0xfc   : > { %v628_v8 = vpop.permute.xlu0 %627 }
  0xfd   : > { %1045 = vrot.lane.b32.xlu1 %v1483_v20, %s1412_s6  ;;  %v646_v63 = vsel %vm643_vm4, %v626_v45, %v628_v8  ;;  %v647_v0 = vsel %vm643_vm4, %v628_v8, %v630_v58  ;;  %v730_v2 = vpop.permute.xlu2 %729 }
  0xfe   : > { %v742_v11 = vpop.permute.xlu1 %741  ;;  %673 = vmatpush.bf16.msrb.mxu0 %v646_v63  ;;  %687 = vmatpush.bf16.msrb.mxu1 %v647_v0  ;;  %v370_v63 = vpop.f32.mrf.mxu3 }
  0xff   : > { %v754_v7 = vsel %vm747_vm5, %v742_v11, %v1696_v50 }
 0x100   : > { %775 = vmatpush.bf16.msrb.mxu3 %v754_v7 }
 0x103   : > { %1049 = vrot.lane.b32.xlu0 %v1501_v28, %s1412_s6  ;;  %1041 = vrot.lane.b32.xlu2 %v1490_v23, %s1412_s6 }
 0x104   : > { %v846_v19 = vpop.permute.xlu0 %845 }
 0x105   : > { %1039 = vrot.lane.b32.xlu1 %v1503_v29, %s1412_s6  ;;  %v834_v5 = vpop.permute.xlu2 %833 }
 0x106   : > { %v848_v20 = vpop.permute.xlu1 %847 }
 0x107   : > { %v858_v4 = vsel %vm851_vm6, %v846_v19, %v848_v20  ;;  %v1374_v19 = vld [vmem:[%s1859_s1 + $0x38] sm:$0xff] }
 0x108   : > { %879 = vmatpush.bf16.msra.mxu2 %v858_v4 }
 0x10b   : > { %1043 = vrot.lane.b32.xlu0 %v1514_v32, %s1412_s6  ;;  %1037 = vrot.lane.b32.xlu2 %v1523_v35, %s1412_s6 }
 0x10c   : > { %v622_v28 = vpop.permute.xlu0 %621 }
 0x10d   : > { %1035 = vrot.lane.b32.xlu1 %v1479_v18, %s1412_s6  ;;  %v644_v6 = vsel %vm643_vm4, %v620_v57, %v622_v28  ;;  %v645_v23 = vsel %vm643_vm4, %v622_v28, %v624_v60  ;;  %v726_v18 = vpop.permute.xlu2 %725 }
 0x10e   : > { %v736_v29 = vpop.permute.xlu1 %735  ;;  %674 = vmatpush.bf16.msrb.mxu0 %v644_v6  ;;  %688 = vmatpush.bf16.msrb.mxu1 %v645_v23  ;;  %v372_v23 = vpop.f32.mrf.mxu3 }
 0x10f   : > { %v752_v9 = vsel %vm747_vm5, %v736_v29, %v1720_v3 }
 0x110   : > { %776 = vmatpush.bf16.msrb.mxu3 %v752_v9 }
 0x111   : > { %1314 = vmatmul.msk.bf16.vlgmr.msrb.gmra.mxu0 %vm295_vm1, %v1371_v1  ;;  %1315 = vmatmul.msk.bf16.vlgmr.msrb.gmra.mxu1 %vm295_vm1, %v1371_v1 }
 0x114   : > { %v840_v32 = vpop.permute.xlu0 %839 }
 0x115   : > { %v1758_v12 = vpop.permute.xlu2 %829 }
 0x116   : > { %v842_v10 = vpop.permute.xlu1 %841 }
 0x117   : > { %v856_v35 = vsel %vm851_vm6, %v840_v32, %v842_v10  ;;  %v1788_v58 = vpop.f32.mrf.mxu2 }
 0x118   : > { %880 = vmatpush.bf16.msra.mxu2 %v856_v35 }
 0x11c   : > { %v732_v13 = vpop.permute.xlu0 %731 }
 0x11d   : > { %v750_v15 = vsel %vm747_vm5, %v730_v2, %v732_v13  ;;  %v952_v24 = vpop.permute.xlu2 %951 }
 0x11e   : > { %777 = vmatpush.bf16.msrb.mxu3 %v750_v15 }
 0x11f   : > { %v746_v14 = vpop.permute.xlu1 %745  ;;  %v1795_v11 = vpop.f32.mrf.mxu2 }
 0x120   : > { %v755_v16 = vsel %vm747_vm5, %v1696_v50, %v746_v14  ;;  %803 = vmatpush.bf16.msra.mxu1 %v746_v14  ;;  %v1413_v14 = vmov 0  }
 0x121   : > { %789 = vmatpush.bf16.msra.mxu0 %v755_v16  ;;  %1395 = vset.pattern.permute.xlu0 %v1413_v14 }
 0x122   : > { %1396 = vset.pattern.permute.xlu1 %v1413_v14 }
 0x124   : > { %v836_v17 = vpop.permute.xlu0 %835 }
 0x125   : > { %v854_v22 = vsel %vm851_vm6, %v834_v5, %v836_v17  ;;  %v844_v36 = vpop.permute.xlu2 %843 }
 0x126   : > { %881 = vmatpush.bf16.msra.mxu2 %v854_v22  ;;  %v857_v42 = vsel %vm851_vm6, %v842_v10, %v844_v36 }
 0x127   : > { %v724_v21 = vpop.permute.xlu1 %723 }
 0x128   : > { %v748_v25 = vsel %vm747_vm5, %v724_v21, %v726_v18  ;;  %v308_v57 = vpop.f32.mrf.mxu0 }
 0x129   : > { %778 = vmatpush.bf16.msrb.mxu3 %v748_v25  ;;  %v371_v0 = vadd.f32 %v370_v63, %v308_v57 }
 0x12a   : > { %v322_v4 = vpop.f32.mrf.mxu1 }
 0x12c   : > { %1323 = vmatmul.msk.bf16.vlgmr.msrb.gmra.mxu3 %vm295_vm1, %v1372_v26  ;;  %v740_v27 = vpop.permute.xlu0 %739 }
 0x12d   : > { %804 = vmatpush.bf16.msra.mxu1 %v740_v27  ;;  %v753_v31 = vsel %vm747_vm5, %v1720_v3, %v740_v27  ;;  %v838_v41 = vpop.permute.xlu2 %837 }
 0x12e   : > { %790 = vmatpush.bf16.msra.mxu0 %v753_v31  ;;  %v855_v47 = vsel %vm851_vm6, %v836_v17, %v838_v41 }
 0x12f   : > { %v828_v30 = vpop.permute.xlu1 %827 }
 0x130   : > { %v852_v33 = vsel %vm851_vm6, %v828_v30, %v1758_v12  ;;  %v310_v8 = vpop.f32.mrf.mxu0 }
 0x131   : > { %882 = vmatpush.bf16.msra.mxu2 %v852_v33 }
 0x132   : > { %v324_v15 = vpop.f32.mrf.mxu1 }
 0x134   : > { %1332 = vmatmul.msk.bf16.vlgmr.msra.gmra.mxu2 %vm295_vm1, %v1373_v34  ;;  %v734_v37 = vpop.permute.xlu0 %733 }
 0x135   : > { %805 = vmatpush.bf16.msra.mxu1 %v734_v37  ;;  %v751_v39 = vsel %vm747_vm5, %v732_v13, %v734_v37  ;;  %v942_v48 = vpop.permute.xlu2 %941  ;;  %v1132_v13 = vld [vmem:[%s1860_s2 + $0x8] sm:$0xff] }
 0x136   : > { %791 = vmatpush.bf16.msra.mxu0 %v751_v39  ;;  %1140 = vperm.xlu1 %1396, %v1132_v13  }
 0x137   : > { %v850_v38 = vpop.permute.xlu1 %849 }
 0x138   : > { %v859_v40 = vsel %vm851_vm6, %v848_v20, %v850_v38  ;;  %v384_v28 = vpop.f32.mrf.mxu0 }
 0x139   : > { %893 = vmatpush.bf16.msra.mxu3 %v859_v40  ;;  %v1803_v29 = vadd.f32 %v384_v28, %v322_v4 }
 0x13c   : > { %v954_v43 = vpop.permute.xlu0 %953 }
 0x13d   : > { %894 = vmatpush.bf16.msra.mxu3 %v857_v42  ;;  %v963_v44 = vsel %vm955_vm7, %v952_v24, %v954_v43  ;;  %v934_v53 = vpop.permute.xlu2 %933 }
 0x13e   : > { %997 = vmatpush.bf16.msrb.mxu2 %v963_v44 }
 0x13f   : > { %v728_v45 = vpop.permute.xlu1 %727  ;;  %v468_v6 = vpop.f32.mrf.mxu2 }
 0x140   : > { %806 = vmatpush.bf16.msra.mxu1 %v728_v45  ;;  %v749_v46 = vsel %vm747_vm5, %v726_v18, %v728_v45  ;;  %v1805_v9 = vadd.f32 %v468_v6, %v371_v0  ;;  %v373_v18 = vadd.f32 %v372_v23, %v310_v8  ;;  %v386_v16 = vpop.f32.mrf.mxu0 }
 0x141   : > { %792 = vmatpush.bf16.msra.mxu0 %v749_v46  ;;  %895 = vmatpush.bf16.msra.mxu3 %v855_v47  ;;  %v1816_v21 = vadd.f32 %v386_v16, %v324_v15  ;;  %v398_v46 = vpop.f32.mrf.mxu1 }
 0x142   : > { %v399_v28 = vadd.f32 %v398_v46, %v1788_v58 }
 0x143   : > { %1325 = vmatmul.msk.bf16.vlgmr.msra.gmra.mxu1 %vm295_vm1, %v1372_v26 }
 0x144   : > { %1324 = vmatmul.msk.bf16.vlgmr.msra.gmra.mxu0 %vm295_vm1, %v1372_v26  ;;  %v946_v49 = vpop.permute.xlu0 %945 }
 0x145   : > { %907 = vmatpush.bf16.msrb.mxu0 %v850_v38  ;;  %v1058_v62 = vpop.permute.xlu2 %1057  ;;  %v1375_v38 = vld [vmem:[%s1859_s1 + $0x40] sm:$0xff] }
 0x147   : > { %v948_v50 = vpop.permute.xlu1 %947  ;;  %v470_v22 = vpop.f32.mrf.mxu2 }
 0x148   : > { %v961_v51 = vsel %vm955_vm7, %v946_v49, %v948_v50 }
 0x149   : > { %908 = vmatpush.bf16.msrb.mxu0 %v844_v36  ;;  %998 = vmatpush.bf16.msrb.mxu2 %v961_v51 }
 0x14c   : > { %v950_v52 = vpop.permute.xlu0 %949 }
 0x14d   : > { %909 = vmatpush.bf16.msrb.mxu0 %v838_v41  ;;  %v962_v54 = vsel %vm955_vm7, %v950_v52, %v952_v24  ;;  %v1054_v5 = vpop.permute.xlu2 %1053  ;;  %v1818_v24 = vadd.f32 %v470_v22, %v373_v18 }
 0x14e   : > { %983 = vmatpush.bf16.msrb.mxu1 %v962_v54 }
 0x14f   : > { %v940_v55 = vpop.permute.xlu1 %939 }
 0x150   : > { %v959_v56 = vsel %vm955_vm7, %v940_v55, %v942_v48 }
 0x151   : > { %999 = vmatpush.bf16.msrb.mxu2 %v959_v56 }
 0x155   : > { %v832_v59 = vpop.permute.xlu0 %831  ;;  %v1048_v17 = vpop.permute.xlu2 %1047 }
 0x156   : > { %910 = vmatpush.bf16.msrb.mxu0 %v832_v59  ;;  %v853_v60 = vsel %vm851_vm6, %v1758_v12, %v832_v59  ;;  %v1131_v12 = vld [vmem:[%s1860_s2] sm:$0xff]  ;;  %v496_v51 = vpop.f32.mrf.mxu0 }
 0x157   : > { %v944_v3 = vpop.permute.xlu1 %943  ;;  %896 = vmatpush.bf16.msra.mxu3 %v853_v60  ;;  %1135 = vperm.xlu0 %1395, %v1131_v12   ;;  %v503_v18 = vadd.f32 %v496_v51, %v399_v28 }
 0x158   : > { %v960_v61 = vsel %vm955_vm7, %v944_v3, %v946_v49 }
 0x159   : > { %984 = vmatpush.bf16.msrb.mxu1 %v960_v61  ;;  %1334 = vmatmul.msk.bf16.vlgmr.msrb.gmra.mxu0 %vm295_vm1, %v1373_v34 }
 0x15a   : > { %1333 = vmatmul.msk.bf16.vlgmr.msra.gmra.mxu3 %vm295_vm1, %v1373_v34 }
 0x15b   : > { %1011 = vmatpush.bf16.msrb.mxu3 %v954_v43 }
 0x15c   : > { %v482_v47 = vpop.f32.mrf.mxu3 }
 0x15d   : > { %v936_v1 = vpop.permute.xlu0 %935  ;;  %v1042_v31 = vpop.permute.xlu2 %1041  ;;  %v502_v13 = vadd.f32 %v482_v47, %v1803_v29 }
 0x15e   : > { %v957_v7 = vsel %vm955_vm7, %v934_v53, %v936_v1 }
 0x15f   : > { %1012 = vmatpush.bf16.msrb.mxu3 %v948_v50  ;;  %v938_v2 = vpop.permute.xlu1 %937  ;;  %1000 = vmatpush.bf16.msrb.mxu2 %v957_v7 }
 0x160   : > { %v958_v20 = vsel %vm955_vm7, %v938_v2, %v940_v55  ;;  %v498_v55 = vpop.f32.mrf.mxu0 }
 0x161   : > { %985 = vmatpush.bf16.msrb.mxu1 %v958_v20 }
 0x162   : > { %1342 = vmatmul.msk.bf16.vlgmr.msrb.gmra.mxu2 %vm295_vm1, %v1374_v19 }
 0x163   : > { %1013 = vmatpush.bf16.msrb.mxu3 %v942_v48  ;;  %1115 = vmatpush.bf16.msra.mxu2 %v1058_v62  ;;  %v400_v48 = vpop.f32.mrf.mxu1 }
 0x164   : > { %v586_v49 = vpop.f32.mrf.mxu2  ;;  %v484_v50 = vpop.f32.mrf.mxu3 }
 0x165   : > { %v932_v32 = vpop.permute.xlu0 %931  ;;  %v1038_v43 = vpop.permute.xlu2 %1037 }
 0x166   : > { %v956_v35 = vsel %vm955_vm7, %v932_v32, %v934_v53 }
 0x167   : > { %1014 = vmatpush.bf16.msrb.mxu3 %v936_v1  ;;  %v1052_v10 = vpop.permute.xlu1 %1051  ;;  %986 = vmatpush.bf16.msrb.mxu1 %v956_v35  ;;  %v401_v35 = vadd.f32 %v400_v48, %v1795_v11 }
 0x168   : > { %1116 = vmatpush.bf16.msra.mxu2 %v1052_v10 }
 0x169   : > { %v506_v15 = vadd.f32 %v498_v55, %v401_v35 }
 0x16a   : > { %1341 = vmatmul.msk.bf16.vlgmr.msrb.gmra.mxu1 %vm295_vm1, %v1374_v19  ;;  %1343 = vmatmul.msk.bf16.vlgmr.msrb.gmra.mxu3 %vm295_vm1, %v1374_v19 }
 0x16b   : > { %v572_v52 = vpop.f32.mrf.mxu1 }
 0x16c   : > { %v588_v53 = vpop.f32.mrf.mxu2  ;;  %v600_v54 = vpop.f32.mrf.mxu3  ;;  %v605_v22 = vadd.f32 %v572_v52, %v1805_v9 }
 0x16d   : > { %v1056_v25 = vpop.permute.xlu0 %1055  ;;  %v607_v12 = vadd.f32 %v600_v54, %v503_v18 }
 0x16e   : > { %v1066_v26 = vsel %vm1059_vm8, %v1054_v5, %v1056_v25  ;;  %v1067_v27 = vsel %vm1059_vm8, %v1056_v25, %v1058_v62  ;;  %v606_v25 = vadd.f32 %v586_v49, %v502_v13 }
 0x16f   : > { %v1046_v30 = vpop.permute.xlu1 %1045  ;;  %1087 = vmatpush.bf16.msra.mxu0 %v1066_v26  ;;  %1101 = vmatpush.bf16.msra.mxu1 %v1067_v27 }
 0x170   : > { %1117 = vmatpush.bf16.msra.mxu2 %v1046_v30 }
 0x173   : > { %v574_v56 = vpop.f32.mrf.mxu1 }
 0x174   : > { %v602_v59 = vpop.f32.mrf.mxu3  ;;  %v608_v9 = vadd.f32 %v574_v56, %v1818_v24 }
 0x175   : > { %v1050_v33 = vpop.permute.xlu0 %1049  ;;  %v610_v27 = vadd.f32 %v602_v59, %v506_v15 }
 0x176   : > { %v1064_v36 = vsel %vm1059_vm8, %v1048_v17, %v1050_v33  ;;  %v1065_v37 = vsel %vm1059_vm8, %v1050_v33, %v1052_v10 }
 0x177   : > { %v1040_v34 = vpop.permute.xlu1 %1039  ;;  %1088 = vmatpush.bf16.msra.mxu0 %v1064_v36  ;;  %1102 = vmatpush.bf16.msra.mxu1 %v1065_v37 }
 0x178   : > { %1118 = vmatpush.bf16.msra.mxu2 %v1040_v34  ;;  %v1061_v45 = vsel %vm1059_vm8, %v1038_v43, %v1040_v34 }
 0x17b   : > { %1352 = vmatmul.msk.bf16.vlgmr.msra.gmra.mxu2 %vm295_vm1, %v1375_v38 }
 0x17d   : > { %v1044_v39 = vpop.permute.xlu0 %1043  ;;  %v704_v57 = vpop.f32.mrf.mxu2 }
 0x17e   : > { %v1062_v40 = vsel %vm1059_vm8, %v1042_v31, %v1044_v39  ;;  %v1063_v41 = vsel %vm1059_vm8, %v1044_v39, %v1046_v30  ;;  %v711_v16 = vadd.f32 %v704_v57, %v607_v12  ;;  %v505_v30 = vadd.f32 %v484_v50, %v1816_v21 }
 0x17f   : > { %v1036_v42 = vpop.permute.xlu1 %1035  ;;  %1089 = vmatpush.bf16.msra.mxu0 %v1062_v40  ;;  %1103 = vmatpush.bf16.msra.mxu1 %v1063_v41 }
 0x180   : > { %v1060_v44 = vsel %vm1059_vm8, %v1036_v42, %v1038_v43  ;;  %v609_v42 = vadd.f32 %v588_v53, %v505_v30 }
 0x183   : > { %1090 = vmatpush.bf16.msra.mxu0 %v1060_v44  ;;  %1104 = vmatpush.bf16.msra.mxu1 %v1061_v45 }
 0x185   : > { %v706_v61 = vpop.f32.mrf.mxu2 }
 0x186   : > { %1350 = vmatmul.msk.bf16.vlgmr.msra.gmra.mxu0 %vm295_vm1, %v1375_v38  ;;  %1351 = vmatmul.msk.bf16.vlgmr.msra.gmra.mxu1 %vm295_vm1, %v1375_v38  ;;  %v714_v38 = vadd.f32 %v706_v61, %v610_v27 }
 0x18e   : > { %v676_v3 = vpop.f32.mrf.mxu0  ;;  %v690_v60 = vpop.f32.mrf.mxu1 }
 0x18f   : > { %v709_v34 = vadd.f32 %v676_v3, %v605_v22  ;;  %v710_v11 = vadd.f32 %v690_v60, %v606_v25 }
 0x196   : > { %v678_v8 = vpop.f32.mrf.mxu0  ;;  %v692_v63 = vpop.f32.mrf.mxu1 }
 0x197   : > { %v712_v51 = vadd.f32 %v678_v8, %v608_v9  ;;  %v713_v52 = vadd.f32 %v692_v63, %v609_v42 }
 0x1a8   : > { %v1141_v60 = vpop.permute.xlu1 %1140 }
 0x1af   : > { %v780_v62 = vpop.f32.mrf.mxu3 }
 0x1b0   : > { %v813_v39 = vadd.f32 %v780_v62, %v709_v34 }
 0x1b7   : > { %v884_v0 = vpop.f32.mrf.mxu2  ;;  %v782_v1 = vpop.f32.mrf.mxu3 }
 0x1b8   : > { %v917_v43 = vadd.f32 %v884_v0, %v813_v39  ;;  %v816_v59 = vadd.f32 %v782_v1, %v712_v51 }
 0x1bf   : > { %v1834_v19 = vpop.f32.mrf.mxu2 }
 0x1c0   : > { %v808_v2 = vpop.f32.mrf.mxu1  ;;  %v920_v0 = vadd.f32 %v1834_v19, %v816_v59 }
 0x1c1   : > { %v794_v7 = vpop.f32.mrf.mxu0  ;;  %v815_v26 = vadd.f32 %v808_v2, %v711_v16 }
 0x1c2   : > { %v814_v40 = vadd.f32 %v794_v7, %v710_v11 }
 0x1c8   : > { %v810_v4 = vpop.f32.mrf.mxu1 }
 0x1c9   : > { %v796_v5 = vpop.f32.mrf.mxu0  ;;  %v1136_v29 = vpop.permute.xlu0 %1135  ;;  %v818_v44 = vadd.f32 %v810_v4, %v714_v38 }
 0x1ca   : > { %v817_v61 = vadd.f32 %v796_v5, %v713_v52 }
 0x1d6   : > { %v912_v32 = vpop.f32.mrf.mxu0 }
 0x1d7   : > { %v919_v58 = vadd.f32 %v912_v32, %v815_v26 }
 0x1dd   : > { %v898_v20 = vpop.f32.mrf.mxu3 }
 0x1de   : > { %v914_v31 = vpop.f32.mrf.mxu0  ;;  %v918_v45 = vadd.f32 %v898_v20, %v814_v40 }
 0x1df   : > { %v922_v47 = vadd.f32 %v914_v31, %v818_v44 }
 0x1e5   : > { %v1002_v6 = vpop.f32.mrf.mxu2  ;;  %v900_v23 = vpop.f32.mrf.mxu3 }
 0x1e6   : > { %v1022_v48 = vadd.f32 %v1002_v6, %v918_v45  ;;  %v921_v2 = vadd.f32 %v900_v23, %v817_v61 }
 0x1e7   : > { %v988_v10 = vpop.f32.mrf.mxu1 }
 0x1e8   : > { %v1021_v49 = vadd.f32 %v988_v10, %v917_v43 }
 0x1ed   : > { %v1004_v14 = vpop.f32.mrf.mxu2  ;;  %v1016_v17 = vpop.f32.mrf.mxu3 }
 0x1ee   : > { %v1023_v36 = vadd.f32 %v1016_v17, %v919_v58  ;;  %v1025_v28 = vadd.f32 %v1004_v14, %v921_v2 }
 0x1ef   : > { %v990_v33 = vpop.f32.mrf.mxu1 }
 0x1f0   : > { %v1024_v6 = vadd.f32 %v990_v33, %v920_v0 }
 0x1f5   : > { %v1018_v21 = vpop.f32.mrf.mxu3 }
 0x1f6   : > { %v1026_v54 = vadd.f32 %v1018_v21, %v922_v47 }
 0x1fe   : > { %v1120_v37 = vpop.f32.mrf.mxu2 }
 0x1ff   : > { %v1127_v41 = vadd.f32 %v1120_v37, %v1023_v36 }
 0x201   : > { %v1145_v46 = vadd.f32 %v1136_v29, %v1127_v41 }
 0x203   : > { %v1151_v50 = vmax.f32 %v1145_v46, 0.0  ;;  %v1092_v24 = vpop.f32.mrf.mxu0  ;;  %v1106_v53 = vpop.f32.mrf.mxu1 }
 0x204   : > { %v1125_v56 = vadd.f32 %v1092_v24, %v1021_v49  ;;  %v1126_v57 = vadd.f32 %v1106_v53, %v1022_v48 }
 0x205   : > { %v1156_v55 = vpack.c.bf16 %v1151_v50, %v1151_v50 }
 0x206   : > { %v1122_v3 = vpop.f32.mrf.mxu2  ;;  %v1143_v62 = vadd.f32 %v1136_v29, %v1125_v56  ;;  %v1144_v8 = vadd.f32 %v1136_v29, %v1126_v57 }
 0x207   : > { %1161 = vst.msk [vmem:[%s1846_s26 + $0x8] sm:$0xf] %vm1160_vm9, %v1156_v55  ;;  %v1130_v63 = vadd.f32 %v1122_v3, %v1026_v54 }
 0x208   : > { %v1149_v7 = vmax.f32 %v1143_v62, 0.0  ;;  %v1150_v20 = vmax.f32 %v1144_v8, 0.0 }
 0x209   : > { %v1148_v4 = vadd.f32 %v1141_v60, %v1130_v63 }
 0x20a   : > { %v1155_v1 = vpack.c.bf16 %v1150_v20, %v1149_v7 }
 0x20b   : > { %v1154_v18 = vmax.f32 %v1148_v4, 0.0  ;;  %v1094_v32 = vpop.f32.mrf.mxu0  ;;  %v1108_v5 = vpop.f32.mrf.mxu1 }
 0x20c   : > { %1159 = vst [vmem:[%s1846_s26] sm:$0xff] %v1155_v1  ;;  %v1128_v35 = vadd.f32 %v1094_v32, %v1024_v6  ;;  %v1129_v12 = vadd.f32 %v1108_v5, %v1025_v28 }
 0x20d   : > { %v1158_v10 = vpack.c.bf16 %v1154_v18, %v1154_v18 }
 0x20e   : > { %v1146_v13 = vadd.f32 %v1141_v60, %v1128_v35  ;;  %v1147_v15 = vadd.f32 %v1141_v60, %v1129_v12 }
 0x20f   : > { %1163 = vst.msk [vmem:[%s1846_s26 + $0x14] sm:$0xf] %vm1160_vm9, %v1158_v10 }
 0x210   : > { %v1152_v19 = vmax.f32 %v1146_v13, 0.0  ;;  %v1153_v23 = vmax.f32 %v1147_v15, 0.0 }
 0x212   : > { %v1157_v16 = vpack.c.bf16 %v1153_v23, %v1152_v19 }
 0x214   : > { %1162 = vst [vmem:[%s1846_s26 + $0xc] sm:$0xff] %v1157_v16 }
 0x215 PF: > { %s13_s12 = sadd.s32 1, %s1403_s12  }
 0x216   : > { %p10_p4 = scmp.ge.s32.totalorder %s13_s12, 4  }
 0x218   :  { %12 = sbr.rel (!%p10_p4) target bundleno = 1 (0x1), region = 70 }

// kernel: skip_fcn_cct_forward.33
= control target key start
LH: loop header
LB: loop body
LE: loop exit
PB: predicated region body
PF: predicated region fallthrough
CT: control target
= control target key end

     0   :  { %s481_s14 = smov 0   ;;  %s522_s0 = inlined_call_operand.vmem [shape: bf16[2,1,8,1024], index: 0, kind: input, shape index: {}]   ;;  %s523_s1 = inlined_call_operand.vmem [shape: bf16[1,1,8], index: 1, kind: input, shape index: {}]   ;;  %s524_s2 = inlined_call_operand.<no memory space> [shape: f32[1,1], index: 2, kind: input, shape index: {}]   ;;  %s525_s3 = inlined_call_operand.vmem [shape: f32[2,1,1024], index: 3, kind: output, shape index: {}]  }
   0x1   :  { %v8_v0 = vstv %s524_s2 }
   0x2   :  { %9 = vst [vmem:[#allocation2] sm:$0x1] %v8_v0 }
   0x3 LB: > { %s420_s15 = sadd.s32 4294967295, %s455_s14   ;;  %p424_p0 = scmp.ge.s32.totalorder %s455_s14, 1  ;;  %s455_s14 = sphi %s481_s14, %s15_s14  }
   0x4   : > { %p139_p1 = scmp.lt.s32.totalorder %s455_s14, 3 }
   0x6   : > { %p140_p2 = pnand %p424_p0, %p139_p1 }
   0x7   : > { %p162_p3 = scmp.lt.s32.totalorder (!%p140_p2), %s420_s15, 1 }
   0x8   : > { %143 = sbr.rel (%p140_p2) target bundleno = 182 (0xb6), region = 32 }
   0xd   : > { %v457_v1 = vmov 0   ;;  %v177_v2 = vld [vmem:[#allocation2] sm:$0x1]  ;;  %s527_s15 = smov (!%p162_p3, %s420_s15), 1  ;;  %vm208_vm0 = vcmask 1043456   ;;  %vm204_vm1 = vcmask 64512  }
   0xe   : > { %448 = vset.pattern.permute.xlu0 %v457_v1  ;;  %s438_s2 = sshll.u32 %s527_s15, 5  ;;  %v176_v27 = vld [vmem:[%s523_s1] sm:$0x1]  ;;  %vm354_vm2 = vcmask 1042434   ;;  %vm358_vm3 = vcmask 1044484   ;;  %s427_s21 = sshll.u32 %s527_s15, 3 }
   0xf   : > { %180 = vperm.xlu0 %448, %v177_v2   ;;  %s166_s18 = scalar_lea.vmem %s522_s0, %s438_s2  ;;  %vm352_vm4 = vcmask 1040384   ;;  %vm356_vm5 = vcmask 1041408   ;;  %vm360_vm6 = vcmask 1046534   ;;  %vm362_vm7 = vcmask 1045508   ;;  %s170_s24 = scalar_lea.vmem %s525_s3, %s427_s21 }
  0x10   : > { %v172_v3 = vld [vmem:[%s166_s18] sm:$0xff]  ;;  %v173_v4 = vld [vmem:[%s166_s18 + $0x8] sm:$0xff]  ;;  %v175_v5 = vld [vmem:[%s166_s18 + $0x18] sm:$0xff] }
  0x11   : > { %v188_v6 = vunpack.c.l.b16 %v172_v3  ;;  %v189_v7 = vunpack.c.h.b16 %v172_v3  ;;  %v190_v8 = vunpack.c.l.b16 %v173_v4  ;;  %v191_v9 = vunpack.c.h.b16 %v173_v4  ;;  %v174_v10 = vld [vmem:[%s166_s18 + $0x10] sm:$0xff] }
  0x12   : > { %v194_v11 = vunpack.c.l.b16 %v175_v5  ;;  %v195_v12 = vunpack.c.h.b16 %v175_v5  ;;  %v192_v13 = vunpack.c.l.b16 %v174_v10  ;;  %v193_v14 = vunpack.c.h.b16 %v174_v10 }
  0x13   : > { %v196_v15 = vpack.c.b16 %v188_v6, %v188_v6  ;;  %v197_v16 = vpack.c.b16 %v189_v7, %v189_v7  ;;  %v198_v17 = vpack.c.b16 %v190_v8, %v190_v8  ;;  %v199_v18 = vpack.c.b16 %v191_v9, %v191_v9 }
  0x14   : > { %v202_v19 = vpack.c.b16 %v194_v11, %v194_v11  ;;  %v203_v20 = vpack.c.b16 %v195_v12, %v195_v12  ;;  %v200_v21 = vpack.c.b16 %v192_v13, %v192_v13  ;;  %v201_v22 = vpack.c.b16 %v193_v14, %v193_v14 }
  0x15   : > { %v210_v23 = vsel %vm208_vm0, %v196_v15, 0  ;;  %v213_v24 = vsel %vm208_vm0, %v197_v16, 0  ;;  %v216_v25 = vsel %vm208_vm0, %v198_v17, 0  ;;  %v219_v26 = vsel %vm208_vm0, %v199_v18, 0 }
  0x16   : > { %240 = vmatpush.bf16.msra.mxu0 %v210_v23  ;;  %253 = vmatpush.bf16.msra.mxu1 %v213_v24  ;;  %v228_v28 = vsel %vm208_vm0, %v202_v19, 0  ;;  %v231_v29 = vsel %vm208_vm0, %v203_v20, 0  ;;  %v222_v30 = vsel %vm208_vm0, %v200_v21, 0  ;;  %v225_v31 = vsel %vm208_vm0, %v201_v22, 0 }
  0x17   : > { %266 = vmatpush.bf16.msra.mxu2 %v216_v25  ;;  %279 = vmatpush.bf16.msra.mxu3 %v219_v26 }
  0x19   : > { %428 = vmatmul.msk.bf16.vlgmr.msra.gmra.mxu0 %vm204_vm1, %v176_v27  ;;  %429 = vmatmul.msk.bf16.vlgmr.msra.gmra.mxu1 %vm204_vm1, %v176_v27 }
  0x1a   : > { %430 = vmatmul.msk.bf16.vlgmr.msra.gmra.mxu2 %vm204_vm1, %v176_v27  ;;  %431 = vmatmul.msk.bf16.vlgmr.msra.gmra.mxu3 %vm204_vm1, %v176_v27 }
  0x1b   : > { %318 = vmatpush.bf16.msrb.mxu2 %v228_v28  ;;  %331 = vmatpush.bf16.msrb.mxu3 %v231_v29 }
  0x1c   : > { %292 = vmatpush.bf16.msrb.mxu0 %v222_v30  ;;  %305 = vmatpush.bf16.msrb.mxu1 %v225_v31 }
  0x29   : > { %432 = vmatmul.msk.bf16.vlgmr.msrb.gmra.mxu0 %vm204_vm1, %v176_v27  ;;  %433 = vmatmul.msk.bf16.vlgmr.msrb.gmra.mxu1 %vm204_vm1, %v176_v27 }
  0x2a   : > { %434 = vmatmul.msk.bf16.vlgmr.msrb.gmra.mxu2 %vm204_vm1, %v176_v27  ;;  %435 = vmatmul.msk.bf16.vlgmr.msrb.gmra.mxu3 %vm204_vm1, %v176_v27 }
  0x81   : > { %v181_v38 = vpop.permute.xlu0 %180 }
  0x82   : > { %v183_v41 = vperm.slane %v181_v38, 0 }
  0x96   : > { %v242_v32 = vpop.f32.mrf.mxu0  ;;  %v255_v33 = vpop.f32.mrf.mxu1 }
  0x97   : > { %v256_v48 = vadd.f32 %v255_v33, %v183_v41  ;;  %v243_v55 = vadd.f32 %v242_v32, %v183_v41 }
  0x99   : > { %v345_v56 = vrot.slane %v256_v48, 7 }
  0x9b   : > { %v353_v1 = vsel %vm352_vm4, %v243_v55, %v345_v56 }
  0x9d   : > { %v268_v34 = vpop.f32.mrf.mxu2  ;;  %v281_v35 = vpop.f32.mrf.mxu3 }
  0x9e   : > { %v244_v36 = vpop.f32.mrf.mxu0  ;;  %v257_v37 = vpop.f32.mrf.mxu1  ;;  %v269_v44 = vadd.f32 %v268_v34, %v183_v41  ;;  %v282_v45 = vadd.f32 %v281_v35, %v183_v41 }
  0xa0   : > { %v346_v49 = vrot.slane %v269_v44, 6  ;;  %v347_v50 = vrot.slane %v282_v45, 5 }
  0xa2   : > { %v355_v61 = vsel %vm354_vm2, %v346_v49, %v347_v50 }
  0xa3   : > { %v357_v3 = vsel %vm356_vm5, %v353_v1, %v355_v61 }
  0xa5   : > { %v270_v39 = vpop.f32.mrf.mxu2  ;;  %v283_v40 = vpop.f32.mrf.mxu3 }
  0xa6   : > { %v294_v42 = vpop.f32.mrf.mxu0  ;;  %v307_v43 = vpop.f32.mrf.mxu1 }
  0xa7   : > { %v295_v46 = vadd.f32 %v294_v42, %v183_v41  ;;  %v308_v47 = vadd.f32 %v307_v43, %v183_v41 }
  0xa9   : > { %v348_v51 = vrot.slane %v295_v46, 4  ;;  %v349_v52 = vrot.slane %v308_v47, 3 }
  0xab   : > { %v359_v62 = vsel %vm358_vm3, %v348_v51, %v349_v52 }
  0xad   : > { %v320_v53 = vpop.f32.mrf.mxu2  ;;  %v333_v54 = vpop.f32.mrf.mxu3 }
  0xae   : > { %v321_v57 = vadd.f32 %v320_v53, %v183_v41  ;;  %v334_v58 = vadd.f32 %v333_v54, %v183_v41  ;;  %v296_v59 = vpop.f32.mrf.mxu0  ;;  %v309_v60 = vpop.f32.mrf.mxu1 }
  0xb0   : > { %v350_v63 = vrot.slane %v321_v57, 2  ;;  %v351_v0 = vrot.slane %v334_v58, 1 }
  0xb2   : > { %v361_v2 = vsel %vm360_vm6, %v350_v63, %v351_v0 }
  0xb3   : > { %v363_v4 = vsel %vm362_vm7, %v359_v62, %v361_v2 }
  0xb4   : > { %v364_v5 = vsel %vm208_vm0, %v357_v3, %v363_v4 }
  0xb5   : > { %366 = vst [vmem:[%s170_s24] sm:$0xff] %v364_v5  ;;  %v322_v6 = vpop.f32.mrf.mxu2  ;;  %v335_v7 = vpop.f32.mrf.mxu3 }
  0xb6 PF: > { %s15_s14 = sadd.s32 1, %s455_s14  }
  0xb7   : > { %p12_p4 = scmp.ge.s32.totalorder %s15_s14, 4  }
  0xb9   :  { %14 = sbr.rel (!%p12_p4) target bundleno = 3 (0x3), region = 62 }

// kernel: skip_fcn_cct_forward.32
= control target key start
LH: loop header
LB: loop body
LE: loop exit
PB: predicated region body
PF: predicated region fallthrough
CT: control target
= control target key end

     0   :  { %s2017_s12 = smov 0   ;;  %s2506_s0 = inlined_call_operand.vmem [shape: bf16[2,1,16,1190], index: 0, kind: input, shape index: {}]   ;;  %s2507_s1 = inlined_call_operand.vmem [shape: bf16[9,4,16], index: 1, kind: input, shape index: {}]   ;;  %s2508_s2 = inlined_call_operand.vmem [shape: f32[4,1], index: 2, kind: input, shape index: {}]   ;;  %s2509_s3 = inlined_call_operand.vmem [shape: bf16[2,4,1088], index: 3, kind: output, shape index: {}]  }
   0x1 LB: > { %s1812_s13 = sadd.s32 4294967295, %s1986_s12   ;;  %p1816_p0 = scmp.ge.s32.totalorder %s1986_s12, 1  ;;  %s1986_s12 = sphi %s2017_s12, %s13_s12  }
   0x2   : > { %p137_p1 = scmp.lt.s32.totalorder %s1986_s12, 3 }
   0x4   : > { %p138_p2 = pnand %p1816_p0, %p137_p1 }
   0x5   : > { %p161_p3 = scmp.lt.s32.totalorder (!%p138_p2), %s1812_s13, 1  ;;  %s1988_s18 = smov (!%p138_p2), 127  }
   0x6   : > { %141 = sbr.rel (%p138_p2) target bundleno = 604 (0x25c), region = 32  ;;  %s1989_s19 = smov (!%p138_p2), 126  }
   0x7   : > { %s1990_s20 = smov (!%p138_p2), 94   ;;  %s1991_s21 = smov (!%p138_p2), 93  }
   0x8   : > { %s1992_s22 = smov (!%p138_p2), 92   ;;  %s1993_s23 = smov (!%p138_p2), 60  }
   0x9   : > { %s1994_s26 = smov (!%p138_p2), 59   ;;  %s1995_s29 = smov (!%p138_p2), 58  }
   0xb   : > { %s2511_s13 = smov (!%p161_p3, %s1812_s13), 1  ;;  %vm240_vm0 = vcmask 1039360   ;;  %v1819_v38 = vld [vmem:[%s2507_s1 + $0x2] sm:$0x3]  ;;  %vm258_vm1 = vcmask 130048   ;;  %vm528_vm2 = vcmask 1031168  }
   0xc   : > { %s1960_s14 = smul.u32 80, %s2511_s13  ;;  %v182_v47 = vld [vmem:[%s2507_s1] sm:$0x3]  ;;  %v1874_v62 = vld [vmem:[%s2507_s1 + $0x4] sm:$0x3]  ;;  %vm695_vm3 = vcmask 769024  }
   0xd   : > { %vm862_vm4 = vcmask 760832   ;;  %vm1029_vm5 = vcmask 752640   ;;  %vm1201_vm6 = vcmask 490496   ;;  %vm1371_vm7 = vcmask 482304  }
   0xe   : > { %s2031_s17 = scalar_lea.vmem %s2506_s0, %s1960_s14  ;;  %vm1541_vm8 = vcmask 474112   ;;  %vm1734_vm9 = vcmask 1045508   ;;  %vm1730_vm10 = vcmask 1041408   ;;  %vm1738_vm11 = vcmask 1043456  }
   0xf   : > { %v1830_v0 = vld [vmem:[%s2031_s17 + $0x8] sm:$0xf]  ;;  %v1956_v1 = vld [vmem:[%s2031_s17 + $0x2c] sm:$0xf0]  ;;  %v1822_v2 = vld [vmem:[%s2031_s17] sm:$0xf] }
  0x10   : > { %v2036_v3 = vor.u32 %v1956_v1, %v1830_v0  ;;  %v1955_v4 = vld [vmem:[%s2031_s17 + $0x24] sm:$0xf0]  ;;  %v1838_v6 = vld [vmem:[%s2031_s17 + $0x10] sm:$0xf]  ;;  %v1957_v7 = vld [vmem:[%s2031_s17 + $0x34] sm:$0xf0] }
  0x11   : > { %v2039_v5 = vor.u32 %v1955_v4, %v1822_v2  ;;  %v1951_v8 = vld [vmem:[%s2031_s17 + $0xc] sm:$0xf]  ;;  %v1832_v9 = vld [vmem:[%s2031_s17 + $0x30] sm:$0xf0]  ;;  %v2047_v10 = vor.u32 %v1957_v7, %v1838_v6  ;;  %v1950_v11 = vld [vmem:[%s2031_s17 + $0x4] sm:$0xf] }
  0x12   : > { %226 = vrot.lane.b32.xlu1 %v2036_v3, %s1988_s18  ;;  %v1824_v12 = vld [vmem:[%s2031_s17 + $0x28] sm:$0xf0]  ;;  %v2052_v13 = vor.u32 %v1951_v8, %v1832_v9  ;;  %v1952_v14 = vld [vmem:[%s2031_s17 + $0x14] sm:$0xf]  ;;  %v1840_v15 = vld [vmem:[%s2031_s17 + $0x38] sm:$0xf0] }
  0x13   : > { %222 = vrot.lane.b32.xlu0 %v2039_v5, %s1988_s18  ;;  %230 = vrot.lane.b32.xlu2 %v2047_v10, %s1988_s18  ;;  %v2056_v16 = vor.u32 %v1950_v11, %v1824_v12  ;;  %v2058_v17 = vor.u32 %v1952_v14, %v1840_v15  ;;  %v1953_v18 = vld [vmem:[%s2031_s17 + $0x1c] sm:$0xf]  ;;  %v1848_v19 = vld [vmem:[%s2031_s17 + $0x40] sm:$0xf0]  ;;  %vm1755_vm12 = vcmask 517120  }
  0x14   : > { %v1846_v20 = vld [vmem:[%s2031_s17 + $0x18] sm:$0xf]  ;;  %v1958_v21 = vld [vmem:[%s2031_s17 + $0x3c] sm:$0xf0]  ;;  %v2067_v22 = vor.u32 %v1953_v18, %v1848_v19  ;;  %v1959_v24 = vld [vmem:[%s2031_s17 + $0x44] sm:$0xf0] }
  0x15   : > { %v1854_v23 = vld [vmem:[%s2031_s17 + $0x20] sm:$0xf]  ;;  %v2071_v25 = vor.u32 %v1958_v21, %v1846_v20  ;;  %v1954_v4 = vld [vmem:[%s2031_s17 + $0x24] sm:$0xf] }
  0x16   : > { %v2073_v26 = vor.u32 %v1959_v24, %v1854_v23  ;;  %v1884_v19 = vld [vmem:[%s2507_s1 + $0x6] sm:$0x3] }
  0x1a   : > { %228 = vrot.lane.b32.xlu1 %v2052_v13, %s1988_s18 }
  0x1b   : > { %224 = vrot.lane.b32.xlu0 %v2056_v16, %s1988_s18  ;;  %232 = vrot.lane.b32.xlu2 %v2058_v17, %s1988_s18 }
  0x22   : > { %236 = vrot.lane.b32.xlu1 %v2067_v22, %s1988_s18 }
  0x23   : > { %234 = vrot.lane.b32.xlu0 %v2071_v25, %s1988_s18  ;;  %238 = vrot.lane.b32.xlu2 %v2073_v26, %s1988_s18 }
  0x2a   : > { %512 = vrot.lane.b32.xlu1 %v2056_v16, %s1989_s19 }
  0x2b   : > { %510 = vrot.lane.b32.xlu0 %v2039_v5, %s1989_s19  ;;  %514 = vrot.lane.b32.xlu2 %v2036_v3, %s1989_s19 }
  0x32   : > { %518 = vrot.lane.b32.xlu1 %v2047_v10, %s1989_s19 }
  0x33   : > { %516 = vrot.lane.b32.xlu0 %v2052_v13, %s1989_s19  ;;  %520 = vrot.lane.b32.xlu2 %v2058_v17, %s1989_s19 }
  0x3a   : > { %524 = vrot.lane.b32.xlu1 %v2067_v22, %s1989_s19 }
  0x3b   : > { %522 = vrot.lane.b32.xlu0 %v2071_v25, %s1989_s19  ;;  %677 = vrot.lane.b32.xlu2 %v2039_v5, %s1990_s20 }
  0x42   : > { %526 = vrot.lane.b32.xlu1 %v2073_v26, %s1989_s19 }
  0x43   : > { %679 = vrot.lane.b32.xlu0 %v2056_v16, %s1990_s20  ;;  %681 = vrot.lane.b32.xlu2 %v2036_v3, %s1990_s20 }
  0x4a   : > { %685 = vrot.lane.b32.xlu1 %v2047_v10, %s1990_s20 }
  0x4b   : > { %683 = vrot.lane.b32.xlu0 %v2052_v13, %s1990_s20  ;;  %687 = vrot.lane.b32.xlu2 %v2058_v17, %s1990_s20 }
  0x52   : > { %691 = vrot.lane.b32.xlu1 %v2067_v22, %s1990_s20 }
  0x53   : > { %689 = vrot.lane.b32.xlu0 %v2071_v25, %s1990_s20  ;;  %693 = vrot.lane.b32.xlu2 %v2073_v26, %s1990_s20 }
  0x5a   : > { %846 = vrot.lane.b32.xlu1 %v2056_v16, %s1991_s21 }
  0x5b   : > { %844 = vrot.lane.b32.xlu0 %v2039_v5, %s1991_s21  ;;  %848 = vrot.lane.b32.xlu2 %v2036_v3, %s1991_s21 }
  0x62   : > { %852 = vrot.lane.b32.xlu1 %v2047_v10, %s1991_s21 }
  0x63   : > { %850 = vrot.lane.b32.xlu0 %v2052_v13, %s1991_s21  ;;  %854 = vrot.lane.b32.xlu2 %v2058_v17, %s1991_s21 }
  0x6a   : > { %858 = vrot.lane.b32.xlu1 %v2067_v22, %s1991_s21 }
  0x6b   : > { %856 = vrot.lane.b32.xlu0 %v2071_v25, %s1991_s21  ;;  %860 = vrot.lane.b32.xlu2 %v2073_v26, %s1991_s21  ;;  %s1961_s21 = smul.u32 18, %s2511_s13 }
  0x6d   : > { %v231_v27 = vpop.permute.xlu2 %230  ;;  %s2482_s24 = scalar_lea.vmem %s2509_s3, %s1961_s21 }
  0x72   : > { %1015 = vrot.lane.b32.xlu1 %v2036_v3, %s1992_s22 }
  0x73   : > { %1013 = vrot.lane.b32.xlu0 %v2056_v16, %s1992_s22  ;;  %1017 = vrot.lane.b32.xlu2 %v2052_v13, %s1992_s22 }
  0x75   : > { %v233_v30 = vpop.permute.xlu2 %232 }
  0x76   : > { %v245_v35 = vsel %vm240_vm0, %v231_v27, %v233_v30 }
  0x7a   : > { %1019 = vrot.lane.b32.xlu1 %v2047_v10, %s1992_s22 }
  0x7b   : > { %1011 = vrot.lane.b32.xlu0 %v2039_v5, %s1992_s22  ;;  %1021 = vrot.lane.b32.xlu2 %v2058_v17, %s1992_s22 }
  0x7d   : > { %v239_v39 = vpop.permute.xlu2 %238 }
  0x82   : > { %1025 = vrot.lane.b32.xlu1 %v2067_v22, %s1992_s22 }
  0x83   : > { %1023 = vrot.lane.b32.xlu0 %v2071_v25, %s1992_s22  ;;  %1027 = vrot.lane.b32.xlu2 %v2073_v26, %s1992_s22 }
  0x84   : > { %v227_v28 = vpop.permute.xlu1 %226 }
  0x85   : > { %v223_v29 = vpop.permute.xlu0 %222  ;;  %v515_v48 = vpop.permute.xlu2 %514 }
  0x8a   : > { %1183 = vrot.lane.b32.xlu1 %v2056_v16, %s1993_s23 }
  0x8b   : > { %1181 = vrot.lane.b32.xlu0 %v2039_v5, %s1993_s23  ;;  %1185 = vrot.lane.b32.xlu2 %v2036_v3, %s1993_s23 }
  0x8c   : > { %v229_v31 = vpop.permute.xlu1 %228 }
  0x8d   : > { %v225_v32 = vpop.permute.xlu0 %224  ;;  %v243_v33 = vsel %vm240_vm0, %v227_v28, %v229_v31  ;;  %v244_v34 = vsel %vm240_vm0, %v229_v31, %v231_v27  ;;  %v521_v53 = vpop.permute.xlu2 %520 }
  0x8e   : > { %295 = vmatpush.bf16.msra.mxu2 %v243_v33  ;;  %308 = vmatpush.bf16.msra.mxu3 %v244_v34  ;;  %v241_v36 = vsel %vm240_vm0, %v223_v29, %v225_v32  ;;  %v242_v37 = vsel %vm240_vm0, %v225_v32, %v227_v28 }
  0x8f   : > { %269 = vmatpush.bf16.msra.mxu0 %v241_v36  ;;  %282 = vmatpush.bf16.msra.mxu1 %v242_v37 }
  0x91   : > { %1858 = vmatmul.msk.bf16.vlgmr.msra.gmra.mxu2 %vm258_vm1, %v1819_v38  ;;  %1859 = vmatmul.msk.bf16.vlgmr.msra.gmra.mxu3 %vm258_vm1, %v1819_v38 }
  0x92   : > { %1856 = vmatmul.msk.bf16.vlgmr.msra.gmra.mxu0 %vm258_vm1, %v1819_v38  ;;  %1857 = vmatmul.msk.bf16.vlgmr.msra.gmra.mxu1 %vm258_vm1, %v1819_v38 }
  0x93   : > { %321 = vmatpush.bf16.msrb.mxu0 %v245_v35  ;;  %1187 = vrot.lane.b32.xlu0 %v2052_v13, %s1993_s23 }
  0x94   : > { %v237_v40 = vpop.permute.xlu1 %236  ;;  %1189 = vrot.lane.b32.xlu1 %v2047_v10, %s1993_s23  ;;  %1191 = vrot.lane.b32.xlu2 %v2058_v17, %s1993_s23 }
  0x95   : > { %v235_v41 = vpop.permute.xlu0 %234  ;;  %v248_v42 = vsel %vm240_vm0, %v237_v40, %v239_v39  ;;  %v678_v60 = vpop.permute.xlu2 %677 }
  0x96   : > { %v246_v43 = vsel %vm240_vm0, %v233_v30, %v235_v41  ;;  %v247_v44 = vsel %vm240_vm0, %v235_v41, %v237_v40  ;;  %360 = vmatpush.bf16.msrb.mxu3 %v248_v42 }
  0x97   : > { %373 = vmatpush.bf16.msra.mxu0 %v239_v39  ;;  %334 = vmatpush.bf16.msrb.mxu1 %v246_v43 }
  0x98   : > { %347 = vmatpush.bf16.msrb.mxu2 %v247_v44 }
  0x9a   : > { %424 = vmatpush.bf16.msra.mxu3 %v2036_v3 }
  0x9b   : > { %398 = vmatpush.bf16.msra.mxu1 %v2039_v5  ;;  %1193 = vrot.lane.b32.xlu0 %v2071_v25, %s1993_s23 }
  0x9c   : > { %411 = vmatpush.bf16.msra.mxu2 %v2056_v16  ;;  %1195 = vrot.lane.b32.xlu1 %v2067_v22, %s1993_s23  ;;  %v513_v46 = vpop.permute.xlu1 %512 }
  0x9d   : > { %1197 = vrot.lane.b32.xlu2 %v2073_v26, %s1993_s23  ;;  %v511_v45 = vpop.permute.xlu0 %510  ;;  %v530_v50 = vsel %vm528_vm2, %v513_v46, %v515_v48  ;;  %v682_v6 = vpop.permute.xlu2 %681 }
  0x9e   : > { %v529_v49 = vsel %vm528_vm2, %v511_v45, %v513_v46 }
  0xa1   : > { %1862 = vmatmul.msk.bf16.vlgmr.msrb.gmra.mxu2 %vm258_vm1, %v1819_v38  ;;  %1863 = vmatmul.msk.bf16.vlgmr.msrb.gmra.mxu3 %vm258_vm1, %v1819_v38 }
  0xa2   : > { %1860 = vmatmul.msk.bf16.vlgmr.msrb.gmra.mxu0 %vm258_vm1, %v1819_v38  ;;  %1861 = vmatmul.msk.bf16.vlgmr.msrb.gmra.mxu1 %vm258_vm1, %v1819_v38 }
  0xa3   : > { %437 = vmatpush.bf16.msrb.mxu0 %v2052_v13  ;;  %463 = vmatpush.bf16.msrb.mxu2 %v2058_v17 }
  0xa4   : > { %476 = vmatpush.bf16.msrb.mxu3 %v2071_v25  ;;  %450 = vmatpush.bf16.msrb.mxu1 %v2047_v10  ;;  %v519_v52 = vpop.permute.xlu1 %518 }
  0xa5   : > { %1351 = vrot.lane.b32.xlu1 %v2039_v5, %s1994_s26  ;;  %1353 = vrot.lane.b32.xlu2 %v2056_v16, %s1994_s26  ;;  %v517_v51 = vpop.permute.xlu0 %516  ;;  %v533_v57 = vsel %vm528_vm2, %v519_v52, %v521_v53  ;;  %v688_v11 = vpop.permute.xlu2 %687 }
  0xa6   : > { %v531_v55 = vsel %vm528_vm2, %v515_v48, %v517_v51  ;;  %v532_v56 = vsel %vm528_vm2, %v517_v51, %v519_v52 }
  0xac   : > { %v525_v59 = vpop.permute.xlu1 %524 }
  0xad   : > { %1357 = vrot.lane.b32.xlu1 %v2052_v13, %s1994_s26  ;;  %1359 = vrot.lane.b32.xlu2 %v2047_v10, %s1994_s26  ;;  %v523_v54 = vpop.permute.xlu0 %522  ;;  %v694_v20 = vpop.permute.xlu2 %693 }
  0xae   : > { %v534_v58 = vsel %vm528_vm2, %v521_v53, %v523_v54  ;;  %v535_v0 = vsel %vm528_vm2, %v523_v54, %v525_v59 }
  0xb1   : > { %1866 = vmatmul.msk.bf16.vlgmr.msra.gmra.mxu2 %vm258_vm1, %v182_v47  ;;  %1867 = vmatmul.msk.bf16.vlgmr.msra.gmra.mxu3 %vm258_vm1, %v182_v47 }
  0xb2   : > { %1864 = vmatmul.msk.bf16.vlgmr.msra.gmra.mxu0 %vm258_vm1, %v1819_v38  ;;  %1865 = vmatmul.msk.bf16.vlgmr.msra.gmra.mxu1 %vm258_vm1, %v182_v47 }
  0xb3   : > { %489 = vmatpush.bf16.msra.mxu0 %v2067_v22  ;;  %556 = vmatpush.bf16.msra.mxu2 %v529_v49  ;;  %v2269_v49 = vld [vmem:[%s2507_s1 + $0x8] sm:$0x3] }
  0xb4   : > { %569 = vmatpush.bf16.msra.mxu3 %v530_v50  ;;  %502 = vmatpush.bf16.msra.mxu1 %v2073_v26  ;;  %v527_v61 = vpop.permute.xlu1 %526 }
  0xb5   : > { %1363 = vrot.lane.b32.xlu1 %v2071_v25, %s1994_s26  ;;  %1365 = vrot.lane.b32.xlu2 %v2067_v22, %s1994_s26  ;;  %v680_v63 = vpop.permute.xlu0 %679  ;;  %v536_v1 = vsel %vm528_vm2, %v525_v59, %v527_v61 }
  0xb6   : > { %v696_v2 = vsel %vm695_vm3, %v678_v60, %v680_v63  ;;  %v697_v12 = vsel %vm695_vm3, %v680_v63, %v682_v6 }
  0xbc   : > { %v686_v9 = vpop.permute.xlu1 %685 }
  0xbd   : > { %1521 = vrot.lane.b32.xlu2 %v2039_v5, %s1995_s29  ;;  %v1915_v5 = vld [vmem:[%s2031_s17 + $0x48] sm:$0xf0]  ;;  %v684_v8 = vpop.permute.xlu0 %683  ;;  %v700_v15 = vsel %vm695_vm3, %v686_v9, %v688_v11 }
  0xbe   : > { %v1918_v7 = vor.u32 %v1954_v4, %v1915_v5  ;;  %v699_v14 = vsel %vm695_vm3, %v684_v8, %v686_v9 }
  0xc0   : > { %1199 = vrot.lane.b32.xlu0 %v1918_v7, %s1993_s23  ;;  %1369 = vrot.lane.b32.xlu1 %v1918_v7, %s1994_s26 }
  0xc1   : > { %1870 = vmatmul.msk.bf16.vlgmr.msrb.gmra.mxu2 %vm258_vm1, %v182_v47  ;;  %1871 = vmatmul.msk.bf16.vlgmr.msrb.gmra.mxu3 %vm258_vm1, %v182_v47 }
  0xc2   : > { %1868 = vmatmul.msk.bf16.vlgmr.msrb.gmra.mxu0 %vm258_vm1, %v182_v47  ;;  %1869 = vmatmul.msk.bf16.vlgmr.msrb.gmra.mxu1 %vm258_vm1, %v182_v47 }
  0xc3   : > { %582 = vmatpush.bf16.msrb.mxu0 %v531_v55  ;;  %595 = vmatpush.bf16.msrb.mxu1 %v532_v56 }
  0xc4   : > { %608 = vmatpush.bf16.msrb.mxu2 %v533_v57  ;;  %621 = vmatpush.bf16.msrb.mxu3 %v534_v58 }
  0xc5   : > { %1527 = vrot.lane.b32.xlu2 %v2052_v13, %s1995_s29  ;;  %v698_v13 = vsel %vm695_vm3, %v682_v6, %v684_v8  ;;  %v690_v18 = vpop.permute.xlu0 %689 }
  0xc6   : > { %v701_v21 = vsel %vm695_vm3, %v688_v11, %v690_v18 }
  0xc8   : > { %1355 = vrot.lane.b32.xlu0 %v2036_v3, %s1994_s26  ;;  %1525 = vrot.lane.b32.xlu1 %v2036_v3, %s1995_s29  ;;  %v692_v3 = vpop.permute.xlu1 %691 }
  0xc9   : > { %v702_v23 = vsel %vm695_vm3, %v690_v18, %v692_v3 }
  0xcd   : > { %1533 = vrot.lane.b32.xlu2 %v2071_v25, %s1995_s29  ;;  %v845_v25 = vpop.permute.xlu0 %844 }
  0xd0   : > { %1361 = vrot.lane.b32.xlu0 %v2058_v17, %s1994_s26  ;;  %1531 = vrot.lane.b32.xlu1 %v2058_v17, %s1995_s29  ;;  %v703_v17 = vsel %vm695_vm3, %v692_v3, %v694_v20  ;;  %v847_v24 = vpop.permute.xlu1 %846 }
  0xd1   : > { %1875 = vmatmul.msk.bf16.vlgmr.msra.gmra.mxu2 %vm258_vm1, %v1874_v62  ;;  %1876 = vmatmul.msk.bf16.vlgmr.msra.gmra.mxu3 %vm258_vm1, %v1874_v62  ;;  %v863_v30 = vsel %vm862_vm4, %v845_v25, %v847_v24 }
  0xd2   : > { %1872 = vmatmul.msk.bf16.vlgmr.msra.gmra.mxu0 %vm258_vm1, %v182_v47  ;;  %1873 = vmatmul.msk.bf16.vlgmr.msra.gmra.mxu1 %vm258_vm1, %v182_v47 }
  0xd3   : > { %634 = vmatpush.bf16.msra.mxu0 %v535_v0  ;;  %647 = vmatpush.bf16.msra.mxu1 %v536_v1 }
  0xd4   : > { %723 = vmatpush.bf16.msra.mxu3 %v696_v2  ;;  %660 = vmatpush.bf16.msra.mxu2 %v527_v61 }
  0xd5   : > { %1539 = vrot.lane.b32.xlu2 %v1918_v7, %s1995_s29  ;;  %v851_v27 = vpop.permute.xlu0 %850 }
  0xd8   : > { %1367 = vrot.lane.b32.xlu0 %v2073_v26, %s1994_s26  ;;  %1537 = vrot.lane.b32.xlu1 %v2073_v26, %s1995_s29  ;;  %v849_v26 = vpop.permute.xlu2 %848  ;;  %v853_v28 = vpop.permute.xlu1 %852 }
  0xd9   : > { %v864_v29 = vsel %vm862_vm4, %v847_v24, %v849_v26  ;;  %v865_v31 = vsel %vm862_vm4, %v849_v26, %v851_v27  ;;  %v866_v32 = vsel %vm862_vm4, %v851_v27, %v853_v28 }
  0xe0   : > { %1523 = vrot.lane.b32.xlu0 %v2056_v16, %s1995_s29  ;;  %v855_v16 = vpop.permute.xlu2 %854  ;;  %v859_v34 = vpop.permute.xlu1 %858 }
  0xe1   : > { %1879 = vmatmul.msk.bf16.vlgmr.msrb.gmra.mxu2 %vm258_vm1, %v1874_v62  ;;  %1880 = vmatmul.msk.bf16.vlgmr.msrb.gmra.mxu3 %vm258_vm1, %v1874_v62  ;;  %v867_v37 = vsel %vm862_vm4, %v853_v28, %v855_v16 }
  0xe2   : > { %1877 = vmatmul.msk.bf16.vlgmr.msrb.gmra.mxu0 %vm258_vm1, %v1874_v62  ;;  %1878 = vmatmul.msk.bf16.vlgmr.msrb.gmra.mxu1 %vm258_vm1, %v1874_v62 }
  0xe3   : > { %736 = vmatpush.bf16.msrb.mxu0 %v697_v12  ;;  %749 = vmatpush.bf16.msrb.mxu1 %v698_v13 }
  0xe4   : > { %762 = vmatpush.bf16.msrb.mxu2 %v699_v14  ;;  %775 = vmatpush.bf16.msrb.mxu3 %v700_v15 }
  0xe8   : > { %1529 = vrot.lane.b32.xlu0 %v2047_v10, %s1995_s29  ;;  %v857_v10 = vpop.permute.xlu0 %856  ;;  %v861_v33 = vpop.permute.xlu2 %860 }
  0xe9   : > { %v868_v38 = vsel %vm862_vm4, %v855_v16, %v857_v10  ;;  %v869_v39 = vsel %vm862_vm4, %v857_v10, %v859_v34  ;;  %v870_v40 = vsel %vm862_vm4, %v859_v34, %v861_v33  ;;  %v1016_v45 = vpop.permute.xlu1 %1015 }
  0xf0   : > { %1535 = vrot.lane.b32.xlu0 %v2067_v22, %s1995_s29  ;;  %v1014_v22 = vpop.permute.xlu0 %1013  ;;  %v1018_v50 = vpop.permute.xlu2 %1017 }
  0xf1   : > { %1883 = vmatmul.msk.bf16.vlgmr.msra.gmra.mxu2 %vm258_vm1, %v1874_v62  ;;  %1885 = vmatmul.msk.bf16.vlgmr.msra.gmra.mxu3 %vm258_vm1, %v1884_v19  ;;  %v1031_v54 = vsel %vm1029_vm5, %v1014_v22, %v1016_v45  ;;  %v1032_v55 = vsel %vm1029_vm5, %v1016_v45, %v1018_v50  ;;  %v1020_v56 = vpop.permute.xlu1 %1019 }
  0xf2   : > { %1881 = vmatmul.msk.bf16.vlgmr.msra.gmra.mxu0 %vm258_vm1, %v1874_v62  ;;  %1882 = vmatmul.msk.bf16.vlgmr.msra.gmra.mxu1 %vm258_vm1, %v1874_v62  ;;  %v1033_v6 = vsel %vm1029_vm5, %v1018_v50, %v1020_v56 }
  0xf3   : > { %788 = vmatpush.bf16.msra.mxu0 %v701_v21  ;;  %801 = vmatpush.bf16.msra.mxu1 %v702_v23  ;;  %v2306_v23 = vld [vmem:[%s2507_s1 + $0xa] sm:$0x3] }
  0xf4   : > { %814 = vmatpush.bf16.msra.mxu2 %v703_v17  ;;  %827 = vmatpush.bf16.msra.mxu3 %v694_v20 }
  0xf8   : > { %v1012_v48 = vpop.permute.xlu0 %1011  ;;  %v1022_v61 = vpop.permute.xlu2 %1021 }
  0xf9   : > { %v1030_v53 = vsel %vm1029_vm5, %v1012_v48, %v1014_v22  ;;  %v1026_v1 = vpop.permute.xlu1 %1025  ;;  %v1034_v7 = vsel %vm1029_vm5, %v1020_v56, %v1022_v61 }
 0x100   : > { %v1024_v0 = vpop.permute.xlu0 %1023  ;;  %v1028_v11 = vpop.permute.xlu2 %1027 }
 0x101   : > { %1888 = vmatmul.msk.bf16.vlgmr.msrb.gmra.mxu2 %vm258_vm1, %v1884_v19  ;;  %1889 = vmatmul.msk.bf16.vlgmr.msrb.gmra.mxu3 %vm258_vm1, %v1884_v19  ;;  %v1035_v8 = vsel %vm1029_vm5, %v1022_v61, %v1024_v0  ;;  %v1036_v9 = vsel %vm1029_vm5, %v1024_v0, %v1026_v1  ;;  %v1184_v17 = vpop.permute.xlu1 %1183 }
 0x102   : > { %1886 = vmatmul.msk.bf16.vlgmr.msrb.gmra.mxu0 %vm258_vm1, %v1884_v19  ;;  %1887 = vmatmul.msk.bf16.vlgmr.msrb.gmra.mxu1 %vm258_vm1, %v1884_v19 }
 0x103   : > { %890 = vmatpush.bf16.msrb.mxu0 %v863_v30  ;;  %903 = vmatpush.bf16.msrb.mxu1 %v864_v29  ;;  %v1037_v29 = vsel %vm1029_vm5, %v1026_v1, %v1028_v11 }
 0x104   : > { %916 = vmatpush.bf16.msrb.mxu2 %v865_v31  ;;  %929 = vmatpush.bf16.msrb.mxu3 %v866_v32 }
 0x108   : > { %v1186_v24 = vpop.permute.xlu2 %1185 }
 0x109   : > { %v1203_v31 = vsel %vm1201_vm6, %v1184_v17, %v1186_v24 }
 0x10f   : > { %v271_v35 = vpop.f32.mrf.mxu0  ;;  %v2254_v36 = vpop.f32.mrf.mxu1 }
 0x111   : > { %1892 = vmatmul.msk.bf16.vlgmr.msra.gmra.mxu2 %vm258_vm1, %v1884_v19  ;;  %1893 = vmatmul.msk.bf16.vlgmr.msra.gmra.mxu3 %vm258_vm1, %v1884_v19 }
 0x112   : > { %1890 = vmatmul.msk.bf16.vlgmr.msra.gmra.mxu0 %vm258_vm1, %v1884_v19  ;;  %1891 = vmatmul.msk.bf16.vlgmr.msra.gmra.mxu1 %vm258_vm1, %v1884_v19  ;;  %v1182_v19 = vpop.permute.xlu0 %1181 }
 0x113   : > { %942 = vmatpush.bf16.msra.mxu0 %v867_v37  ;;  %955 = vmatpush.bf16.msra.mxu1 %v868_v38  ;;  %v1202_v30 = vsel %vm1201_vm6, %v1182_v19, %v1184_v17  ;;  %v1190_v37 = vpop.permute.xlu1 %1189  ;;  %v1192_v38 = vpop.permute.xlu2 %1191 }
 0x114   : > { %v297_v41 = vpop.f32.mrf.mxu2  ;;  %v2264_v42 = vpop.f32.mrf.mxu3  ;;  %968 = vmatpush.bf16.msra.mxu2 %v869_v39  ;;  %981 = vmatpush.bf16.msra.mxu3 %v870_v40 }
 0x117   : > { %v273_v43 = vpop.f32.mrf.mxu0  ;;  %v286_v44 = vpop.f32.mrf.mxu1 }
 0x11a   : > { %v1188_v32 = vpop.permute.xlu0 %1187 }
 0x11b   : > { %v1204_v45 = vsel %vm1201_vm6, %v1186_v24, %v1188_v32  ;;  %v1198_v50 = vpop.permute.xlu2 %1197 }
 0x11c   : > { %v299_v46 = vpop.f32.mrf.mxu2  ;;  %v312_v47 = vpop.f32.mrf.mxu3 }
 0x11d   : > { %v1205_v46 = vsel %vm1201_vm6, %v1188_v32, %v1190_v37  ;;  %v1206_v47 = vsel %vm1201_vm6, %v1190_v37, %v1192_v38 }
 0x11f   : > { %v323_v51 = vpop.f32.mrf.mxu0  ;;  %v2271_v52 = vpop.f32.mrf.mxu1 }
 0x121   : > { %1897 = vmatmul.msk.bf16.vlgmr.msrb.gmra.mxu2 %vm258_vm1, %v2269_v49  ;;  %1898 = vmatmul.msk.bf16.vlgmr.msrb.gmra.mxu3 %vm258_vm1, %v2269_v49 }
 0x122   : > { %1895 = vmatmul.msk.bf16.vlgmr.msrb.gmra.mxu0 %vm258_vm1, %v2269_v49  ;;  %1896 = vmatmul.msk.bf16.vlgmr.msrb.gmra.mxu1 %vm258_vm1, %v2269_v49  ;;  %v1194_v22 = vpop.permute.xlu0 %1193 }
 0x123   : > { %994 = vmatpush.bf16.msrb.mxu0 %v861_v33  ;;  %1057 = vmatpush.bf16.msrb.mxu1 %v1030_v53  ;;  %v1207_v48 = vsel %vm1201_vm6, %v1192_v38, %v1194_v22 }
 0x124   : > { %v349_v57 = vpop.f32.mrf.mxu2  ;;  %v2284_v58 = vpop.f32.mrf.mxu3  ;;  %1070 = vmatpush.bf16.msrb.mxu2 %v1031_v54  ;;  %1083 = vmatpush.bf16.msrb.mxu3 %v1032_v55 }
 0x127   : > { %v325_v59 = vpop.f32.mrf.mxu0  ;;  %v338_v60 = vpop.f32.mrf.mxu1 }
 0x128   : > { %v2346_v60 = vld [vmem:[%s2507_s1 + $0xc] sm:$0x3] }
 0x12c   : > { %v351_v62 = vpop.f32.mrf.mxu2  ;;  %v364_v63 = vpop.f32.mrf.mxu3 }
 0x12d   : > { %v1354_v62 = vpop.permute.xlu2 %1353 }
 0x12f   : > { %v375_v2 = vpop.f32.mrf.mxu0  ;;  %v400_v4 = vpop.f32.mrf.mxu1 }
 0x130   : > { %v2286_v5 = vadd.f32 %v400_v4, %v271_v35 }
 0x131   : > { %1901 = vmatmul.msk.bf16.vlgmr.msra.gmra.mxu2 %vm258_vm1, %v2269_v49  ;;  %1902 = vmatmul.msk.bf16.vlgmr.msra.gmra.mxu3 %vm258_vm1, %v2269_v49 }
 0x132   : > { %1899 = vmatmul.msk.bf16.vlgmr.msra.gmra.mxu0 %vm258_vm1, %v2269_v49  ;;  %1900 = vmatmul.msk.bf16.vlgmr.msra.gmra.mxu1 %vm258_vm1, %v2269_v49 }
 0x133   : > { %1096 = vmatpush.bf16.msra.mxu0 %v1033_v6  ;;  %1109 = vmatpush.bf16.msra.mxu1 %v1034_v7 }
 0x134   : > { %v413_v12 = vpop.f32.mrf.mxu2  ;;  %v426_v13 = vpop.f32.mrf.mxu3  ;;  %1122 = vmatpush.bf16.msra.mxu2 %v1035_v8  ;;  %1135 = vmatpush.bf16.msra.mxu3 %v1036_v9 }
 0x135   : > { %v414_v14 = vadd.f32 %v413_v12, %v2254_v36  ;;  %v2301_v15 = vadd.f32 %v426_v13, %v297_v41 }
 0x137   : > { %v377_v3 = vpop.f32.mrf.mxu0  ;;  %v402_v18 = vpop.f32.mrf.mxu1 }
 0x13c   : > { %v415_v20 = vpop.f32.mrf.mxu2  ;;  %v428_v21 = vpop.f32.mrf.mxu3 }
 0x13d   : > { %v1360_v20 = vpop.permute.xlu2 %1359 }
 0x13f   : > { %v439_v25 = vpop.f32.mrf.mxu0  ;;  %v452_v26 = vpop.f32.mrf.mxu1 }
 0x140   : > { %v440_v27 = vadd.f32 %v439_v25, %v2264_v42  ;;  %v2309_v28 = vadd.f32 %v452_v26, %v323_v51 }
 0x141   : > { %1906 = vmatmul.msk.bf16.vlgmr.msrb.gmra.mxu2 %vm258_vm1, %v2306_v23  ;;  %1907 = vmatmul.msk.bf16.vlgmr.msrb.gmra.mxu3 %vm258_vm1, %v2306_v23 }
 0x142   : > { %1903 = vmatmul.msk.bf16.vlgmr.msrb.gmra.mxu0 %vm258_vm1, %v2269_v49  ;;  %1905 = vmatmul.msk.bf16.vlgmr.msrb.gmra.mxu1 %vm258_vm1, %v2306_v23  ;;  %v1196_v49 = vpop.permute.xlu1 %1195 }
 0x143   : > { %1148 = vmatpush.bf16.msrb.mxu0 %v1037_v29  ;;  %1161 = vmatpush.bf16.msrb.mxu1 %v1028_v11  ;;  %v1208_v4 = vsel %vm1201_vm6, %v1194_v22, %v1196_v49 }
 0x144   : > { %v465_v16 = vpop.f32.mrf.mxu2  ;;  %v478_v10 = vpop.f32.mrf.mxu3  ;;  %1230 = vmatpush.bf16.msrb.mxu2 %v1202_v30  ;;  %1243 = vmatpush.bf16.msrb.mxu3 %v1203_v31 }
 0x145   : > { %v466_v33 = vadd.f32 %v465_v16, %v2271_v52  ;;  %v2323_v34 = vadd.f32 %v478_v10, %v349_v57  ;;  %v1200_v57 = vpop.permute.xlu0 %1199 }
 0x146   : > { %v1210_v6 = vsel %vm1201_vm6, %v1198_v50, %v1200_v57 }
 0x147   : > { %v441_v35 = vpop.f32.mrf.mxu0  ;;  %v454_v36 = vpop.f32.mrf.mxu1 }
 0x148   : > { %v1366_v35 = vpop.permute.xlu2 %1365 }
 0x14a   : > { %v1352_v61 = vpop.permute.xlu1 %1351 }
 0x14b   : > { %v1372_v7 = vsel %vm1371_vm7, %v1352_v61, %v1354_v62 }
 0x14c   : > { %v467_v39 = vpop.f32.mrf.mxu2  ;;  %v480_v40 = vpop.f32.mrf.mxu3 }
 0x14d   : > { %v1356_v8 = vpop.permute.xlu0 %1355  ;;  %v2387_v39 = vld [vmem:[%s2507_s1 + $0xe] sm:$0x3] }
 0x14e   : > { %v1373_v26 = vsel %vm1371_vm7, %v1354_v62, %v1356_v8 }
 0x14f   : > { %v491_v41 = vpop.f32.mrf.mxu0  ;;  %v504_v42 = vpop.f32.mrf.mxu1 }
 0x150   : > { %v492_v43 = vadd.f32 %v491_v41, %v2284_v58  ;;  %v2326_v44 = vadd.f32 %v504_v42, %v375_v2 }
 0x151   : > { %1910 = vmatmul.msk.bf16.vlgmr.msra.gmra.mxu2 %vm258_vm1, %v2306_v23  ;;  %1911 = vmatmul.msk.bf16.vlgmr.msra.gmra.mxu3 %vm258_vm1, %v2306_v23 }
 0x152   : > { %1908 = vmatmul.msk.bf16.vlgmr.msra.gmra.mxu0 %vm258_vm1, %v2306_v23  ;;  %1909 = vmatmul.msk.bf16.vlgmr.msra.gmra.mxu1 %vm258_vm1, %v2306_v23  ;;  %v1358_v3 = vpop.permute.xlu1 %1357 }
 0x153   : > { %1256 = vmatpush.bf16.msra.mxu0 %v1204_v45  ;;  %1269 = vmatpush.bf16.msra.mxu1 %v1205_v46 }
 0x154   : > { %v558_v51 = vpop.f32.mrf.mxu2  ;;  %v571_v52 = vpop.f32.mrf.mxu3  ;;  %1282 = vmatpush.bf16.msra.mxu2 %v1206_v47  ;;  %1295 = vmatpush.bf16.msra.mxu3 %v1207_v48 }
 0x155   : > { %v666_v53 = vadd.f32 %v558_v51, %v2286_v5  ;;  %v2341_v54 = vadd.f32 %v571_v52, %v414_v14  ;;  %v1209_v5 = vsel %vm1201_vm6, %v1196_v49, %v1198_v50  ;;  %v1362_v21 = vpop.permute.xlu0 %1361  ;;  %v1522_v48 = vpop.permute.xlu2 %1521 }
 0x156   : > { %v1376_v29 = vsel %vm1371_vm7, %v1360_v20, %v1362_v21 }
 0x157   : > { %v493_v55 = vpop.f32.mrf.mxu0  ;;  %v506_v56 = vpop.f32.mrf.mxu1 }
 0x15a   : > { %v1364_v30 = vpop.permute.xlu1 %1363 }
 0x15b   : > { %v1378_v45 = vsel %vm1371_vm7, %v1364_v30, %v1366_v35 }
 0x15c   : > { %v560_v58 = vpop.f32.mrf.mxu2  ;;  %v573_v59 = vpop.f32.mrf.mxu3 }
 0x15d   : > { %v1368_v36 = vpop.permute.xlu0 %1367  ;;  %v1528_v59 = vpop.permute.xlu2 %1527 }
 0x15e   : > { %v1379_v46 = vsel %vm1371_vm7, %v1366_v35, %v1368_v36 }
 0x15f   : > { %v584_v63 = vpop.f32.mrf.mxu0  ;;  %v597_v0 = vpop.f32.mrf.mxu1 }
 0x160   : > { %v668_v1 = vadd.f32 %v584_v63, %v2301_v15  ;;  %v2349_v2 = vadd.f32 %v597_v0, %v440_v27  ;;  %v1374_v27 = vsel %vm1371_vm7, %v1356_v8, %v1358_v3 }
 0x161   : > { %1919 = vmatmul.msk.bf16.vlgmr.msrb.gmra.mxu2 %vm258_vm1, %v2346_v60  ;;  %1920 = vmatmul.msk.bf16.vlgmr.msrb.gmra.mxu3 %vm258_vm1, %v2346_v60 }
 0x162   : > { %1912 = vmatmul.msk.bf16.vlgmr.msrb.gmra.mxu0 %vm258_vm1, %v2306_v23  ;;  %1913 = vmatmul.msk.bf16.vlgmr.msrb.gmra.mxu1 %vm258_vm1, %v2306_v23  ;;  %v1370_v40 = vpop.permute.xlu1 %1369 }
 0x163   : > { %1308 = vmatpush.bf16.msrb.mxu0 %v1208_v4  ;;  %1321 = vmatpush.bf16.msrb.mxu1 %v1209_v5  ;;  %v1380_v47 = vsel %vm1371_vm7, %v1368_v36, %v1370_v40 }
 0x164   : > { %v610_v9 = vpop.f32.mrf.mxu2  ;;  %v623_v11 = vpop.f32.mrf.mxu3  ;;  %1334 = vmatpush.bf16.msrb.mxu2 %v1210_v6  ;;  %1400 = vmatpush.bf16.msrb.mxu3 %v1372_v7 }
 0x165   : > { %v670_v12 = vadd.f32 %v610_v9, %v2309_v28  ;;  %v2364_v13 = vadd.f32 %v623_v11, %v466_v33  ;;  %v1375_v28 = vsel %vm1371_vm7, %v1358_v3, %v1360_v20  ;;  %v1524_v49 = vpop.permute.xlu0 %1523  ;;  %v1689_v3 = vld [vmem:[%s2508_s2] sm:$0xf] }
 0x167   : > { %v586_v14 = vpop.f32.mrf.mxu0  ;;  %v599_v15 = vpop.f32.mrf.mxu1 }
 0x16a   : > { %v1526_v56 = vpop.permute.xlu1 %1525 }
 0x16b   : > { %v1544_v4 = vsel %vm1541_vm8, %v1526_v56, %v1528_v59 }
 0x16c   : > { %v612_v18 = vpop.f32.mrf.mxu2  ;;  %v625_v19 = vpop.f32.mrf.mxu3 }
 0x16d   : > { %v1534_v18 = vpop.permute.xlu2 %1533  ;;  %v1996_v19 = vmov 0  }
 0x16e   : > { %1979 = vset.pattern.permute.xlu0 %v1996_v19 }
 0x16f   : > { %v636_v17 = vpop.f32.mrf.mxu0  ;;  %v649_v23 = vpop.f32.mrf.mxu1  ;;  %1692 = vperm.xlu0 %1979, %v1689_v3  }
 0x170   : > { %v672_v24 = vadd.f32 %v636_v17, %v2323_v34  ;;  %v2367_v25 = vadd.f32 %v649_v23, %v492_v43 }
 0x171   : > { %1923 = vmatmul.msk.bf16.vlgmr.msra.gmra.mxu2 %vm258_vm1, %v2346_v60  ;;  %1924 = vmatmul.msk.bf16.vlgmr.msra.gmra.mxu3 %vm258_vm1, %v2346_v60 }
 0x172   : > { %1921 = vmatmul.msk.bf16.vlgmr.msra.gmra.mxu0 %vm258_vm1, %v2346_v60  ;;  %1922 = vmatmul.msk.bf16.vlgmr.msra.gmra.mxu1 %vm258_vm1, %v2346_v60  ;;  %v1532_v6 = vpop.permute.xlu1 %1531 }
 0x173   : > { %1413 = vmatpush.bf16.msra.mxu0 %v1373_v26  ;;  %1426 = vmatpush.bf16.msra.mxu1 %v1374_v27  ;;  %v1547_v27 = vsel %vm1541_vm8, %v1532_v6, %v1534_v18 }
 0x174   : > { %v662_v31 = vpop.f32.mrf.mxu2  ;;  %v725_v32 = vpop.f32.mrf.mxu3  ;;  %1439 = vmatpush.bf16.msra.mxu2 %v1375_v28  ;;  %1452 = vmatpush.bf16.msra.mxu3 %v1376_v29 }
 0x175   : > { %v674_v16 = vadd.f32 %v662_v31, %v2326_v44  ;;  %v2382_v10 = vadd.f32 %v725_v32, %v666_v53  ;;  %v1377_v44 = vsel %vm1371_vm7, %v1362_v21, %v1364_v30  ;;  %v1540_v36 = vpop.permute.xlu2 %1539 }
 0x177   : > { %v638_v33 = vpop.f32.mrf.mxu0  ;;  %v651_v34 = vpop.f32.mrf.mxu1 }
 0x17a   : > { %v1538_v21 = vpop.permute.xlu1 %1537 }
 0x17c   : > { %v664_v37 = vpop.f32.mrf.mxu2  ;;  %v727_v38 = vpop.f32.mrf.mxu3 }
 0x17d   : > { %v1938_v37 = vld [vmem:[%s2507_s1 + $0x10] sm:$0x3] }
 0x17f   : > { %v738_v22 = vpop.f32.mrf.mxu0  ;;  %v751_v41 = vpop.f32.mrf.mxu1 }
 0x180   : > { %v2390_v42 = vadd.f32 %v738_v22, %v2341_v54  ;;  %v2392_v43 = vadd.f32 %v751_v41, %v668_v1  ;;  %v1542_v1 = vsel %vm1541_vm8, %v1522_v48, %v1524_v49  ;;  %v1550_v41 = vsel %vm1541_vm8, %v1538_v21, %v1540_v36 }
 0x181   : > { %1927 = vmatmul.msk.bf16.vlgmr.msrb.gmra.mxu2 %vm258_vm1, %v2346_v60  ;;  %1929 = vmatmul.msk.bf16.vlgmr.msrb.gmra.mxu3 %vm258_vm1, %v2387_v39 }
 0x182   : > { %1925 = vmatmul.msk.bf16.vlgmr.msrb.gmra.mxu0 %vm258_vm1, %v2346_v60  ;;  %1926 = vmatmul.msk.bf16.vlgmr.msrb.gmra.mxu1 %vm258_vm1, %v2346_v60  ;;  %v1530_v60 = vpop.permute.xlu0 %1529 }
 0x183   : > { %1465 = vmatpush.bf16.msrb.mxu0 %v1377_v44  ;;  %1478 = vmatpush.bf16.msrb.mxu1 %v1378_v45  ;;  %v1545_v5 = vsel %vm1541_vm8, %v1528_v59, %v1530_v60  ;;  %v1546_v26 = vsel %vm1541_vm8, %v1530_v60, %v1532_v6 }
 0x184   : > { %v764_v50 = vpop.f32.mrf.mxu2  ;;  %v777_v51 = vpop.f32.mrf.mxu3  ;;  %1491 = vmatpush.bf16.msrb.mxu2 %v1379_v46  ;;  %1504 = vmatpush.bf16.msrb.mxu3 %v1380_v47 }
 0x185   : > { %v836_v52 = vadd.f32 %v764_v50, %v2349_v2  ;;  %v2407_v53 = vadd.f32 %v777_v51, %v670_v12  ;;  %v1543_v2 = vsel %vm1541_vm8, %v1524_v49, %v1526_v56 }
 0x187   : > { %v740_v54 = vpop.f32.mrf.mxu0  ;;  %v753_v55 = vpop.f32.mrf.mxu1 }
 0x18a   : > { %v1536_v20 = vpop.permute.xlu0 %1535 }
 0x18b   : > { %v1548_v28 = vsel %vm1541_vm8, %v1534_v18, %v1536_v20  ;;  %v1549_v29 = vsel %vm1541_vm8, %v1536_v20, %v1538_v21 }
 0x18c   : > { %v766_v57 = vpop.f32.mrf.mxu2  ;;  %v779_v58 = vpop.f32.mrf.mxu3 }
 0x18f   : > { %v790_v61 = vpop.f32.mrf.mxu0  ;;  %v803_v62 = vpop.f32.mrf.mxu1 }
 0x190   : > { %v838_v63 = vadd.f32 %v790_v61, %v2364_v13  ;;  %v2410_v0 = vadd.f32 %v803_v62, %v672_v24 }
 0x191   : > { %1932 = vmatmul.msk.bf16.vlgmr.msra.gmra.mxu2 %vm258_vm1, %v2387_v39  ;;  %1933 = vmatmul.msk.bf16.vlgmr.msra.gmra.mxu3 %vm258_vm1, %v2387_v39 }
 0x192   : > { %1930 = vmatmul.msk.bf16.vlgmr.msra.gmra.mxu0 %vm258_vm1, %v2387_v39  ;;  %1931 = vmatmul.msk.bf16.vlgmr.msra.gmra.mxu1 %vm258_vm1, %v2387_v39 }
 0x193   : > { %1570 = vmatpush.bf16.msra.mxu0 %v1542_v1  ;;  %1583 = vmatpush.bf16.msra.mxu1 %v1543_v2 }
 0x194   : > { %v816_v7 = vpop.f32.mrf.mxu2  ;;  %v829_v8 = vpop.f32.mrf.mxu3  ;;  %1596 = vmatpush.bf16.msra.mxu2 %v1544_v4  ;;  %1609 = vmatpush.bf16.msra.mxu3 %v1545_v5 }
 0x195   : > { %v840_v9 = vadd.f32 %v816_v7, %v2367_v25  ;;  %v841_v11 = vadd.f32 %v829_v8, %v674_v16 }
 0x197   : > { %v792_v12 = vpop.f32.mrf.mxu0  ;;  %v805_v13 = vpop.f32.mrf.mxu1 }
 0x19c   : > { %v818_v14 = vpop.f32.mrf.mxu2  ;;  %v831_v15 = vpop.f32.mrf.mxu3 }
 0x19f   : > { %v892_v17 = vpop.f32.mrf.mxu0  ;;  %v905_v23 = vpop.f32.mrf.mxu1 }
 0x1a0   : > { %v1000_v24 = vadd.f32 %v892_v17, %v2382_v10  ;;  %v1001_v25 = vadd.f32 %v905_v23, %v2390_v42 }
 0x1a1   : > { %1936 = vmatmul.msk.bf16.vlgmr.msrb.gmra.mxu2 %vm258_vm1, %v2387_v39  ;;  %1937 = vmatmul.msk.bf16.vlgmr.msrb.gmra.mxu3 %vm258_vm1, %v2387_v39 }
 0x1a2   : > { %1934 = vmatmul.msk.bf16.vlgmr.msrb.gmra.mxu0 %vm258_vm1, %v2387_v39  ;;  %1935 = vmatmul.msk.bf16.vlgmr.msrb.gmra.mxu1 %vm258_vm1, %v2387_v39 }
 0x1a3   : > { %1622 = vmatpush.bf16.msrb.mxu0 %v1546_v26  ;;  %1635 = vmatpush.bf16.msrb.mxu1 %v1547_v27 }
 0x1a4   : > { %v918_v30 = vpop.f32.mrf.mxu2  ;;  %v931_v31 = vpop.f32.mrf.mxu3  ;;  %1648 = vmatpush.bf16.msrb.mxu2 %v1548_v28  ;;  %1661 = vmatpush.bf16.msrb.mxu3 %v1549_v29 }
 0x1a5   : > { %v1002_v32 = vadd.f32 %v918_v30, %v2392_v43  ;;  %v1003_v16 = vadd.f32 %v931_v31, %v836_v52 }
 0x1a7   : > { %v894_v10 = vpop.f32.mrf.mxu0  ;;  %v907_v33 = vpop.f32.mrf.mxu1 }
 0x1ac   : > { %v920_v34 = vpop.f32.mrf.mxu2  ;;  %v933_v35 = vpop.f32.mrf.mxu3 }
 0x1af   : > { %v944_v38 = vpop.f32.mrf.mxu0  ;;  %v957_v39 = vpop.f32.mrf.mxu1 }
 0x1b0   : > { %v1004_v40 = vadd.f32 %v944_v38, %v2407_v53  ;;  %v1005_v22 = vadd.f32 %v957_v39, %v838_v63 }
 0x1b1   : > { %1941 = vmatmul.msk.bf16.vlgmr.msra.gmra.mxu2 %vm258_vm1, %v1938_v37  ;;  %1942 = vmatmul.msk.bf16.vlgmr.msra.gmra.mxu3 %vm258_vm1, %v1938_v37 }
 0x1b2   : > { %1939 = vmatmul.msk.bf16.vlgmr.msra.gmra.mxu0 %vm258_vm1, %v1938_v37  ;;  %1940 = vmatmul.msk.bf16.vlgmr.msra.gmra.mxu1 %vm258_vm1, %v1938_v37 }
 0x1b3   : > { %1674 = vmatpush.bf16.msra.mxu0 %v1550_v41 }
 0x1b4   : > { %v970_v42 = vpop.f32.mrf.mxu2  ;;  %v983_v43 = vpop.f32.mrf.mxu3 }
 0x1b5   : > { %v1006_v44 = vadd.f32 %v970_v42, %v2410_v0  ;;  %v1007_v45 = vadd.f32 %v983_v43, %v840_v9 }
 0x1b7   : > { %v946_v46 = vpop.f32.mrf.mxu0  ;;  %v959_v47 = vpop.f32.mrf.mxu1 }
 0x1bc   : > { %v972_v48 = vpop.f32.mrf.mxu2  ;;  %v985_v49 = vpop.f32.mrf.mxu3 }
 0x1bf   : > { %v996_v50 = vpop.f32.mrf.mxu0  ;;  %v1059_v51 = vpop.f32.mrf.mxu1 }
 0x1c0   : > { %v1008_v52 = vadd.f32 %v996_v50, %v841_v11  ;;  %v1167_v53 = vadd.f32 %v1059_v51, %v1000_v24 }
 0x1c1   : > { %1945 = vmatmul.msk.bf16.vlgmr.msrb.gmra.mxu2 %vm258_vm1, %v1938_v37  ;;  %1946 = vmatmul.msk.bf16.vlgmr.msrb.gmra.mxu3 %vm258_vm1, %v1938_v37 }
 0x1c2   : > { %1943 = vmatmul.msk.bf16.vlgmr.msrb.gmra.mxu0 %vm258_vm1, %v1938_v37  ;;  %1944 = vmatmul.msk.bf16.vlgmr.msrb.gmra.mxu1 %vm258_vm1, %v1938_v37 }
 0x1c4   : > { %v1072_v54 = vpop.f32.mrf.mxu2  ;;  %v1085_v55 = vpop.f32.mrf.mxu3 }
 0x1c5   : > { %v1168_v56 = vadd.f32 %v1072_v54, %v1001_v25  ;;  %v1169_v57 = vadd.f32 %v1085_v55, %v1002_v32 }
 0x1c7   : > { %v998_v58 = vpop.f32.mrf.mxu0  ;;  %v1061_v59 = vpop.f32.mrf.mxu1 }
 0x1cc   : > { %v1074_v60 = vpop.f32.mrf.mxu2  ;;  %v1087_v61 = vpop.f32.mrf.mxu3 }
 0x1cf   : > { %v1098_v62 = vpop.f32.mrf.mxu0  ;;  %v1111_v63 = vpop.f32.mrf.mxu1 }
 0x1d0   : > { %v1170_v0 = vadd.f32 %v1098_v62, %v1003_v16  ;;  %v1171_v1 = vadd.f32 %v1111_v63, %v1004_v40 }
 0x1d2   : > { %1947 = vmatmul.msk.bf16.vlgmr.msra.gmra.mxu0 %vm258_vm1, %v1938_v37 }
 0x1d4   : > { %v1124_v2 = vpop.f32.mrf.mxu2  ;;  %v1137_v4 = vpop.f32.mrf.mxu3 }
 0x1d5   : > { %v1172_v5 = vadd.f32 %v1124_v2, %v1005_v22  ;;  %v1173_v6 = vadd.f32 %v1137_v4, %v1006_v44 }
 0x1d7   : > { %v1100_v7 = vpop.f32.mrf.mxu0  ;;  %v1113_v8 = vpop.f32.mrf.mxu1 }
 0x1dc   : > { %v1126_v9 = vpop.f32.mrf.mxu2  ;;  %v1139_v11 = vpop.f32.mrf.mxu3 }
 0x1df   : > { %v1150_v12 = vpop.f32.mrf.mxu0  ;;  %v1163_v13 = vpop.f32.mrf.mxu1 }
 0x1e0   : > { %v1174_v14 = vadd.f32 %v1150_v12, %v1007_v45  ;;  %v1175_v15 = vadd.f32 %v1163_v13, %v1008_v52 }
 0x1e1   : > { %v2470_v63 = vpop.permute.xlu0 %1692 }
 0x1e4   : > { %v1232_v3 = vpop.f32.mrf.mxu2  ;;  %v1245_v18 = vpop.f32.mrf.mxu3 }
 0x1e5   : > { %v1340_v19 = vadd.f32 %v1232_v3, %v1167_v53  ;;  %v1341_v20 = vadd.f32 %v1245_v18, %v1168_v56 }
 0x1e7   : > { %v1152_v21 = vpop.f32.mrf.mxu0  ;;  %v1165_v17 = vpop.f32.mrf.mxu1 }
 0x1ec   : > { %v1234_v23 = vpop.f32.mrf.mxu2  ;;  %v1247_v24 = vpop.f32.mrf.mxu3 }
 0x1ef   : > { %v1258_v25 = vpop.f32.mrf.mxu0  ;;  %v1271_v26 = vpop.f32.mrf.mxu1 }
 0x1f0   : > { %v1342_v27 = vadd.f32 %v1258_v25, %v1169_v57  ;;  %v1343_v28 = vadd.f32 %v1271_v26, %v1170_v0 }
 0x1f4   : > { %v1284_v29 = vpop.f32.mrf.mxu2  ;;  %v1297_v30 = vpop.f32.mrf.mxu3 }
 0x1f5   : > { %v2458_v31 = vadd.f32 %v1284_v29, %v1171_v1  ;;  %v2460_v32 = vadd.f32 %v1297_v30, %v1172_v5 }
 0x1f7   : > { %v1260_v16 = vpop.f32.mrf.mxu0  ;;  %v1273_v10 = vpop.f32.mrf.mxu1 }
 0x1fc   : > { %v1286_v33 = vpop.f32.mrf.mxu2  ;;  %v1299_v34 = vpop.f32.mrf.mxu3 }
 0x1ff   : > { %v1310_v35 = vpop.f32.mrf.mxu0  ;;  %v1323_v36 = vpop.f32.mrf.mxu1 }
 0x200   : > { %v2462_v37 = vadd.f32 %v1310_v35, %v1173_v6  ;;  %v2464_v38 = vadd.f32 %v1323_v36, %v1174_v14 }
 0x204   : > { %v1336_v39 = vpop.f32.mrf.mxu2  ;;  %v1402_v40 = vpop.f32.mrf.mxu3 }
 0x205   : > { %v2466_v22 = vadd.f32 %v1336_v39, %v1175_v15  ;;  %v1510_v61 = vadd.f32 %v1402_v40, %v1340_v19 }
 0x207   : > { %v1312_v41 = vpop.f32.mrf.mxu0  ;;  %v1325_v42 = vpop.f32.mrf.mxu1 }
 0x20c   : > { %v1338_v43 = vpop.f32.mrf.mxu2  ;;  %v1404_v44 = vpop.f32.mrf.mxu3 }
 0x20f   : > { %v1415_v45 = vpop.f32.mrf.mxu0  ;;  %v1428_v46 = vpop.f32.mrf.mxu1 }
 0x210   : > { %v1511_v62 = vadd.f32 %v1415_v45, %v1341_v20  ;;  %v1512_v7 = vadd.f32 %v1428_v46, %v1342_v27 }
 0x214   : > { %v1441_v47 = vpop.f32.mrf.mxu2  ;;  %v1454_v48 = vpop.f32.mrf.mxu3 }
 0x215   : > { %v1513_v8 = vadd.f32 %v1441_v47, %v1343_v28  ;;  %v1514_v30 = vadd.f32 %v1454_v48, %v2458_v31 }
 0x217   : > { %v1417_v49 = vpop.f32.mrf.mxu0  ;;  %v1430_v50 = vpop.f32.mrf.mxu1 }
 0x21c   : > { %v1443_v51 = vpop.f32.mrf.mxu2  ;;  %v1456_v52 = vpop.f32.mrf.mxu3 }
 0x21f   : > { %v1467_v53 = vpop.f32.mrf.mxu0  ;;  %v1480_v54 = vpop.f32.mrf.mxu1 }
 0x220   : > { %v1515_v16 = vadd.f32 %v1467_v53, %v2460_v32  ;;  %v1516_v41 = vadd.f32 %v1480_v54, %v2462_v37 }
 0x224   : > { %v1493_v55 = vpop.f32.mrf.mxu2  ;;  %v2468_v56 = vpop.f32.mrf.mxu3 }
 0x225   : > { %v1517_v42 = vadd.f32 %v1493_v55, %v2464_v38 }
 0x227   : > { %v1469_v57 = vpop.f32.mrf.mxu0  ;;  %v1482_v58 = vpop.f32.mrf.mxu1 }
 0x22c   : > { %v1495_v59 = vpop.f32.mrf.mxu2  ;;  %v1508_v60 = vpop.f32.mrf.mxu3 }
 0x22f   : > { %v1572_v0 = vpop.f32.mrf.mxu0  ;;  %v1585_v1 = vpop.f32.mrf.mxu1 }
 0x230   : > { %v1680_v2 = vadd.f32 %v1572_v0, %v1510_v61  ;;  %v1681_v4 = vadd.f32 %v1585_v1, %v1511_v62  ;;  %v1518_v61 = vadd.f32 %v2468_v56, %v2466_v22 }
 0x232   : > { %v1695_v5 = vadd.f32 %v2470_v63, %v1680_v2  ;;  %v1696_v6 = vadd.f32 %v2470_v63, %v1681_v4 }
 0x234   : > { %v1704_v9 = vmax.f32 %v1695_v5, 0.0  ;;  %v1705_v11 = vmax.f32 %v1696_v6, 0.0  ;;  %v1598_v12 = vpop.f32.mrf.mxu2  ;;  %v1611_v13 = vpop.f32.mrf.mxu3 }
 0x235   : > { %v1682_v14 = vadd.f32 %v1598_v12, %v1512_v7  ;;  %v1683_v15 = vadd.f32 %v1611_v13, %v1513_v8 }
 0x236   : > { %v1713_v3 = vpack.c.bf16 %v1705_v11, %v1704_v9 }
 0x237   : > { %v1697_v18 = vadd.f32 %v2470_v63, %v1682_v14  ;;  %v1698_v19 = vadd.f32 %v2470_v63, %v1683_v15  ;;  %v1574_v20 = vpop.f32.mrf.mxu0  ;;  %v1587_v21 = vpop.f32.mrf.mxu1 }
 0x238   : > { %v1723_v25 = vrot.slane %v1713_v3, 2 }
 0x239   : > { %v1706_v17 = vmax.f32 %v1697_v18, 0.0  ;;  %v1707_v23 = vmax.f32 %v1698_v19, 0.0 }
 0x23a   : > { %v1733_v35 = vsel %vm1730_vm10, %v1713_v3, %v1723_v25 }
 0x23b   : > { %v1714_v24 = vpack.c.bf16 %v1707_v23, %v1706_v17 }
 0x23c   : > { %v1600_v26 = vpop.f32.mrf.mxu2  ;;  %v1613_v27 = vpop.f32.mrf.mxu3 }
 0x23d   : > { %v1724_v28 = vrot.slane %v1714_v24, 4  ;;  %v1725_v29 = vrot.slane %v1714_v24, 6 }
 0x23f   : > { %v1737_v10 = vsel %vm1734_vm9, %v1724_v28, %v1725_v29  ;;  %v1624_v33 = vpop.f32.mrf.mxu0  ;;  %v1637_v34 = vpop.f32.mrf.mxu1 }
 0x240   : > { %v1684_v36 = vadd.f32 %v1624_v33, %v1514_v30  ;;  %v1685_v39 = vadd.f32 %v1637_v34, %v1515_v16  ;;  %v1739_v40 = vsel %vm1738_vm11, %v1733_v35, %v1737_v10 }
 0x241   : > { %1753 = vst [vmem:[%s2482_s24] sm:$0xff] %v1739_v40 }
 0x242   : > { %v1699_v31 = vadd.f32 %v2470_v63, %v1684_v36  ;;  %v1700_v32 = vadd.f32 %v2470_v63, %v1685_v39 }
 0x244   : > { %v1708_v43 = vmax.f32 %v1699_v31, 0.0  ;;  %v1709_v44 = vmax.f32 %v1700_v32, 0.0  ;;  %v1650_v45 = vpop.f32.mrf.mxu2  ;;  %v1663_v46 = vpop.f32.mrf.mxu3 }
 0x245   : > { %v1686_v47 = vadd.f32 %v1650_v45, %v1516_v41  ;;  %v1687_v48 = vadd.f32 %v1663_v46, %v1517_v42 }
 0x246   : > { %v1715_v49 = vpack.c.bf16 %v1709_v44, %v1708_v43 }
 0x247   : > { %v1701_v50 = vadd.f32 %v2470_v63, %v1686_v47  ;;  %v1702_v51 = vadd.f32 %v2470_v63, %v1687_v48  ;;  %v1626_v52 = vpop.f32.mrf.mxu0  ;;  %v1639_v53 = vpop.f32.mrf.mxu1 }
 0x248   : > { %v1726_v59 = vrot.slane %v1715_v49, 2 }
 0x249   : > { %v1710_v57 = vmax.f32 %v1701_v50, 0.0  ;;  %v1711_v58 = vmax.f32 %v1702_v51, 0.0 }
 0x24a   : > { %v1742_v62 = vsel %vm1730_vm10, %v1715_v49, %v1726_v59 }
 0x24b   : > { %v1716_v37 = vpack.c.bf16 %v1711_v58, %v1710_v57 }
 0x24c   : > { %v1652_v54 = vpop.f32.mrf.mxu2  ;;  %v1665_v38 = vpop.f32.mrf.mxu3 }
 0x24d   : > { %v1727_v55 = vrot.slane %v1716_v37, 4  ;;  %v1728_v60 = vrot.slane %v1716_v37, 6 }
 0x24f   : > { %v1745_v0 = vsel %vm1734_vm9, %v1727_v55, %v1728_v60  ;;  %v1676_v1 = vpop.f32.mrf.mxu0 }
 0x250   : > { %v1746_v2 = vsel %vm1738_vm11, %v1742_v62, %v1745_v0  ;;  %v1688_v4 = vadd.f32 %v1676_v1, %v1518_v61 }
 0x251   : > { %1754 = vst [vmem:[%s2482_s24 + $0x8] sm:$0xff] %v1746_v2 }
 0x252   : > { %v1703_v5 = vadd.f32 %v2470_v63, %v1688_v4 }
 0x254   : > { %v1712_v6 = vmax.f32 %v1703_v5, 0.0 }
 0x256   : > { %v1717_v7 = vpack.c.bf16 %v1712_v6, %v1712_v6 }
 0x257   : > { %v1678_v8 = vpop.f32.mrf.mxu0 }
 0x258   : > { %v1729_v9 = vrot.slane %v1717_v7, 2 }
 0x25a   : > { %v1749_v11 = vsel %vm1730_vm10, %v1717_v7, %v1729_v9 }
 0x25b   : > { %1756 = vst.msk [vmem:[%s2482_s24 + $0x10] sm:$0x3] %vm1755_vm12, %v1749_v11 }
 0x25c PF: > { %s13_s12 = sadd.s32 1, %s1986_s12  }
 0x25d   : > { %p10_p4 = scmp.ge.s32.totalorder %s13_s12, 4  }
 0x25f   :  { %12 = sbr.rel (!%p10_p4) target bundleno = 1 (0x1), region = 70 }

</bundles_post_ra>
